<compile_context>
chip_gen: v6e
topology: v6e:2x2x1
jax: 0.10.0
libtpu: 0.0.40
codegen_flags: <defaults>
</compile_context>

<pallas_src>
import functools

import numpy as np
import jax
import jax.numpy as jnp
from jax import lax
from jax.experimental import pallas as pl
from jax.experimental.pallas import tpu as pltpu

EPS = 1e-5  # LayerNormalization4D default eps


def _mhsa2d_kernel(x_ref, wqkv_ref, qkvp_ref, gsel_ref, gselt_ref, ginv_ref,
                   wp_ref, pp_ref, o_ref, *, n_head, e_qk, e_v, eps):
    # x_ref   : (1, T, C*F)  token-major input slab for one batch element
    # wqkv_ref: (C*F, D*F)   Kronecker-expanded fused Q/K/V 1x1-conv weight
    # qkvp_ref: (4, D*F)     rows = [bias, prelu_alpha, ln_gamma, ln_beta]
    # gsel_ref: (D*F, G)     0/1 lane -> norm-group selector (G = 3*n_head)
    # gselt_ref:(G, D*F)     transposed selector (broadcast-back direction)
    # ginv_ref: (1, G)       1 / (#elements per norm group)
    # wp_ref  : (C*F, C*F)   Kronecker-expanded concat-projection weight
    # pp_ref  : (4, C*F)     [bias, prelu_alpha, ln_gamma, ln_beta] (concat proj)
    # o_ref   : (1, T, C*F)
    f32 = jnp.float32
    x = x_ref[0]                                              # (T, C*F)

    # ---- fused Q/K/V 1x1-conv projection: one lane-dense MXU matmul --------
    z = jnp.dot(x, wqkv_ref[...], preferred_element_type=f32)          # (T, D*F)
    z = z + qkvp_ref[0:1, :].astype(f32)                               # conv bias
    alpha = qkvp_ref[1:2, :].astype(f32)                               # PReLU alpha
    z = jnp.maximum(z, 0.0) + alpha * jnp.minimum(z, 0.0)

    # ---- LayerNormalization4D per (time, module): single-pass stats --------
    gsel = gsel_ref[...].astype(f32)                                   # (D*F, G)
    ginv = ginv_ref[...].astype(f32)                                   # (1, G)
    mean = jnp.dot(z, gsel, preferred_element_type=f32) * ginv         # (T, G)
    msq = jnp.dot(z * z, gsel, preferred_element_type=f32) * ginv      # (T, G)
    inv_std = lax.rsqrt(msq - mean * mean + eps)                       # (T, G)
    gselt = gselt_ref[...].astype(f32)                                 # (G, D*F)
    scale_b = jnp.dot(inv_std, gselt, preferred_element_type=f32)      # (T, D*F)
    shift_b = jnp.dot(-mean * inv_std, gselt, preferred_element_type=f32)
    z = (z * scale_b + shift_b) * qkvp_ref[2:3, :].astype(f32) \
        + qkvp_ref[3:4, :].astype(f32)

    # ---- per-head attention over time (heads statically unrolled) ----------
    k_base = n_head * e_qk
    v_base = 2 * n_head * e_qk
    inv_sqrt_e = 1.0 / float(e_qk) ** 0.5
    dims_nt = (((1,), (1,)), ((), ()))        # contract last axes  (A @ B^T)
    heads = []
    for h in range(n_head):
        q = z[:, h * e_qk:(h + 1) * e_qk]                              # (T, E_qk)
        k = z[:, k_base + h * e_qk:k_base + (h + 1) * e_qk]            # (T, E_qk)
        v = z[:, v_base + h * e_v:v_base + (h + 1) * e_v]              # (T, E_v)
        s = lax.dot_general(q, k, dims_nt, preferred_element_type=f32) * inv_sqrt_e
        s = s - jnp.max(s, axis=1, keepdims=True)
        ex = jnp.exp(s)
        attn = ex / jnp.sum(ex, axis=1, keepdims=True)                 # (T, T)
        heads.append(jnp.dot(attn, v, preferred_element_type=f32))     # (T, E_v)
    att = jnp.concatenate(heads, axis=1)                               # (T, C*F)

    # ---- concat projection + PReLU + LayerNormalization4D + residual -------
    y = jnp.dot(att.astype(wp_ref.dtype), wp_ref[...], preferred_element_type=f32)
    y = y + pp_ref[0:1, :].astype(f32)
    ap = pp_ref[1:2, :].astype(f32)
    y = jnp.maximum(y, 0.0) + ap * jnp.minimum(y, 0.0)
    inv_n = 1.0 / float(y.shape[1])
    m1 = jnp.sum(y, axis=1, keepdims=True) * inv_n
    m2 = jnp.sum(y * y, axis=1, keepdims=True) * inv_n
    y = (y - m1) * lax.rsqrt(m2 - m1 * m1 + eps)
    y = y * pp_ref[2:3, :].astype(f32) + pp_ref[3:4, :].astype(f32)
    y = y + x.astype(f32)                                              # residual

    o_ref[0] = y.astype(o_ref.dtype)


def multi_head_self_attention_2d(x, p, *, n_head, hid_chan, eps=EPS):
    """Forward pass of MultiHeadSelfAttention2D via one fused Pallas TPU kernel.

    x: (B, C, T, F); returns (B, C, T, F)."""
    B, C, T, F = x.shape
    assert C % n_head == 0
    H, Cv = n_head, C // n_head
    E_qk, E_v, CF = hid_chan * F, Cv * F, C * F
    D_all = 2 * H * hid_chan + H * Cv
    DF = D_all * F
    G = 3 * H
    f32 = jnp.float32

    # ---- stack every 1x1 conv (Q heads, K heads, V heads) -------------------
    w_all = jnp.concatenate([p["q_w"].reshape(H * hid_chan, C),
                             p["k_w"].reshape(H * hid_chan, C),
                             p["v_w"].reshape(H * Cv, C)], axis=0).astype(f32)
    b_all = jnp.concatenate([p["q_b"].reshape(-1), p["k_b"].reshape(-1),
                             p["v_b"].reshape(-1)]).astype(f32)
    a_all = jnp.concatenate([jnp.repeat(p["q_a"], hid_chan),
                             jnp.repeat(p["k_a"], hid_chan),
                             jnp.repeat(p["v_a"], Cv)]).astype(f32)
    g_all = jnp.concatenate([p["q_g"].reshape(H * hid_chan, F),
                             p["k_g"].reshape(H * hid_chan, F),
                             p["v_g"].reshape(H * Cv, F)], axis=0).astype(f32)
    be_all = jnp.concatenate([p["q_be"].reshape(H * hid_chan, F),
                              p["k_be"].reshape(H * hid_chan, F),
                              p["v_be"].reshape(H * Cv, F)], axis=0).astype(f32)

    eye_f = jnp.eye(F, dtype=f32)
    # 1x1 conv in token layout == matmul by (W^T (x) I_F): built once here so
    # the in-kernel QKV projection is one matmul with contraction C*F.
    wqkv_kron = jnp.einsum("dc,fg->cfdg", w_all, eye_f).reshape(CF, DF).astype(x.dtype)
    wp_kron = jnp.einsum("dc,fg->cfdg", p["p_w"].astype(f32),
                         eye_f).reshape(CF, CF).astype(x.dtype)

    qkv_lane = jnp.stack([jnp.repeat(b_all, F),
                          jnp.repeat(a_all, F),
                          g_all.reshape(DF),
                          be_all.reshape(DF)], axis=0)                 # (4, DF)
    p_lane = jnp.stack([jnp.repeat(p["p_b"].astype(f32), F),
                        jnp.full((CF,), p["p_a"], dtype=f32),
                        p["p_g"].astype(f32).reshape(CF),
                        p["p_be"].astype(f32).reshape(CF)], axis=0)    # (4, CF)

    # one norm group per ATTConvActNorm module (Q0..Q3, K0..K3, V0..V3)
    sizes = np.array([hid_chan] * H + [hid_chan] * H + [Cv] * H)
    gid_rows = np.repeat(np.arange(G), sizes)                          # (D_all,)
    gsel_np = np.repeat(np.eye(G, dtype=np.float32)[gid_rows], F, axis=0)
    gsel = jnp.asarray(gsel_np)                                        # (DF, G)
    gselt = jnp.asarray(gsel_np.T.copy())                              # (G, DF)
    ginv = jnp.asarray((1.0 / (sizes.astype(np.float32) * F)).reshape(1, G))

    # token-major layout: (B, T, C*F)
    x_tok = jnp.transpose(x, (0, 2, 1, 3)).reshape(B, T, CF)

    kernel = functools.partial(_mhsa2d_kernel, n_head=H, e_qk=E_qk, e_v=E_v,
                               eps=eps)

    grid_spec = pltpu.PrefetchScalarGridSpec(
        num_scalar_prefetch=0,
        grid=(B,),
        in_specs=[
            pl.BlockSpec((1, T, CF), lambda b: (b, 0, 0)),
            pl.BlockSpec((CF, DF), lambda b: (0, 0)),
            pl.BlockSpec((4, DF), lambda b: (0, 0)),
            pl.BlockSpec((DF, G), lambda b: (0, 0)),
            pl.BlockSpec((G, DF), lambda b: (0, 0)),
            pl.BlockSpec((1, G), lambda b: (0, 0)),
            pl.BlockSpec((CF, CF), lambda b: (0, 0)),
            pl.BlockSpec((4, CF), lambda b: (0, 0)),
        ],
        out_specs=pl.BlockSpec((1, T, CF), lambda b: (b, 0, 0)),
    )

    out_tok = pl.pallas_call(
        kernel,
        out_shape=jax.ShapeDtypeStruct((B, T, CF), x.dtype),
        grid_spec=grid_spec,
        compiler_params=pltpu.CompilerParams(
            dimension_semantics=("parallel",)),
    )(x_tok, wqkv_kron, qkv_lane, gsel, gselt, ginv, wp_kron, p_lane)

    return out_tok.reshape(B, T, C, F).transpose(0, 2, 1, 3)


# ----------------------------- pure-JAX reference ----------------------------
def _att_conv_act_norm_ref(x, w, b, alpha, gamma, beta, eps):
    # Conv2d(k=1) -> PReLU -> LayerNormalization4D (stats over (C, F) per (B, T))
    z = jnp.einsum("oc,bctf->botf", w, x) + b[None, :, None, None]
    z = jnp.where(z >= 0, z, alpha * z)
    mu = jnp.mean(z, axis=(1, 3), keepdims=True)
    var = jnp.mean((z - mu) ** 2, axis=(1, 3), keepdims=True)
    z = (z - mu) / jnp.sqrt(var + eps)
    return z * gamma[None, :, None, :] + beta[None, :, None, :]


def _mhsa2d_reference(x, p, *, n_head, hid_chan, eps=EPS):
    B, C, T, F = x.shape
    Cv = C // n_head
    residual = x
    all_q = [_att_conv_act_norm_ref(x, p["q_w"][h], p["q_b"][h], p["q_a"][h],
                                    p["q_g"][h], p["q_be"][h], eps) for h in range(n_head)]
    all_k = [_att_conv_act_norm_ref(x, p["k_w"][h], p["k_b"][h], p["k_a"][h],
                                    p["k_g"][h], p["k_be"][h], eps) for h in range(n_head)]
    all_v = [_att_conv_act_norm_ref(x, p["v_w"][h], p["v_b"][h], p["v_a"][h],
                                    p["v_g"][h], p["v_be"][h], eps) for h in range(n_head)]
    Q = jnp.concatenate(all_q, axis=0)                 # (H*B, hid, T, F)
    K = jnp.concatenate(all_k, axis=0)
    V = jnp.concatenate(all_v, axis=0)                 # (H*B, Cv, T, F)
    Q = Q.transpose(0, 2, 1, 3).reshape(n_head * B, T, hid_chan * F)
    K = K.transpose(0, 2, 1, 3).reshape(n_head * B, T, hid_chan * F)
    V4 = V.transpose(0, 2, 1, 3)
    old_shape = V4.shape
    Vf = V4.reshape(n_head * B, T, Cv * F)
    emb = Q.shape[-1]
    attn = jnp.einsum("bte,bse->bts", Q, K) / (emb ** 0.5)
    attn = jax.nn.softmax(attn, axis=2)
    Vo = jnp.einsum("bts,bse->bte", attn, Vf)
    Vo = Vo.reshape(old_shape).transpose(0, 2, 1, 3)   # (H*B, Cv, T, F)
    xc = Vo.reshape(n_head, B, Cv, T, F).transpose(1, 0, 2, 3, 4).reshape(B, C, T, F)
    y = _att_conv_act_norm_ref(xc, p["p_w"], p["p_b"], p["p_a"],
                               p["p_g"], p["p_be"], eps)
    return y + residual


if __name__ == "__main__":
    # MultiHeadSelfAttention2D(in_chan=16, n_freqs=32, n_head=4, hid_chan=4)
    B, C_IN, T, F = 2, 16, 16, 32
    N_HEAD, HID = 4, 4
    CV = C_IN // N_HEAD

    keys = iter(jax.random.split(jax.random.PRNGKey(0), 24))

    def rnd(shape, scale=1.0):
        return scale * jax.random.normal(next(keys), shape, dtype=jnp.float32)

    x = rnd((B, C_IN, T, F))
    params = {
        "q_w": rnd((N_HEAD, HID, C_IN), 0.3), "q_b": rnd((N_HEAD, HID), 0.1),
        "q_a": 0.25 + 0.05 * rnd((N_HEAD,)),
        "q_g": 1.0 + 0.1 * rnd((N_HEAD, HID, F)), "q_be": 0.1 * rnd((N_HEAD, HID, F)),
        "k_w": rnd((N_HEAD, HID, C_IN), 0.3), "k_b": rnd((N_HEAD, HID), 0.1),
        "k_a": 0.25 + 0.05 * rnd((N_HEAD,)),
        "k_g": 1.0 + 0.1 * rnd((N_HEAD, HID, F)), "k_be": 0.1 * rnd((N_HEAD, HID, F)),
        "v_w": rnd((N_HEAD, CV, C_IN), 0.3), "v_b": rnd((N_HEAD, CV), 0.1),
        "v_a": 0.25 + 0.05 * rnd((N_HEAD,)),
        "v_g": 1.0 + 0.1 * rnd((N_HEAD, CV, F)), "v_be": 0.1 * rnd((N_HEAD, CV, F)),
        "p_w": rnd((C_IN, C_IN), 0.3), "p_b": rnd((C_IN,), 0.1),
        "p_a": 0.25 + 0.05 * rnd(()),
        "p_g": 1.0 + 0.1 * rnd((C_IN, F)), "p_be": 0.1 * rnd((C_IN, F)),
    }

    out = multi_head_self_attention_2d(x, params, n_head=N_HEAD, hid_chan=HID)
    out = jax.block_until_ready(out)
    assert out.shape == x.shape, out.shape

    with jax.default_matmul_precision("highest"):
        ref = _mhsa2d_reference(x, params, n_head=N_HEAD, hid_chan=HID)
    ref = jax.block_until_ready(ref)

    max_err = float(jnp.max(jnp.abs(out - ref)))
    assert jnp.allclose(out, ref, atol=2e-2, rtol=2e-2), max_err

    print("KERNEL_OK")
</pallas_src>

<mosaic_0001>
module attributes {stable_mosaic.version = 11 : i64} {
  func.func @_mhsa2d_kernel(%arg0: i32, %arg1: memref<1x16x512xf32, #tpu.memory_space<vmem>>, %arg2: memref<512x1536xf32, #tpu.memory_space<vmem>>, %arg3: memref<4x1536xf32, #tpu.memory_space<vmem>>, %arg4: memref<1536x12xf32, #tpu.memory_space<vmem>>, %arg5: memref<12x1536xf32, #tpu.memory_space<vmem>>, %arg6: memref<1x12xf32, #tpu.memory_space<vmem>>, %arg7: memref<512x512xf32, #tpu.memory_space<vmem>>, %arg8: memref<4x512xf32, #tpu.memory_space<vmem>>, %arg9: memref<1x16x512xf32, #tpu.memory_space<vmem>>) attributes {dimension_semantics = [#tpu.dimension_semantics<parallel>], iteration_bounds = array<i64: 2>, scalar_prefetch = 0 : i64, scratch_operands = 0 : i64, tpu.core_type = #tpu.core_type<tc>, window_params = [{transform_indices = @transform_0, window_bounds = array<i64: 1, 16, 512>}, {pipeline_mode = #tpu.pipeline_mode<synchronous>, transform_indices = @transform_1, window_bounds = array<i64: 512, 1536>}, {pipeline_mode = #tpu.pipeline_mode<synchronous>, transform_indices = @transform_2, window_bounds = array<i64: 4, 1536>}, {pipeline_mode = #tpu.pipeline_mode<synchronous>, transform_indices = @transform_3, window_bounds = array<i64: 1536, 12>}, {pipeline_mode = #tpu.pipeline_mode<synchronous>, transform_indices = @transform_4, window_bounds = array<i64: 12, 1536>}, {pipeline_mode = #tpu.pipeline_mode<synchronous>, transform_indices = @transform_5, window_bounds = array<i64: 1, 12>}, {pipeline_mode = #tpu.pipeline_mode<synchronous>, transform_indices = @transform_6, window_bounds = array<i64: 512, 512>}, {pipeline_mode = #tpu.pipeline_mode<synchronous>, transform_indices = @transform_7, window_bounds = array<i64: 4, 512>}, {transform_indices = @transform_8, window_bounds = array<i64: 1, 16, 512>}]} {
    %c0 = arith.constant 0 : index
    %c0_0 = arith.constant 0 : index
    %c0_1 = arith.constant 0 : index
    %0 = vector.load %arg1[%c0, %c0_0, %c0_1] : memref<1x16x512xf32, #tpu.memory_space<vmem>>, vector<1x16x512xf32>
    %1 = vector.shape_cast %0 : vector<1x16x512xf32> to vector<16x512xf32>
    %c0_2 = arith.constant 0 : index
    %c0_3 = arith.constant 0 : index
    %2 = vector.load %arg2[%c0_2, %c0_3] : memref<512x1536xf32, #tpu.memory_space<vmem>>, vector<512x1536xf32>
    %cst = arith.constant dense<0.000000e+00> : vector<16x1536xf32>
    %3 = tpu.matmul %1, %2, %cst {dimension_numbers = #tpu.dot_dimension_numbers<[1], [0], [0], [1], [0, 0, 1, 1], [], []>} : vector<16x512xf32>, vector<512x1536xf32>, vector<16x1536xf32> -> vector<16x1536xf32>
    %c0_4 = arith.constant 0 : index
    %c0_5 = arith.constant 0 : index
    %4 = vector.load %arg3[%c0_4, %c0_5] : memref<4x1536xf32, #tpu.memory_space<vmem>>, vector<1x1536xf32>
    %5 = vector.broadcast %4 : vector<1x1536xf32> to vector<16x1536xf32>
    %6 = arith.addf %3, %5 : vector<16x1536xf32>
    %c1 = arith.constant 1 : index
    %c0_6 = arith.constant 0 : index
    %7 = vector.load %arg3[%c1, %c0_6] : memref<4x1536xf32, #tpu.memory_space<vmem>>, vector<1x1536xf32>
    %cst_7 = arith.constant 0.000000e+00 : f32
    %8 = vector.broadcast %cst_7 : f32 to vector<16x1536xf32>
    %9 = arith.maximumf %6, %8 : vector<16x1536xf32>
    %cst_8 = arith.constant 0.000000e+00 : f32
    %10 = vector.broadcast %cst_8 : f32 to vector<16x1536xf32>
    %11 = arith.minimumf %6, %10 : vector<16x1536xf32>
    %12 = vector.broadcast %7 : vector<1x1536xf32> to vector<16x1536xf32>
    %13 = arith.mulf %12, %11 : vector<16x1536xf32>
    %14 = arith.addf %9, %13 : vector<16x1536xf32>
    %c0_9 = arith.constant 0 : index
    %c0_10 = arith.constant 0 : index
    %15 = vector.load %arg4[%c0_9, %c0_10] : memref<1536x12xf32, #tpu.memory_space<vmem>>, vector<1536x12xf32>
    %c0_11 = arith.constant 0 : index
    %c0_12 = arith.constant 0 : index
    %16 = vector.load %arg6[%c0_11, %c0_12] : memref<1x12xf32, #tpu.memory_space<vmem>>, vector<1x12xf32>
    %cst_13 = arith.constant dense<0.000000e+00> : vector<16x12xf32>
    %17 = tpu.matmul %14, %15, %cst_13 {dimension_numbers = #tpu.dot_dimension_numbers<[1], [0], [0], [1], [0, 0, 1, 1], [], []>} : vector<16x1536xf32>, vector<1536x12xf32>, vector<16x12xf32> -> vector<16x12xf32>
    %18 = vector.broadcast %16 : vector<1x12xf32> to vector<16x12xf32>
    %19 = arith.mulf %17, %18 : vector<16x12xf32>
    %20 = arith.mulf %14, %14 : vector<16x1536xf32>
    %cst_14 = arith.constant dense<0.000000e+00> : vector<16x12xf32>
    %21 = tpu.matmul %20, %15, %cst_14 {dimension_numbers = #tpu.dot_dimension_numbers<[1], [0], [0], [1], [0, 0, 1, 1], [], []>} : vector<16x1536xf32>, vector<1536x12xf32>, vector<16x12xf32> -> vector<16x12xf32>
    %22 = vector.broadcast %16 : vector<1x12xf32> to vector<16x12xf32>
    %23 = arith.mulf %21, %22 : vector<16x12xf32>
    %24 = arith.mulf %19, %19 : vector<16x12xf32>
    %25 = arith.subf %23, %24 : vector<16x12xf32>
    %cst_15 = arith.constant 9.99999974E-6 : f32
    %26 = vector.broadcast %cst_15 : f32 to vector<16x12xf32>
    %27 = arith.addf %25, %26 : vector<16x12xf32>
    %28 = math.rsqrt %27 : vector<16x12xf32>
    %c0_16 = arith.constant 0 : index
    %c0_17 = arith.constant 0 : index
    %29 = vector.load %arg5[%c0_16, %c0_17] : memref<12x1536xf32, #tpu.memory_space<vmem>>, vector<12x1536xf32>
    %cst_18 = arith.constant dense<0.000000e+00> : vector<16x1536xf32>
    %30 = tpu.matmul %28, %29, %cst_18 {dimension_numbers = #tpu.dot_dimension_numbers<[1], [0], [0], [1], [0, 0, 1, 1], [], []>} : vector<16x12xf32>, vector<12x1536xf32>, vector<16x1536xf32> -> vector<16x1536xf32>
    %cst_19 = arith.constant 0.000000e+00 : f32
    %31 = vector.broadcast %cst_19 : f32 to vector<16x12xf32>
    %32 = arith.subf %31, %19 : vector<16x12xf32>
    %33 = arith.mulf %32, %28 : vector<16x12xf32>
    %cst_20 = arith.constant dense<0.000000e+00> : vector<16x1536xf32>
    %34 = tpu.matmul %33, %29, %cst_20 {dimension_numbers = #tpu.dot_dimension_numbers<[1], [0], [0], [1], [0, 0, 1, 1], [], []>} : vector<16x12xf32>, vector<12x1536xf32>, vector<16x1536xf32> -> vector<16x1536xf32>
    %35 = arith.mulf %14, %30 : vector<16x1536xf32>
    %36 = arith.addf %35, %34 : vector<16x1536xf32>
    %c2 = arith.constant 2 : index
    %c0_21 = arith.constant 0 : index
    %37 = vector.load %arg3[%c2, %c0_21] : memref<4x1536xf32, #tpu.memory_space<vmem>>, vector<1x1536xf32>
    %38 = vector.broadcast %37 : vector<1x1536xf32> to vector<16x1536xf32>
    %39 = arith.mulf %36, %38 : vector<16x1536xf32>
    %c3 = arith.constant 3 : index
    %c0_22 = arith.constant 0 : index
    %40 = vector.load %arg3[%c3, %c0_22] : memref<4x1536xf32, #tpu.memory_space<vmem>>, vector<1x1536xf32>
    %41 = vector.broadcast %40 : vector<1x1536xf32> to vector<16x1536xf32>
    %42 = arith.addf %39, %41 : vector<16x1536xf32>
    %43 = vector.extract_strided_slice %42 {offsets = [0, 0], sizes = [16, 128], strides = [1, 1]} : vector<16x1536xf32> to vector<16x128xf32>
    %44 = vector.extract_strided_slice %42 {offsets = [0, 512], sizes = [16, 128], strides = [1, 1]} : vector<16x1536xf32> to vector<16x128xf32>
    %45 = vector.extract_strided_slice %42 {offsets = [0, 1024], sizes = [16, 128], strides = [1, 1]} : vector<16x1536xf32> to vector<16x128xf32>
    %cst_23 = arith.constant dense<0.000000e+00> : vector<16x16xf32>
    %46 = tpu.matmul %43, %44, %cst_23 {dimension_numbers = #tpu.dot_dimension_numbers<[1], [1], [0], [0], [0, 0, 1, 0], [], []>} : vector<16x128xf32>, vector<16x128xf32>, vector<16x16xf32> -> vector<16x16xf32>
    %cst_24 = arith.constant 0.0883883461 : f32
    %47 = vector.broadcast %cst_24 : f32 to vector<16x16xf32>
    %48 = arith.mulf %46, %47 : vector<16x16xf32>
    %cst_25 = arith.constant dense<0xFF800000> : vector<16xf32>
    %49 = vector.multi_reduction <maximumf>, %48, %cst_25 [1] : vector<16x16xf32> to vector<16xf32>
    %50 = vector.shape_cast %49 : vector<16xf32> to vector<16x1xf32>
    %51 = vector.broadcast %50 : vector<16x1xf32> to vector<16x16xf32>
    %52 = arith.subf %48, %51 : vector<16x16xf32>
    %53 = math.exp %52 : vector<16x16xf32>
    %cst_26 = arith.constant dense<0.000000e+00> : vector<16xf32>
    %54 = vector.multi_reduction <add>, %53, %cst_26 [1] : vector<16x16xf32> to vector<16xf32>
    %55 = vector.shape_cast %54 : vector<16xf32> to vector<16x1xf32>
    %56 = vector.broadcast %55 : vector<16x1xf32> to vector<16x16xf32>
    %57 = arith.divf %53, %56 : vector<16x16xf32>
    %cst_27 = arith.constant dense<0.000000e+00> : vector<16x128xf32>
    %58 = tpu.matmul %57, %45, %cst_27 {dimension_numbers = #tpu.dot_dimension_numbers<[1], [0], [0], [1], [0, 0, 1, 1], [], []>} : vector<16x16xf32>, vector<16x128xf32>, vector<16x128xf32> -> vector<16x128xf32>
    %59 = vector.extract_strided_slice %42 {offsets = [0, 128], sizes = [16, 128], strides = [1, 1]} : vector<16x1536xf32> to vector<16x128xf32>
    %60 = vector.extract_strided_slice %42 {offsets = [0, 640], sizes = [16, 128], strides = [1, 1]} : vector<16x1536xf32> to vector<16x128xf32>
    %61 = vector.extract_strided_slice %42 {offsets = [0, 1152], sizes = [16, 128], strides = [1, 1]} : vector<16x1536xf32> to vector<16x128xf32>
    %cst_28 = arith.constant dense<0.000000e+00> : vector<16x16xf32>
    %62 = tpu.matmul %59, %60, %cst_28 {dimension_numbers = #tpu.dot_dimension_numbers<[1], [1], [0], [0], [0, 0, 1, 0], [], []>} : vector<16x128xf32>, vector<16x128xf32>, vector<16x16xf32> -> vector<16x16xf32>
    %cst_29 = arith.constant 0.0883883461 : f32
    %63 = vector.broadcast %cst_29 : f32 to vector<16x16xf32>
    %64 = arith.mulf %62, %63 : vector<16x16xf32>
    %cst_30 = arith.constant dense<0xFF800000> : vector<16xf32>
    %65 = vector.multi_reduction <maximumf>, %64, %cst_30 [1] : vector<16x16xf32> to vector<16xf32>
    %66 = vector.shape_cast %65 : vector<16xf32> to vector<16x1xf32>
    %67 = vector.broadcast %66 : vector<16x1xf32> to vector<16x16xf32>
    %68 = arith.subf %64, %67 : vector<16x16xf32>
    %69 = math.exp %68 : vector<16x16xf32>
    %cst_31 = arith.constant dense<0.000000e+00> : vector<16xf32>
    %70 = vector.multi_reduction <add>, %69, %cst_31 [1] : vector<16x16xf32> to vector<16xf32>
    %71 = vector.shape_cast %70 : vector<16xf32> to vector<16x1xf32>
    %72 = vector.broadcast %71 : vector<16x1xf32> to vector<16x16xf32>
    %73 = arith.divf %69, %72 : vector<16x16xf32>
    %cst_32 = arith.constant dense<0.000000e+00> : vector<16x128xf32>
    %74 = tpu.matmul %73, %61, %cst_32 {dimension_numbers = #tpu.dot_dimension_numbers<[1], [0], [0], [1], [0, 0, 1, 1], [], []>} : vector<16x16xf32>, vector<16x128xf32>, vector<16x128xf32> -> vector<16x128xf32>
    %75 = vector.extract_strided_slice %42 {offsets = [0, 256], sizes = [16, 128], strides = [1, 1]} : vector<16x1536xf32> to vector<16x128xf32>
    %76 = vector.extract_strided_slice %42 {offsets = [0, 768], sizes = [16, 128], strides = [1, 1]} : vector<16x1536xf32> to vector<16x128xf32>
    %77 = vector.extract_strided_slice %42 {offsets = [0, 1280], sizes = [16, 128], strides = [1, 1]} : vector<16x1536xf32> to vector<16x128xf32>
    %cst_33 = arith.constant dense<0.000000e+00> : vector<16x16xf32>
    %78 = tpu.matmul %75, %76, %cst_33 {dimension_numbers = #tpu.dot_dimension_numbers<[1], [1], [0], [0], [0, 0, 1, 0], [], []>} : vector<16x128xf32>, vector<16x128xf32>, vector<16x16xf32> -> vector<16x16xf32>
    %cst_34 = arith.constant 0.0883883461 : f32
    %79 = vector.broadcast %cst_34 : f32 to vector<16x16xf32>
    %80 = arith.mulf %78, %79 : vector<16x16xf32>
    %cst_35 = arith.constant dense<0xFF800000> : vector<16xf32>
    %81 = vector.multi_reduction <maximumf>, %80, %cst_35 [1] : vector<16x16xf32> to vector<16xf32>
    %82 = vector.shape_cast %81 : vector<16xf32> to vector<16x1xf32>
    %83 = vector.broadcast %82 : vector<16x1xf32> to vector<16x16xf32>
    %84 = arith.subf %80, %83 : vector<16x16xf32>
    %85 = math.exp %84 : vector<16x16xf32>
    %cst_36 = arith.constant dense<0.000000e+00> : vector<16xf32>
    %86 = vector.multi_reduction <add>, %85, %cst_36 [1] : vector<16x16xf32> to vector<16xf32>
    %87 = vector.shape_cast %86 : vector<16xf32> to vector<16x1xf32>
    %88 = vector.broadcast %87 : vector<16x1xf32> to vector<16x16xf32>
    %89 = arith.divf %85, %88 : vector<16x16xf32>
    %cst_37 = arith.constant dense<0.000000e+00> : vector<16x128xf32>
    %90 = tpu.matmul %89, %77, %cst_37 {dimension_numbers = #tpu.dot_dimension_numbers<[1], [0], [0], [1], [0, 0, 1, 1], [], []>} : vector<16x16xf32>, vector<16x128xf32>, vector<16x128xf32> -> vector<16x128xf32>
    %91 = vector.extract_strided_slice %42 {offsets = [0, 384], sizes = [16, 128], strides = [1, 1]} : vector<16x1536xf32> to vector<16x128xf32>
    %92 = vector.extract_strided_slice %42 {offsets = [0, 896], sizes = [16, 128], strides = [1, 1]} : vector<16x1536xf32> to vector<16x128xf32>
    %93 = vector.extract_strided_slice %42 {offsets = [0, 1408], sizes = [16, 128], strides = [1, 1]} : vector<16x1536xf32> to vector<16x128xf32>
    %cst_38 = arith.constant dense<0.000000e+00> : vector<16x16xf32>
    %94 = tpu.matmul %91, %92, %cst_38 {dimension_numbers = #tpu.dot_dimension_numbers<[1], [1], [0], [0], [0, 0, 1, 0], [], []>} : vector<16x128xf32>, vector<16x128xf32>, vector<16x16xf32> -> vector<16x16xf32>
    %cst_39 = arith.constant 0.0883883461 : f32
    %95 = vector.broadcast %cst_39 : f32 to vector<16x16xf32>
    %96 = arith.mulf %94, %95 : vector<16x16xf32>
    %cst_40 = arith.constant dense<0xFF800000> : vector<16xf32>
    %97 = vector.multi_reduction <maximumf>, %96, %cst_40 [1] : vector<16x16xf32> to vector<16xf32>
    %98 = vector.shape_cast %97 : vector<16xf32> to vector<16x1xf32>
    %99 = vector.broadcast %98 : vector<16x1xf32> to vector<16x16xf32>
    %100 = arith.subf %96, %99 : vector<16x16xf32>
    %101 = math.exp %100 : vector<16x16xf32>
    %cst_41 = arith.constant dense<0.000000e+00> : vector<16xf32>
    %102 = vector.multi_reduction <add>, %101, %cst_41 [1] : vector<16x16xf32> to vector<16xf32>
    %103 = vector.shape_cast %102 : vector<16xf32> to vector<16x1xf32>
    %104 = vector.broadcast %103 : vector<16x1xf32> to vector<16x16xf32>
    %105 = arith.divf %101, %104 : vector<16x16xf32>
    %cst_42 = arith.constant dense<0.000000e+00> : vector<16x128xf32>
    %106 = tpu.matmul %105, %93, %cst_42 {dimension_numbers = #tpu.dot_dimension_numbers<[1], [0], [0], [1], [0, 0, 1, 1], [], []>} : vector<16x16xf32>, vector<16x128xf32>, vector<16x128xf32> -> vector<16x128xf32>
    %107 = tpu.concatenate %58, %74, %90, %106 in 1 : vector<16x128xf32>, vector<16x128xf32>, vector<16x128xf32>, vector<16x128xf32> -> vector<16x512xf32>
    %c0_43 = arith.constant 0 : index
    %c0_44 = arith.constant 0 : index
    %108 = vector.load %arg7[%c0_43, %c0_44] : memref<512x512xf32, #tpu.memory_space<vmem>>, vector<512x512xf32>
    %cst_45 = arith.constant dense<0.000000e+00> : vector<16x512xf32>
    %109 = tpu.matmul %107, %108, %cst_45 {dimension_numbers = #tpu.dot_dimension_numbers<[1], [0], [0], [1], [0, 0, 1, 1], [], []>} : vector<16x512xf32>, vector<512x512xf32>, vector<16x512xf32> -> vector<16x512xf32>
    %c0_46 = arith.constant 0 : index
    %c0_47 = arith.constant 0 : index
    %110 = vector.load %arg8[%c0_46, %c0_47] : memref<4x512xf32, #tpu.memory_space<vmem>>, vector<1x512xf32>
    %111 = vector.broadcast %110 : vector<1x512xf32> to vector<16x512xf32>
    %112 = arith.addf %109, %111 : vector<16x512xf32>
    %c1_48 = arith.constant 1 : index
    %c0_49 = arith.constant 0 : index
    %113 = vector.load %arg8[%c1_48, %c0_49] : memref<4x512xf32, #tpu.memory_space<vmem>>, vector<1x512xf32>
    %cst_50 = arith.constant 0.000000e+00 : f32
    %114 = vector.broadcast %cst_50 : f32 to vector<16x512xf32>
    %115 = arith.maximumf %112, %114 : vector<16x512xf32>
    %cst_51 = arith.constant 0.000000e+00 : f32
    %116 = vector.broadcast %cst_51 : f32 to vector<16x512xf32>
    %117 = arith.minimumf %112, %116 : vector<16x512xf32>
    %118 = vector.broadcast %113 : vector<1x512xf32> to vector<16x512xf32>
    %119 = arith.mulf %118, %117 : vector<16x512xf32>
    %120 = arith.addf %115, %119 : vector<16x512xf32>
    %cst_52 = arith.constant dense<0.000000e+00> : vector<16xf32>
    %121 = vector.multi_reduction <add>, %120, %cst_52 [1] : vector<16x512xf32> to vector<16xf32>
    %122 = vector.shape_cast %121 : vector<16xf32> to vector<16x1xf32>
    %cst_53 = arith.constant 0.001953125 : f32
    %123 = vector.broadcast %cst_53 : f32 to vector<16x1xf32>
    %124 = arith.mulf %122, %123 : vector<16x1xf32>
    %125 = arith.mulf %120, %120 : vector<16x512xf32>
    %cst_54 = arith.constant dense<0.000000e+00> : vector<16xf32>
    %126 = vector.multi_reduction <add>, %125, %cst_54 [1] : vector<16x512xf32> to vector<16xf32>
    %127 = vector.shape_cast %126 : vector<16xf32> to vector<16x1xf32>
    %cst_55 = arith.constant 0.001953125 : f32
    %128 = vector.broadcast %cst_55 : f32 to vector<16x1xf32>
    %129 = arith.mulf %127, %128 : vector<16x1xf32>
    %130 = vector.broadcast %124 : vector<16x1xf32> to vector<16x512xf32>
    %131 = arith.subf %120, %130 : vector<16x512xf32>
    %132 = arith.mulf %124, %124 : vector<16x1xf32>
    %133 = arith.subf %129, %132 : vector<16x1xf32>
    %cst_56 = arith.constant 9.99999974E-6 : f32
    %134 = vector.broadcast %cst_56 : f32 to vector<16x1xf32>
    %135 = arith.addf %133, %134 : vector<16x1xf32>
    %136 = math.rsqrt %135 : vector<16x1xf32>
    %137 = vector.broadcast %136 : vector<16x1xf32> to vector<16x512xf32>
    %138 = arith.mulf %131, %137 : vector<16x512xf32>
    %c2_57 = arith.constant 2 : index
    %c0_58 = arith.constant 0 : index
    %139 = vector.load %arg8[%c2_57, %c0_58] : memref<4x512xf32, #tpu.memory_space<vmem>>, vector<1x512xf32>
    %140 = vector.broadcast %139 : vector<1x512xf32> to vector<16x512xf32>
    %141 = arith.mulf %138, %140 : vector<16x512xf32>
    %c3_59 = arith.constant 3 : index
    %c0_60 = arith.constant 0 : index
    %142 = vector.load %arg8[%c3_59, %c0_60] : memref<4x512xf32, #tpu.memory_space<vmem>>, vector<1x512xf32>
    %143 = vector.broadcast %142 : vector<1x512xf32> to vector<16x512xf32>
    %144 = arith.addf %141, %143 : vector<16x512xf32>
    %145 = arith.addf %144, %1 : vector<16x512xf32>
    %c0_61 = arith.constant 0 : index
    %c0_62 = arith.constant 0 : index
    %c0_63 = arith.constant 0 : index
    %146 = vector.load %arg9[%c0_61, %c0_62, %c0_63] : memref<1x16x512xf32, #tpu.memory_space<vmem>>, vector<1x16x512xf32>
    %147 = vector.shape_cast %146 : vector<1x16x512xf32> to vector<16x512xf32>
    %148 = vector.shape_cast %145 : vector<16x512xf32> to vector<1x16x512xf32>
    tpu.vector_store %arg9[%c0_61, %c0_62, %c0_63], %148 {strides = array<i32>} : memref<1x16x512xf32, #tpu.memory_space<vmem>>, vector<1x16x512xf32>,
    return
  }
  func.func @transform_0(%arg0: i32) -> (i32, i32, i32) {
    %c0_i32 = arith.constant 0 : i32
    %c0_i32_0 = arith.constant 0 : i32
    %c0_i32_1 = arith.constant 0 : i32
    return %arg0, %c0_i32, %c0_i32_0 : i32, i32, i32
  }
  func.func @transform_1(%arg0: i32) -> (i32, i32) {
    %c0_i32 = arith.constant 0 : i32
    %c0_i32_0 = arith.constant 0 : i32
    %c0_i32_1 = arith.constant 0 : i32
    return %c0_i32, %c0_i32_0 : i32, i32
  }
  func.func @transform_2(%arg0: i32) -> (i32, i32) {
    %c0_i32 = arith.constant 0 : i32
    %c0_i32_0 = arith.constant 0 : i32
    %c0_i32_1 = arith.constant 0 : i32
    return %c0_i32, %c0_i32_0 : i32, i32
  }
  func.func @transform_3(%arg0: i32) -> (i32, i32) {
    %c0_i32 = arith.constant 0 : i32
    %c0_i32_0 = arith.constant 0 : i32
    %c0_i32_1 = arith.constant 0 : i32
    return %c0_i32, %c0_i32_0 : i32, i32
  }
  func.func @transform_4(%arg0: i32) -> (i32, i32) {
    %c0_i32 = arith.constant 0 : i32
    %c0_i32_0 = arith.constant 0 : i32
    %c0_i32_1 = arith.constant 0 : i32
    return %c0_i32, %c0_i32_0 : i32, i32
  }
  func.func @transform_5(%arg0: i32) -> (i32, i32) {
    %c0_i32 = arith.constant 0 : i32
    %c0_i32_0 = arith.constant 0 : i32
    %c0_i32_1 = arith.constant 0 : i32
    return %c0_i32, %c0_i32_0 : i32, i32
  }
  func.func @transform_6(%arg0: i32) -> (i32, i32) {
    %c0_i32 = arith.constant 0 : i32
    %c0_i32_0 = arith.constant 0 : i32
    %c0_i32_1 = arith.constant 0 : i32
    return %c0_i32, %c0_i32_0 : i32, i32
  }
  func.func @transform_7(%arg0: i32) -> (i32, i32) {
    %c0_i32 = arith.constant 0 : i32
    %c0_i32_0 = arith.constant 0 : i32
    %c0_i32_1 = arith.constant 0 : i32
    return %c0_i32, %c0_i32_0 : i32, i32
  }
  func.func @transform_8(%arg0: i32) -> (i32, i32, i32) {
    %c0_i32 = arith.constant 0 : i32
    %c0_i32_0 = arith.constant 0 : i32
    %c0_i32_1 = arith.constant 0 : i32
    return %arg0, %c0_i32, %c0_i32_0 : i32, i32, i32
  }
}

</mosaic_0001>

<bundles_post_ra>
// kernel: tpu_custom_call.1
= control target key start
LH: loop header
LB: loop body
LE: loop exit
PB: predicated region body
PF: predicated region fallthrough
CT: control target
= control target key end

     0   :  { %s10000_s0 = inlined_call_operand.hbm [shape: f32[2,16,512], index: 0, kind: input, shape index: {}]   ;;  %s10001_s1 = inlined_call_operand.hbm [shape: f32[512,1536], index: 1, kind: input, shape index: {}]   ;;  %s10002_s2 = inlined_call_operand.hbm [shape: f32[4,1536], index: 2, kind: input, shape index: {}]   ;;  %s10003_s3 = inlined_call_operand.vmem [shape: f32[1536,12], index: 3, kind: input, shape index: {}]   ;;  %s10004_s4 = inlined_call_operand.hbm [shape: f32[12,1536], index: 4, kind: input, shape index: {}]   ;;  %s10005_s5 = inlined_call_operand.hbm [shape: f32[1,12], index: 5, kind: input, shape index: {}]   ;;  %s10006_s6 = inlined_call_operand.hbm [shape: f32[512,512], index: 6, kind: input, shape index: {}]   ;;  %s10007_s7 = inlined_call_operand.hbm [shape: f32[4,512], index: 7, kind: input, shape index: {}]   ;;  %s10008_s8 = inlined_call_operand.hbm [shape: f32[2,16,512], index: 8, kind: output, shape index: {}]  }
   0x1   :  { %10171 = sst [smem:[#allocation145_spill]] %s10001_s1 }
   0x2   :  { %10172 = sst [smem:[#allocation146_spill]] %s10002_s2 }
   0x3   :  { %13 = vsyncpa [#allocation3], 0 }
   0x4   :  { %15 = vsyncpa [#allocation3 + $0x1], 0 }
   0x5   :  { %16 = vsyncpa [#allocation6], 0 }
   0x6   :  { %17 = vsyncpa [#allocation9], 0 }
   0x7   :  { %18 = vsyncpa [#allocation12], 0 }
   0x8   :  { %19 = vsyncpa [#allocation4], 0 }
   0x9   :  { %21 = vsyncpa [#allocation4 + $0x1], 0  ;;  %s7529_s27 = smov 0   ;;  %s7531_s28 = smov 0  }
   0xa   :  { %s7533_s29 = smov 0   ;;  %s7535_s30 = smov 0  }
   0xb LB: > { %s7469_s9 = smov [#allocation5]   ;;  %s7550_s11 = sadd.s32 4294967295, %s7467_s30   ;;  %s7467_s30 = sphi %s7535_s30, %s10482_s30   ;;  %s7463_s29 = sphi %s7533_s29, %s10481_s29   ;;  %s7459_s28 = sphi %s7531_s28, %s10480_s28   ;;  %s7455_s27 = sphi %s7529_s27, %s10479_s27  }
   0xc   : > { %s243_s10 = sshll.u32 %s7469_s9, 4  ;;  %p6338_p0 = scmp.ge.s32.totalorder %s7467_s30, 1  ;;  %s244_s10 = int_to_ptr.vmem [resolvable:$true] %s243_s10 }
   0xd   : > { %p10009_p1 = scmp.eq.s32.totalorder %s7550_s11, 0  ;;  %p231_p2 = scmp.lt.s32.totalorder %s7467_s30, 3 }
   0xe   : > { %s7470_s13 = smov [#allocation8]   ;;  %s7471_s16 = smov [#allocation11]  }
   0xf   : > { %p7555_p3 = pnand %p6338_p0, %p231_p2  ;;  %s270_s14 = sshll.u32 %s7470_s13, 4  ;;  %s7568_s14 = int_to_ptr.vmem [resolvable:$true] %s270_s14 }
  0x10   : > { %s294_s17 = sshll.u32 %s7471_s16, 4  ;;  %s7218_s19 = scalar_lea.vmem %s244_s10, 98304  ;;  %s7570_s17 = int_to_ptr.vmem [resolvable:$true] %s294_s17 }
  0x11   : > { %s10173_s12 = scalar_select %p7555_p3, 1, 0 }
  0x12   : > { %p6994_p5 = pneg %p7555_p3  ;;  %p7219_p8 = scmp.ne.s32.totalorder %s244_s10, %s7218_s19 }
  0x13   : > { %p7226_p11 = scmp.lt.s32.totalorder %s244_s10, %s244_s10  ;;  %p7227_p12 = scmp.lt.s32.totalorder %s7218_s19, %s7218_s19 }
  0x14   : > { %p7564_p6 = pnand %p6994_p5, %p10009_p1 }
  0x15   : > { %p7228_p13 = por %p7227_p12, %p7226_p11 }
  0x16   : > { %p7574_p7 = pneg %p7564_p6 }
  0x18   : > { %p7221_p9 = pnand %p7219_p8, %p7574_p7 }
  0x1a   : > { %p7222_p10 = pneg %p7221_p9 }
  0x1c   : > { %p7229_p0 = pnand %p7228_p13, %p7222_p10 }
  0x1e   : > { %7232 = shalt.err (!%p7229_p0)
}
  0x1f   : > { %s7472_s20 = smov 1536   ;;  %s7473_s21 = smov 96  }
  0x20   : > { %s10176_s1 = sld [smem:[#allocation145_spill]]  ;;  %s7244_s24 = scalar_lea.vmem %s7568_s14, 3072 }
  0x21   : > { %p7245_p2 = scmp.ne.s32.totalorder %s7568_s14, %s7244_s24  ;;  %p7252_p9 = scmp.lt.s32.totalorder %s7568_s14, %s7568_s14 }
  0x22   : > { %p7253_p10 = scmp.lt.s32.totalorder %s7244_s24, %s7244_s24 }
  0x23   : > { %p7247_p5 = pnand %p7245_p2, %p7574_p7 }
  0x24   : > { %p7254_p11 = por %p7253_p10, %p7252_p9 }
  0x25   : > { %p7248_p8 = pneg %p7247_p5 }
  0x26   : > { %6997 = dma.hbm_to_vmem [thread:$0]  (!%p7564_p6), %s10176_s1, 98304, %s244_s10, [#allocation6], %s7472_s20, %s7472_s20, %s7473_s21  }
  0x27   : > { %p7255_p12 = pnand %p7254_p11, %p7248_p8 }
  0x29   : > { %7258 = shalt.err (!%p7255_p12)
}
  0x2a   : > { %7003 = dma.hbm_to_vmem [thread:$0]  (!%p7564_p6), %s10004_s4, 3072, %s7568_s14, [#allocation9], %s7472_s20, %s7472_s20, %s7473_s21  }
  0x2b   : > { %s7270_s9 = scalar_lea.vmem %s7570_s17, 32768  ;;  %p7278_p5 = scmp.lt.s32.totalorder %s7570_s17, %s7570_s17 }
  0x2c   : > { %p7271_p13 = scmp.ne.s32.totalorder %s7570_s17, %s7270_s9  ;;  %p7279_p8 = scmp.lt.s32.totalorder %s7270_s9, %s7270_s9 }
  0x2e   : > { %p7273_p0 = pnand %p7271_p13, %p7574_p7  ;;  %p7280_p9 = por %p7279_p8, %p7278_p5 }
  0x30   : > { %p7274_p2 = pneg %p7273_p0 }
  0x32   : > { %p7281_p10 = pnand %p7280_p9, %p7274_p2 }
  0x34   : > { %7284 = shalt.err (!%p7281_p10)
}
  0x35   : > { %s10010_s10 = smov 512   ;;  %s10011_s13 = smov 32  }
  0x36   : > { %7009 = dma.hbm_to_vmem [thread:$0]  (!%p7564_p6), %s10006_s6, 32768, %s7570_s17, [#allocation12], %s10010_s10, %s10010_s10, %s10011_s13  }
  0x37   : > { %s7476_s19 = smov [#allocation7]   ;;  %s7477_s21 = smov [#allocation10]  }
  0x38   : > { %s257_s20 = sshll.u32 %s7476_s19, 4  ;;  %s284_s22 = sshll.u32 %s7477_s21, 4  ;;  %s258_s20 = int_to_ptr.vmem [resolvable:$true] %s257_s20  ;;  %s285_s22 = int_to_ptr.vmem [resolvable:$true] %s284_s22 }
  0x39   : > { %s7296_s23 = scalar_lea.vmem %s258_s20, 768  ;;  %p7304_p0 = scmp.lt.s32.totalorder %s258_s20, %s258_s20 }
  0x3a   : > { %p7297_p11 = scmp.ne.s32.totalorder %s258_s20, %s7296_s23  ;;  %p7305_p2 = scmp.lt.s32.totalorder %s7296_s23, %s7296_s23 }
  0x3c   : > { %p7299_p12 = pnand %p7297_p11, %p7574_p7  ;;  %p7306_p5 = por %p7305_p2, %p7304_p0 }
  0x3e   : > { %p7300_p13 = pneg %p7299_p12 }
  0x40   : > { %p7307_p8 = pnand %p7306_p5, %p7300_p13 }
  0x42   : > { %7310 = shalt.err (!%p7307_p8)
}
  0x43   : > { %s10177_s2 = sld [smem:[#allocation146_spill]]  ;;  %s7322_s17 = scalar_lea.vmem %s285_s22, 16 }
  0x44   : > { %p7323_p9 = scmp.ne.s32.totalorder %s285_s22, %s7322_s17  ;;  %s7329_s26 = scalar_lea.vmem %s285_s22, 32 }
  0x45   : > { %p7330_p11 = scmp.lt.s32.totalorder %s285_s22, %s285_s22  ;;  %p7331_p12 = scmp.lt.s32.totalorder %s7329_s26, %s7322_s17 }
  0x46   : > { %p7325_p10 = pnand %p7323_p9, %p7574_p7 }
  0x47   : > { %p7332_p1 = por %p7331_p12, %p7330_p11 }
  0x48   : > { %p7326_p4 = pneg %p7325_p10 }
  0x49   : > { %7000 = dma.hbm_to_vmem [thread:$0]  (!%p7564_p6), %s10177_s2, 768, %s258_s20, [#allocation6]  }
  0x4a   : > { %p7333_p0 = pnand %p7332_p1, %p7326_p4 }
  0x4c   : > { %7336 = shalt.err (!%p7333_p0)
}
  0x4d   : > { %7006 = dma.hbm_to_vmem [thread:$0]  (!%p7564_p6), %s10005_s5, 16, %s285_s22, [#allocation9]  }
  0x4e   : > { %s7478_s16 = smov [#allocation13]  }
  0x4f   : > { %s308_s19 = sshll.u32 %s7478_s16, 4  ;;  %s309_s19 = int_to_ptr.vmem [resolvable:$true] %s308_s19 }
  0x50   : > { %s7348_s20 = scalar_lea.vmem %s309_s19, 256  ;;  %p7356_p8 = scmp.lt.s32.totalorder %s309_s19, %s309_s19 }
  0x51   : > { %p7349_p13 = scmp.ne.s32.totalorder %s309_s19, %s7348_s20  ;;  %p7357_p9 = scmp.lt.s32.totalorder %s7348_s20, %s7348_s20 }
  0x53   : > { %p7351_p2 = pnand %p7349_p13, %p7574_p7  ;;  %p7358_p10 = por %p7357_p9, %p7356_p8 }
  0x55   : > { %p7352_p5 = pneg %p7351_p2 }
  0x57   : > { %p7359_p1 = pnand %p7358_p10, %p7352_p5 }
  0x59   : > { %7362 = shalt.err (!%p7359_p1)
}
  0x5a   : > { %7012 = dma.hbm_to_vmem [thread:$0]  (!%p7564_p6), %s10007_s7, 256, %s309_s19, [#allocation12]  }
  0x5b   : > { %s6337_s18 = sadd.s32 4294967294, %s7467_s30   ;;  %s7635_s15 = sadd.s32 1, %s7467_s30  }
  0x5c   : > { %s31_s22 = ssub.s32 %s7467_s30, %s7635_s15  ;;  %s34_s24 = sadd.s32 1, %s7463_s29 }
  0x5d   : > { %p32_p4 = scmp.eq.s32.totalorder %s31_s22, 0  ;;  %p41_p7 = scmp.ne.s32.totalorder %s7463_s29, %s7459_s28 }
  0x5e   : > { %p42_p11 = scmp.eq.s32.totalorder %s7467_s30, 0  ;;  %p47_p12 = scmp.ne.s32.totalorder %s7459_s28, %s7455_s27 }
  0x5f   : > { %s7646_s25 = scalar_select %p32_p4, %s7463_s29, %s34_s24  }
  0x60   : > { %p7648_p0 = por %p42_p11, %p41_p7  ;;  %p10179_p13 = scmp.eq.s32.totalorder %s7550_s11, 0 }
  0x61   : > { %p218_p2 = scmp.eq.s32.totalorder %s7550_s11, 1  ;;  %p224_p5 = scmp.eq.s32.totalorder %s6337_s18, 1 }
  0x62   : > { %p7654_p6 = por %p10179_p13, %p47_p12  ;;  %p7027_p8 = scmp.lt.s32.totalorder %s7467_s30, 2 }
  0x63   : > { %s319_s9 = sand.u32 1, %s7463_s29   ;;  %p7661_p9 = por %p218_p2, %p41_p7 }
  0x64   : > { %s10180_s26 = scalar_select %p7654_p6, 1, 0 }
  0x65   : > { %s10181_s14 = scalar_select %p7661_p9, 1, 0 }
  0x66   : > { %p7665_p10 = por %p224_p5, %p47_p12  ;;  %s6346_s19 = sshll.u32 %s319_s9, 6 }
  0x67   : > { %s6420_s20 = sshll.u32 %s7467_s30, 10  ;;  %s323_s18 = scalar_lea.vmem [#allocation2], %s6346_s19 }
  0x68   : > { %s10182_s16 = scalar_select %p7665_p10, 1, 0 }
  0x69   : > { %s7673_s22 = scalar_lea.hbm %s10000_s0, %s6420_s20  ;;  %s330_s24 = sshll.u32 %s323_s18, 4  ;;  %s7675_s24 = int_to_ptr.vmem [resolvable:$true] %s330_s24 }
  0x6a   : > { %p7679_p1 = pnand %p7027_p8, %p7648_p0  ;;  %s7683_s13 = scalar_lea.sflag [#allocation3], %s319_s9 }
  0x6b   : > { %s7363_s1 = scalar_lea.hbm %s7673_s22, 1024  ;;  %s7368_s19 = scalar_lea.hbm %s10000_s0, 2048 }
  0x6c   : > { %p7364_p4 = scmp.ne.s32.totalorder %s7673_s22, %s7363_s1  ;;  %p7365_p7 = pneg %p7679_p1 }
  0x6d   : > { %p7369_p0 = scmp.lt.s32.totalorder %s7673_s22, %s10000_s0  ;;  %p7370_p13 = scmp.lt.s32.totalorder %s7368_s19, %s7363_s1 }
  0x6e   : > { %p7366_p11 = pnand %p7365_p7, %p7364_p4 }
  0x6f   : > { %p7371_p2 = por %p7370_p13, %p7369_p0 }
  0x70   : > { %p7367_p12 = pneg %p7366_p11 }
  0x72   : > { %p7372_p5 = pnand %p7371_p2, %p7367_p12 }
  0x74   : > { %7375 = shalt.err (!%p7372_p5)
}
  0x75   : > { %s7376_s17 = scalar_lea.vmem %s7675_s24, 1024  ;;  %s7479_s9 = smov [#allocation2]  }
  0x76   : > { %p7377_p8 = scmp.ne.s32.totalorder %s7675_s24, %s7376_s17  ;;  %s7381_s2 = sshll.u32 %s7479_s9, 4  ;;  %s7382_s2 = int_to_ptr.vmem [resolvable:$false] %s7381_s2 }
  0x77   : > { %s7383_s20 = scalar_lea.vmem %s7382_s2, 2048  ;;  %p7384_p11 = scmp.lt.s32.totalorder %s7675_s24, %s7382_s2 }
  0x78   : > { %p7379_p10 = pnand %p7377_p8, %p7365_p7  ;;  %p7385_p9 = scmp.lt.s32.totalorder %s7383_s20, %s7376_s17 }
  0x7a   : > { %p7380_p4 = pneg %p7379_p10  ;;  %p7386_p6 = por %p7385_p9, %p7384_p11 }
  0x7c   : > { %p7387_p3 = pnand %p7386_p6, %p7380_p4 }
  0x7e   : > { %7390 = shalt.err (!%p7387_p3)
}
  0x7f   : > { %s10184_s1 = smov 32   ;;  %s10185_s21 = smov 512  }
  0x80   : > { %7016 = dma.hbm_to_vmem [thread:$0]  (!%p7679_p1), %s7673_s22, 1024, %s7675_s24, %s7683_s13, %s10185_s21, %s10185_s21, %s10184_s1  }
  0x81   : > { %p10186_p10 = scmp.ne.s32.totalorder %s10173_s12, 0 }
  0x83   : > { %342 = sbr.rel (%p10186_p10) target bundleno = 3533 (0xdcd), region = 52 }
  0x88   : > { %s7710_s19 = sand.u32 1, %s7459_s28   ;;  %p10187_p3 = scmp.ne.s32.totalorder %s10180_s26, 0 }
  0x89   : > { %s6350_s2 = sshll.u32 %s7710_s19, 6  ;;  %s345_s23 = scalar_lea.sflag [#allocation3], %s7710_s19 }
  0x8a   : > { %s7716_s10 = scalar_lea.vmem [#allocation2], %s6350_s2 }
  0x8b   : > { %7434 = dma.done.wait (%p10187_p3), %s345_s23, 1024  }
  0x8c   : > { %7436 = vsyncadd (%p10187_p3), %s345_s23, 4294966272  ;;  %p10188_p6 = scmp.eq.s32.totalorder %s7550_s11, 0 }
  0x8e   : > { %7438 = dma.done.wait (%p10188_p6), [#allocation6], 99072   ;;  %p10189_p9 = pmov %p10188_p6 }
  0x8f   : > { %p10190_p1 = pmov %p10188_p6 }
  0x90   : > { %7440 = vsyncadd (%p10189_p9), [#allocation6], 4294868224 }
  0x91   : > { %7442 = dma.done.wait (%p10190_p1), [#allocation9], 3088   ;;  %p10191_p7 = pmov %p10190_p1 }
  0x92   : > { %p10192_p12 = pmov %p10190_p1 }
  0x93   : > { %7444 = vsyncadd (%p10191_p7), [#allocation9], 4294964208 }
  0x94   : > { %7446 = dma.done.wait (%p10192_p12), [#allocation12], 33024   ;;  %p10193_p0 = pmov %p10190_p1 }
  0x95   : > { %v594_v0 = vld [vmem:[#allocation5 + $0x5a8] sm:$0xff]  ;;  %v593_v2 = vld [vmem:[#allocation5 + $0x5a0] sm:$0xff]  ;;  %vm3498_vm0 = vcmask 1043456   ;;  %vm3491_vm1 = vcmask 97280   ;;  %vm4774_vm2 = vcmask 130048   ;;  %s6421_s17 = sshll.u32 %s7550_s11, 10 }
  0x96   : > { %7448 = vsyncadd (%p10193_p0), [#allocation12], 4294934272  ;;  %v978_v1 = vld [vmem:[#allocation5 + $0x11a8] sm:$0xff]  ;;  %1246 = vmatprep.subr.mxu0 %v594_v0  ;;  %v977_v3 = vld [vmem:[#allocation5 + $0x11a0] sm:$0xff]  ;;  %s404_s9 = scalar_lea.vmem [#allocation14], %s6350_s2  ;;  %s9951_s23 = scalar_lea.hbm %s10008_s8, %s6421_s17 }
  0x97   : > { %1323 = vmatprep.subr.mxu1 %v978_v1  ;;  %v582_v4 = vld [vmem:[#allocation5 + $0x548] sm:$0xff]  ;;  %1247 = vmatpush1.msra.mxu0 %v593_v2  ;;  %v581_v6 = vld [vmem:[#allocation5 + $0x540] sm:$0xff]  ;;  %s6207_s20 = sshll.u32 %s404_s9, 4  ;;  %s6194_s11 = scalar_lea.sflag [#allocation4], %s7710_s19  ;;  %s9953_s20 = int_to_ptr.vmem [resolvable:$true] %s6207_s20 }
  0x98   : > { %v966_v5 = vld [vmem:[#allocation5 + $0x1148] sm:$0xff]  ;;  %1324 = vmatpush1.msra.mxu1 %v977_v3  ;;  %v965_v7 = vld [vmem:[#allocation5 + $0x1140] sm:$0xff]  ;;  %1248 = vmatprep.subr.mxu0 %v582_v4  ;;  %s7391_s2 = scalar_lea.vmem %s9953_s20, 1024  ;;  %p10476_p2 = scmp.ne.s32.totalorder %s10181_s14, 0 }
  0x99   : > { %v570_v8 = vld [vmem:[#allocation5 + $0x4e8] sm:$0xff]  ;;  %1325 = vmatprep.subr.mxu1 %v966_v5  ;;  %v569_v10 = vld [vmem:[#allocation5 + $0x4e0] sm:$0xff]  ;;  %1249 = vmatpush1.msra.mxu0 %v581_v6  ;;  %p7392_p13 = scmp.ne.s32.totalorder %s9953_s20, %s7391_s2  ;;  %s7481_s12 = smov [#allocation14]  }
  0x9a   : > { %v954_v9 = vld [vmem:[#allocation5 + $0x10e8] sm:$0xff]  ;;  %v953_v11 = vld [vmem:[#allocation5 + $0x10e0] sm:$0xff]  ;;  %1326 = vmatpush1.msra.mxu1 %v965_v7  ;;  %1250 = vmatprep.subr.mxu0 %v570_v8  ;;  %s7395_s13 = sshll.u32 %s7481_s12, 4  ;;  %s7396_s13 = int_to_ptr.vmem [resolvable:$false] %s7395_s13 }
  0x9b   : > { %v558_v12 = vld [vmem:[#allocation5 + $0x488] sm:$0xff]  ;;  %1327 = vmatprep.subr.mxu1 %v954_v9  ;;  %v557_v14 = vld [vmem:[#allocation5 + $0x480] sm:$0xff]  ;;  %1251 = vmatpush1.msra.mxu0 %v569_v10  ;;  %p7393_p5 = pnand %p7392_p13, %p10476_p2  ;;  %s7397_s26 = scalar_lea.vmem %s7396_s13, 2048 }
  0x9c   : > { %v942_v13 = vld [vmem:[#allocation5 + $0x1088] sm:$0xff]  ;;  %v941_v15 = vld [vmem:[#allocation5 + $0x1080] sm:$0xff]  ;;  %1328 = vmatpush1.msra.mxu1 %v953_v11  ;;  %1252 = vmatprep.subr.mxu0 %v558_v12  ;;  %p7398_p4 = scmp.lt.s32.totalorder %s9953_s20, %s7396_s13  ;;  %p7399_p11 = scmp.lt.s32.totalorder %s7397_s26, %s7391_s2 }
  0x9d   : > { %v546_v16 = vld [vmem:[#allocation5 + $0x428] sm:$0xff]  ;;  %1329 = vmatprep.subr.mxu1 %v942_v13  ;;  %v545_v18 = vld [vmem:[#allocation5 + $0x420] sm:$0xff]  ;;  %1253 = vmatpush1.msra.mxu0 %v557_v14  ;;  %p7394_p8 = pneg %p7393_p5 }
  0x9e   : > { %v930_v17 = vld [vmem:[#allocation5 + $0x1028] sm:$0xff]  ;;  %v929_v19 = vld [vmem:[#allocation5 + $0x1020] sm:$0xff]  ;;  %1330 = vmatpush1.msra.mxu1 %v941_v15  ;;  %1254 = vmatprep.subr.mxu0 %v546_v16  ;;  %p7400_p10 = por %p7399_p11, %p7398_p4 }
  0x9f   : > { %v534_v20 = vld [vmem:[#allocation5 + $0x3c8] sm:$0xff]  ;;  %1331 = vmatprep.subr.mxu1 %v930_v17  ;;  %v533_v22 = vld [vmem:[#allocation5 + $0x3c0] sm:$0xff]  ;;  %1255 = vmatpush1.msra.mxu0 %v545_v18 }
  0xa0   : > { %v918_v21 = vld [vmem:[#allocation5 + $0xfc8] sm:$0xff]  ;;  %v917_v23 = vld [vmem:[#allocation5 + $0xfc0] sm:$0xff]  ;;  %1332 = vmatpush1.msra.mxu1 %v929_v19  ;;  %1256 = vmatprep.subr.mxu0 %v534_v20  ;;  %p7401_p3 = pnand %p7400_p10, %p7394_p8 }
  0xa1   : > { %v522_v24 = vld [vmem:[#allocation5 + $0x368] sm:$0xff]  ;;  %1333 = vmatprep.subr.mxu1 %v918_v21  ;;  %v521_v26 = vld [vmem:[#allocation5 + $0x360] sm:$0xff]  ;;  %1257 = vmatpush1.msra.mxu0 %v533_v22 }
  0xa2   : > { %v906_v25 = vld [vmem:[#allocation5 + $0xf68] sm:$0xff]  ;;  %v905_v27 = vld [vmem:[#allocation5 + $0xf60] sm:$0xff]  ;;  %1334 = vmatpush1.msra.mxu1 %v917_v23  ;;  %1258 = vmatprep.subr.mxu0 %v522_v24 }
  0xa3   : > { %v510_v28 = vld [vmem:[#allocation5 + $0x308] sm:$0xff]  ;;  %1335 = vmatprep.subr.mxu1 %v906_v25  ;;  %v509_v30 = vld [vmem:[#allocation5 + $0x300] sm:$0xff]  ;;  %1259 = vmatpush1.msra.mxu0 %v521_v26 }
  0xa4   : > { %v894_v29 = vld [vmem:[#allocation5 + $0xf08] sm:$0xff]  ;;  %v893_v31 = vld [vmem:[#allocation5 + $0xf00] sm:$0xff]  ;;  %1336 = vmatpush1.msra.mxu1 %v905_v27  ;;  %1260 = vmatprep.subr.mxu0 %v510_v28 }
  0xa5   : > { %v498_v32 = vld [vmem:[#allocation5 + $0x2a8] sm:$0xff]  ;;  %1337 = vmatprep.subr.mxu1 %v894_v29  ;;  %v497_v34 = vld [vmem:[#allocation5 + $0x2a0] sm:$0xff]  ;;  %1261 = vmatpush1.msra.mxu0 %v509_v30 }
  0xa6   : > { %v882_v33 = vld [vmem:[#allocation5 + $0xea8] sm:$0xff]  ;;  %v881_v35 = vld [vmem:[#allocation5 + $0xea0] sm:$0xff]  ;;  %1338 = vmatpush1.msra.mxu1 %v893_v31  ;;  %1262 = vmatprep.subr.mxu0 %v498_v32 }
  0xa7   : > { %v486_v36 = vld [vmem:[#allocation5 + $0x248] sm:$0xff]  ;;  %1339 = vmatprep.subr.mxu1 %v882_v33  ;;  %v485_v38 = vld [vmem:[#allocation5 + $0x240] sm:$0xff]  ;;  %1263 = vmatpush1.msra.mxu0 %v497_v34 }
  0xa8   : > { %v870_v37 = vld [vmem:[#allocation5 + $0xe48] sm:$0xff]  ;;  %v869_v39 = vld [vmem:[#allocation5 + $0xe40] sm:$0xff]  ;;  %1340 = vmatpush1.msra.mxu1 %v881_v35  ;;  %1264 = vmatprep.subr.mxu0 %v486_v36 }
  0xa9   : > { %v474_v40 = vld [vmem:[#allocation5 + $0x1e8] sm:$0xff]  ;;  %1341 = vmatprep.subr.mxu1 %v870_v37  ;;  %v473_v42 = vld [vmem:[#allocation5 + $0x1e0] sm:$0xff]  ;;  %1265 = vmatpush1.msra.mxu0 %v485_v38 }
  0xaa   : > { %v858_v41 = vld [vmem:[#allocation5 + $0xde8] sm:$0xff]  ;;  %v857_v43 = vld [vmem:[#allocation5 + $0xde0] sm:$0xff]  ;;  %1342 = vmatpush1.msra.mxu1 %v869_v39  ;;  %1266 = vmatprep.subr.mxu0 %v474_v40 }
  0xab   : > { %v462_v44 = vld [vmem:[#allocation5 + $0x188] sm:$0xff]  ;;  %1343 = vmatprep.subr.mxu1 %v858_v41  ;;  %v461_v46 = vld [vmem:[#allocation5 + $0x180] sm:$0xff]  ;;  %1267 = vmatpush1.msra.mxu0 %v473_v42 }
  0xac   : > { %v846_v45 = vld [vmem:[#allocation5 + $0xd88] sm:$0xff]  ;;  %v845_v47 = vld [vmem:[#allocation5 + $0xd80] sm:$0xff]  ;;  %1344 = vmatpush1.msra.mxu1 %v857_v43  ;;  %1268 = vmatprep.subr.mxu0 %v462_v44 }
  0xad   : > { %v450_v48 = vld [vmem:[#allocation5 + $0x128] sm:$0xff]  ;;  %1345 = vmatprep.subr.mxu1 %v846_v45  ;;  %v449_v50 = vld [vmem:[#allocation5 + $0x120] sm:$0xff]  ;;  %1269 = vmatpush1.msra.mxu0 %v461_v46 }
  0xae   : > { %v834_v49 = vld [vmem:[#allocation5 + $0xd28] sm:$0xff]  ;;  %v833_v51 = vld [vmem:[#allocation5 + $0xd20] sm:$0xff]  ;;  %1346 = vmatpush1.msra.mxu1 %v845_v47  ;;  %1270 = vmatprep.subr.mxu0 %v450_v48 }
  0xaf   : > { %v438_v52 = vld [vmem:[#allocation5 + $0xc8] sm:$0xff]  ;;  %1347 = vmatprep.subr.mxu1 %v834_v49  ;;  %v437_v54 = vld [vmem:[#allocation5 + $0xc0] sm:$0xff]  ;;  %1271 = vmatpush1.msra.mxu0 %v449_v50 }
  0xb0   : > { %v822_v53 = vld [vmem:[#allocation5 + $0xcc8] sm:$0xff]  ;;  %v821_v55 = vld [vmem:[#allocation5 + $0xcc0] sm:$0xff]  ;;  %1348 = vmatpush1.msra.mxu1 %v833_v51  ;;  %1272 = vmatprep.subr.mxu0 %v438_v52 }
  0xb1   : > { %v426_v56 = vld [vmem:[#allocation5 + $0x68] sm:$0xff]  ;;  %1349 = vmatprep.subr.mxu1 %v822_v53  ;;  %v425_v58 = vld [vmem:[#allocation5 + $0x60] sm:$0xff]  ;;  %1273 = vmatpush1.msra.mxu0 %v437_v54 }
  0xb2   : > { %v810_v57 = vld [vmem:[#allocation5 + $0xc68] sm:$0xff]  ;;  %v809_v59 = vld [vmem:[#allocation5 + $0xc60] sm:$0xff]  ;;  %1350 = vmatpush1.msra.mxu1 %v821_v55  ;;  %1274 = vmatprep.subr.mxu0 %v426_v56 }
  0xb3   : > { %v414_v60 = vld [vmem:[#allocation5 + $0x8] sm:$0xff]  ;;  %1351 = vmatprep.subr.mxu1 %v810_v57  ;;  %v413_v62 = vld [vmem:[#allocation5] sm:$0xff]  ;;  %1275 = vmatpush1.msra.mxu0 %v425_v58 }
  0xb4   : > { %v798_v61 = vld [vmem:[#allocation5 + $0xc08] sm:$0xff]  ;;  %v797_v63 = vld [vmem:[#allocation5 + $0xc00] sm:$0xff]  ;;  %1352 = vmatpush1.msra.mxu1 %v809_v59  ;;  %1276 = vmatprep.subr.mxu0 %v414_v60 }
  0xb5   : > { %v786_v0 = vld [vmem:[#allocation5 + $0xba8] sm:$0xff]  ;;  %1353 = vmatprep.subr.mxu1 %v798_v61  ;;  %v785_v2 = vld [vmem:[#allocation5 + $0xba0] sm:$0xff]  ;;  %1277 = vmatpush1.msra.mxu0 %v413_v62 }
  0xb6   : > { %v1170_v1 = vld [vmem:[#allocation5 + $0x17a8] sm:$0xff]  ;;  %v1169_v3 = vld [vmem:[#allocation5 + $0x17a0] sm:$0xff]  ;;  %1354 = vmatpush1.msra.mxu1 %v797_v63  ;;  %1278 = vmatprep.subr.mxu0 %v786_v0 }
  0xb7   : > { %v774_v4 = vld [vmem:[#allocation5 + $0xb48] sm:$0xff]  ;;  %1355 = vmatprep.subr.mxu1 %v1170_v1  ;;  %v773_v6 = vld [vmem:[#allocation5 + $0xb40] sm:$0xff]  ;;  %1279 = vmatpush2.msra.mxu0 %v785_v2  ;;  %v7741_v2 = vld [vmem:[%s7716_s10 + $0x18] sm:$0xff] }
  0xb8   : > { %v1158_v5 = vld [vmem:[#allocation5 + $0x1748] sm:$0xff]  ;;  %v1157_v7 = vld [vmem:[#allocation5 + $0x1740] sm:$0xff]  ;;  %1356 = vmatpush2.msra.mxu1 %v1169_v3  ;;  %1280 = vmatprep.subr.mxu0 %v774_v4  ;;  %v596_v3 = vld [vmem:[#allocation5 + $0x5b8] sm:$0xff] }
  0xb9   : > { %v762_v8 = vld [vmem:[#allocation5 + $0xae8] sm:$0xff]  ;;  %1357 = vmatprep.subr.mxu1 %v1158_v5  ;;  %v761_v10 = vld [vmem:[#allocation5 + $0xae0] sm:$0xff]  ;;  %1281 = vmatpush2.msra.mxu0 %v773_v6  ;;  %v980_v4 = vld [vmem:[#allocation5 + $0x11b8] sm:$0xff] }
  0xba   : > { %v1146_v9 = vld [vmem:[#allocation5 + $0x16e8] sm:$0xff]  ;;  %v1145_v11 = vld [vmem:[#allocation5 + $0x16e0] sm:$0xff]  ;;  %1358 = vmatpush2.msra.mxu1 %v1157_v7  ;;  %1282 = vmatprep.subr.mxu0 %v762_v8  ;;  %v7745_v5 = vld [vmem:[%s7716_s10 + $0x10] sm:$0xff] }
  0xbb   : > { %v750_v12 = vld [vmem:[#allocation5 + $0xa88] sm:$0xff]  ;;  %1359 = vmatprep.subr.mxu1 %v1146_v9  ;;  %v749_v14 = vld [vmem:[#allocation5 + $0xa80] sm:$0xff]  ;;  %1283 = vmatpush2.msra.mxu0 %v761_v10  ;;  %v595_v6 = vld [vmem:[#allocation5 + $0x5b0] sm:$0xff] }
  0xbc   : > { %v1134_v13 = vld [vmem:[#allocation5 + $0x1688] sm:$0xff]  ;;  %v1133_v15 = vld [vmem:[#allocation5 + $0x1680] sm:$0xff]  ;;  %1360 = vmatpush2.msra.mxu1 %v1145_v11  ;;  %1284 = vmatprep.subr.mxu0 %v750_v12  ;;  %v979_v7 = vld [vmem:[#allocation5 + $0x11b0] sm:$0xff] }
  0xbd   : > { %v738_v16 = vld [vmem:[#allocation5 + $0xa28] sm:$0xff]  ;;  %1361 = vmatprep.subr.mxu1 %v1134_v13  ;;  %v737_v18 = vld [vmem:[#allocation5 + $0xa20] sm:$0xff]  ;;  %1285 = vmatpush2.msra.mxu0 %v749_v14  ;;  %v584_v8 = vld [vmem:[#allocation5 + $0x558] sm:$0xff] }
  0xbe   : > { %v1122_v17 = vld [vmem:[#allocation5 + $0x1628] sm:$0xff]  ;;  %v1121_v19 = vld [vmem:[#allocation5 + $0x1620] sm:$0xff]  ;;  %1362 = vmatpush2.msra.mxu1 %v1133_v15  ;;  %1286 = vmatprep.subr.mxu0 %v738_v16  ;;  %v968_v9 = vld [vmem:[#allocation5 + $0x1158] sm:$0xff] }
  0xbf   : > { %v726_v20 = vld [vmem:[#allocation5 + $0x9c8] sm:$0xff]  ;;  %1363 = vmatprep.subr.mxu1 %v1122_v17  ;;  %v725_v22 = vld [vmem:[#allocation5 + $0x9c0] sm:$0xff]  ;;  %1287 = vmatpush2.msra.mxu0 %v737_v18  ;;  %v583_v10 = vld [vmem:[#allocation5 + $0x550] sm:$0xff] }
  0xc0   : > { %v1110_v21 = vld [vmem:[#allocation5 + $0x15c8] sm:$0xff]  ;;  %v1109_v23 = vld [vmem:[#allocation5 + $0x15c0] sm:$0xff]  ;;  %1364 = vmatpush2.msra.mxu1 %v1121_v19  ;;  %1288 = vmatprep.subr.mxu0 %v726_v20  ;;  %v967_v11 = vld [vmem:[#allocation5 + $0x1150] sm:$0xff] }
  0xc1   : > { %v714_v24 = vld [vmem:[#allocation5 + $0x968] sm:$0xff]  ;;  %1365 = vmatprep.subr.mxu1 %v1110_v21  ;;  %v713_v26 = vld [vmem:[#allocation5 + $0x960] sm:$0xff]  ;;  %1289 = vmatpush2.msra.mxu0 %v725_v22  ;;  %v572_v12 = vld [vmem:[#allocation5 + $0x4f8] sm:$0xff] }
  0xc2   : > { %v1098_v25 = vld [vmem:[#allocation5 + $0x1568] sm:$0xff]  ;;  %v1097_v27 = vld [vmem:[#allocation5 + $0x1560] sm:$0xff]  ;;  %1366 = vmatpush2.msra.mxu1 %v1109_v23  ;;  %1290 = vmatprep.subr.mxu0 %v714_v24  ;;  %v956_v13 = vld [vmem:[#allocation5 + $0x10f8] sm:$0xff] }
  0xc3   : > { %v702_v28 = vld [vmem:[#allocation5 + $0x908] sm:$0xff]  ;;  %1367 = vmatprep.subr.mxu1 %v1098_v25  ;;  %v701_v30 = vld [vmem:[#allocation5 + $0x900] sm:$0xff]  ;;  %1291 = vmatpush2.msra.mxu0 %v713_v26  ;;  %v571_v14 = vld [vmem:[#allocation5 + $0x4f0] sm:$0xff] }
  0xc4   : > { %v1086_v29 = vld [vmem:[#allocation5 + $0x1508] sm:$0xff]  ;;  %v1085_v31 = vld [vmem:[#allocation5 + $0x1500] sm:$0xff]  ;;  %1368 = vmatpush2.msra.mxu1 %v1097_v27  ;;  %1292 = vmatprep.subr.mxu0 %v702_v28  ;;  %v955_v15 = vld [vmem:[#allocation5 + $0x10f0] sm:$0xff] }
  0xc5   : > { %v690_v32 = vld [vmem:[#allocation5 + $0x8a8] sm:$0xff]  ;;  %1369 = vmatprep.subr.mxu1 %v1086_v29  ;;  %v689_v34 = vld [vmem:[#allocation5 + $0x8a0] sm:$0xff]  ;;  %1293 = vmatpush2.msra.mxu0 %v701_v30  ;;  %v560_v16 = vld [vmem:[#allocation5 + $0x498] sm:$0xff] }
  0xc6   : > { %v1074_v33 = vld [vmem:[#allocation5 + $0x14a8] sm:$0xff]  ;;  %v1073_v35 = vld [vmem:[#allocation5 + $0x14a0] sm:$0xff]  ;;  %1370 = vmatpush2.msra.mxu1 %v1085_v31  ;;  %1294 = vmatprep.subr.mxu0 %v690_v32  ;;  %v944_v17 = vld [vmem:[#allocation5 + $0x1098] sm:$0xff] }
  0xc7   : > { %v678_v36 = vld [vmem:[#allocation5 + $0x848] sm:$0xff]  ;;  %1371 = vmatprep.subr.mxu1 %v1074_v33  ;;  %v677_v38 = vld [vmem:[#allocation5 + $0x840] sm:$0xff]  ;;  %1295 = vmatpush2.msra.mxu0 %v689_v34  ;;  %v559_v18 = vld [vmem:[#allocation5 + $0x490] sm:$0xff] }
  0xc8   : > { %v1062_v37 = vld [vmem:[#allocation5 + $0x1448] sm:$0xff]  ;;  %v1061_v39 = vld [vmem:[#allocation5 + $0x1440] sm:$0xff]  ;;  %1372 = vmatpush2.msra.mxu1 %v1073_v35  ;;  %1296 = vmatprep.subr.mxu0 %v678_v36  ;;  %v943_v19 = vld [vmem:[#allocation5 + $0x1090] sm:$0xff] }
  0xc9   : > { %v666_v40 = vld [vmem:[#allocation5 + $0x7e8] sm:$0xff]  ;;  %1373 = vmatprep.subr.mxu1 %v1062_v37  ;;  %v665_v42 = vld [vmem:[#allocation5 + $0x7e0] sm:$0xff]  ;;  %1297 = vmatpush2.msra.mxu0 %v677_v38  ;;  %v548_v20 = vld [vmem:[#allocation5 + $0x438] sm:$0xff] }
  0xca   : > { %v1050_v41 = vld [vmem:[#allocation5 + $0x13e8] sm:$0xff]  ;;  %v1049_v43 = vld [vmem:[#allocation5 + $0x13e0] sm:$0xff]  ;;  %1374 = vmatpush2.msra.mxu1 %v1061_v39  ;;  %1298 = vmatprep.subr.mxu0 %v666_v40  ;;  %v932_v21 = vld [vmem:[#allocation5 + $0x1038] sm:$0xff] }
  0xcb   : > { %v654_v44 = vld [vmem:[#allocation5 + $0x788] sm:$0xff]  ;;  %1375 = vmatprep.subr.mxu1 %v1050_v41  ;;  %v653_v46 = vld [vmem:[#allocation5 + $0x780] sm:$0xff]  ;;  %1299 = vmatpush2.msra.mxu0 %v665_v42  ;;  %v547_v22 = vld [vmem:[#allocation5 + $0x430] sm:$0xff] }
  0xcc   : > { %v1038_v45 = vld [vmem:[#allocation5 + $0x1388] sm:$0xff]  ;;  %v1037_v47 = vld [vmem:[#allocation5 + $0x1380] sm:$0xff]  ;;  %1376 = vmatpush2.msra.mxu1 %v1049_v43  ;;  %1300 = vmatprep.subr.mxu0 %v654_v44  ;;  %v931_v23 = vld [vmem:[#allocation5 + $0x1030] sm:$0xff] }
  0xcd   : > { %v642_v48 = vld [vmem:[#allocation5 + $0x728] sm:$0xff]  ;;  %1377 = vmatprep.subr.mxu1 %v1038_v45  ;;  %v641_v50 = vld [vmem:[#allocation5 + $0x720] sm:$0xff]  ;;  %1301 = vmatpush2.msra.mxu0 %v653_v46  ;;  %v536_v24 = vld [vmem:[#allocation5 + $0x3d8] sm:$0xff] }
  0xce   : > { %v1026_v49 = vld [vmem:[#allocation5 + $0x1328] sm:$0xff]  ;;  %v1025_v51 = vld [vmem:[#allocation5 + $0x1320] sm:$0xff]  ;;  %1378 = vmatpush2.msra.mxu1 %v1037_v47  ;;  %1302 = vmatprep.subr.mxu0 %v642_v48  ;;  %v920_v25 = vld [vmem:[#allocation5 + $0xfd8] sm:$0xff] }
  0xcf   : > { %v630_v52 = vld [vmem:[#allocation5 + $0x6c8] sm:$0xff]  ;;  %1379 = vmatprep.subr.mxu1 %v1026_v49  ;;  %v629_v54 = vld [vmem:[#allocation5 + $0x6c0] sm:$0xff]  ;;  %1303 = vmatpush2.msra.mxu0 %v641_v50  ;;  %v535_v26 = vld [vmem:[#allocation5 + $0x3d0] sm:$0xff] }
  0xd0   : > { %v1014_v53 = vld [vmem:[#allocation5 + $0x12c8] sm:$0xff]  ;;  %v1013_v55 = vld [vmem:[#allocation5 + $0x12c0] sm:$0xff]  ;;  %1380 = vmatpush2.msra.mxu1 %v1025_v51  ;;  %1304 = vmatprep.subr.mxu0 %v630_v52  ;;  %v919_v27 = vld [vmem:[#allocation5 + $0xfd0] sm:$0xff] }
  0xd1   : > { %v618_v56 = vld [vmem:[#allocation5 + $0x668] sm:$0xff]  ;;  %1381 = vmatprep.subr.mxu1 %v1014_v53  ;;  %v617_v58 = vld [vmem:[#allocation5 + $0x660] sm:$0xff]  ;;  %1305 = vmatpush2.msra.mxu0 %v629_v54  ;;  %v524_v28 = vld [vmem:[#allocation5 + $0x378] sm:$0xff] }
  0xd2   : > { %v1002_v57 = vld [vmem:[#allocation5 + $0x1268] sm:$0xff]  ;;  %v1001_v59 = vld [vmem:[#allocation5 + $0x1260] sm:$0xff]  ;;  %1382 = vmatpush2.msra.mxu1 %v1013_v55  ;;  %1306 = vmatprep.subr.mxu0 %v618_v56  ;;  %v908_v29 = vld [vmem:[#allocation5 + $0xf78] sm:$0xff] }
  0xd3   : > { %v606_v60 = vld [vmem:[#allocation5 + $0x608] sm:$0xff]  ;;  %1383 = vmatprep.subr.mxu1 %v1002_v57  ;;  %v605_v62 = vld [vmem:[#allocation5 + $0x600] sm:$0xff]  ;;  %1307 = vmatpush2.msra.mxu0 %v617_v58  ;;  %v523_v30 = vld [vmem:[#allocation5 + $0x370] sm:$0xff] }
  0xd4   : > { %v990_v61 = vld [vmem:[#allocation5 + $0x1208] sm:$0xff]  ;;  %1384 = vmatpush2.msra.mxu1 %v1001_v59  ;;  %v989_v0 = vld [vmem:[#allocation5 + $0x1200] sm:$0xff]  ;;  %1308 = vmatprep.subr.mxu0 %v606_v60  ;;  %v907_v31 = vld [vmem:[#allocation5 + $0xf70] sm:$0xff] }
  0xd5   : > { %v7735_v63 = vld [vmem:[%s7716_s10 + $0x8] sm:$0xff]  ;;  %v7738_v1 = vld [vmem:[%s7716_s10] sm:$0xff]  ;;  %1385 = vmatprep.subr.mxu1 %v990_v61  ;;  %1309 = vmatpush2.msra.mxu0 %v605_v62  ;;  %v512_v32 = vld [vmem:[#allocation5 + $0x318] sm:$0xff] }
  0xd6   : > { %1310 = vmatprep.mubr.f32.mxu0 %v7735_v63  ;;  %1386 = vmatpush2.msra.mxu1 %v989_v0  ;;  %v896_v33 = vld [vmem:[#allocation5 + $0xf18] sm:$0xff]  ;;  %v511_v34 = vld [vmem:[#allocation5 + $0x310] sm:$0xff] }
  0xd7   : > { %1311 = vmatmul.mubr.f32.vlgmr.msra.gmra.mxu0 %v7738_v1  ;;  %1387 = vmatprep.mubr.f32.mxu1 %v7741_v2  ;;  %v895_v35 = vld [vmem:[#allocation5 + $0xf10] sm:$0xff]  ;;  %v500_v36 = vld [vmem:[#allocation5 + $0x2b8] sm:$0xff] }
  0xd8   : > { %1400 = vmatprep.subr.mxu0 %v596_v3  ;;  %1477 = vmatprep.subr.mxu1 %v980_v4  ;;  %v884_v37 = vld [vmem:[#allocation5 + $0xeb8] sm:$0xff]  ;;  %v499_v38 = vld [vmem:[#allocation5 + $0x2b0] sm:$0xff] }
  0xd9   : > { %1388 = vmatmul.mubr.f32.vlgmr.msra.gmra.mxu1 %v7745_v5  ;;  %1401 = vmatpush1.msra.mxu0 %v595_v6  ;;  %v883_v39 = vld [vmem:[#allocation5 + $0xeb0] sm:$0xff]  ;;  %v488_v40 = vld [vmem:[#allocation5 + $0x258] sm:$0xff] }
  0xda   : > { %1478 = vmatpush1.msra.mxu1 %v979_v7  ;;  %1402 = vmatprep.subr.mxu0 %v584_v8  ;;  %v872_v41 = vld [vmem:[#allocation5 + $0xe58] sm:$0xff]  ;;  %v487_v42 = vld [vmem:[#allocation5 + $0x250] sm:$0xff] }
  0xdb   : > { %1479 = vmatprep.subr.mxu1 %v968_v9  ;;  %1403 = vmatpush1.msra.mxu0 %v583_v10  ;;  %v871_v43 = vld [vmem:[#allocation5 + $0xe50] sm:$0xff]  ;;  %v476_v44 = vld [vmem:[#allocation5 + $0x1f8] sm:$0xff] }
  0xdc   : > { %1480 = vmatpush1.msra.mxu1 %v967_v11  ;;  %1404 = vmatprep.subr.mxu0 %v572_v12  ;;  %v860_v45 = vld [vmem:[#allocation5 + $0xdf8] sm:$0xff]  ;;  %v475_v46 = vld [vmem:[#allocation5 + $0x1f0] sm:$0xff] }
  0xdd   : > { %1481 = vmatprep.subr.mxu1 %v956_v13  ;;  %1405 = vmatpush1.msra.mxu0 %v571_v14  ;;  %v859_v47 = vld [vmem:[#allocation5 + $0xdf0] sm:$0xff]  ;;  %v464_v48 = vld [vmem:[#allocation5 + $0x198] sm:$0xff] }
  0xde   : > { %1482 = vmatpush1.msra.mxu1 %v955_v15  ;;  %1406 = vmatprep.subr.mxu0 %v560_v16  ;;  %v848_v49 = vld [vmem:[#allocation5 + $0xd98] sm:$0xff]  ;;  %v463_v50 = vld [vmem:[#allocation5 + $0x190] sm:$0xff] }
  0xdf   : > { %1483 = vmatprep.subr.mxu1 %v944_v17  ;;  %1407 = vmatpush1.msra.mxu0 %v559_v18  ;;  %v847_v51 = vld [vmem:[#allocation5 + $0xd90] sm:$0xff]  ;;  %v452_v52 = vld [vmem:[#allocation5 + $0x138] sm:$0xff] }
  0xe0   : > { %1484 = vmatpush1.msra.mxu1 %v943_v19  ;;  %1408 = vmatprep.subr.mxu0 %v548_v20  ;;  %v836_v53 = vld [vmem:[#allocation5 + $0xd38] sm:$0xff]  ;;  %v451_v54 = vld [vmem:[#allocation5 + $0x130] sm:$0xff] }
  0xe1   : > { %1485 = vmatprep.subr.mxu1 %v932_v21  ;;  %1409 = vmatpush1.msra.mxu0 %v547_v22  ;;  %v835_v55 = vld [vmem:[#allocation5 + $0xd30] sm:$0xff]  ;;  %v440_v56 = vld [vmem:[#allocation5 + $0xd8] sm:$0xff] }
  0xe2   : > { %1486 = vmatpush1.msra.mxu1 %v931_v23  ;;  %1410 = vmatprep.subr.mxu0 %v536_v24  ;;  %v824_v57 = vld [vmem:[#allocation5 + $0xcd8] sm:$0xff]  ;;  %v439_v58 = vld [vmem:[#allocation5 + $0xd0] sm:$0xff] }
  0xe3   : > { %1487 = vmatprep.subr.mxu1 %v920_v25  ;;  %1411 = vmatpush1.msra.mxu0 %v535_v26  ;;  %v823_v59 = vld [vmem:[#allocation5 + $0xcd0] sm:$0xff]  ;;  %v428_v60 = vld [vmem:[#allocation5 + $0x78] sm:$0xff] }
  0xe4   : > { %1488 = vmatpush1.msra.mxu1 %v919_v27  ;;  %1412 = vmatprep.subr.mxu0 %v524_v28  ;;  %v812_v61 = vld [vmem:[#allocation5 + $0xc78] sm:$0xff]  ;;  %v427_v62 = vld [vmem:[#allocation5 + $0x70] sm:$0xff] }
  0xe5   : > { %1489 = vmatprep.subr.mxu1 %v908_v29  ;;  %1413 = vmatpush1.msra.mxu0 %v523_v30  ;;  %v811_v0 = vld [vmem:[#allocation5 + $0xc70] sm:$0xff]  ;;  %v416_v3 = vld [vmem:[#allocation5 + $0x18] sm:$0xff] }
  0xe6   : > { %1490 = vmatpush1.msra.mxu1 %v907_v31  ;;  %1414 = vmatprep.subr.mxu0 %v512_v32  ;;  %v800_v4 = vld [vmem:[#allocation5 + $0xc18] sm:$0xff]  ;;  %v415_v6 = vld [vmem:[#allocation5 + $0x10] sm:$0xff] }
  0xe7   : > { %1491 = vmatprep.subr.mxu1 %v896_v33  ;;  %1415 = vmatpush1.msra.mxu0 %v511_v34  ;;  %v799_v7 = vld [vmem:[#allocation5 + $0xc10] sm:$0xff]  ;;  %v788_v8 = vld [vmem:[#allocation5 + $0xbb8] sm:$0xff] }
  0xe8   : > { %1492 = vmatpush1.msra.mxu1 %v895_v35  ;;  %1416 = vmatprep.subr.mxu0 %v500_v36  ;;  %v1172_v9 = vld [vmem:[#allocation5 + $0x17b8] sm:$0xff]  ;;  %v787_v10 = vld [vmem:[#allocation5 + $0xbb0] sm:$0xff] }
  0xe9   : > { %1493 = vmatprep.subr.mxu1 %v884_v37  ;;  %1417 = vmatpush1.msra.mxu0 %v499_v38  ;;  %v1171_v11 = vld [vmem:[#allocation5 + $0x17b0] sm:$0xff]  ;;  %v776_v12 = vld [vmem:[#allocation5 + $0xb58] sm:$0xff] }
  0xea   : > { %1494 = vmatpush1.msra.mxu1 %v883_v39  ;;  %1418 = vmatprep.subr.mxu0 %v488_v40  ;;  %v1160_v13 = vld [vmem:[#allocation5 + $0x1758] sm:$0xff]  ;;  %v775_v14 = vld [vmem:[#allocation5 + $0xb50] sm:$0xff] }
  0xeb   : > { %1495 = vmatprep.subr.mxu1 %v872_v41  ;;  %1419 = vmatpush1.msra.mxu0 %v487_v42  ;;  %v1159_v15 = vld [vmem:[#allocation5 + $0x1750] sm:$0xff]  ;;  %v764_v16 = vld [vmem:[#allocation5 + $0xaf8] sm:$0xff] }
  0xec   : > { %1496 = vmatpush1.msra.mxu1 %v871_v43  ;;  %1420 = vmatprep.subr.mxu0 %v476_v44  ;;  %v1148_v17 = vld [vmem:[#allocation5 + $0x16f8] sm:$0xff]  ;;  %v763_v18 = vld [vmem:[#allocation5 + $0xaf0] sm:$0xff] }
  0xed   : > { %1497 = vmatprep.subr.mxu1 %v860_v45  ;;  %1421 = vmatpush1.msra.mxu0 %v475_v46  ;;  %v1147_v19 = vld [vmem:[#allocation5 + $0x16f0] sm:$0xff]  ;;  %v752_v20 = vld [vmem:[#allocation5 + $0xa98] sm:$0xff] }
  0xee   : > { %1498 = vmatpush1.msra.mxu1 %v859_v47  ;;  %1422 = vmatprep.subr.mxu0 %v464_v48  ;;  %v1136_v21 = vld [vmem:[#allocation5 + $0x1698] sm:$0xff]  ;;  %v751_v22 = vld [vmem:[#allocation5 + $0xa90] sm:$0xff] }
  0xef   : > { %1499 = vmatprep.subr.mxu1 %v848_v49  ;;  %1423 = vmatpush1.msra.mxu0 %v463_v50  ;;  %v1135_v23 = vld [vmem:[#allocation5 + $0x1690] sm:$0xff]  ;;  %v740_v24 = vld [vmem:[#allocation5 + $0xa38] sm:$0xff] }
  0xf0   : > { %1500 = vmatpush1.msra.mxu1 %v847_v51  ;;  %1424 = vmatprep.subr.mxu0 %v452_v52  ;;  %v1124_v25 = vld [vmem:[#allocation5 + $0x1638] sm:$0xff]  ;;  %v739_v26 = vld [vmem:[#allocation5 + $0xa30] sm:$0xff] }
  0xf1   : > { %1501 = vmatprep.subr.mxu1 %v836_v53  ;;  %1425 = vmatpush1.msra.mxu0 %v451_v54  ;;  %v1123_v27 = vld [vmem:[#allocation5 + $0x1630] sm:$0xff]  ;;  %v728_v28 = vld [vmem:[#allocation5 + $0x9d8] sm:$0xff] }
  0xf2   : > { %1502 = vmatpush1.msra.mxu1 %v835_v55  ;;  %1426 = vmatprep.subr.mxu0 %v440_v56  ;;  %v1112_v29 = vld [vmem:[#allocation5 + $0x15d8] sm:$0xff]  ;;  %v727_v30 = vld [vmem:[#allocation5 + $0x9d0] sm:$0xff]  ;;  %v7751_v56 = vld [vmem:[%s7716_s10 + $0x28] sm:$0xff] }
  0xf3   : > { %1503 = vmatprep.subr.mxu1 %v824_v57  ;;  %1427 = vmatpush1.msra.mxu0 %v439_v58  ;;  %v1111_v31 = vld [vmem:[#allocation5 + $0x15d0] sm:$0xff]  ;;  %v716_v32 = vld [vmem:[#allocation5 + $0x978] sm:$0xff] }
  0xf4   : > { %1504 = vmatpush1.msra.mxu1 %v823_v59  ;;  %1428 = vmatprep.subr.mxu0 %v428_v60  ;;  %v1100_v33 = vld [vmem:[#allocation5 + $0x1578] sm:$0xff]  ;;  %v715_v34 = vld [vmem:[#allocation5 + $0x970] sm:$0xff]  ;;  %v7754_v59 = vld [vmem:[%s7716_s10 + $0x20] sm:$0xff] }
  0xf5   : > { %1505 = vmatprep.subr.mxu1 %v812_v61  ;;  %1429 = vmatpush1.msra.mxu0 %v427_v62  ;;  %v1099_v35 = vld [vmem:[#allocation5 + $0x1570] sm:$0xff]  ;;  %v704_v36 = vld [vmem:[#allocation5 + $0x918] sm:$0xff] }
  0xf6   : > { %1506 = vmatpush1.msra.mxu1 %v811_v0  ;;  %1430 = vmatprep.subr.mxu0 %v416_v3  ;;  %v1088_v37 = vld [vmem:[#allocation5 + $0x1518] sm:$0xff]  ;;  %v703_v38 = vld [vmem:[#allocation5 + $0x910] sm:$0xff] }
  0xf7   : > { %1507 = vmatprep.subr.mxu1 %v800_v4  ;;  %1431 = vmatpush1.msra.mxu0 %v415_v6  ;;  %v1087_v39 = vld [vmem:[#allocation5 + $0x1510] sm:$0xff]  ;;  %v692_v40 = vld [vmem:[#allocation5 + $0x8b8] sm:$0xff] }
  0xf8   : > { %1508 = vmatpush1.msra.mxu1 %v799_v7  ;;  %1432 = vmatprep.subr.mxu0 %v788_v8  ;;  %v1076_v41 = vld [vmem:[#allocation5 + $0x14b8] sm:$0xff]  ;;  %v691_v42 = vld [vmem:[#allocation5 + $0x8b0] sm:$0xff] }
  0xf9   : > { %1509 = vmatprep.subr.mxu1 %v1172_v9  ;;  %1433 = vmatpush2.msra.mxu0 %v787_v10  ;;  %v1075_v43 = vld [vmem:[#allocation5 + $0x14b0] sm:$0xff]  ;;  %v680_v44 = vld [vmem:[#allocation5 + $0x858] sm:$0xff] }
  0xfa   : > { %1510 = vmatpush2.msra.mxu1 %v1171_v11  ;;  %1434 = vmatprep.subr.mxu0 %v776_v12  ;;  %v1064_v45 = vld [vmem:[#allocation5 + $0x1458] sm:$0xff]  ;;  %v679_v46 = vld [vmem:[#allocation5 + $0x850] sm:$0xff] }
  0xfb   : > { %1511 = vmatprep.subr.mxu1 %v1160_v13  ;;  %1435 = vmatpush2.msra.mxu0 %v775_v14  ;;  %v1063_v47 = vld [vmem:[#allocation5 + $0x1450] sm:$0xff]  ;;  %v668_v48 = vld [vmem:[#allocation5 + $0x7f8] sm:$0xff] }
  0xfc   : > { %1512 = vmatpush2.msra.mxu1 %v1159_v15  ;;  %1436 = vmatprep.subr.mxu0 %v764_v16  ;;  %v1052_v49 = vld [vmem:[#allocation5 + $0x13f8] sm:$0xff]  ;;  %v667_v50 = vld [vmem:[#allocation5 + $0x7f0] sm:$0xff]  ;;  %v598_v16 = vld [vmem:[#allocation5 + $0x5c8] sm:$0xff] }
  0xfd   : > { %1513 = vmatprep.subr.mxu1 %v1148_v17  ;;  %1437 = vmatpush2.msra.mxu0 %v763_v18  ;;  %v1051_v51 = vld [vmem:[#allocation5 + $0x13f0] sm:$0xff]  ;;  %v656_v52 = vld [vmem:[#allocation5 + $0x798] sm:$0xff]  ;;  %v982_v17 = vld [vmem:[#allocation5 + $0x11c8] sm:$0xff] }
  0xfe   : > { %1514 = vmatpush2.msra.mxu1 %v1147_v19  ;;  %1438 = vmatprep.subr.mxu0 %v752_v20  ;;  %v1040_v53 = vld [vmem:[#allocation5 + $0x1398] sm:$0xff]  ;;  %v655_v54 = vld [vmem:[#allocation5 + $0x790] sm:$0xff]  ;;  %v597_v18 = vld [vmem:[#allocation5 + $0x5c0] sm:$0xff] }
  0xff   : > { %1515 = vmatprep.subr.mxu1 %v1136_v21  ;;  %1439 = vmatpush2.msra.mxu0 %v751_v22  ;;  %v1039_v55 = vld [vmem:[#allocation5 + $0x1390] sm:$0xff]  ;;  %v644_v57 = vld [vmem:[#allocation5 + $0x738] sm:$0xff]  ;;  %v981_v19 = vld [vmem:[#allocation5 + $0x11c0] sm:$0xff] }
 0x100   : > { %1516 = vmatpush2.msra.mxu1 %v1135_v23  ;;  %1440 = vmatprep.subr.mxu0 %v740_v24  ;;  %v1028_v58 = vld [vmem:[#allocation5 + $0x1338] sm:$0xff]  ;;  %v643_v60 = vld [vmem:[#allocation5 + $0x730] sm:$0xff]  ;;  %v586_v20 = vld [vmem:[#allocation5 + $0x568] sm:$0xff] }
 0x101   : > { %1517 = vmatprep.subr.mxu1 %v1124_v25  ;;  %1441 = vmatpush2.msra.mxu0 %v739_v26  ;;  %v1027_v61 = vld [vmem:[#allocation5 + $0x1330] sm:$0xff]  ;;  %v7758_v62 = vld [vmem:[%s7716_s10 + $0x38] sm:$0xff]  ;;  %v970_v21 = vld [vmem:[#allocation5 + $0x1168] sm:$0xff] }
 0x102   : > { %1518 = vmatpush2.msra.mxu1 %v1123_v27  ;;  %1442 = vmatprep.subr.mxu0 %v728_v28  ;;  %v632_v0 = vld [vmem:[#allocation5 + $0x6d8] sm:$0xff]  ;;  %v7762_v4 = vld [vmem:[%s7716_s10 + $0x30] sm:$0xff]  ;;  %v585_v22 = vld [vmem:[#allocation5 + $0x560] sm:$0xff] }
 0x103   : > { %1519 = vmatprep.subr.mxu1 %v1112_v29  ;;  %1443 = vmatpush2.msra.mxu0 %v727_v30  ;;  %v1016_v3 = vld [vmem:[#allocation5 + $0x12d8] sm:$0xff]  ;;  %v631_v6 = vld [vmem:[#allocation5 + $0x6d0] sm:$0xff]  ;;  %v969_v23 = vld [vmem:[#allocation5 + $0x1160] sm:$0xff] }
 0x104   : > { %1520 = vmatpush2.msra.mxu1 %v1111_v31  ;;  %1444 = vmatprep.subr.mxu0 %v716_v32  ;;  %v1015_v7 = vld [vmem:[#allocation5 + $0x12d0] sm:$0xff]  ;;  %v620_v8 = vld [vmem:[#allocation5 + $0x678] sm:$0xff]  ;;  %v574_v24 = vld [vmem:[#allocation5 + $0x508] sm:$0xff] }
 0x105   : > { %1521 = vmatprep.subr.mxu1 %v1100_v33  ;;  %1445 = vmatpush2.msra.mxu0 %v715_v34  ;;  %v1004_v9 = vld [vmem:[#allocation5 + $0x1278] sm:$0xff]  ;;  %v619_v10 = vld [vmem:[#allocation5 + $0x670] sm:$0xff]  ;;  %v573_v25 = vld [vmem:[#allocation5 + $0x500] sm:$0xff] }
 0x106   : > { %1522 = vmatpush2.msra.mxu1 %v1099_v35  ;;  %1446 = vmatprep.subr.mxu0 %v704_v36  ;;  %v1003_v11 = vld [vmem:[#allocation5 + $0x1270] sm:$0xff]  ;;  %v608_v12 = vld [vmem:[#allocation5 + $0x618] sm:$0xff]  ;;  %v562_v26 = vld [vmem:[#allocation5 + $0x4a8] sm:$0xff] }
 0x107   : > { %1523 = vmatprep.subr.mxu1 %v1088_v37  ;;  %1447 = vmatpush2.msra.mxu0 %v703_v38  ;;  %v992_v13 = vld [vmem:[#allocation5 + $0x1218] sm:$0xff]  ;;  %v607_v14 = vld [vmem:[#allocation5 + $0x610] sm:$0xff]  ;;  %v561_v27 = vld [vmem:[#allocation5 + $0x4a0] sm:$0xff] }
 0x108   : > { %1524 = vmatpush2.msra.mxu1 %v1087_v39  ;;  %1448 = vmatprep.subr.mxu0 %v692_v40  ;;  %v991_v15 = vld [vmem:[#allocation5 + $0x1210] sm:$0xff]  ;;  %v945_v28 = vld [vmem:[#allocation5 + $0x10a0] sm:$0xff]  ;;  %v934_v29 = vld [vmem:[#allocation5 + $0x1048] sm:$0xff] }
 0x109   : > { %1525 = vmatprep.subr.mxu1 %v1076_v41  ;;  %1449 = vmatpush2.msra.mxu0 %v691_v42  ;;  %v549_v30 = vld [vmem:[#allocation5 + $0x440] sm:$0xff]  ;;  %v538_v32 = vld [vmem:[#allocation5 + $0x3e8] sm:$0xff] }
 0x10a   : > { %1526 = vmatpush2.msra.mxu1 %v1075_v43  ;;  %1450 = vmatprep.subr.mxu0 %v680_v44  ;;  %v933_v31 = vld [vmem:[#allocation5 + $0x1040] sm:$0xff]  ;;  %v922_v33 = vld [vmem:[#allocation5 + $0xfe8] sm:$0xff] }
 0x10b   : > { %1527 = vmatprep.subr.mxu1 %v1064_v45  ;;  %1451 = vmatpush2.msra.mxu0 %v679_v46  ;;  %v537_v34 = vld [vmem:[#allocation5 + $0x3e0] sm:$0xff]  ;;  %v526_v36 = vld [vmem:[#allocation5 + $0x388] sm:$0xff] }
 0x10c   : > { %1528 = vmatpush2.msra.mxu1 %v1063_v47  ;;  %1452 = vmatprep.subr.mxu0 %v668_v48  ;;  %v921_v35 = vld [vmem:[#allocation5 + $0xfe0] sm:$0xff]  ;;  %v910_v37 = vld [vmem:[#allocation5 + $0xf88] sm:$0xff] }
 0x10d   : > { %1529 = vmatprep.subr.mxu1 %v1052_v49  ;;  %1453 = vmatpush2.msra.mxu0 %v667_v50  ;;  %v525_v38 = vld [vmem:[#allocation5 + $0x380] sm:$0xff]  ;;  %v514_v40 = vld [vmem:[#allocation5 + $0x328] sm:$0xff] }
 0x10e   : > { %1530 = vmatpush2.msra.mxu1 %v1051_v51  ;;  %1454 = vmatprep.subr.mxu0 %v656_v52  ;;  %v909_v39 = vld [vmem:[#allocation5 + $0xf80] sm:$0xff]  ;;  %v898_v41 = vld [vmem:[#allocation5 + $0xf28] sm:$0xff] }
 0x10f   : > { %1531 = vmatprep.subr.mxu1 %v1040_v53  ;;  %1455 = vmatpush2.msra.mxu0 %v655_v54  ;;  %v513_v42 = vld [vmem:[#allocation5 + $0x320] sm:$0xff]  ;;  %v502_v44 = vld [vmem:[#allocation5 + $0x2c8] sm:$0xff] }
 0x110   : > { %1532 = vmatpush2.msra.mxu1 %v1039_v55  ;;  %1316 = vmatprep.mubr.f32.mxu0 %v7751_v56  ;;  %v897_v43 = vld [vmem:[#allocation5 + $0xf20] sm:$0xff]  ;;  %v886_v45 = vld [vmem:[#allocation5 + $0xec8] sm:$0xff] }
 0x111   : > { %1456 = vmatprep.subr.mxu0 %v644_v57  ;;  %1533 = vmatprep.subr.mxu1 %v1028_v58  ;;  %v501_v46 = vld [vmem:[#allocation5 + $0x2c0] sm:$0xff]  ;;  %v490_v48 = vld [vmem:[#allocation5 + $0x268] sm:$0xff] }
 0x112   : > { %1317 = vmatmul.mubr.f32.gmra.mxu0 %v7754_v59  ;;  %1534 = vmatpush2.msra.mxu1 %v1027_v61  ;;  %v885_v47 = vld [vmem:[#allocation5 + $0xec0] sm:$0xff]  ;;  %v874_v49 = vld [vmem:[#allocation5 + $0xe68] sm:$0xff] }
 0x113   : > { %1457 = vmatpush2.msra.mxu0 %v643_v60  ;;  %1393 = vmatprep.mubr.f32.mxu1 %v7758_v62  ;;  %v489_v50 = vld [vmem:[#allocation5 + $0x260] sm:$0xff]  ;;  %v478_v52 = vld [vmem:[#allocation5 + $0x208] sm:$0xff] }
 0x114   : > { %1458 = vmatprep.subr.mxu0 %v632_v0  ;;  %1535 = vmatprep.subr.mxu1 %v1016_v3  ;;  %v873_v51 = vld [vmem:[#allocation5 + $0xe60] sm:$0xff]  ;;  %v862_v53 = vld [vmem:[#allocation5 + $0xe08] sm:$0xff] }
 0x115   : > { %1394 = vmatmul.mubr.f32.gmra.mxu1 %v7762_v4  ;;  %1459 = vmatpush2.msra.mxu0 %v631_v6  ;;  %v477_v54 = vld [vmem:[#allocation5 + $0x200] sm:$0xff]  ;;  %v466_v57 = vld [vmem:[#allocation5 + $0x1a8] sm:$0xff] }
 0x116   : > { %1536 = vmatpush2.msra.mxu1 %v1015_v7  ;;  %1460 = vmatprep.subr.mxu0 %v620_v8  ;;  %v861_v55 = vld [vmem:[#allocation5 + $0xe00] sm:$0xff]  ;;  %v850_v58 = vld [vmem:[#allocation5 + $0xda8] sm:$0xff] }
 0x117   : > { %1537 = vmatprep.subr.mxu1 %v1004_v9  ;;  %1461 = vmatpush2.msra.mxu0 %v619_v10  ;;  %v465_v60 = vld [vmem:[#allocation5 + $0x1a0] sm:$0xff]  ;;  %v454_v0 = vld [vmem:[#allocation5 + $0x148] sm:$0xff] }
 0x118   : > { %1538 = vmatpush2.msra.mxu1 %v1003_v11  ;;  %1462 = vmatprep.subr.mxu0 %v608_v12  ;;  %v849_v61 = vld [vmem:[#allocation5 + $0xda0] sm:$0xff]  ;;  %v838_v3 = vld [vmem:[#allocation5 + $0xd48] sm:$0xff] }
 0x119   : > { %1539 = vmatprep.subr.mxu1 %v992_v13  ;;  %1463 = vmatpush2.msra.mxu0 %v607_v14  ;;  %v453_v6 = vld [vmem:[#allocation5 + $0x140] sm:$0xff]  ;;  %v442_v8 = vld [vmem:[#allocation5 + $0xe8] sm:$0xff] }
 0x11a   : > { %1464 = vmatprep.mubr.f32.mxu0 %v7735_v63  ;;  %1540 = vmatpush2.msra.mxu1 %v991_v15  ;;  %v958_v63 = vld [vmem:[#allocation5 + $0x1108] sm:$0xff]  ;;  %v837_v7 = vld [vmem:[#allocation5 + $0xd40] sm:$0xff] }
 0x11b   : > { %1465 = vmatmul.mubr.f32.vlgmr.msra.gmra.mxu0 %v7738_v1  ;;  %1541 = vmatprep.mubr.f32.mxu1 %v7741_v2  ;;  %v957_v1 = vld [vmem:[#allocation5 + $0x1100] sm:$0xff]  ;;  %v946_v2 = vld [vmem:[#allocation5 + $0x10a8] sm:$0xff] }
 0x11c   : > { %1554 = vmatprep.subr.mxu0 %v598_v16  ;;  %1631 = vmatprep.subr.mxu1 %v982_v17  ;;  %v826_v9 = vld [vmem:[#allocation5 + $0xce8] sm:$0xff]  ;;  %v441_v10 = vld [vmem:[#allocation5 + $0xe0] sm:$0xff] }
 0x11d   : > { %1542 = vmatmul.mubr.f32.vlgmr.msra.gmra.mxu1 %v7745_v5  ;;  %1555 = vmatpush1.msra.mxu0 %v597_v18  ;;  %v550_v5 = vld [vmem:[#allocation5 + $0x448] sm:$0xff]  ;;  %v825_v11 = vld [vmem:[#allocation5 + $0xce0] sm:$0xff] }
 0x11e   : > { %1632 = vmatpush1.msra.mxu1 %v981_v19  ;;  %1556 = vmatprep.subr.mxu0 %v586_v20  ;;  %v430_v12 = vld [vmem:[#allocation5 + $0x88] sm:$0xff]  ;;  %v429_v14 = vld [vmem:[#allocation5 + $0x80] sm:$0xff] }
 0x11f   : > { %1633 = vmatprep.subr.mxu1 %v970_v21  ;;  %1557 = vmatpush1.msra.mxu0 %v585_v22  ;;  %v814_v13 = vld [vmem:[#allocation5 + $0xc88] sm:$0xff]  ;;  %v813_v15 = vld [vmem:[#allocation5 + $0xc80] sm:$0xff] }
 0x120   : > { %1634 = vmatpush1.msra.mxu1 %v969_v23  ;;  %1558 = vmatprep.subr.mxu0 %v574_v24  ;;  %v418_v16 = vld [vmem:[#allocation5 + $0x28] sm:$0xff]  ;;  %v417_v18 = vld [vmem:[#allocation5 + $0x20] sm:$0xff] }
 0x121   : > { %1635 = vmatprep.subr.mxu1 %v958_v63  ;;  %1559 = vmatpush1.msra.mxu0 %v573_v25  ;;  %v802_v17 = vld [vmem:[#allocation5 + $0xc28] sm:$0xff]  ;;  %v801_v19 = vld [vmem:[#allocation5 + $0xc20] sm:$0xff] }
 0x122   : > { %1636 = vmatpush1.msra.mxu1 %v957_v1  ;;  %1560 = vmatprep.subr.mxu0 %v562_v26  ;;  %v790_v20 = vld [vmem:[#allocation5 + $0xbc8] sm:$0xff]  ;;  %v789_v22 = vld [vmem:[#allocation5 + $0xbc0] sm:$0xff] }
 0x123   : > { %1637 = vmatprep.subr.mxu1 %v946_v2  ;;  %1561 = vmatpush1.msra.mxu0 %v561_v27  ;;  %v1174_v21 = vld [vmem:[#allocation5 + $0x17c8] sm:$0xff]  ;;  %v1173_v23 = vld [vmem:[#allocation5 + $0x17c0] sm:$0xff] }
 0x124   : > { %1638 = vmatpush1.msra.mxu1 %v945_v28  ;;  %1562 = vmatprep.subr.mxu0 %v550_v5  ;;  %v778_v24 = vld [vmem:[#allocation5 + $0xb68] sm:$0xff]  ;;  %v777_v25 = vld [vmem:[#allocation5 + $0xb60] sm:$0xff] }
 0x125   : > { %1639 = vmatprep.subr.mxu1 %v934_v29  ;;  %1563 = vmatpush1.msra.mxu0 %v549_v30  ;;  %v1162_v63 = vld [vmem:[#allocation5 + $0x1768] sm:$0xff]  ;;  %v1161_v1 = vld [vmem:[#allocation5 + $0x1760] sm:$0xff] }
 0x126   : > { %1640 = vmatpush1.msra.mxu1 %v933_v31  ;;  %1564 = vmatprep.subr.mxu0 %v538_v32  ;;  %v766_v26 = vld [vmem:[#allocation5 + $0xb08] sm:$0xff]  ;;  %v765_v27 = vld [vmem:[#allocation5 + $0xb00] sm:$0xff] }
 0x127   : > { %1641 = vmatprep.subr.mxu1 %v922_v33  ;;  %1565 = vmatpush1.msra.mxu0 %v537_v34  ;;  %v1150_v2 = vld [vmem:[#allocation5 + $0x1708] sm:$0xff]  ;;  %v1149_v28 = vld [vmem:[#allocation5 + $0x1700] sm:$0xff] }
 0x128   : > { %1642 = vmatpush1.msra.mxu1 %v921_v35  ;;  %1566 = vmatprep.subr.mxu0 %v526_v36  ;;  %v754_v5 = vld [vmem:[#allocation5 + $0xaa8] sm:$0xff]  ;;  %v753_v30 = vld [vmem:[#allocation5 + $0xaa0] sm:$0xff] }
 0x129   : > { %1643 = vmatprep.subr.mxu1 %v910_v37  ;;  %1567 = vmatpush1.msra.mxu0 %v525_v38  ;;  %v1138_v29 = vld [vmem:[#allocation5 + $0x16a8] sm:$0xff]  ;;  %v1137_v31 = vld [vmem:[#allocation5 + $0x16a0] sm:$0xff] }
 0x12a   : > { %1644 = vmatpush1.msra.mxu1 %v909_v39  ;;  %1568 = vmatprep.subr.mxu0 %v514_v40  ;;  %v742_v32 = vld [vmem:[#allocation5 + $0xa48] sm:$0xff]  ;;  %v741_v34 = vld [vmem:[#allocation5 + $0xa40] sm:$0xff] }
 0x12b   : > { %1645 = vmatprep.subr.mxu1 %v898_v41  ;;  %1569 = vmatpush1.msra.mxu0 %v513_v42  ;;  %v1126_v33 = vld [vmem:[#allocation5 + $0x1648] sm:$0xff]  ;;  %v1125_v35 = vld [vmem:[#allocation5 + $0x1640] sm:$0xff] }
 0x12c   : > { %1646 = vmatpush1.msra.mxu1 %v897_v43  ;;  %1570 = vmatprep.subr.mxu0 %v502_v44  ;;  %v730_v36 = vld [vmem:[#allocation5 + $0x9e8] sm:$0xff]  ;;  %v729_v38 = vld [vmem:[#allocation5 + $0x9e0] sm:$0xff] }
 0x12d   : > { %1647 = vmatprep.subr.mxu1 %v886_v45  ;;  %1571 = vmatpush1.msra.mxu0 %v501_v46  ;;  %v1114_v37 = vld [vmem:[#allocation5 + $0x15e8] sm:$0xff]  ;;  %v1113_v39 = vld [vmem:[#allocation5 + $0x15e0] sm:$0xff] }
 0x12e   : > { %1648 = vmatpush1.msra.mxu1 %v885_v47  ;;  %1572 = vmatprep.subr.mxu0 %v490_v48  ;;  %v718_v40 = vld [vmem:[#allocation5 + $0x988] sm:$0xff]  ;;  %v717_v42 = vld [vmem:[#allocation5 + $0x980] sm:$0xff] }
 0x12f   : > { %1649 = vmatprep.subr.mxu1 %v874_v49  ;;  %1573 = vmatpush1.msra.mxu0 %v489_v50  ;;  %v1102_v41 = vld [vmem:[#allocation5 + $0x1588] sm:$0xff]  ;;  %v1101_v43 = vld [vmem:[#allocation5 + $0x1580] sm:$0xff] }
 0x130   : > { %1650 = vmatpush1.msra.mxu1 %v873_v51  ;;  %1574 = vmatprep.subr.mxu0 %v478_v52  ;;  %v706_v44 = vld [vmem:[#allocation5 + $0x928] sm:$0xff]  ;;  %v705_v46 = vld [vmem:[#allocation5 + $0x920] sm:$0xff] }
 0x131   : > { %1651 = vmatprep.subr.mxu1 %v862_v53  ;;  %1575 = vmatpush1.msra.mxu0 %v477_v54  ;;  %v1090_v45 = vld [vmem:[#allocation5 + $0x1528] sm:$0xff]  ;;  %v1089_v47 = vld [vmem:[#allocation5 + $0x1520] sm:$0xff] }
 0x132   : > { %1652 = vmatpush1.msra.mxu1 %v861_v55  ;;  %1576 = vmatprep.subr.mxu0 %v466_v57  ;;  %v694_v48 = vld [vmem:[#allocation5 + $0x8c8] sm:$0xff]  ;;  %v693_v50 = vld [vmem:[#allocation5 + $0x8c0] sm:$0xff] }
 0x133   : > { %1653 = vmatprep.subr.mxu1 %v850_v58  ;;  %1577 = vmatpush1.msra.mxu0 %v465_v60  ;;  %v1078_v49 = vld [vmem:[#allocation5 + $0x14c8] sm:$0xff]  ;;  %v1077_v51 = vld [vmem:[#allocation5 + $0x14c0] sm:$0xff] }
 0x134   : > { %1654 = vmatpush1.msra.mxu1 %v849_v61  ;;  %1578 = vmatprep.subr.mxu0 %v454_v0  ;;  %v682_v52 = vld [vmem:[#allocation5 + $0x868] sm:$0xff]  ;;  %v681_v54 = vld [vmem:[#allocation5 + $0x860] sm:$0xff] }
 0x135   : > { %1655 = vmatprep.subr.mxu1 %v838_v3  ;;  %1579 = vmatpush1.msra.mxu0 %v453_v6  ;;  %v1066_v53 = vld [vmem:[#allocation5 + $0x1468] sm:$0xff]  ;;  %v1065_v55 = vld [vmem:[#allocation5 + $0x1460] sm:$0xff] }
 0x136   : > { %1656 = vmatpush1.msra.mxu1 %v837_v7  ;;  %1580 = vmatprep.subr.mxu0 %v442_v8  ;;  %v670_v57 = vld [vmem:[#allocation5 + $0x808] sm:$0xff]  ;;  %v669_v60 = vld [vmem:[#allocation5 + $0x800] sm:$0xff] }
 0x137   : > { %1657 = vmatprep.subr.mxu1 %v826_v9  ;;  %1581 = vmatpush1.msra.mxu0 %v441_v10  ;;  %v1054_v58 = vld [vmem:[#allocation5 + $0x1408] sm:$0xff]  ;;  %v1053_v61 = vld [vmem:[#allocation5 + $0x1400] sm:$0xff] }
 0x138   : > { %1658 = vmatpush1.msra.mxu1 %v825_v11  ;;  %1582 = vmatprep.subr.mxu0 %v430_v12  ;;  %v658_v0 = vld [vmem:[#allocation5 + $0x7a8] sm:$0xff]  ;;  %v657_v6 = vld [vmem:[#allocation5 + $0x7a0] sm:$0xff] }
 0x139   : > { %1659 = vmatprep.subr.mxu1 %v814_v13  ;;  %1583 = vmatpush1.msra.mxu0 %v429_v14  ;;  %v1042_v3 = vld [vmem:[#allocation5 + $0x13a8] sm:$0xff]  ;;  %v1041_v7 = vld [vmem:[#allocation5 + $0x13a0] sm:$0xff] }
 0x13a   : > { %1660 = vmatpush1.msra.mxu1 %v813_v15  ;;  %1584 = vmatprep.subr.mxu0 %v418_v16  ;;  %v646_v8 = vld [vmem:[#allocation5 + $0x748] sm:$0xff]  ;;  %v645_v10 = vld [vmem:[#allocation5 + $0x740] sm:$0xff] }
 0x13b   : > { %1661 = vmatprep.subr.mxu1 %v802_v17  ;;  %1585 = vmatpush1.msra.mxu0 %v417_v18  ;;  %v1030_v9 = vld [vmem:[#allocation5 + $0x1348] sm:$0xff]  ;;  %v1029_v11 = vld [vmem:[#allocation5 + $0x1340] sm:$0xff] }
 0x13c   : > { %1662 = vmatpush1.msra.mxu1 %v801_v19  ;;  %1586 = vmatprep.subr.mxu0 %v790_v20  ;;  %v634_v12 = vld [vmem:[#allocation5 + $0x6e8] sm:$0xff]  ;;  %v633_v14 = vld [vmem:[#allocation5 + $0x6e0] sm:$0xff] }
 0x13d   : > { %1663 = vmatprep.subr.mxu1 %v1174_v21  ;;  %1587 = vmatpush2.msra.mxu0 %v789_v22  ;;  %v1018_v13 = vld [vmem:[#allocation5 + $0x12e8] sm:$0xff]  ;;  %v1017_v15 = vld [vmem:[#allocation5 + $0x12e0] sm:$0xff]  ;;  %v600_v21 = vld [vmem:[#allocation5 + $0x5d8] sm:$0xff] }
 0x13e   : > { %1664 = vmatpush2.msra.mxu1 %v1173_v23  ;;  %1588 = vmatprep.subr.mxu0 %v778_v24  ;;  %v622_v16 = vld [vmem:[#allocation5 + $0x688] sm:$0xff]  ;;  %v621_v18 = vld [vmem:[#allocation5 + $0x680] sm:$0xff]  ;;  %v984_v22 = vld [vmem:[#allocation5 + $0x11d8] sm:$0xff] }
 0x13f   : > { %1665 = vmatprep.subr.mxu1 %v1162_v63  ;;  %1589 = vmatpush2.msra.mxu0 %v777_v25  ;;  %v1006_v17 = vld [vmem:[#allocation5 + $0x1288] sm:$0xff]  ;;  %v609_v20 = vld [vmem:[#allocation5 + $0x620] sm:$0xff]  ;;  %v599_v24 = vld [vmem:[#allocation5 + $0x5d0] sm:$0xff] }
 0x140   : > { %1666 = vmatpush2.msra.mxu1 %v1161_v1  ;;  %1590 = vmatprep.subr.mxu0 %v766_v26  ;;  %v610_v19 = vld [vmem:[#allocation5 + $0x628] sm:$0xff]  ;;  %v7779_v23 = vld [vmem:[%s7716_s10] sm:$0xff]  ;;  %v983_v63 = vld [vmem:[#allocation5 + $0x11d0] sm:$0xff] }
 0x141   : > { %1667 = vmatprep.subr.mxu1 %v1150_v2  ;;  %1591 = vmatpush2.msra.mxu0 %v765_v27  ;;  %v7783_v25 = vld [vmem:[%s7716_s10 + $0x18] sm:$0xff]  ;;  %v7787_v2 = vld [vmem:[%s7716_s10 + $0x10] sm:$0xff] }
 0x142   : > { %1668 = vmatpush2.msra.mxu1 %v1149_v28  ;;  %1592 = vmatprep.subr.mxu0 %v754_v5  ;;  %v588_v1 = vld [vmem:[#allocation5 + $0x578] sm:$0xff]  ;;  %v587_v27 = vld [vmem:[#allocation5 + $0x570] sm:$0xff] }
 0x143   : > { %1669 = vmatprep.subr.mxu1 %v1138_v29  ;;  %1593 = vmatpush2.msra.mxu0 %v753_v30  ;;  %v972_v26 = vld [vmem:[#allocation5 + $0x1178] sm:$0xff]  ;;  %v971_v28 = vld [vmem:[#allocation5 + $0x1170] sm:$0xff] }
 0x144   : > { %1670 = vmatpush2.msra.mxu1 %v1137_v31  ;;  %1594 = vmatprep.subr.mxu0 %v742_v32  ;;  %v576_v5 = vld [vmem:[#allocation5 + $0x518] sm:$0xff]  ;;  %v575_v30 = vld [vmem:[#allocation5 + $0x510] sm:$0xff] }
 0x145   : > { %1671 = vmatprep.subr.mxu1 %v1126_v33  ;;  %1595 = vmatpush2.msra.mxu0 %v741_v34  ;;  %v960_v29 = vld [vmem:[#allocation5 + $0x1118] sm:$0xff]  ;;  %v959_v31 = vld [vmem:[#allocation5 + $0x1110] sm:$0xff] }
 0x146   : > { %1672 = vmatpush2.msra.mxu1 %v1125_v35  ;;  %1596 = vmatprep.subr.mxu0 %v730_v36  ;;  %v564_v32 = vld [vmem:[#allocation5 + $0x4b8] sm:$0xff]  ;;  %v563_v34 = vld [vmem:[#allocation5 + $0x4b0] sm:$0xff] }
 0x147   : > { %1673 = vmatprep.subr.mxu1 %v1114_v37  ;;  %1597 = vmatpush2.msra.mxu0 %v729_v38  ;;  %v948_v33 = vld [vmem:[#allocation5 + $0x10b8] sm:$0xff]  ;;  %v947_v35 = vld [vmem:[#allocation5 + $0x10b0] sm:$0xff] }
 0x148   : > { %1674 = vmatpush2.msra.mxu1 %v1113_v39  ;;  %1598 = vmatprep.subr.mxu0 %v718_v40  ;;  %v552_v36 = vld [vmem:[#allocation5 + $0x458] sm:$0xff]  ;;  %v551_v38 = vld [vmem:[#allocation5 + $0x450] sm:$0xff] }
 0x149   : > { %1675 = vmatprep.subr.mxu1 %v1102_v41  ;;  %1599 = vmatpush2.msra.mxu0 %v717_v42  ;;  %v936_v37 = vld [vmem:[#allocation5 + $0x1058] sm:$0xff]  ;;  %v935_v39 = vld [vmem:[#allocation5 + $0x1050] sm:$0xff] }
 0x14a   : > { %1676 = vmatpush2.msra.mxu1 %v1101_v43  ;;  %1600 = vmatprep.subr.mxu0 %v706_v44  ;;  %v540_v40 = vld [vmem:[#allocation5 + $0x3f8] sm:$0xff]  ;;  %v539_v42 = vld [vmem:[#allocation5 + $0x3f0] sm:$0xff] }
 0x14b   : > { %1677 = vmatprep.subr.mxu1 %v1090_v45  ;;  %1601 = vmatpush2.msra.mxu0 %v705_v46  ;;  %v924_v41 = vld [vmem:[#allocation5 + $0xff8] sm:$0xff]  ;;  %v923_v43 = vld [vmem:[#allocation5 + $0xff0] sm:$0xff] }
 0x14c   : > { %1678 = vmatpush2.msra.mxu1 %v1089_v47  ;;  %1602 = vmatprep.subr.mxu0 %v694_v48  ;;  %v528_v44 = vld [vmem:[#allocation5 + $0x398] sm:$0xff]  ;;  %v527_v46 = vld [vmem:[#allocation5 + $0x390] sm:$0xff] }
 0x14d   : > { %1679 = vmatprep.subr.mxu1 %v1078_v49  ;;  %1603 = vmatpush2.msra.mxu0 %v693_v50  ;;  %v912_v45 = vld [vmem:[#allocation5 + $0xf98] sm:$0xff]  ;;  %v911_v47 = vld [vmem:[#allocation5 + $0xf90] sm:$0xff] }
 0x14e   : > { %1680 = vmatpush2.msra.mxu1 %v1077_v51  ;;  %1604 = vmatprep.subr.mxu0 %v682_v52  ;;  %v516_v48 = vld [vmem:[#allocation5 + $0x338] sm:$0xff]  ;;  %v515_v50 = vld [vmem:[#allocation5 + $0x330] sm:$0xff] }
 0x14f   : > { %1681 = vmatprep.subr.mxu1 %v1066_v53  ;;  %1605 = vmatpush2.msra.mxu0 %v681_v54  ;;  %v900_v49 = vld [vmem:[#allocation5 + $0xf38] sm:$0xff]  ;;  %v899_v51 = vld [vmem:[#allocation5 + $0xf30] sm:$0xff] }
 0x150   : > { %1682 = vmatpush2.msra.mxu1 %v1065_v55  ;;  %1606 = vmatprep.subr.mxu0 %v670_v57  ;;  %v504_v52 = vld [vmem:[#allocation5 + $0x2d8] sm:$0xff]  ;;  %v503_v54 = vld [vmem:[#allocation5 + $0x2d0] sm:$0xff] }
 0x151   : > { %1683 = vmatprep.subr.mxu1 %v1054_v58  ;;  %1607 = vmatpush2.msra.mxu0 %v669_v60  ;;  %v888_v53 = vld [vmem:[#allocation5 + $0xed8] sm:$0xff]  ;;  %v887_v55 = vld [vmem:[#allocation5 + $0xed0] sm:$0xff] }
 0x152   : > { %1684 = vmatpush2.msra.mxu1 %v1053_v61  ;;  %1608 = vmatprep.subr.mxu0 %v658_v0  ;;  %v492_v57 = vld [vmem:[#allocation5 + $0x278] sm:$0xff]  ;;  %v491_v60 = vld [vmem:[#allocation5 + $0x270] sm:$0xff] }
 0x153   : > { %1685 = vmatprep.subr.mxu1 %v1042_v3  ;;  %1609 = vmatpush2.msra.mxu0 %v657_v6  ;;  %v876_v58 = vld [vmem:[#allocation5 + $0xe78] sm:$0xff]  ;;  %v875_v61 = vld [vmem:[#allocation5 + $0xe70] sm:$0xff] }
 0x154   : > { %1686 = vmatpush2.msra.mxu1 %v1041_v7  ;;  %1470 = vmatprep.mubr.f32.mxu0 %v7751_v56  ;;  %v1005_v56 = vld [vmem:[#allocation5 + $0x1280] sm:$0xff]  ;;  %v480_v0 = vld [vmem:[#allocation5 + $0x218] sm:$0xff]  ;;  %v479_v6 = vld [vmem:[#allocation5 + $0x210] sm:$0xff] }
 0x155   : > { %1610 = vmatprep.subr.mxu0 %v646_v8  ;;  %1687 = vmatprep.subr.mxu1 %v1030_v9  ;;  %v864_v3 = vld [vmem:[#allocation5 + $0xe18] sm:$0xff]  ;;  %v863_v7 = vld [vmem:[#allocation5 + $0xe10] sm:$0xff] }
 0x156   : > { %1471 = vmatmul.mubr.f32.gmra.mxu0 %v7754_v59  ;;  %1688 = vmatpush2.msra.mxu1 %v1029_v11  ;;  %v994_v59 = vld [vmem:[#allocation5 + $0x1228] sm:$0xff]  ;;  %v468_v8 = vld [vmem:[#allocation5 + $0x1b8] sm:$0xff]  ;;  %v851_v11 = vld [vmem:[#allocation5 + $0xdb0] sm:$0xff] }
 0x157   : > { %1611 = vmatpush2.msra.mxu0 %v645_v10  ;;  %1547 = vmatprep.mubr.f32.mxu1 %v7758_v62  ;;  %v993_v62 = vld [vmem:[#allocation5 + $0x1220] sm:$0xff]  ;;  %v852_v9 = vld [vmem:[#allocation5 + $0xdb8] sm:$0xff]  ;;  %v467_v10 = vld [vmem:[#allocation5 + $0x1b0] sm:$0xff] }
 0x158   : > { %1612 = vmatprep.subr.mxu0 %v634_v12  ;;  %1689 = vmatprep.subr.mxu1 %v1018_v13  ;;  %v456_v12 = vld [vmem:[#allocation5 + $0x158] sm:$0xff] }
 0x159   : > { %1548 = vmatmul.mubr.f32.gmra.mxu1 %v7762_v4  ;;  %1613 = vmatpush2.msra.mxu0 %v633_v14  ;;  %v7775_v4 = vld [vmem:[%s7716_s10 + $0x8] sm:$0xff]  ;;  %v840_v13 = vld [vmem:[#allocation5 + $0xd58] sm:$0xff]  ;;  %v455_v14 = vld [vmem:[#allocation5 + $0x150] sm:$0xff] }
 0x15a   : > { %1690 = vmatpush2.msra.mxu1 %v1017_v15  ;;  %1614 = vmatprep.subr.mxu0 %v622_v16  ;;  %v839_v15 = vld [vmem:[#allocation5 + $0xd50] sm:$0xff]  ;;  %v444_v16 = vld [vmem:[#allocation5 + $0xf8] sm:$0xff] }
 0x15b   : > { %1691 = vmatprep.subr.mxu1 %v1006_v17  ;;  %1615 = vmatpush2.msra.mxu0 %v621_v18  ;;  %v828_v17 = vld [vmem:[#allocation5 + $0xcf8] sm:$0xff]  ;;  %v443_v18 = vld [vmem:[#allocation5 + $0xf0] sm:$0xff] }
 0x15c   : > { %1692 = vmatpush2.msra.mxu1 %v1005_v56  ;;  %1616 = vmatprep.subr.mxu0 %v610_v19  ;;  %v827_v56 = vld [vmem:[#allocation5 + $0xcf0] sm:$0xff]  ;;  %v432_v19 = vld [vmem:[#allocation5 + $0x98] sm:$0xff] }
 0x15d   : > { %1693 = vmatprep.subr.mxu1 %v994_v59  ;;  %1617 = vmatpush2.msra.mxu0 %v609_v20  ;;  %v816_v59 = vld [vmem:[#allocation5 + $0xc98] sm:$0xff]  ;;  %v431_v20 = vld [vmem:[#allocation5 + $0x90] sm:$0xff] }
 0x15e   : > { %1618 = vmatprep.mubr.f32.mxu0 %v7775_v4  ;;  %1694 = vmatpush2.msra.mxu1 %v993_v62  ;;  %v815_v62 = vld [vmem:[#allocation5 + $0xc90] sm:$0xff] }
 0x15f   : > { %1619 = vmatmul.mubr.f32.vlgmr.msra.gmra.mxu0 %v7779_v23  ;;  %1695 = vmatprep.mubr.f32.mxu1 %v7783_v25 }
 0x160   : > { %1708 = vmatprep.subr.mxu0 %v600_v21  ;;  %1785 = vmatprep.subr.mxu1 %v984_v22  ;;  %v420_v21 = vld [vmem:[#allocation5 + $0x38] sm:$0xff] }
 0x161   : > { %1696 = vmatmul.mubr.f32.vlgmr.msra.gmra.mxu1 %v7787_v2  ;;  %1709 = vmatpush1.msra.mxu0 %v599_v24  ;;  %v804_v22 = vld [vmem:[#allocation5 + $0xc38] sm:$0xff]  ;;  %v419_v24 = vld [vmem:[#allocation5 + $0x30] sm:$0xff] }
 0x162   : > { %1786 = vmatpush1.msra.mxu1 %v983_v63  ;;  %1710 = vmatprep.subr.mxu0 %v588_v1  ;;  %v803_v63 = vld [vmem:[#allocation5 + $0xc30] sm:$0xff]  ;;  %v792_v1 = vld [vmem:[#allocation5 + $0xbd8] sm:$0xff] }
 0x163   : > { %1787 = vmatprep.subr.mxu1 %v972_v26  ;;  %1711 = vmatpush1.msra.mxu0 %v587_v27  ;;  %v1176_v26 = vld [vmem:[#allocation5 + $0x17d8] sm:$0xff]  ;;  %v791_v27 = vld [vmem:[#allocation5 + $0xbd0] sm:$0xff] }
 0x164   : > { %1788 = vmatpush1.msra.mxu1 %v971_v28  ;;  %1712 = vmatprep.subr.mxu0 %v576_v5  ;;  %v1175_v28 = vld [vmem:[#allocation5 + $0x17d0] sm:$0xff]  ;;  %v780_v5 = vld [vmem:[#allocation5 + $0xb78] sm:$0xff] }
 0x165   : > { %1789 = vmatprep.subr.mxu1 %v960_v29  ;;  %1713 = vmatpush1.msra.mxu0 %v575_v30  ;;  %v1164_v29 = vld [vmem:[#allocation5 + $0x1778] sm:$0xff]  ;;  %v779_v30 = vld [vmem:[#allocation5 + $0xb70] sm:$0xff] }
 0x166   : > { %1790 = vmatpush1.msra.mxu1 %v959_v31  ;;  %1714 = vmatprep.subr.mxu0 %v564_v32  ;;  %v1163_v31 = vld [vmem:[#allocation5 + $0x1770] sm:$0xff]  ;;  %v768_v32 = vld [vmem:[#allocation5 + $0xb18] sm:$0xff] }
 0x167   : > { %1791 = vmatprep.subr.mxu1 %v948_v33  ;;  %1715 = vmatpush1.msra.mxu0 %v563_v34  ;;  %v1152_v33 = vld [vmem:[#allocation5 + $0x1718] sm:$0xff]  ;;  %v767_v34 = vld [vmem:[#allocation5 + $0xb10] sm:$0xff] }
 0x168   : > { %1792 = vmatpush1.msra.mxu1 %v947_v35  ;;  %1716 = vmatprep.subr.mxu0 %v552_v36  ;;  %v1151_v35 = vld [vmem:[#allocation5 + $0x1710] sm:$0xff]  ;;  %v756_v36 = vld [vmem:[#allocation5 + $0xab8] sm:$0xff] }
 0x169   : > { %1793 = vmatprep.subr.mxu1 %v936_v37  ;;  %1717 = vmatpush1.msra.mxu0 %v551_v38  ;;  %v1140_v37 = vld [vmem:[#allocation5 + $0x16b8] sm:$0xff]  ;;  %v755_v38 = vld [vmem:[#allocation5 + $0xab0] sm:$0xff] }
 0x16a   : > { %1794 = vmatpush1.msra.mxu1 %v935_v39  ;;  %1718 = vmatprep.subr.mxu0 %v540_v40  ;;  %v1139_v39 = vld [vmem:[#allocation5 + $0x16b0] sm:$0xff]  ;;  %v744_v40 = vld [vmem:[#allocation5 + $0xa58] sm:$0xff] }
 0x16b   : > { %1795 = vmatprep.subr.mxu1 %v924_v41  ;;  %1719 = vmatpush1.msra.mxu0 %v539_v42  ;;  %v1128_v41 = vld [vmem:[#allocation5 + $0x1658] sm:$0xff]  ;;  %v743_v42 = vld [vmem:[#allocation5 + $0xa50] sm:$0xff] }
 0x16c   : > { %1796 = vmatpush1.msra.mxu1 %v923_v43  ;;  %1720 = vmatprep.subr.mxu0 %v528_v44  ;;  %v1127_v43 = vld [vmem:[#allocation5 + $0x1650] sm:$0xff]  ;;  %v732_v44 = vld [vmem:[#allocation5 + $0x9f8] sm:$0xff] }
 0x16d   : > { %1797 = vmatprep.subr.mxu1 %v912_v45  ;;  %1721 = vmatpush1.msra.mxu0 %v527_v46  ;;  %v1116_v45 = vld [vmem:[#allocation5 + $0x15f8] sm:$0xff]  ;;  %v731_v46 = vld [vmem:[#allocation5 + $0x9f0] sm:$0xff] }
 0x16e   : > { %1798 = vmatpush1.msra.mxu1 %v911_v47  ;;  %1722 = vmatprep.subr.mxu0 %v516_v48  ;;  %v1115_v47 = vld [vmem:[#allocation5 + $0x15f0] sm:$0xff]  ;;  %v720_v48 = vld [vmem:[#allocation5 + $0x998] sm:$0xff] }
 0x16f   : > { %1799 = vmatprep.subr.mxu1 %v900_v49  ;;  %1723 = vmatpush1.msra.mxu0 %v515_v50  ;;  %v1104_v49 = vld [vmem:[#allocation5 + $0x1598] sm:$0xff]  ;;  %v719_v50 = vld [vmem:[#allocation5 + $0x990] sm:$0xff] }
 0x170   : > { %1800 = vmatpush1.msra.mxu1 %v899_v51  ;;  %1724 = vmatprep.subr.mxu0 %v504_v52  ;;  %v1103_v51 = vld [vmem:[#allocation5 + $0x1590] sm:$0xff]  ;;  %v708_v52 = vld [vmem:[#allocation5 + $0x938] sm:$0xff] }
 0x171   : > { %1801 = vmatprep.subr.mxu1 %v888_v53  ;;  %1725 = vmatpush1.msra.mxu0 %v503_v54  ;;  %v1092_v53 = vld [vmem:[#allocation5 + $0x1538] sm:$0xff]  ;;  %v707_v54 = vld [vmem:[#allocation5 + $0x930] sm:$0xff] }
 0x172   : > { %1802 = vmatpush1.msra.mxu1 %v887_v55  ;;  %1726 = vmatprep.subr.mxu0 %v492_v57  ;;  %v1091_v55 = vld [vmem:[#allocation5 + $0x1530] sm:$0xff]  ;;  %v696_v57 = vld [vmem:[#allocation5 + $0x8d8] sm:$0xff] }
 0x173   : > { %1803 = vmatprep.subr.mxu1 %v876_v58  ;;  %1727 = vmatpush1.msra.mxu0 %v491_v60  ;;  %v1080_v58 = vld [vmem:[#allocation5 + $0x14d8] sm:$0xff]  ;;  %v695_v60 = vld [vmem:[#allocation5 + $0x8d0] sm:$0xff] }
 0x174   : > { %1804 = vmatpush1.msra.mxu1 %v875_v61  ;;  %1728 = vmatprep.subr.mxu0 %v480_v0  ;;  %v1079_v61 = vld [vmem:[#allocation5 + $0x14d0] sm:$0xff]  ;;  %v684_v0 = vld [vmem:[#allocation5 + $0x878] sm:$0xff] }
 0x175   : > { %1805 = vmatprep.subr.mxu1 %v864_v3  ;;  %1729 = vmatpush1.msra.mxu0 %v479_v6  ;;  %v1068_v3 = vld [vmem:[#allocation5 + $0x1478] sm:$0xff]  ;;  %v683_v6 = vld [vmem:[#allocation5 + $0x870] sm:$0xff] }
 0x176   : > { %1806 = vmatpush1.msra.mxu1 %v863_v7  ;;  %1730 = vmatprep.subr.mxu0 %v468_v8  ;;  %v1067_v7 = vld [vmem:[#allocation5 + $0x1470] sm:$0xff]  ;;  %v672_v8 = vld [vmem:[#allocation5 + $0x818] sm:$0xff] }
 0x177   : > { %1807 = vmatprep.subr.mxu1 %v852_v9  ;;  %1731 = vmatpush1.msra.mxu0 %v467_v10  ;;  %v1056_v9 = vld [vmem:[#allocation5 + $0x1418] sm:$0xff]  ;;  %v671_v10 = vld [vmem:[#allocation5 + $0x810] sm:$0xff] }
 0x178   : > { %1808 = vmatpush1.msra.mxu1 %v851_v11  ;;  %1732 = vmatprep.subr.mxu0 %v456_v12  ;;  %v1055_v11 = vld [vmem:[#allocation5 + $0x1410] sm:$0xff]  ;;  %v660_v12 = vld [vmem:[#allocation5 + $0x7b8] sm:$0xff] }
 0x179   : > { %1809 = vmatprep.subr.mxu1 %v840_v13  ;;  %1733 = vmatpush1.msra.mxu0 %v455_v14  ;;  %v1044_v13 = vld [vmem:[#allocation5 + $0x13b8] sm:$0xff]  ;;  %v7791_v14 = vld [vmem:[%s7716_s10 + $0x28] sm:$0xff] }
 0x17a   : > { %1810 = vmatpush1.msra.mxu1 %v839_v15  ;;  %1734 = vmatprep.subr.mxu0 %v444_v16  ;;  %v659_v15 = vld [vmem:[#allocation5 + $0x7b0] sm:$0xff]  ;;  %v7795_v16 = vld [vmem:[%s7716_s10 + $0x20] sm:$0xff] }
 0x17b   : > { %1811 = vmatprep.subr.mxu1 %v828_v17  ;;  %1735 = vmatpush1.msra.mxu0 %v443_v18  ;;  %v1043_v17 = vld [vmem:[#allocation5 + $0x13b0] sm:$0xff]  ;;  %v648_v18 = vld [vmem:[#allocation5 + $0x758] sm:$0xff] }
 0x17c   : > { %1812 = vmatpush1.msra.mxu1 %v827_v56  ;;  %1736 = vmatprep.subr.mxu0 %v432_v19  ;;  %v1032_v56 = vld [vmem:[#allocation5 + $0x1358] sm:$0xff] }
 0x17d   : > { %1813 = vmatprep.subr.mxu1 %v816_v59  ;;  %1737 = vmatpush1.msra.mxu0 %v431_v20  ;;  %v7799_v19 = vld [vmem:[%s7716_s10 + $0x38] sm:$0xff]  ;;  %v647_v59 = vld [vmem:[#allocation5 + $0x750] sm:$0xff] }
 0x17e   : > { %1814 = vmatpush1.msra.mxu1 %v815_v62  ;;  %1738 = vmatprep.subr.mxu0 %v420_v21  ;;  %v1031_v20 = vld [vmem:[#allocation5 + $0x1350] sm:$0xff]  ;;  %v636_v62 = vld [vmem:[#allocation5 + $0x6f8] sm:$0xff] }
 0x17f   : > { %1815 = vmatprep.subr.mxu1 %v804_v22  ;;  %1739 = vmatpush1.msra.mxu0 %v419_v24  ;;  %v1020_v21 = vld [vmem:[#allocation5 + $0x12f8] sm:$0xff]  ;;  %v7803_v22 = vld [vmem:[%s7716_s10 + $0x30] sm:$0xff] }
 0x180   : > { %1816 = vmatpush1.msra.mxu1 %v803_v63  ;;  %1740 = vmatprep.subr.mxu0 %v792_v1  ;;  %v635_v24 = vld [vmem:[#allocation5 + $0x6f0] sm:$0xff]  ;;  %v624_v1 = vld [vmem:[#allocation5 + $0x698] sm:$0xff] }
 0x181   : > { %1817 = vmatprep.subr.mxu1 %v1176_v26  ;;  %1741 = vmatpush2.msra.mxu0 %v791_v27  ;;  %v1019_v63 = vld [vmem:[#allocation5 + $0x12f0] sm:$0xff]  ;;  %v1008_v26 = vld [vmem:[#allocation5 + $0x1298] sm:$0xff] }
 0x182   : > { %1818 = vmatpush2.msra.mxu1 %v1175_v28  ;;  %1742 = vmatprep.subr.mxu0 %v780_v5  ;;  %v623_v27 = vld [vmem:[#allocation5 + $0x690] sm:$0xff]  ;;  %v612_v5 = vld [vmem:[#allocation5 + $0x638] sm:$0xff] }
 0x183   : > { %1819 = vmatprep.subr.mxu1 %v1164_v29  ;;  %1743 = vmatpush2.msra.mxu0 %v779_v30  ;;  %v1007_v28 = vld [vmem:[#allocation5 + $0x1290] sm:$0xff]  ;;  %v996_v29 = vld [vmem:[#allocation5 + $0x1238] sm:$0xff] }
 0x184   : > { %1820 = vmatpush2.msra.mxu1 %v1163_v31  ;;  %1744 = vmatprep.subr.mxu0 %v768_v32  ;;  %v611_v30 = vld [vmem:[#allocation5 + $0x630] sm:$0xff]  ;;  %v602_v32 = vld [vmem:[#allocation5 + $0x5e8] sm:$0xff] }
 0x185   : > { %1821 = vmatprep.subr.mxu1 %v1152_v33  ;;  %1745 = vmatpush2.msra.mxu0 %v767_v34  ;;  %v995_v31 = vld [vmem:[#allocation5 + $0x1230] sm:$0xff]  ;;  %v986_v33 = vld [vmem:[#allocation5 + $0x11e8] sm:$0xff]  ;;  %v601_v34 = vld [vmem:[#allocation5 + $0x5e0] sm:$0xff] }
 0x186   : > { %1822 = vmatpush2.msra.mxu1 %v1151_v35  ;;  %1746 = vmatprep.subr.mxu0 %v756_v36  ;;  %v985_v35 = vld [vmem:[#allocation5 + $0x11e0] sm:$0xff]  ;;  %v590_v36 = vld [vmem:[#allocation5 + $0x588] sm:$0xff] }
 0x187   : > { %1823 = vmatprep.subr.mxu1 %v1140_v37  ;;  %1747 = vmatpush2.msra.mxu0 %v755_v38  ;;  %v974_v37 = vld [vmem:[#allocation5 + $0x1188] sm:$0xff]  ;;  %v589_v38 = vld [vmem:[#allocation5 + $0x580] sm:$0xff] }
 0x188   : > { %1824 = vmatpush2.msra.mxu1 %v1139_v39  ;;  %1748 = vmatprep.subr.mxu0 %v744_v40  ;;  %v973_v39 = vld [vmem:[#allocation5 + $0x1180] sm:$0xff]  ;;  %v962_v40 = vld [vmem:[#allocation5 + $0x1128] sm:$0xff] }
 0x189   : > { %1825 = vmatprep.subr.mxu1 %v1128_v41  ;;  %1749 = vmatpush2.msra.mxu0 %v743_v42  ;;  %v566_v41 = vld [vmem:[#allocation5 + $0x4c8] sm:$0xff]  ;;  %v565_v42 = vld [vmem:[#allocation5 + $0x4c0] sm:$0xff] }
 0x18a   : > { %1826 = vmatpush2.msra.mxu1 %v1127_v43  ;;  %1750 = vmatprep.subr.mxu0 %v732_v44  ;;  %v949_v43 = vld [vmem:[#allocation5 + $0x10c0] sm:$0xff]  ;;  %v554_v44 = vld [vmem:[#allocation5 + $0x468] sm:$0xff] }
 0x18b   : > { %1827 = vmatprep.subr.mxu1 %v1116_v45  ;;  %1751 = vmatpush2.msra.mxu0 %v731_v46  ;;  %v938_v45 = vld [vmem:[#allocation5 + $0x1068] sm:$0xff]  ;;  %v553_v46 = vld [vmem:[#allocation5 + $0x460] sm:$0xff] }
 0x18c   : > { %1828 = vmatpush2.msra.mxu1 %v1115_v47  ;;  %1752 = vmatprep.subr.mxu0 %v720_v48  ;;  %v937_v47 = vld [vmem:[#allocation5 + $0x1060] sm:$0xff]  ;;  %v542_v48 = vld [vmem:[#allocation5 + $0x408] sm:$0xff] }
 0x18d   : > { %1829 = vmatprep.subr.mxu1 %v1104_v49  ;;  %1753 = vmatpush2.msra.mxu0 %v719_v50  ;;  %v926_v49 = vld [vmem:[#allocation5 + $0x1008] sm:$0xff]  ;;  %v541_v50 = vld [vmem:[#allocation5 + $0x400] sm:$0xff] }
 0x18e   : > { %1830 = vmatpush2.msra.mxu1 %v1103_v51  ;;  %1754 = vmatprep.subr.mxu0 %v708_v52  ;;  %v925_v51 = vld [vmem:[#allocation5 + $0x1000] sm:$0xff]  ;;  %v530_v52 = vld [vmem:[#allocation5 + $0x3a8] sm:$0xff] }
 0x18f   : > { %1831 = vmatprep.subr.mxu1 %v1092_v53  ;;  %1755 = vmatpush2.msra.mxu0 %v707_v54  ;;  %v914_v53 = vld [vmem:[#allocation5 + $0xfa8] sm:$0xff]  ;;  %v529_v54 = vld [vmem:[#allocation5 + $0x3a0] sm:$0xff] }
 0x190   : > { %1832 = vmatpush2.msra.mxu1 %v1091_v55  ;;  %1756 = vmatprep.subr.mxu0 %v696_v57  ;;  %v913_v55 = vld [vmem:[#allocation5 + $0xfa0] sm:$0xff]  ;;  %v518_v57 = vld [vmem:[#allocation5 + $0x348] sm:$0xff] }
 0x191   : > { %1833 = vmatprep.subr.mxu1 %v1080_v58  ;;  %1757 = vmatpush2.msra.mxu0 %v695_v60  ;;  %v902_v58 = vld [vmem:[#allocation5 + $0xf48] sm:$0xff]  ;;  %v517_v60 = vld [vmem:[#allocation5 + $0x340] sm:$0xff] }
 0x192   : > { %1834 = vmatpush2.msra.mxu1 %v1079_v61  ;;  %1758 = vmatprep.subr.mxu0 %v684_v0  ;;  %v901_v61 = vld [vmem:[#allocation5 + $0xf40] sm:$0xff]  ;;  %v506_v0 = vld [vmem:[#allocation5 + $0x2e8] sm:$0xff] }
 0x193   : > { %1835 = vmatprep.subr.mxu1 %v1068_v3  ;;  %1759 = vmatpush2.msra.mxu0 %v683_v6  ;;  %v890_v3 = vld [vmem:[#allocation5 + $0xee8] sm:$0xff]  ;;  %v505_v6 = vld [vmem:[#allocation5 + $0x2e0] sm:$0xff] }
 0x194   : > { %1836 = vmatpush2.msra.mxu1 %v1067_v7  ;;  %1760 = vmatprep.subr.mxu0 %v672_v8  ;;  %v889_v7 = vld [vmem:[#allocation5 + $0xee0] sm:$0xff]  ;;  %v494_v8 = vld [vmem:[#allocation5 + $0x288] sm:$0xff] }
 0x195   : > { %1837 = vmatprep.subr.mxu1 %v1056_v9  ;;  %1624 = vmatprep.mubr.f32.mxu0 %v7791_v14  ;;  %v878_v9 = vld [vmem:[#allocation5 + $0xe88] sm:$0xff] }
 0x196   : > { %1761 = vmatpush2.msra.mxu0 %v671_v10  ;;  %1838 = vmatpush2.msra.mxu1 %v1055_v11  ;;  %v493_v10 = vld [vmem:[#allocation5 + $0x280] sm:$0xff] }
 0x197   : > { %1625 = vmatmul.mubr.f32.gmra.mxu0 %v7795_v16  ;;  %1762 = vmatprep.subr.mxu0 %v660_v12  ;;  %v877_v11 = vld [vmem:[#allocation5 + $0xe80] sm:$0xff]  ;;  %v482_v12 = vld [vmem:[#allocation5 + $0x228] sm:$0xff] }
 0x198   : > { %1839 = vmatprep.subr.mxu1 %v1044_v13  ;;  %1701 = vmatprep.mubr.f32.mxu1 %v7799_v19  ;;  %v866_v13 = vld [vmem:[#allocation5 + $0xe28] sm:$0xff] }
 0x199   : > { %1763 = vmatpush2.msra.mxu0 %v659_v15  ;;  %1840 = vmatpush2.msra.mxu1 %v1043_v17  ;;  %v481_v15 = vld [vmem:[#allocation5 + $0x220] sm:$0xff] }
 0x19a   : > { %1764 = vmatprep.subr.mxu0 %v648_v18  ;;  %1702 = vmatmul.mubr.f32.gmra.mxu1 %v7803_v22  ;;  %v865_v17 = vld [vmem:[#allocation5 + $0xe20] sm:$0xff]  ;;  %v470_v18 = vld [vmem:[#allocation5 + $0x1c8] sm:$0xff] }
 0x19b   : > { %1841 = vmatprep.subr.mxu1 %v1032_v56  ;;  %1765 = vmatpush2.msra.mxu0 %v647_v59  ;;  %v854_v56 = vld [vmem:[#allocation5 + $0xdc8] sm:$0xff]  ;;  %v469_v59 = vld [vmem:[#allocation5 + $0x1c0] sm:$0xff] }
 0x19c   : > { %1842 = vmatpush2.msra.mxu1 %v1031_v20  ;;  %1766 = vmatprep.subr.mxu0 %v636_v62  ;;  %v853_v20 = vld [vmem:[#allocation5 + $0xdc0] sm:$0xff]  ;;  %v458_v62 = vld [vmem:[#allocation5 + $0x168] sm:$0xff] }
 0x19d   : > { %1843 = vmatprep.subr.mxu1 %v1020_v21  ;;  %1767 = vmatpush2.msra.mxu0 %v635_v24  ;;  %v842_v21 = vld [vmem:[#allocation5 + $0xd68] sm:$0xff]  ;;  %v457_v24 = vld [vmem:[#allocation5 + $0x160] sm:$0xff] }
 0x19e   : > { %1844 = vmatpush2.msra.mxu1 %v1019_v63  ;;  %1768 = vmatprep.subr.mxu0 %v624_v1  ;;  %v841_v63 = vld [vmem:[#allocation5 + $0xd60] sm:$0xff]  ;;  %v446_v1 = vld [vmem:[#allocation5 + $0x108] sm:$0xff] }
 0x19f   : > { %1845 = vmatprep.subr.mxu1 %v1008_v26  ;;  %1769 = vmatpush2.msra.mxu0 %v623_v27  ;;  %v830_v26 = vld [vmem:[#allocation5 + $0xd08] sm:$0xff]  ;;  %v445_v27 = vld [vmem:[#allocation5 + $0x100] sm:$0xff] }
 0x1a0   : > { %1846 = vmatpush2.msra.mxu1 %v1007_v28  ;;  %1770 = vmatprep.subr.mxu0 %v612_v5  ;;  %v829_v28 = vld [vmem:[#allocation5 + $0xd00] sm:$0xff]  ;;  %v434_v5 = vld [vmem:[#allocation5 + $0xa8] sm:$0xff] }
 0x1a1   : > { %1847 = vmatprep.subr.mxu1 %v996_v29  ;;  %1771 = vmatpush2.msra.mxu0 %v611_v30  ;;  %v818_v29 = vld [vmem:[#allocation5 + $0xca8] sm:$0xff]  ;;  %v433_v30 = vld [vmem:[#allocation5 + $0xa0] sm:$0xff] }
 0x1a2   : > { %1772 = vmatprep.mubr.f32.mxu0 %v7775_v4  ;;  %1848 = vmatpush2.msra.mxu1 %v995_v31  ;;  %v578_v4 = vld [vmem:[#allocation5 + $0x528] sm:$0xff]  ;;  %v817_v31 = vld [vmem:[#allocation5 + $0xca0] sm:$0xff] }
 0x1a3   : > { %1773 = vmatmul.mubr.f32.vlgmr.msra.gmra.mxu0 %v7779_v23  ;;  %1849 = vmatprep.mubr.f32.mxu1 %v7783_v25  ;;  %v577_v23 = vld [vmem:[#allocation5 + $0x520] sm:$0xff] }
 0x1a4   : > { %1862 = vmatprep.subr.mxu0 %v602_v32  ;;  %1939 = vmatprep.subr.mxu1 %v986_v33  ;;  %v961_v25 = vld [vmem:[#allocation5 + $0x1120] sm:$0xff]  ;;  %v422_v32 = vld [vmem:[#allocation5 + $0x48] sm:$0xff] }
 0x1a5   : > { %1850 = vmatmul.mubr.f32.vlgmr.msra.gmra.mxu1 %v7787_v2  ;;  %1863 = vmatpush1.msra.mxu0 %v601_v34  ;;  %v950_v2 = vld [vmem:[#allocation5 + $0x10c8] sm:$0xff]  ;;  %v421_v34 = vld [vmem:[#allocation5 + $0x40] sm:$0xff] }
 0x1a6   : > { %1940 = vmatpush1.msra.mxu1 %v985_v35  ;;  %1864 = vmatprep.subr.mxu0 %v590_v36  ;;  %v806_v33 = vld [vmem:[#allocation5 + $0xc48] sm:$0xff]  ;;  %v805_v35 = vld [vmem:[#allocation5 + $0xc40] sm:$0xff] }
 0x1a7   : > { %1941 = vmatprep.subr.mxu1 %v974_v37  ;;  %1778 = vmatprep.mubr.f32.mxu0 %v7791_v14  ;;  %v794_v36 = vld [vmem:[#allocation5 + $0xbe8] sm:$0xff] }
 0x1a8   : > { %1865 = vmatpush1.msra.mxu0 %v589_v38  ;;  %1942 = vmatpush1.msra.mxu1 %v973_v39  ;;  %v1178_v37 = vld [vmem:[#allocation5 + $0x17e8] sm:$0xff]  ;;  %v793_v38 = vld [vmem:[#allocation5 + $0xbe0] sm:$0xff] }
 0x1a9   : > { %1779 = vmatmul.mubr.f32.gmra.mxu0 %v7795_v16  ;;  %1866 = vmatprep.subr.mxu0 %v578_v4  ;;  %v1177_v39 = vld [vmem:[#allocation5 + $0x17e0] sm:$0xff]  ;;  %v782_v4 = vld [vmem:[#allocation5 + $0xb88] sm:$0xff] }
 0x1aa   : > { %1943 = vmatprep.subr.mxu1 %v962_v40  ;;  %1855 = vmatprep.mubr.f32.mxu1 %v7799_v19  ;;  %v1166_v40 = vld [vmem:[#allocation5 + $0x1788] sm:$0xff] }
 0x1ab   : > { %1867 = vmatpush1.msra.mxu0 %v577_v23  ;;  %1944 = vmatpush1.msra.mxu1 %v961_v25  ;;  %v781_v23 = vld [vmem:[#allocation5 + $0xb80] sm:$0xff] }
 0x1ac   : > { %1868 = vmatprep.subr.mxu0 %v566_v41  ;;  %1856 = vmatmul.mubr.f32.gmra.mxu1 %v7803_v22  ;;  %v1165_v25 = vld [vmem:[#allocation5 + $0x1780] sm:$0xff]  ;;  %v770_v41 = vld [vmem:[#allocation5 + $0xb28] sm:$0xff] }
 0x1ad   : > { %1945 = vmatprep.subr.mxu1 %v950_v2  ;;  %1869 = vmatpush1.msra.mxu0 %v565_v42  ;;  %v1154_v2 = vld [vmem:[#allocation5 + $0x1728] sm:$0xff]  ;;  %v769_v42 = vld [vmem:[#allocation5 + $0xb20] sm:$0xff] }
 0x1ae   : > { %1946 = vmatpush1.msra.mxu1 %v949_v43  ;;  %1870 = vmatprep.subr.mxu0 %v554_v44  ;;  %v1153_v43 = vld [vmem:[#allocation5 + $0x1720] sm:$0xff]  ;;  %v758_v44 = vld [vmem:[#allocation5 + $0xac8] sm:$0xff] }
 0x1af   : > { %1947 = vmatprep.subr.mxu1 %v938_v45  ;;  %1871 = vmatpush1.msra.mxu0 %v553_v46  ;;  %v1142_v45 = vld [vmem:[#allocation5 + $0x16c8] sm:$0xff]  ;;  %v757_v46 = vld [vmem:[#allocation5 + $0xac0] sm:$0xff] }
 0x1b0   : > { %1948 = vmatpush1.msra.mxu1 %v937_v47  ;;  %1872 = vmatprep.subr.mxu0 %v542_v48  ;;  %v1141_v47 = vld [vmem:[#allocation5 + $0x16c0] sm:$0xff]  ;;  %v746_v48 = vld [vmem:[#allocation5 + $0xa68] sm:$0xff] }
 0x1b1   : > { %1949 = vmatprep.subr.mxu1 %v926_v49  ;;  %1873 = vmatpush1.msra.mxu0 %v541_v50  ;;  %v1130_v49 = vld [vmem:[#allocation5 + $0x1668] sm:$0xff]  ;;  %v745_v50 = vld [vmem:[#allocation5 + $0xa60] sm:$0xff] }
 0x1b2   : > { %1950 = vmatpush1.msra.mxu1 %v925_v51  ;;  %1874 = vmatprep.subr.mxu0 %v530_v52  ;;  %v1129_v51 = vld [vmem:[#allocation5 + $0x1660] sm:$0xff]  ;;  %v734_v52 = vld [vmem:[#allocation5 + $0xa08] sm:$0xff] }
 0x1b3   : > { %1951 = vmatprep.subr.mxu1 %v914_v53  ;;  %1875 = vmatpush1.msra.mxu0 %v529_v54  ;;  %v1118_v53 = vld [vmem:[#allocation5 + $0x1608] sm:$0xff]  ;;  %v733_v54 = vld [vmem:[#allocation5 + $0xa00] sm:$0xff] }
 0x1b4   : > { %1952 = vmatpush1.msra.mxu1 %v913_v55  ;;  %1876 = vmatprep.subr.mxu0 %v518_v57  ;;  %v1117_v55 = vld [vmem:[#allocation5 + $0x1600] sm:$0xff]  ;;  %v722_v57 = vld [vmem:[#allocation5 + $0x9a8] sm:$0xff] }
 0x1b5   : > { %1953 = vmatprep.subr.mxu1 %v902_v58  ;;  %1877 = vmatpush1.msra.mxu0 %v517_v60  ;;  %v1106_v58 = vld [vmem:[#allocation5 + $0x15a8] sm:$0xff]  ;;  %v721_v60 = vld [vmem:[#allocation5 + $0x9a0] sm:$0xff] }
 0x1b6   : > { %1954 = vmatpush1.msra.mxu1 %v901_v61  ;;  %1878 = vmatprep.subr.mxu0 %v506_v0  ;;  %v1105_v61 = vld [vmem:[#allocation5 + $0x15a0] sm:$0xff]  ;;  %v710_v0 = vld [vmem:[#allocation5 + $0x948] sm:$0xff] }
 0x1b7   : > { %1955 = vmatprep.subr.mxu1 %v890_v3  ;;  %1879 = vmatpush1.msra.mxu0 %v505_v6  ;;  %v1094_v3 = vld [vmem:[#allocation5 + $0x1548] sm:$0xff]  ;;  %v709_v6 = vld [vmem:[#allocation5 + $0x940] sm:$0xff] }
 0x1b8   : > { %1956 = vmatpush1.msra.mxu1 %v889_v7  ;;  %1880 = vmatprep.subr.mxu0 %v494_v8  ;;  %v1093_v7 = vld [vmem:[#allocation5 + $0x1540] sm:$0xff]  ;;  %v698_v8 = vld [vmem:[#allocation5 + $0x8e8] sm:$0xff] }
 0x1b9   : > { %1957 = vmatprep.subr.mxu1 %v878_v9  ;;  %1881 = vmatpush1.msra.mxu0 %v493_v10  ;;  %v1082_v9 = vld [vmem:[#allocation5 + $0x14e8] sm:$0xff]  ;;  %v697_v10 = vld [vmem:[#allocation5 + $0x8e0] sm:$0xff] }
 0x1ba   : > { %1958 = vmatpush1.msra.mxu1 %v877_v11  ;;  %1882 = vmatprep.subr.mxu0 %v482_v12  ;;  %v1081_v11 = vld [vmem:[#allocation5 + $0x14e0] sm:$0xff]  ;;  %v686_v12 = vld [vmem:[#allocation5 + $0x888] sm:$0xff] }
 0x1bb   : > { %1959 = vmatprep.subr.mxu1 %v866_v13  ;;  %1883 = vmatpush1.msra.mxu0 %v481_v15  ;;  %v1070_v13 = vld [vmem:[#allocation5 + $0x1488] sm:$0xff]  ;;  %v685_v15 = vld [vmem:[#allocation5 + $0x880] sm:$0xff] }
 0x1bc   : > { %1960 = vmatpush1.msra.mxu1 %v865_v17  ;;  %1884 = vmatprep.subr.mxu0 %v470_v18  ;;  %v1069_v17 = vld [vmem:[#allocation5 + $0x1480] sm:$0xff]  ;;  %v674_v18 = vld [vmem:[#allocation5 + $0x828] sm:$0xff] }
 0x1bd   : > { %1961 = vmatprep.subr.mxu1 %v854_v56  ;;  %1885 = vmatpush1.msra.mxu0 %v469_v59  ;;  %v1058_v56 = vld [vmem:[#allocation5 + $0x1428] sm:$0xff]  ;;  %v673_v59 = vld [vmem:[#allocation5 + $0x820] sm:$0xff] }
 0x1be   : > { %1962 = vmatpush1.msra.mxu1 %v853_v20  ;;  %1886 = vmatprep.subr.mxu0 %v458_v62  ;;  %v1057_v20 = vld [vmem:[#allocation5 + $0x1420] sm:$0xff]  ;;  %v662_v62 = vld [vmem:[#allocation5 + $0x7c8] sm:$0xff] }
 0x1bf   : > { %1963 = vmatprep.subr.mxu1 %v842_v21  ;;  %1887 = vmatpush1.msra.mxu0 %v457_v24  ;;  %v1046_v21 = vld [vmem:[#allocation5 + $0x13c8] sm:$0xff]  ;;  %v661_v24 = vld [vmem:[#allocation5 + $0x7c0] sm:$0xff] }
 0x1c0   : > { %1964 = vmatpush1.msra.mxu1 %v841_v63  ;;  %1888 = vmatprep.subr.mxu0 %v446_v1  ;;  %v1045_v63 = vld [vmem:[#allocation5 + $0x13c0] sm:$0xff]  ;;  %v650_v1 = vld [vmem:[#allocation5 + $0x768] sm:$0xff] }
 0x1c1   : > { %1965 = vmatprep.subr.mxu1 %v830_v26  ;;  %1889 = vmatpush1.msra.mxu0 %v445_v27  ;;  %v1034_v26 = vld [vmem:[#allocation5 + $0x1368] sm:$0xff]  ;;  %v649_v27 = vld [vmem:[#allocation5 + $0x760] sm:$0xff] }
 0x1c2   : > { %1966 = vmatpush1.msra.mxu1 %v829_v28  ;;  %1890 = vmatprep.subr.mxu0 %v434_v5  ;;  %v1033_v28 = vld [vmem:[#allocation5 + $0x1360] sm:$0xff]  ;;  %v638_v5 = vld [vmem:[#allocation5 + $0x708] sm:$0xff] }
 0x1c3   : > { %1967 = vmatprep.subr.mxu1 %v818_v29  ;;  %1891 = vmatpush1.msra.mxu0 %v433_v30  ;;  %v1022_v29 = vld [vmem:[#allocation5 + $0x1308] sm:$0xff]  ;;  %v637_v30 = vld [vmem:[#allocation5 + $0x700] sm:$0xff] }
 0x1c4   : > { %1968 = vmatpush1.msra.mxu1 %v817_v31  ;;  %1892 = vmatprep.subr.mxu0 %v422_v32  ;;  %v1021_v31 = vld [vmem:[#allocation5 + $0x1300] sm:$0xff]  ;;  %v626_v32 = vld [vmem:[#allocation5 + $0x6a8] sm:$0xff] }
 0x1c5   : > { %1969 = vmatprep.subr.mxu1 %v806_v33  ;;  %1893 = vmatpush1.msra.mxu0 %v421_v34  ;;  %v1010_v33 = vld [vmem:[#allocation5 + $0x12a8] sm:$0xff]  ;;  %v625_v34 = vld [vmem:[#allocation5 + $0x6a0] sm:$0xff] }
 0x1c6   : > { %1970 = vmatpush1.msra.mxu1 %v805_v35  ;;  %1894 = vmatprep.subr.mxu0 %v794_v36  ;;  %v1009_v35 = vld [vmem:[#allocation5 + $0x12a0] sm:$0xff]  ;;  %v614_v36 = vld [vmem:[#allocation5 + $0x648] sm:$0xff] }
 0x1c7   : > { %1971 = vmatprep.subr.mxu1 %v1178_v37  ;;  %1895 = vmatpush2.msra.mxu0 %v793_v38  ;;  %v998_v37 = vld [vmem:[#allocation5 + $0x1248] sm:$0xff]  ;;  %v613_v38 = vld [vmem:[#allocation5 + $0x640] sm:$0xff] }
 0x1c8   : > { %1972 = vmatpush2.msra.mxu1 %v1177_v39  ;;  %1896 = vmatprep.subr.mxu0 %v782_v4  ;;  %v997_v39 = vld [vmem:[#allocation5 + $0x1240] sm:$0xff]  ;;  %v604_v4 = vld [vmem:[#allocation5 + $0x5f8] sm:$0xff] }
 0x1c9   : > { %1973 = vmatprep.subr.mxu1 %v1166_v40  ;;  %1897 = vmatpush2.msra.mxu0 %v781_v23  ;;  %v7815_v40 = vld [vmem:[%s7716_s10 + $0x8] sm:$0xff]  ;;  %v988_v23 = vld [vmem:[#allocation5 + $0x11f8] sm:$0xff] }
 0x1ca   : > { %1974 = vmatpush2.msra.mxu1 %v1165_v25  ;;  %1898 = vmatprep.subr.mxu0 %v770_v41  ;;  %v7819_v25 = vld [vmem:[%s7716_s10] sm:$0xff]  ;;  %v603_v41 = vld [vmem:[#allocation5 + $0x5f0] sm:$0xff] }
 0x1cb   : > { %1975 = vmatprep.subr.mxu1 %v1154_v2  ;;  %1899 = vmatpush2.msra.mxu0 %v769_v42  ;;  %v987_v2 = vld [vmem:[#allocation5 + $0x11f0] sm:$0xff]  ;;  %v7823_v42 = vld [vmem:[%s7716_s10 + $0x18] sm:$0xff] }
 0x1cc   : > { %1976 = vmatpush2.msra.mxu1 %v1153_v43  ;;  %1900 = vmatprep.subr.mxu0 %v758_v44  ;;  %v592_v43 = vld [vmem:[#allocation5 + $0x598] sm:$0xff] }
 0x1cd   : > { %1977 = vmatprep.subr.mxu1 %v1142_v45  ;;  %1901 = vmatpush2.msra.mxu0 %v757_v46  ;;  %v976_v44 = vld [vmem:[#allocation5 + $0x1198] sm:$0xff]  ;;  %v7827_v45 = vld [vmem:[%s7716_s10 + $0x10] sm:$0xff] }
 0x1ce   : > { %1978 = vmatpush2.msra.mxu1 %v1141_v47  ;;  %1902 = vmatprep.subr.mxu0 %v746_v48  ;;  %v591_v46 = vld [vmem:[#allocation5 + $0x590] sm:$0xff]  ;;  %v580_v48 = vld [vmem:[#allocation5 + $0x538] sm:$0xff] }
 0x1cf   : > { %1979 = vmatprep.subr.mxu1 %v1130_v49  ;;  %1903 = vmatpush2.msra.mxu0 %v745_v50  ;;  %v975_v47 = vld [vmem:[#allocation5 + $0x1190] sm:$0xff]  ;;  %v964_v49 = vld [vmem:[#allocation5 + $0x1138] sm:$0xff] }
 0x1d0   : > { %1980 = vmatpush2.msra.mxu1 %v1129_v51  ;;  %1904 = vmatprep.subr.mxu0 %v734_v52  ;;  %v579_v50 = vld [vmem:[#allocation5 + $0x530] sm:$0xff]  ;;  %v568_v52 = vld [vmem:[#allocation5 + $0x4d8] sm:$0xff] }
 0x1d1   : > { %1981 = vmatprep.subr.mxu1 %v1118_v53  ;;  %1905 = vmatpush2.msra.mxu0 %v733_v54  ;;  %v963_v51 = vld [vmem:[#allocation5 + $0x1130] sm:$0xff]  ;;  %v952_v53 = vld [vmem:[#allocation5 + $0x10d8] sm:$0xff] }
 0x1d2   : > { %1982 = vmatpush2.msra.mxu1 %v1117_v55  ;;  %1906 = vmatprep.subr.mxu0 %v722_v57  ;;  %v567_v54 = vld [vmem:[#allocation5 + $0x4d0] sm:$0xff]  ;;  %v556_v57 = vld [vmem:[#allocation5 + $0x478] sm:$0xff] }
 0x1d3   : > { %1983 = vmatprep.subr.mxu1 %v1106_v58  ;;  %1907 = vmatpush2.msra.mxu0 %v721_v60  ;;  %v951_v55 = vld [vmem:[#allocation5 + $0x10d0] sm:$0xff]  ;;  %v940_v58 = vld [vmem:[#allocation5 + $0x1078] sm:$0xff] }
 0x1d4   : > { %1984 = vmatpush2.msra.mxu1 %v1105_v61  ;;  %1908 = vmatprep.subr.mxu0 %v710_v0  ;;  %v939_v60 = vld [vmem:[#allocation5 + $0x1070] sm:$0xff]  ;;  %v928_v61 = vld [vmem:[#allocation5 + $0x1018] sm:$0xff] }
 0x1d5   : > { %1985 = vmatprep.subr.mxu1 %v1094_v3  ;;  %1909 = vmatpush2.msra.mxu0 %v709_v6  ;;  %v543_v0 = vld [vmem:[#allocation5 + $0x410] sm:$0xff]  ;;  %v532_v3 = vld [vmem:[#allocation5 + $0x3b8] sm:$0xff] }
 0x1d6   : > { %1986 = vmatpush2.msra.mxu1 %v1093_v7  ;;  %1910 = vmatprep.subr.mxu0 %v698_v8  ;;  %v916_v6 = vld [vmem:[#allocation5 + $0xfb8] sm:$0xff]  ;;  %v531_v7 = vld [vmem:[#allocation5 + $0x3b0] sm:$0xff] }
 0x1d7   : > { %1987 = vmatprep.subr.mxu1 %v1082_v9  ;;  %1911 = vmatpush2.msra.mxu0 %v697_v10  ;;  %v915_v8 = vld [vmem:[#allocation5 + $0xfb0] sm:$0xff]  ;;  %v904_v9 = vld [vmem:[#allocation5 + $0xf58] sm:$0xff] }
 0x1d8   : > { %1988 = vmatpush2.msra.mxu1 %v1081_v11  ;;  %1912 = vmatprep.subr.mxu0 %v686_v12  ;;  %v519_v10 = vld [vmem:[#allocation5 + $0x350] sm:$0xff]  ;;  %v508_v12 = vld [vmem:[#allocation5 + $0x2f8] sm:$0xff] }
 0x1d9   : > { %1989 = vmatprep.subr.mxu1 %v1070_v13  ;;  %1913 = vmatpush2.msra.mxu0 %v685_v15  ;;  %v903_v11 = vld [vmem:[#allocation5 + $0xf50] sm:$0xff]  ;;  %v892_v13 = vld [vmem:[#allocation5 + $0xef8] sm:$0xff] }
 0x1da   : > { %1990 = vmatpush2.msra.mxu1 %v1069_v17  ;;  %1914 = vmatprep.subr.mxu0 %v674_v18  ;;  %v507_v15 = vld [vmem:[#allocation5 + $0x2f0] sm:$0xff]  ;;  %v496_v18 = vld [vmem:[#allocation5 + $0x298] sm:$0xff] }
 0x1db   : > { %1991 = vmatprep.subr.mxu1 %v1058_v56  ;;  %1915 = vmatpush2.msra.mxu0 %v673_v59  ;;  %v891_v17 = vld [vmem:[#allocation5 + $0xef0] sm:$0xff]  ;;  %v880_v56 = vld [vmem:[#allocation5 + $0xe98] sm:$0xff] }
 0x1dc   : > { %1992 = vmatpush2.msra.mxu1 %v1057_v20  ;;  %1916 = vmatprep.subr.mxu0 %v662_v62  ;;  %v495_v59 = vld [vmem:[#allocation5 + $0x290] sm:$0xff]  ;;  %v484_v62 = vld [vmem:[#allocation5 + $0x238] sm:$0xff] }
 0x1dd   : > { %1993 = vmatprep.subr.mxu1 %v1046_v21  ;;  %1917 = vmatpush2.msra.mxu0 %v661_v24  ;;  %v879_v20 = vld [vmem:[#allocation5 + $0xe90] sm:$0xff]  ;;  %v868_v21 = vld [vmem:[#allocation5 + $0xe38] sm:$0xff] }
 0x1de   : > { %1994 = vmatpush2.msra.mxu1 %v1045_v63  ;;  %1918 = vmatprep.subr.mxu0 %v650_v1  ;;  %v483_v24 = vld [vmem:[#allocation5 + $0x230] sm:$0xff]  ;;  %v472_v1 = vld [vmem:[#allocation5 + $0x1d8] sm:$0xff] }
 0x1df   : > { %1995 = vmatprep.subr.mxu1 %v1034_v26  ;;  %1919 = vmatpush2.msra.mxu0 %v649_v27  ;;  %v867_v63 = vld [vmem:[#allocation5 + $0xe30] sm:$0xff]  ;;  %v856_v26 = vld [vmem:[#allocation5 + $0xdd8] sm:$0xff] }
 0x1e0   : > { %1996 = vmatpush2.msra.mxu1 %v1033_v28  ;;  %1920 = vmatprep.subr.mxu0 %v638_v5  ;;  %v471_v27 = vld [vmem:[#allocation5 + $0x1d0] sm:$0xff]  ;;  %v460_v5 = vld [vmem:[#allocation5 + $0x178] sm:$0xff] }
 0x1e1   : > { %1997 = vmatprep.subr.mxu1 %v1022_v29  ;;  %1921 = vmatpush2.msra.mxu0 %v637_v30  ;;  %v855_v28 = vld [vmem:[#allocation5 + $0xdd0] sm:$0xff]  ;;  %v844_v29 = vld [vmem:[#allocation5 + $0xd78] sm:$0xff] }
 0x1e2   : > { %1998 = vmatpush2.msra.mxu1 %v1021_v31  ;;  %1922 = vmatprep.subr.mxu0 %v626_v32  ;;  %v459_v30 = vld [vmem:[#allocation5 + $0x170] sm:$0xff]  ;;  %v448_v32 = vld [vmem:[#allocation5 + $0x118] sm:$0xff] }
 0x1e3   : > { %1999 = vmatprep.subr.mxu1 %v1010_v33  ;;  %1923 = vmatpush2.msra.mxu0 %v625_v34  ;;  %v843_v31 = vld [vmem:[#allocation5 + $0xd70] sm:$0xff]  ;;  %v832_v33 = vld [vmem:[#allocation5 + $0xd18] sm:$0xff] }
 0x1e4   : > { %2000 = vmatpush2.msra.mxu1 %v1009_v35  ;;  %1924 = vmatprep.subr.mxu0 %v614_v36  ;;  %v447_v34 = vld [vmem:[#allocation5 + $0x110] sm:$0xff]  ;;  %v436_v36 = vld [vmem:[#allocation5 + $0xb8] sm:$0xff] }
 0x1e5   : > { %2001 = vmatprep.subr.mxu1 %v998_v37  ;;  %1925 = vmatpush2.msra.mxu0 %v613_v38  ;;  %v831_v35 = vld [vmem:[#allocation5 + $0xd10] sm:$0xff]  ;;  %v820_v37 = vld [vmem:[#allocation5 + $0xcb8] sm:$0xff] }
 0x1e6   : > { %1926 = vmatprep.mubr.f32.mxu0 %v7815_v40  ;;  %2002 = vmatpush2.msra.mxu1 %v997_v39  ;;  %v435_v38 = vld [vmem:[#allocation5 + $0xb0] sm:$0xff] }
 0x1e7   : > { %1927 = vmatmul.mubr.f32.vlgmr.msra.gmra.mxu0 %v7819_v25  ;;  %2003 = vmatprep.mubr.f32.mxu1 %v7823_v42  ;;  %v819_v39 = vld [vmem:[#allocation5 + $0xcb0] sm:$0xff] }
 0x1e8   : > { %2016 = vmatprep.subr.mxu0 %v604_v4  ;;  %2093 = vmatprep.subr.mxu1 %v988_v23  ;;  %v424_v4 = vld [vmem:[#allocation5 + $0x58] sm:$0xff] }
 0x1e9   : > { %2004 = vmatmul.mubr.f32.vlgmr.msra.gmra.mxu1 %v7827_v45  ;;  %2017 = vmatpush1.msra.mxu0 %v603_v41  ;;  %v808_v23 = vld [vmem:[#allocation5 + $0xc58] sm:$0xff]  ;;  %v423_v41 = vld [vmem:[#allocation5 + $0x50] sm:$0xff] }
 0x1ea   : > { %2094 = vmatpush1.msra.mxu1 %v987_v2  ;;  %2018 = vmatprep.subr.mxu0 %v592_v43  ;;  %v807_v2 = vld [vmem:[#allocation5 + $0xc50] sm:$0xff]  ;;  %v796_v43 = vld [vmem:[#allocation5 + $0xbf8] sm:$0xff] }
 0x1eb   : > { %2095 = vmatprep.subr.mxu1 %v976_v44  ;;  %1932 = vmatprep.mubr.f32.mxu0 %v7791_v14  ;;  %v555_v14 = vld [vmem:[#allocation5 + $0x470] sm:$0xff]  ;;  %v1180_v44 = vld [vmem:[#allocation5 + $0x17f8] sm:$0xff] }
 0x1ec   : > { %2019 = vmatpush1.msra.mxu0 %v591_v46  ;;  %2096 = vmatpush1.msra.mxu1 %v975_v47  ;;  %v795_v46 = vld [vmem:[#allocation5 + $0xbf0] sm:$0xff] }
 0x1ed   : > { %1933 = vmatmul.mubr.f32.gmra.mxu0 %v7795_v16  ;;  %2020 = vmatprep.subr.mxu0 %v580_v48  ;;  %v544_v16 = vld [vmem:[#allocation5 + $0x418] sm:$0xff]  ;;  %v1179_v47 = vld [vmem:[#allocation5 + $0x17f0] sm:$0xff] }
 0x1ee   : > { %2097 = vmatprep.subr.mxu1 %v964_v49  ;;  %2009 = vmatprep.mubr.f32.mxu1 %v7799_v19  ;;  %v927_v19 = vld [vmem:[#allocation5 + $0x1010] sm:$0xff]  ;;  %v784_v48 = vld [vmem:[#allocation5 + $0xb98] sm:$0xff] }
 0x1ef   : > { %2021 = vmatpush1.msra.mxu0 %v579_v50  ;;  %2098 = vmatpush1.msra.mxu1 %v963_v51  ;;  %v1168_v49 = vld [vmem:[#allocation5 + $0x1798] sm:$0xff]  ;;  %v783_v50 = vld [vmem:[#allocation5 + $0xb90] sm:$0xff] }
 0x1f0   : > { %2022 = vmatprep.subr.mxu0 %v568_v52  ;;  %2010 = vmatmul.mubr.f32.gmra.mxu1 %v7803_v22  ;;  %v520_v22 = vld [vmem:[#allocation5 + $0x358] sm:$0xff]  ;;  %v1167_v51 = vld [vmem:[#allocation5 + $0x1790] sm:$0xff] }
 0x1f1   : > { %2099 = vmatprep.subr.mxu1 %v952_v53  ;;  %2023 = vmatpush1.msra.mxu0 %v567_v54  ;;  %v772_v52 = vld [vmem:[#allocation5 + $0xb38] sm:$0xff]  ;;  %v771_v54 = vld [vmem:[#allocation5 + $0xb30] sm:$0xff] }
 0x1f2   : > { %2100 = vmatpush1.msra.mxu1 %v951_v55  ;;  %2024 = vmatprep.subr.mxu0 %v556_v57  ;;  %v1156_v53 = vld [vmem:[#allocation5 + $0x1738] sm:$0xff]  ;;  %v1155_v55 = vld [vmem:[#allocation5 + $0x1730] sm:$0xff] }
 0x1f3   : > { %2101 = vmatprep.subr.mxu1 %v940_v58  ;;  %2025 = vmatpush1.msra.mxu0 %v555_v14  ;;  %v760_v57 = vld [vmem:[#allocation5 + $0xad8] sm:$0xff]  ;;  %v759_v14 = vld [vmem:[#allocation5 + $0xad0] sm:$0xff] }
 0x1f4   : > { %2102 = vmatpush1.msra.mxu1 %v939_v60  ;;  %2026 = vmatprep.subr.mxu0 %v544_v16  ;;  %v1144_v58 = vld [vmem:[#allocation5 + $0x16d8] sm:$0xff]  ;;  %v1143_v60 = vld [vmem:[#allocation5 + $0x16d0] sm:$0xff]  ;;  %v7834_v16 = vpop.f32.mrf.mxu0 }
 0x1f5   : > { %2103 = vmatprep.subr.mxu1 %v928_v61  ;;  %2027 = vmatpush1.msra.mxu0 %v543_v0  ;;  %v748_v61 = vld [vmem:[#allocation5 + $0xa78] sm:$0xff] }
 0x1f6   : > { %2104 = vmatpush1.msra.mxu1 %v927_v19  ;;  %2028 = vmatprep.subr.mxu0 %v532_v3  ;;  %v1132_v0 = vld [vmem:[#allocation5 + $0x1678] sm:$0xff]  ;;  %v747_v19 = vld [vmem:[#allocation5 + $0xa70] sm:$0xff] }
 0x1f7   : > { %2105 = vmatprep.subr.mxu1 %v916_v6  ;;  %2029 = vmatpush1.msra.mxu0 %v531_v7  ;;  %v1131_v3 = vld [vmem:[#allocation5 + $0x1670] sm:$0xff]  ;;  %v736_v6 = vld [vmem:[#allocation5 + $0xa18] sm:$0xff] }
 0x1f8   : > { %2106 = vmatpush1.msra.mxu1 %v915_v8  ;;  %2030 = vmatprep.subr.mxu0 %v520_v22  ;;  %v1120_v7 = vld [vmem:[#allocation5 + $0x1618] sm:$0xff]  ;;  %v735_v8 = vld [vmem:[#allocation5 + $0xa10] sm:$0xff] }
 0x1f9   : > { %2107 = vmatprep.subr.mxu1 %v904_v9  ;;  %2031 = vmatpush1.msra.mxu0 %v519_v10  ;;  %v1119_v22 = vld [vmem:[#allocation5 + $0x1610] sm:$0xff]  ;;  %v1186_v9 = vlaneseq  ;;  %v7836_v10 = vpop.f32.mrf.mxu1 }
 0x1fa   : > { %2108 = vmatpush1.msra.mxu1 %v903_v11  ;;  %2032 = vmatprep.subr.mxu0 %v508_v12  ;;  %v7838_v11 = vpop.f32.mrf.mxu0  ;;  %v724_v12 = vld [vmem:[#allocation5 + $0x9b8] sm:$0xff] }
 0x1fb   : > { %2109 = vmatprep.subr.mxu1 %v892_v13  ;;  %2033 = vmatpush1.msra.mxu0 %v507_v15  ;;  %v1108_v13 = vld [vmem:[#allocation5 + $0x15b8] sm:$0xff]  ;;  %v723_v15 = vld [vmem:[#allocation5 + $0x9b0] sm:$0xff] }
 0x1fc   : > { %2110 = vmatpush1.msra.mxu1 %v891_v17  ;;  %2034 = vmatprep.subr.mxu0 %v496_v18  ;;  %v1107_v17 = vld [vmem:[#allocation5 + $0x15b0] sm:$0xff]  ;;  %v7840_v18 = vpop.f32.mrf.mxu0 }
 0x1fd   : > { %2111 = vmatprep.subr.mxu1 %v880_v56  ;;  %2035 = vmatpush1.msra.mxu0 %v495_v59  ;;  %v712_v56 = vld [vmem:[#allocation5 + $0x958] sm:$0xff] }
 0x1fe   : > { %2112 = vmatpush1.msra.mxu1 %v879_v20  ;;  %2036 = vmatprep.subr.mxu0 %v484_v62  ;;  %v1096_v59 = vld [vmem:[#allocation5 + $0x1558] sm:$0xff]  ;;  %v711_v20 = vld [vmem:[#allocation5 + $0x950] sm:$0xff] }
 0x1ff   : > { %2113 = vmatprep.subr.mxu1 %v868_v21  ;;  %2037 = vmatpush1.msra.mxu0 %v483_v24  ;;  %v1095_v62 = vld [vmem:[#allocation5 + $0x1550] sm:$0xff]  ;;  %v7842_v21 = vshrl.u32 %v1186_v9, 7  ;;  %v7844_v24 = vpop.f32.mrf.mxu1 }
 0x200   : > { %2114 = vmatpush1.msra.mxu1 %v867_v63  ;;  %2038 = vmatprep.subr.mxu0 %v472_v1  ;;  %v700_v63 = vld [vmem:[#allocation5 + $0x8f8] sm:$0xff] }
 0x201   : > { %2115 = vmatprep.subr.mxu1 %v856_v26  ;;  %2039 = vmatpush1.msra.mxu0 %v471_v27  ;;  %v1084_v1 = vld [vmem:[#allocation5 + $0x14f8] sm:$0xff]  ;;  %v699_v26 = vld [vmem:[#allocation5 + $0x8f0] sm:$0xff] }
 0x202   : > { %2116 = vmatpush1.msra.mxu1 %v855_v28  ;;  %2040 = vmatprep.subr.mxu0 %v460_v5  ;;  %v1083_v27 = vld [vmem:[#allocation5 + $0x14f0] sm:$0xff]  ;;  %v7847_v28 = vsub.s32 1, %v7842_v21  ;;  %v7849_v5 = vpop.f32.mrf.mxu0 }
 0x203   : > { %2117 = vmatprep.subr.mxu1 %v844_v29  ;;  %2041 = vmatpush1.msra.mxu0 %v459_v30  ;;  %v7851_v29 = vpop.f32.mrf.mxu1  ;;  %v688_v30 = vld [vmem:[#allocation5 + $0x898] sm:$0xff] }
 0x204   : > { %2118 = vmatpush1.msra.mxu1 %v843_v31  ;;  %2042 = vmatprep.subr.mxu0 %v448_v32  ;;  %10194 = vst [vmem:[#allocation20_spill] sm:$0xff] %v7847_v28  ;;  %v1072_v31 = vld [vmem:[#allocation5 + $0x1498] sm:$0xff]  ;;  %v7854_v32 = vsub.s32 3, %v7842_v21 }
 0x205   : > { %2119 = vmatprep.subr.mxu1 %v832_v33  ;;  %2043 = vmatpush1.msra.mxu0 %v447_v34  ;;  %v687_v33 = vld [vmem:[#allocation5 + $0x890] sm:$0xff] }
 0x206   : > { %2120 = vmatpush1.msra.mxu1 %v831_v35  ;;  %2044 = vmatprep.subr.mxu0 %v436_v36  ;;  %10195 = vst [vmem:[#allocation21_spill] sm:$0xff] %v7854_v32  ;;  %v1071_v34 = vld [vmem:[#allocation5 + $0x1490] sm:$0xff]  ;;  %v7856_v35 = vpop.f32.mrf.mxu0  ;;  %v676_v36 = vld [vmem:[#allocation5 + $0x838] sm:$0xff] }
 0x207   : > { %2121 = vmatprep.subr.mxu1 %v820_v37  ;;  %2045 = vmatpush1.msra.mxu0 %v435_v38  ;;  %v1060_v37 = vld [vmem:[#allocation5 + $0x1438] sm:$0xff] }
 0x208   : > { %2122 = vmatpush1.msra.mxu1 %v819_v39  ;;  %2046 = vmatprep.subr.mxu0 %v424_v4  ;;  %v7858_v38 = vld [vmem:[#allocation7] ss:$4 sm:$0xff] }
 0x209   : > { %2123 = vmatprep.subr.mxu1 %v808_v23  ;;  %2047 = vmatpush1.msra.mxu0 %v423_v41  ;;  %v675_v39 = vld [vmem:[#allocation5 + $0x830] sm:$0xff]  ;;  %v7862_v23 = vrot.slane %v7858_v38, %v7847_v28  ;;  %v7864_v41 = vpop.f32.mrf.mxu1 }
 0x20a   : > { %2124 = vmatpush1.msra.mxu1 %v807_v2  ;;  %2048 = vmatprep.subr.mxu0 %v796_v43  ;;  %v1059_v4 = vld [vmem:[#allocation5 + $0x1430] sm:$0xff]  ;;  %v664_v2 = vld [vmem:[#allocation5 + $0x7d8] sm:$0xff] }
 0x20b   : > { %2125 = vmatprep.subr.mxu1 %v1180_v44  ;;  %2049 = vmatpush2.msra.mxu0 %v795_v46  ;;  %v1048_v43 = vld [vmem:[#allocation5 + $0x13d8] sm:$0xff]  ;;  %v7868_v44 = vrot.slane %v7858_v38, %v7854_v32  ;;  %v663_v46 = vld [vmem:[#allocation5 + $0x7d0] sm:$0xff] }
 0x20c   : > { %2126 = vmatpush2.msra.mxu1 %v1179_v47  ;;  %2050 = vmatprep.subr.mxu0 %v784_v48  ;;  %v1047_v47 = vld [vmem:[#allocation5 + $0x13d0] sm:$0xff]  ;;  %v7870_v48 = vpop.f32.mrf.mxu1 }
 0x20d   : > { %2127 = vmatprep.subr.mxu1 %v1168_v49  ;;  %2051 = vmatpush2.msra.mxu0 %v783_v50  ;;  %v1468_v49 = vpop.f32.mrf.mxu0  ;;  %v652_v50 = vld [vmem:[#allocation5 + $0x778] sm:$0xff] }
 0x20e   : > { %2128 = vmatpush2.msra.mxu1 %v1167_v51  ;;  %2052 = vmatprep.subr.mxu0 %v772_v52  ;;  %v1036_v51 = vld [vmem:[#allocation5 + $0x1378] sm:$0xff]  ;;  %v651_v52 = vld [vmem:[#allocation5 + $0x770] sm:$0xff] }
 0x20f   : > { %2129 = vmatprep.subr.mxu1 %v1156_v53  ;;  %2053 = vmatpush2.msra.mxu0 %v771_v54  ;;  %v1035_v53 = vld [vmem:[#allocation5 + $0x1370] sm:$0xff]  ;;  %v1315_v54 = vadd.f32 %v7838_v11, %v7862_v23 }
 0x210   : > { %2130 = vmatpush2.msra.mxu1 %v1155_v55  ;;  %2054 = vmatprep.subr.mxu0 %v760_v57  ;;  %v640_v55 = vld [vmem:[#allocation5 + $0x718] sm:$0xff]  ;;  %v615_v11 = vld [vmem:[#allocation5 + $0x650] sm:$0xff] }
 0x211   : > { %2131 = vmatprep.subr.mxu1 %v1144_v58  ;;  %2055 = vmatpush2.msra.mxu0 %v759_v14  ;;  %v1024_v57 = vld [vmem:[#allocation5 + $0x1318] sm:$0xff]  ;;  %v1469_v58 = vadd.f32 %v1468_v49, %v7868_v44  ;;  %v639_v14 = vld [vmem:[#allocation5 + $0x710] sm:$0xff]  ;;  %v2392_v49 = vld [vmem:[%s10003_s3 + $0x1e0] sm:$0xff] }
 0x212   : > { %2132 = vmatpush2.msra.mxu1 %v1143_v60  ;;  %2056 = vmatprep.subr.mxu0 %v748_v61  ;;  %v1023_v60 = vld [vmem:[#allocation5 + $0x1310] sm:$0xff]  ;;  %v1545_v61 = vpop.f32.mrf.mxu1 }
 0x213   : > { %2133 = vmatprep.subr.mxu1 %v1132_v0  ;;  %2057 = vmatpush2.msra.mxu0 %v747_v19  ;;  %v628_v0 = vld [vmem:[#allocation5 + $0x6b8] sm:$0xff]  ;;  %v1546_v9 = vadd.f32 %v1545_v61, %v1469_v58  ;;  %v2390_v61 = vld [vmem:[%s10003_s3 + $0x1d0] sm:$0xff] }
 0x214   : > { %2134 = vmatpush2.msra.mxu1 %v1131_v3  ;;  %2058 = vmatprep.subr.mxu0 %v736_v6  ;;  %v1012_v19 = vld [vmem:[#allocation5 + $0x12b8] sm:$0xff]  ;;  %v627_v3 = vld [vmem:[#allocation5 + $0x6b0] sm:$0xff] }
 0x215   : > { %2135 = vmatprep.subr.mxu1 %v1120_v7  ;;  %2059 = vmatpush2.msra.mxu0 %v735_v8  ;;  %v1011_v6 = vld [vmem:[#allocation5 + $0x12b0] sm:$0xff]  ;;  %v1392_v7 = vadd.f32 %v7844_v24, %v1315_v54  ;;  %v616_v8 = vld [vmem:[#allocation5 + $0x658] sm:$0xff]  ;;  %v7957_v54 = vsub.s32 0, %v7842_v21 }
 0x216   : > { %2136 = vmatpush2.msra.mxu1 %v1119_v22  ;;  %2060 = vmatprep.subr.mxu0 %v724_v12  ;;  %v1000_v22 = vld [vmem:[#allocation5 + $0x1258] sm:$0xff]  ;;  %v999_v12 = vld [vmem:[#allocation5 + $0x1250] sm:$0xff] }
 0x217   : > { %2137 = vmatprep.subr.mxu1 %v1108_v13  ;;  %2061 = vmatpush2.msra.mxu0 %v723_v15  ;;  %v7876_v13 = vld [vmem:[#allocation7 + $0x1] ss:$4 sm:$0xff]  ;;  %v2199_v15 = vmin.f32 %v1392_v7, 0.0  ;;  %10198 = vst [vmem:[#allocation24_spill] sm:$0xff] %v7957_v54 }
 0x218   : > { %2138 = vmatpush2.msra.mxu1 %v1107_v17  ;;  %2062 = vmatprep.subr.mxu0 %v712_v56  ;;  %v7880_v17 = vrot.slane %v7876_v13, %v7847_v28  ;;  %v2363_v56 = vld [vmem:[%s10003_s3 + $0xf8] sm:$0xff] }
 0x219   : > { %2139 = vmatprep.subr.mxu1 %v1096_v59  ;;  %2063 = vmatpush2.msra.mxu0 %v711_v20  ;;  %v2395_v59 = vld [vmem:[%s10003_s3 + $0x1f8] sm:$0xff]  ;;  %v2201_v20 = vmin.f32 %v1546_v9, 0.0 }
 0x21a   : > { %2140 = vmatpush2.msra.mxu1 %v1095_v62  ;;  %2064 = vmatprep.subr.mxu0 %v700_v63  ;;  %v7891_v62 = vrot.slane %v7876_v13, %v7854_v32  ;;  %v2379_v24 = vld [vmem:[%s10003_s3 + $0x178] sm:$0xff]  ;;  %v2362_v63 = vld [vmem:[%s10003_s3 + $0xf0] sm:$0xff] }
 0x21b   : > { %2141 = vmatprep.subr.mxu1 %v1084_v1  ;;  %2065 = vmatpush2.msra.mxu0 %v699_v26  ;;  %v2285_v1 = vmul.f32 %v7880_v17, %v2199_v15  ;;  %v2375_v58 = vld [vmem:[%s10003_s3 + $0x158] sm:$0xff]  ;;  %v2356_v15 = vld [vmem:[%s10003_s3 + $0xc0] sm:$0xff] }
 0x21c   : > { %2142 = vmatpush2.msra.mxu1 %v1083_v27  ;;  %2066 = vmatprep.subr.mxu0 %v688_v30  ;;  %v2287_v26 = vmul.f32 %v7891_v62, %v2201_v20  ;;  %v2175_v27 = vmax.f32 %v1392_v7, 0.0  ;;  %v7132_v30 = vld [vmem:[%s7716_s10 + $0x28] sm:$0xff]  ;;  %v1189_v7 = vrot.slane %v7858_v38, %v7957_v54  ;;  %v2340_v20 = vld [vmem:[%s10003_s3 + $0x40] sm:$0xff] }
 0x21d   : > { %2143 = vmatprep.subr.mxu1 %v1072_v31  ;;  %2067 = vmatpush2.msra.mxu0 %v687_v33  ;;  %v7133_v31 = vld [vmem:[%s7716_s10 + $0x38] sm:$0xff]  ;;  %v2361_v33 = vld [vmem:[%s10003_s3 + $0xe8] sm:$0xff] }
 0x21e   : > { %2144 = vmatpush2.msra.mxu1 %v1071_v34  ;;  %2068 = vmatprep.subr.mxu0 %v676_v36  ;;  %v2393_v34 = vld [vmem:[%s10003_s3 + $0x1e8] sm:$0xff]  ;;  %v2177_v36 = vmax.f32 %v1546_v9, 0.0 }
 0x21f   : > { %2145 = vmatprep.subr.mxu1 %v1060_v37  ;;  %2069 = vmatpush2.msra.mxu0 %v675_v39  ;;  %v2345_v37 = vld [vmem:[%s10003_s3 + $0x68] sm:$0xff]  ;;  %v7134_v39 = vld [vmem:[%s7716_s10 + $0x20] sm:$0xff] }
 0x220   : > { %2146 = vmatpush2.msra.mxu1 %v1059_v4  ;;  %2070 = vmatprep.subr.mxu0 %v664_v2  ;;  %v7135_v4 = vld [vmem:[%s7716_s10 + $0x30] sm:$0xff]  ;;  %v7929_v2 = vadd.f32 %v2285_v1, %v2175_v27  ;;  %v2373_v9 = vld [vmem:[%s10003_s3 + $0x148] sm:$0xff]  ;;  %v1313_v1 = vadd.f32 %v7834_v16, %v1189_v7  ;;  %v1321_v27 = vadd.f32 %v7849_v5, %v7862_v23 }
 0x221   : > { %2147 = vmatprep.subr.mxu1 %v1048_v43  ;;  %2071 = vmatpush2.msra.mxu0 %v663_v46  ;;  %v2377_v43 = vld [vmem:[%s10003_s3 + $0x168] sm:$0xff]  ;;  %v7934_v46 = vadd.f32 %v2287_v26, %v2177_v36  ;;  %v2371_v26 = vld [vmem:[%s10003_s3 + $0x138] sm:$0xff]  ;;  %v8036_v16 = vld [vmem:[%s10003_s3 + $0xb0] sm:$0xff] }
 0x222   : > { %2148 = vmatpush2.msra.mxu1 %v1047_v47  ;;  %2072 = vmatprep.subr.mxu0 %v652_v50  ;;  %10196 = vst [vmem:[#allocation22_spill] sm:$0xff] %v7929_v2  ;;  %v2360_v47 = vld [vmem:[%s10003_s3 + $0xe0] sm:$0xff]  ;;  %v8049_v5 = vld [vmem:[%s10003_s3 + $0x30] sm:$0xff] }
 0x223   : > { %2149 = vmatprep.subr.mxu1 %v1036_v51  ;;  %2073 = vmatpush2.msra.mxu0 %v651_v52  ;;  %10197 = vst [vmem:[#allocation23_spill] sm:$0xff] %v7934_v46  ;;  %v2344_v50 = vld [vmem:[%s10003_s3 + $0x60] sm:$0xff]  ;;  %v2359_v52 = vld [vmem:[%s10003_s3 + $0xd8] sm:$0xff]  ;;  %v2370_v23 = vld [vmem:[%s10003_s3 + $0x130] sm:$0xff] }
 0x224   : > { %2150 = vmatpush2.msra.mxu1 %v1035_v53  ;;  %2074 = vmatprep.subr.mxu0 %v640_v55  ;;  %v2376_v51 = vld [vmem:[%s10003_s3 + $0x160] sm:$0xff]  ;;  %v2391_v53 = vld [vmem:[%s10003_s3 + $0x1d8] sm:$0xff]  ;;  %v7960_v55 = vsub.s32 2, %v7842_v21 }
 0x225   : > { %2151 = vmatprep.subr.mxu1 %v1024_v57  ;;  %2075 = vmatpush2.msra.mxu0 %v639_v14  ;;  %v2343_v57 = vld [vmem:[%s10003_s3 + $0x58] sm:$0xff]  ;;  %v1472_v14 = vpop.f32.mrf.mxu0 }
 0x226   : > { %2152 = vmatpush2.msra.mxu1 %v1023_v60  ;;  %2076 = vmatprep.subr.mxu0 %v628_v0  ;;  %10199 = vst [vmem:[#allocation25_spill] sm:$0xff] %v7960_v55  ;;  %v2358_v60 = vld [vmem:[%s10003_s3 + $0xd0] sm:$0xff] }
 0x227   : > { %2153 = vmatprep.subr.mxu1 %v1012_v19  ;;  %2077 = vmatpush2.msra.mxu0 %v627_v3  ;;  %v2342_v0 = vld [vmem:[%s10003_s3 + $0x50] sm:$0xff]  ;;  %v2357_v3 = vld [vmem:[%s10003_s3 + $0xc8] sm:$0xff] }
 0x228   : > { %2154 = vmatpush2.msra.mxu1 %v1011_v6  ;;  %2078 = vmatprep.subr.mxu0 %v616_v8  ;;  %v2374_v19 = vld [vmem:[%s10003_s3 + $0x150] sm:$0xff]  ;;  %v2389_v6 = vld [vmem:[%s10003_s3 + $0x1c8] sm:$0xff]  ;;  %v1197_v8 = vrot.slane %v7858_v38, %v7960_v55 }
 0x229   : > { %2155 = vmatprep.subr.mxu1 %v1000_v22  ;;  %2079 = vmatpush2.msra.mxu0 %v615_v11  ;;  %v2341_v22 = vld [vmem:[%s10003_s3 + $0x48] sm:$0xff]  ;;  %v1474_v11 = vpop.f32.mrf.mxu0 }
 0x22a   : > { %2080 = vmatprep.mubr.f32.mxu0 %v7815_v40  ;;  %2156 = vmatpush2.msra.mxu1 %v999_v12  ;;  %v2347_v40 = vld [vmem:[%s10003_s3 + $0x78] sm:$0xff]  ;;  %v7996_v12 = vpop.f32.mrf.mxu1 }
 0x22b   : > { %2157 = vmatprep.mubr.f32.mxu1 %v7823_v42  ;;  %2081 = vmatmul.mubr.f32.vlgmr.msra.gmra.mxu0 %v7819_v25  ;;  %v2394_v42 = vld [vmem:[%s10003_s3 + $0x1f0] sm:$0xff] }
 0x22c   : > { %2158 = vmatmul.mubr.f32.vlgmr.msra.gmra.mxu1 %v7827_v45  ;;  %6422 = vmatprep.subr.mxu0 %v2363_v56  ;;  %v2346_v25 = vld [vmem:[%s10003_s3 + $0x70] sm:$0xff]  ;;  %v2388_v56 = vld [vmem:[%s10003_s3 + $0x1c0] sm:$0xff] }
 0x22d   : > { %6460 = vmatprep.subr.mxu1 %v2395_v59  ;;  %6423 = vmatpush3.msra.mxu0 %v2347_v40  ;;  %v2378_v45 = vld [vmem:[%s10003_s3 + $0x170] sm:$0xff]  ;;  %v8005_v59 = vsub.s32 5, %v7842_v21  ;;  %v2372_v40 = vld [vmem:[%s10003_s3 + $0x140] sm:$0xff] }
 0x22e   : > { %6461 = vmatpush3.msra.mxu1 %v2379_v24  ;;  %6424 = vmatprep.subr.mxu0 %v2362_v63  ;;  %v8013_v24 = vpop.f32.mrf.mxu0  ;;  %v2355_v63 = vld [vmem:[%s10003_s3 + $0xb8] sm:$0xff] }
 0x22f   : > { %6462 = vmatprep.subr.mxu1 %v2394_v42  ;;  %2086 = vmatprep.mubr.f32.mxu0 %v7132_v30  ;;  %10200 = vst [vmem:[#allocation26_spill] sm:$0xff] %v8005_v59  ;;  %v2387_v42 = vld [vmem:[%s10003_s3 + $0x1b8] sm:$0xff]  ;;  %v1551_v30 = vpop.f32.mrf.mxu1 }
 0x230   : > { %2163 = vmatprep.mubr.f32.mxu1 %v7133_v31  ;;  %6425 = vmatpush3.msra.mxu0 %v2346_v25  ;;  %v1467_v25 = vadd.f32 %v7856_v35, %v1197_v8  ;;  %v2386_v35 = vld [vmem:[%s10003_s3 + $0x1b0] sm:$0xff]  ;;  %v1475_v31 = vadd.f32 %v1474_v11, %v7868_v44  ;;  %v1622_v36 = vpop.f32.mrf.mxu0  ;;  %v8060_v44 = vld [vmem:[%s10003_s3 + $0xa8] sm:$0xff] }
 0x231   : > { %6463 = vmatpush3.msra.mxu1 %v2378_v45  ;;  %2087 = vmatmul.mubr.f32.gmra.mxu0 %v7134_v39  ;;  %v8026_v45 = vld [vmem:[%s10003_s3 + $0x38] sm:$0xff]  ;;  %v8066_v39 = vadd.f32 %v7836_v10, %v1313_v1  ;;  %v8082_v10 = vadd.f32 %v7864_v41, %v1321_v27  ;;  %v2368_v41 = vld [vmem:[%s10003_s3 + $0x120] sm:$0xff]  ;;  %v2382_v11 = vld [vmem:[%s10003_s3 + $0x190] sm:$0xff] }
 0x232   : > { %2164 = vmatmul.mubr.f32.gmra.mxu1 %v7135_v4  ;;  %6426 = vmatprep.subr.mxu0 %v2361_v33  ;;  %v8044_v33 = vrot.slane %v7858_v38, %v8005_v59  ;;  %v8069_v4 = vadd.f32 %v7870_v48, %v1467_v25  ;;  %v8088_v48 = vld [vmem:[%s10003_s3 + $0xa0] sm:$0xff]  ;;  %v8176_v27 = vld [vmem:[%s10003_s3 + $0x8] sm:$0xff] }
 0x233   : > { %6464 = vmatprep.subr.mxu1 %v2393_v34  ;;  %6427 = vmatpush3.msra.mxu0 %v2345_v37  ;;  %v8054_v34 = vpop.f32.mrf.mxu1  ;;  %v2385_v37 = vld [vmem:[%s10003_s3 + $0x1a8] sm:$0xff] }
 0x234   : > { %2589 = vmatprep.mubr.f32.mxu0 %v7929_v2  ;;  %6465 = vmatpush3.msra.mxu1 %v2377_v43  ;;  %v1473_v43 = vadd.f32 %v1472_v14, %v1197_v8  ;;  %v8113_v14 = vld [vmem:[%s10003_s3 + $0x98] sm:$0xff]  ;;  %v2176_v1 = vmax.f32 %v8069_v4, 0.0 }
 0x235   : > { %2664 = vmatprep.mubr.f32.mxu1 %v7934_v46  ;;  %6428 = vmatprep.subr.mxu0 %v2360_v47  ;;  %v8075_v47 = vld [vmem:[%s10003_s3 + $0x28] sm:$0xff] }
 0x236   : > { %6466 = vmatprep.subr.mxu1 %v2392_v49  ;;  %6429 = vmatpush3.msra.mxu0 %v2344_v50  ;;  %v2369_v49 = vld [vmem:[%s10003_s3 + $0x128] sm:$0xff]  ;;  %v1319_v50 = vadd.f32 %v7840_v18, %v1189_v7  ;;  %v8100_v18 = vld [vmem:[%s10003_s3 + $0x20] sm:$0xff]  ;;  %v2367_v7 = vld [vmem:[%s10003_s3 + $0x118] sm:$0xff] }
 0x237   : > { %6467 = vmatpush3.msra.mxu1 %v2376_v51  ;;  %6430 = vmatprep.subr.mxu0 %v2359_v52  ;;  %v2384_v51 = vld [vmem:[%s10003_s3 + $0x1a0] sm:$0xff]  ;;  %v8093_v52 = vadd.f32 %v1551_v30, %v1475_v31  ;;  %v2365_v30 = vld [vmem:[%s10003_s3 + $0x108] sm:$0xff]  ;;  %v2187_v31 = vmax.f32 %v8082_v10, 0.0 }
 0x238   : > { %6468 = vmatprep.subr.mxu1 %v2391_v53  ;;  %6431 = vmatpush3.msra.mxu0 %v2343_v57  ;;  %v1623_v53 = vadd.f32 %v1622_v36, %v8044_v33  ;;  %v8107_v57 = vrot.slane %v7876_v13, %v7957_v54  ;;  %v8135_v8 = vadd.f32 %v7851_v29, %v1319_v50  ;;  %v8154_v29 = vld [vmem:[%s10003_s3 + $0x10] sm:$0xff]  ;;  %v8188_v36 = vld [vmem:[%s10003_s3 + $0x80] sm:$0xff]  ;;  %v8421_v46 = vld [vmem:[%s10003_s3 + $0x2a8] sm:$0xff] }
 0x239   : > { %6469 = vmatpush3.msra.mxu1 %v2375_v58  ;;  %6432 = vmatprep.subr.mxu0 %v2358_v60  ;;  %v1699_v58 = vpop.f32.mrf.mxu1  ;;  %v2383_v60 = vld [vmem:[%s10003_s3 + $0x198] sm:$0xff]  ;;  %v2364_v50 = vld [vmem:[%s10003_s3 + $0x100] sm:$0xff]  ;;  %10219 = vst [vmem:[#allocation45_spill] sm:$0xff] %v8421_v46 }
 0x23a   : > { %6470 = vmatprep.subr.mxu1 %v2390_v61  ;;  %6433 = vmatpush3.msra.mxu0 %v2342_v0  ;;  %v2198_v61 = vmin.f32 %v8066_v39, 0.0  ;;  %v2200_v0 = vmin.f32 %v8069_v4, 0.0 }
 0x23b   : > { %6471 = vmatpush3.msra.mxu1 %v2374_v19  ;;  %6434 = vmatprep.subr.mxu0 %v2357_v3  ;;  %v2235_v19 = vrot.slane %v7876_v13, %v7960_v55  ;;  %v8123_v3 = vadd.f32 %v7996_v12, %v1473_v43  ;;  %v2213_v12 = vmin.f32 %v8093_v52, 0.0 }
 0x23c   : > { %6472 = vmatprep.subr.mxu1 %v2389_v6  ;;  %6435 = vmatpush3.msra.mxu0 %v2341_v22  ;;  %v8129_v6 = vld [vmem:[%s10003_s3 + $0x18] sm:$0xff]  ;;  %v2211_v22 = vmin.f32 %v8082_v10, 0.0 }
 0x23d   : > { %6473 = vmatpush3.msra.mxu1 %v2373_v9  ;;  %6436 = vmatprep.subr.mxu0 %v2356_v15  ;;  %v8142_v9 = vld [vmem:[%s10003_s3 + $0x90] sm:$0xff]  ;;  %v8148_v15 = vadd.f32 %v1699_v58, %v1623_v53  ;;  %v2286_v25 = vmul.f32 %v2235_v19, %v2200_v0  ;;  %v2299_v4 = vmul.f32 %v7891_v62, %v2213_v12  ;;  %v8219_v53 = vld [vmem:[%s10003_s3 + $0x2f8] sm:$0xff] }
 0x23e   : > { %6474 = vmatprep.subr.mxu1 %v2388_v56  ;;  %6437 = vmatpush3.msra.mxu0 %v2340_v20  ;;  %v2366_v56 = vld [vmem:[%s10003_s3 + $0x110] sm:$0xff]  ;;  %v2174_v20 = vmax.f32 %v8066_v39, 0.0  ;;  %v2189_v39 = vmax.f32 %v8093_v52, 0.0 }
 0x23f   : > { %6475 = vmatpush3.msra.mxu1 %v2372_v40  ;;  %6438 = vmatprep.subr.mxu0 %v2355_v63  ;;  %v8164_v40 = vld [vmem:[%s10003_s3 + $0x88] sm:$0xff]  ;;  %v2203_v43 = vmin.f32 %v8148_v15, 0.0  ;;  %v8212_v10 = vadd.f32 %v2286_v25, %v2176_v1  ;;  %v2458_v1 = vld [vmem:[%s10003_s3 + $0x3f0] sm:$0xff]  ;;  %v8296_v25 = vld [vmem:[%s10003_s3 + $0x2d8] sm:$0xff] }
 0x240   : > { %6476 = vmatprep.subr.mxu1 %v2387_v42  ;;  %6439 = vmatpush3.msra.mxu0 %v8026_v45  ;;  %v2381_v63 = vld [vmem:[%s10003_s3 + $0x188] sm:$0xff]  ;;  %v2284_v42 = vmul.f32 %v8107_v57, %v2198_v61  ;;  %v8229_v61 = vld [vmem:[%s10003_s3 + $0x278] sm:$0xff] }
 0x241   : > { %6477 = vmatpush3.msra.mxu1 %v2371_v26  ;;  %6440 = vmatprep.subr.mxu0 %v8036_v16  ;;  %v2212_v26 = vmin.f32 %v8123_v3, 0.0  ;;  %10202 = vst [vmem:[#allocation28_spill] sm:$0xff] %v8212_v10 }
 0x242   : > { %6478 = vmatprep.subr.mxu1 %v2386_v35  ;;  %6441 = vmatpush3.msra.mxu0 %v8049_v5  ;;  %v2210_v35 = vmin.f32 %v8135_v8, 0.0  ;;  %v8210_v62 = vadd.f32 %v2284_v42, %v2174_v20  ;;  %v8276_v20 = vld [vmem:[%s10003_s3 + $0x2e0] sm:$0xff] }
 0x243   : > { %6479 = vmatpush3.msra.mxu1 %v2370_v23  ;;  %6442 = vmatprep.subr.mxu0 %v8060_v44  ;;  %v2297_v23 = vmul.f32 %v7880_v17, %v2211_v22  ;;  %v8198_v17 = vrot.slane %v7876_v13, %v8005_v59  ;;  %v2298_v52 = vmul.f32 %v2235_v19, %v2212_v26  ;;  %v8286_v42 = vld [vmem:[%s10003_s3 + $0x260] sm:$0xff]  ;;  %v2442_v26 = vld [vmem:[%s10003_s3 + $0x370] sm:$0xff] }
 0x244   : > { %6480 = vmatprep.subr.mxu1 %v2385_v37  ;;  %6443 = vmatpush3.msra.mxu0 %v8075_v47  ;;  %v2380_v37 = vld [vmem:[%s10003_s3 + $0x180] sm:$0xff]  ;;  %10201 = vst [vmem:[#allocation27_spill] sm:$0xff] %v8210_v62  ;;  %v2296_v58 = vmul.f32 %v8107_v57, %v2210_v35  ;;  %v8234_v19 = vadd.f32 %v2299_v4, %v2189_v39  ;;  %v8239_v57 = vld [vmem:[%s10003_s3 + $0x2f0] sm:$0xff]  ;;  %v8308_v35 = vld [vmem:[%s10003_s3 + $0x258] sm:$0xff] }
 0x245   : > { %6481 = vmatpush3.msra.mxu1 %v2369_v49  ;;  %6444 = vmatprep.subr.mxu0 %v8088_v48  ;;  %v8204_v49 = vld [vmem:[%s10003_s3] sm:$0xff]  ;;  %v2289_v0 = vmul.f32 %v8198_v17, %v2203_v43  ;;  %v2441_v39 = vld [vmem:[%s10003_s3 + $0x368] sm:$0xff]  ;;  %v8326_v4 = vld [vmem:[%s10003_s3 + $0x250] sm:$0xff] }
 0x246   : > { %6482 = vmatprep.subr.mxu1 %v2384_v51  ;;  %6445 = vmatpush3.msra.mxu0 %v8100_v18  ;;  %v2188_v51 = vmax.f32 %v8123_v3, 0.0  ;;  %10204 = vst [vmem:[#allocation30_spill] sm:$0xff] %v8234_v19  ;;  %v2459_v3 = vld [vmem:[%s10003_s3 + $0x3f8] sm:$0xff]  ;;  %v2456_v43 = vld [vmem:[%s10003_s3 + $0x3e0] sm:$0xff]  ;;  %v2438_v59 = vld [vmem:[%s10003_s3 + $0x350] sm:$0xff] }
 0x247   : > { %6483 = vmatpush3.msra.mxu1 %v2368_v41  ;;  %6446 = vmatprep.subr.mxu0 %v8113_v14  ;;  %v2186_v41 = vmax.f32 %v8135_v8, 0.0  ;;  %v2179_v8 = vmax.f32 %v8148_v15, 0.0 }
 0x248   : > { %6484 = vmatprep.subr.mxu1 %v2383_v60  ;;  %6447 = vmatpush3.msra.mxu0 %v8129_v6  ;;  %v8224_v60 = vadd.f32 %v2297_v23, %v2187_v31  ;;  %v8254_v22 = vadd.f32 %v2298_v52, %v2188_v51  ;;  %v2457_v31 = vld [vmem:[%s10003_s3 + $0x3e8] sm:$0xff]  ;;  %v2440_v51 = vld [vmem:[%s10003_s3 + $0x360] sm:$0xff] }
 0x249   : > { %6485 = vmatpush3.msra.mxu1 %v2367_v7  ;;  %6448 = vmatprep.subr.mxu0 %v8142_v9  ;;  %v8249_v7 = vld [vmem:[%s10003_s3 + $0x270] sm:$0xff]  ;;  %v8262_v12 = vadd.f32 %v2296_v58, %v2186_v41  ;;  %v8271_v15 = vadd.f32 %v2289_v0, %v2179_v8  ;;  %v8346_v41 = vld [vmem:[%s10003_s3 + $0x248] sm:$0xff]  ;;  %v2455_v58 = vld [vmem:[%s10003_s3 + $0x3d8] sm:$0xff] }
 0x24a   : > { %6486 = vmatprep.subr.mxu1 %v2382_v11  ;;  %6449 = vmatpush3.msra.mxu0 %v8154_v29  ;;  %10203 = vst [vmem:[#allocation29_spill] sm:$0xff] %v8224_v60  ;;  %10205 = vst [vmem:[#allocation31_spill] sm:$0xff] %v8254_v22  ;;  %v8259_v11 = vld [vmem:[%s10003_s3 + $0x2e8] sm:$0xff]  ;;  %v8355_v8 = vld [vmem:[%s10003_s3 + $0x2c0] sm:$0xff] }
 0x24b   : > { %6487 = vmatpush3.msra.mxu1 %v2366_v56  ;;  %6450 = vmatprep.subr.mxu0 %v8164_v40  ;;  %10206 = vst [vmem:[#allocation32_spill] sm:$0xff] %v8262_v12  ;;  %v8267_v56 = vld [vmem:[%s10003_s3 + $0x268] sm:$0xff]  ;;  %10207 = vst [vmem:[#allocation33_spill] sm:$0xff] %v8271_v15 }
 0x24c   : > { %6488 = vmatprep.subr.mxu1 %v2381_v63  ;;  %6451 = vmatpush3.msra.mxu0 %v8176_v27  ;;  %v2443_v63 = vld [vmem:[%s10003_s3 + $0x378] sm:$0xff]  ;;  %10209 = vst [vmem:[#allocation35_spill] sm:$0xff] %v8346_v41  ;;  %10210 = vst [vmem:[#allocation36_spill] sm:$0xff] %v8355_v8 }
 0x24d   : > { %6489 = vmatpush3.msra.mxu1 %v2365_v30  ;;  %6452 = vmatprep.subr.mxu0 %v8188_v36  ;;  %v8302_v30 = vsub.s32 4, %v7842_v21 }
 0x24e   : > { %6490 = vmatprep.subr.mxu1 %v2380_v37  ;;  %6453 = vmatpush3.msra.mxu0 %v8204_v49  ;;  %v8317_v37 = vld [vmem:[%s10003_s3 + $0x2d0] sm:$0xff] }
 0x24f   : > { %6491 = vmatpush3.msra.mxu1 %v2364_v50  ;;  %2590 = vmatmul.mubr.f32.vlgmr.msra.gmra.mxu0 %v8210_v62  ;;  %10208 = vst [vmem:[#allocation34_spill] sm:$0xff] %v8302_v30  ;;  %v8335_v50 = vld [vmem:[%s10003_s3 + $0x2c8] sm:$0xff]  ;;  %v1205_v52 = vrot.slane %v7858_v38, %v8302_v30 }
 0x250   : > { %2665 = vmatmul.mubr.f32.vlgmr.msra.gmra.mxu1 %v8212_v10  ;;  %6498 = vmatprep.subr.mxu0 %v8219_v53 }
 0x251   : > { %2594 = vmatprep.mubr.f32.mxu0 %v8224_v60  ;;  %2669 = vmatprep.mubr.f32.mxu1 %v8234_v19  ;;  %v8390_v19 = vld [vmem:[%s10003_s3 + $0x238] sm:$0xff] }
 0x252   : > { %6499 = vmatpush3.msra.mxu0 %v8229_v61  ;;  %6536 = vmatprep.subr.mxu1 %v2459_v3  ;;  %10215 = vst [vmem:[#allocation41_spill] sm:$0xff] %v8390_v19 }
 0x253   : > { %6500 = vmatprep.subr.mxu0 %v8239_v57  ;;  %2595 = vmatmul.mubr.f32.gmra.mxu0 %v8262_v12 }
 0x254   : > { %6501 = vmatpush3.msra.mxu0 %v8249_v7  ;;  %2670 = vmatmul.mubr.f32.gmra.mxu1 %v8254_v22  ;;  %v1621_v22 = vadd.f32 %v8013_v24, %v1205_v52  ;;  %v2437_v24 = vld [vmem:[%s10003_s3 + $0x348] sm:$0xff] }
 0x255   : > { %6502 = vmatprep.subr.mxu0 %v8259_v11  ;;  %2739 = vmatprep.mubr.f32.mxu0 %v8271_v15 }
 0x256   : > { %6503 = vmatpush3.msra.mxu0 %v8267_v56  ;;  %6537 = vmatpush3.msra.mxu1 %v2443_v63  ;;  %v2439_v63 = vld [vmem:[%s10003_s3 + $0x358] sm:$0xff] }
 0x257   : > { %6504 = vmatprep.subr.mxu0 %v8276_v20  ;;  %v1626_v23 = vpop.f32.mrf.mxu0  ;;  %6538 = vmatprep.subr.mxu1 %v2458_v1  ;;  %v8361_v1 = vsub.s32 6, %v7842_v21 }
 0x258   : > { %6505 = vmatpush3.msra.mxu0 %v8286_v42  ;;  %6539 = vmatpush3.msra.mxu1 %v2442_v26  ;;  %v8367_v26 = vld [vmem:[%s10003_s3 + $0x240] sm:$0xff]  ;;  %v1627_v10 = vadd.f32 %v1626_v23, %v1205_v52  ;;  %v8435_v52 = vadd.f32 %v8054_v34, %v1621_v22  ;;  %v8458_v34 = vld [vmem:[%s10003_s3 + $0x338] sm:$0xff] }
 0x259   : > { %6506 = vmatprep.subr.mxu0 %v8296_v25  ;;  %6540 = vmatprep.subr.mxu1 %v2457_v31  ;;  %v1628_v0 = vpop.f32.mrf.mxu0  ;;  %10211 = vst [vmem:[#allocation37_spill] sm:$0xff] %v8361_v1  ;;  %10212 = vst [vmem:[#allocation38_spill] sm:$0xff] %v8367_v26  ;;  %v2454_v31 = vld [vmem:[%s10003_s3 + $0x3d0] sm:$0xff]  ;;  %v8428_v23 = vld [vmem:[%s10003_s3 + $0x340] sm:$0xff] }
 0x25a   : > { %6507 = vmatpush3.msra.mxu0 %v8308_v35  ;;  %6541 = vmatpush3.msra.mxu1 %v2441_v39  ;;  %v1703_v3 = vpop.f32.mrf.mxu1  ;;  %v8376_v39 = vld [vmem:[%s10003_s3 + $0x2b8] sm:$0xff]  ;;  %10220 = vst [vmem:[#allocation46_spill] sm:$0xff] %v8428_v23  ;;  %10224 = vst [vmem:[#allocation50_spill] sm:$0xff] %v8458_v34 }
 0x25b   : > { %6508 = vmatprep.subr.mxu0 %v8317_v37  ;;  %6542 = vmatprep.subr.mxu1 %v2456_v43  ;;  %10213 = vst [vmem:[#allocation39_spill] sm:$0xff] %v8376_v39  ;;  %v1629_v43 = vadd.f32 %v1628_v0, %v8044_v33  ;;  %v2453_v33 = vld [vmem:[%s10003_s3 + $0x3c8] sm:$0xff]  ;;  %v1213_v0 = vrot.slane %v7858_v38, %v8361_v1 }
 0x25c   : > { %6509 = vmatpush3.msra.mxu0 %v8326_v4  ;;  %6543 = vmatpush3.msra.mxu1 %v2440_v51  ;;  %v8383_v51 = vsub.s32 7, %v7842_v21  ;;  %v8399_v21 = vld [vmem:[%s10003_s3 + $0x2b0] sm:$0xff]  ;;  %v8466_v55 = vadd.f32 %v1703_v3, %v1627_v10 }
 0x25d   : > { %6510 = vmatprep.subr.mxu0 %v8335_v50  ;;  %6544 = vmatprep.subr.mxu1 %v2455_v58  ;;  %v1705_v58 = vpop.f32.mrf.mxu1  ;;  %10216 = vst [vmem:[#allocation42_spill] sm:$0xff] %v8399_v21  ;;  %v8485_v10 = vld [vmem:[%s10003_s3 + $0x330] sm:$0xff] }
 0x25e   : > { %6511 = vmatpush3.msra.mxu0 %v8346_v41  ;;  %10214 = vst [vmem:[#allocation40_spill] sm:$0xff] %v8383_v51  ;;  %6545 = vmatpush3.msra.mxu1 %v2439_v63  ;;  %v8410_v63 = vld [vmem:[%s10003_s3 + $0x230] sm:$0xff]  ;;  %v8423_v32 = vadd.f32 %v1705_v58, %v1629_v43  ;;  %v8441_v43 = vld [vmem:[%s10003_s3 + $0x228] sm:$0xff]  ;;  %v8446_v58 = vld [vmem:[%s10003_s3 + $0x3b8] sm:$0xff] }
 0x25f   : > { %6512 = vmatprep.subr.mxu0 %v8355_v8  ;;  %6546 = vmatprep.subr.mxu1 %v2454_v31  ;;  %10217 = vst [vmem:[#allocation43_spill] sm:$0xff] %v8410_v63  ;;  %v8415_v31 = vld [vmem:[%s10003_s3 + $0x3c0] sm:$0xff]  ;;  %10221 = vst [vmem:[#allocation47_spill] sm:$0xff] %v8441_v43 }
 0x260   : > { %6513 = vmatpush3.msra.mxu0 %v8367_v26  ;;  %6547 = vmatpush3.msra.mxu1 %v2438_v59  ;;  %10218 = vst [vmem:[#allocation44_spill] sm:$0xff] %v8415_v31  ;;  %v8432_v59 = vrot.slane %v7858_v38, %v8383_v51  ;;  %10222 = vst [vmem:[#allocation48_spill] sm:$0xff] %v8446_v58  ;;  %v8452_v38 = vld [vmem:[%s10003_s3 + $0x2a0] sm:$0xff]  ;;  %v8519_v26 = vld [vmem:[%s10003_s3 + $0x328] sm:$0xff] }
 0x261   : > { %6514 = vmatprep.subr.mxu0 %v8376_v39  ;;  %6548 = vmatprep.subr.mxu1 %v2453_v33  ;;  %10223 = vst [vmem:[#allocation49_spill] sm:$0xff] %v8452_v38  ;;  %10228 = vst [vmem:[#allocation54_spill] sm:$0xff] %v8485_v10  ;;  %v8546_v8 = vld [vmem:[%s10003_s3 + $0x320] sm:$0xff] }
 0x262   : > { %6515 = vmatpush3.msra.mxu0 %v8390_v19  ;;  %6549 = vmatpush3.msra.mxu1 %v2437_v24  ;;  %v8464_v24 = vld [vmem:[%s10003_s3 + $0x220] sm:$0xff]  ;;  %v8495_v19 = vld [vmem:[%s10003_s3 + $0x218] sm:$0xff]  ;;  %10232 = vst [vmem:[#allocation58_spill] sm:$0xff] %v8519_v26  ;;  %10235 = vst [vmem:[#allocation61_spill] sm:$0xff] %v8546_v8 }
 0x263   : > { %6516 = vmatprep.subr.mxu0 %v8399_v21  ;;  %v1774_v33 = vpop.f32.mrf.mxu0  ;;  %6550 = vmatprep.subr.mxu1 %v8415_v31  ;;  %10225 = vst [vmem:[#allocation51_spill] sm:$0xff] %v8464_v24  ;;  %v8472_v31 = vld [vmem:[%s10003_s3 + $0x3b0] sm:$0xff]  ;;  %10229 = vst [vmem:[#allocation55_spill] sm:$0xff] %v8495_v19 }
 0x264   : > { %6517 = vmatpush3.msra.mxu0 %v8410_v63  ;;  %v1775_v22 = vadd.f32 %v1774_v33, %v1213_v0  ;;  %6551 = vmatpush3.msra.mxu1 %v8428_v23  ;;  %10226 = vst [vmem:[#allocation52_spill] sm:$0xff] %v8472_v31  ;;  %v8478_v33 = vld [vmem:[%s10003_s3 + $0x298] sm:$0xff]  ;;  %v2202_v23 = vmin.f32 %v8435_v52, 0.0 }
 0x265   : > { %6518 = vmatprep.subr.mxu0 %v8421_v46  ;;  %v1851_v63 = vpop.f32.mrf.mxu1  ;;  %v1776_v21 = vpop.f32.mrf.mxu0  ;;  %10227 = vst [vmem:[#allocation53_spill] sm:$0xff] %v8478_v33  ;;  %v2215_v46 = vmin.f32 %v8423_v32, 0.0  ;;  %6552 = vmatprep.subr.mxu1 %v8446_v58  ;;  %v8501_v58 = vld [vmem:[%s10003_s3 + $0x3a8] sm:$0xff] }
 0x266   : > { %6519 = vmatpush3.msra.mxu0 %v8441_v43  ;;  %v1777_v3 = vadd.f32 %v1776_v21, %v8432_v59  ;;  %v2243_v43 = vrot.slane %v7876_v13, %v8302_v30  ;;  %6553 = vmatpush3.msra.mxu1 %v8458_v34  ;;  %10230 = vst [vmem:[#allocation56_spill] sm:$0xff] %v8501_v58  ;;  %v8507_v30 = vld [vmem:[%s10003_s3 + $0x290] sm:$0xff] }
 0x267   : > { %6520 = vmatprep.subr.mxu0 %v8452_v38  ;;  %v1853_v21 = vpop.f32.mrf.mxu1  ;;  %10231 = vst [vmem:[#allocation57_spill] sm:$0xff] %v8507_v30  ;;  %6554 = vmatprep.subr.mxu1 %v8472_v31  ;;  %v8510_v38 = vadd.f32 %v1851_v63, %v1775_v22  ;;  %v8514_v34 = vrot.slane %v7876_v13, %v8383_v51  ;;  %v8526_v31 = vld [vmem:[%s10003_s3 + $0x210] sm:$0xff]  ;;  %v8532_v22 = vld [vmem:[%s10003_s3 + $0x3a0] sm:$0xff]  ;;  %v8540_v51 = vld [vmem:[%s10003_s3 + $0x288] sm:$0xff] }
 0x268   : > { %6521 = vmatpush3.msra.mxu0 %v8464_v24  ;;  %v1854_v39 = vadd.f32 %v1853_v21, %v1777_v3  ;;  %v2214_v24 = vmin.f32 %v8466_v55, 0.0  ;;  %10233 = vst [vmem:[#allocation59_spill] sm:$0xff] %v8526_v31  ;;  %6555 = vmatpush3.msra.mxu1 %v8485_v10  ;;  %10234 = vst [vmem:[#allocation60_spill] sm:$0xff] %v8532_v22  ;;  %v2191_v3 = vmax.f32 %v8423_v32, 0.0  ;;  %v8553_v32 = vld [vmem:[%s10003_s3 + $0x208] sm:$0xff] }
 0x269   : > { %6522 = vmatprep.subr.mxu0 %v8478_v33  ;;  %v1780_v63 = vpop.f32.mrf.mxu0  ;;  %v2301_v21 = vmul.f32 %v8198_v17, %v2215_v46  ;;  %6556 = vmatprep.subr.mxu1 %v8501_v58  ;;  %v2288_v41 = vmul.f32 %v2243_v43, %v2202_v23  ;;  %v8559_v17 = vld [vmem:[%s10003_s3 + $0x398] sm:$0xff]  ;;  %v2204_v23 = vmin.f32 %v8510_v38, 0.0 }
 0x26a   : > { %6523 = vmatpush3.msra.mxu0 %v8495_v19  ;;  %v2205_v10 = vmin.f32 %v1854_v39, 0.0  ;;  %v1781_v33 = vadd.f32 %v1780_v63, %v1213_v0  ;;  %v2178_v19 = vmax.f32 %v8435_v52, 0.0  ;;  %6557 = vmatpush3.msra.mxu1 %v8519_v26  ;;  %10236 = vst [vmem:[#allocation62_spill] sm:$0xff] %v8559_v17  ;;  %v8565_v0 = vld [vmem:[%s10003_s3 + $0x280] sm:$0xff]  ;;  %v2251_v52 = vrot.slane %v7876_v13, %v8361_v1  ;;  %v8576_v58 = vld [vmem:[%s10003_s3 + $0x318] sm:$0xff] }
 0x26b   : > { %6524 = vmatprep.subr.mxu0 %v8507_v30  ;;  %v1782_v46 = vpop.f32.mrf.mxu0  ;;  %6558 = vmatprep.subr.mxu1 %v8532_v22  ;;  %10237 = vst [vmem:[#allocation63_spill] sm:$0xff] %v8576_v58  ;;  %v2300_v30 = vmul.f32 %v2243_v43, %v2214_v24  ;;  %v8583_v13 = vld [vmem:[%s10003_s3 + $0x200] sm:$0xff]  ;;  %v8598_v24 = vld [vmem:[%s10003_s3 + $0x310] sm:$0xff] }
 0x26c   : > { %6525 = vmatpush3.msra.mxu0 %v8526_v31  ;;  %v2291_v63 = vmul.f32 %v8514_v34, %v2205_v10  ;;  %v1783_v26 = vadd.f32 %v1782_v46, %v8432_v59  ;;  %v2190_v31 = vmax.f32 %v8466_v55, 0.0  ;;  %v2181_v10 = vmax.f32 %v1854_v39, 0.0  ;;  %6559 = vmatpush3.msra.mxu1 %v8546_v8  ;;  %v1857_v1 = vpop.f32.mrf.mxu1  ;;  %v8589_v59 = vld [vmem:[%s10003_s3 + $0x390] sm:$0xff]  ;;  %10240 = vst [vmem:[#allocation66_spill] sm:$0xff] %v8598_v24 }
 0x26d   : > { %6526 = vmatprep.subr.mxu0 %v8540_v51  ;;  %10238 = vst [vmem:[#allocation64_spill] sm:$0xff] %v8589_v59  ;;  %v8592_v55 = vadd.f32 %v2301_v21, %v2191_v3  ;;  %v1858_v43 = vadd.f32 %v1857_v1, %v1781_v33  ;;  %6560 = vmatprep.subr.mxu1 %v8559_v17  ;;  %v8607_v3 = vld [vmem:[%s10003_s3 + $0x388] sm:$0xff]  ;;  %v2180_v33 = vmax.f32 %v8510_v38, 0.0  ;;  %v8626_v38 = vld [vmem:[%s10003_s3 + $0x380] sm:$0xff]  ;;  %v8798_v8 = vld [vmem:[%s10003_s3 + $0x5d0] sm:$0xff] }
 0x26e   : > { %6527 = vmatpush3.msra.mxu0 %v8553_v32  ;;  %v8600_v39 = vadd.f32 %v2288_v41, %v2178_v19  ;;  %6561 = vmatpush3.msra.mxu1 %v8576_v58  ;;  %v1859_v46 = vpop.f32.mrf.mxu1  ;;  %10242 = vst [vmem:[#allocation68_spill] sm:$0xff] %v8607_v3  ;;  %v8609_v1 = vadd.f32 %v2291_v63, %v2181_v10  ;;  %v8617_v41 = vld [vmem:[%s10003_s3 + $0x308] sm:$0xff]  ;;  %10246 = vst [vmem:[#allocation72_spill] sm:$0xff] %v8626_v38  ;;  %v8810_v22 = vld [vmem:[%s10003_s3 + $0x550] sm:$0xff] }
 0x26f   : > { %10239 = vst [vmem:[#allocation65_spill] sm:$0xff] %v8592_v55  ;;  %6528 = vmatprep.subr.mxu0 %v8565_v0  ;;  %v2290_v21 = vmul.f32 %v2251_v52, %v2204_v23  ;;  %v2216_v17 = vmin.f32 %v1858_v43, 0.0  ;;  %v1860_v19 = vadd.f32 %v1859_v46, %v1783_v26  ;;  %6562 = vmatprep.subr.mxu1 %v8589_v59  ;;  %10244 = vst [vmem:[#allocation70_spill] sm:$0xff] %v8617_v41  ;;  %v8631_v26 = vld [vmem:[%s10003_s3 + $0x4f8] sm:$0xff] }
 0x270   : > { %10241 = vst [vmem:[#allocation67_spill] sm:$0xff] %v8600_v39  ;;  %10243 = vst [vmem:[#allocation69_spill] sm:$0xff] %v8609_v1  ;;  %6529 = vmatpush3.msra.mxu0 %v8583_v13  ;;  %v8620_v58 = vadd.f32 %v2300_v30, %v2190_v31  ;;  %6563 = vmatpush3.msra.mxu1 %v8598_v24  ;;  %v2192_v23 = vmax.f32 %v1858_v43, 0.0  ;;  %v8638_v30 = vld [vmem:[%s10003_s3 + $0x300] sm:$0xff]  ;;  %v8645_v31 = vld [vmem:[%s10003_s3 + $0x478] sm:$0xff] }
 0x271   : > { %2740 = vmatmul.mubr.f32.vlgmr.msra.gmra.mxu0 %v8600_v39  ;;  %10247 = vst [vmem:[#allocation73_spill] sm:$0xff] %v8631_v26  ;;  %v2302_v63 = vmul.f32 %v2251_v52, %v2216_v17  ;;  %v2193_v10 = vmax.f32 %v1860_v19, 0.0  ;;  %v2217_v46 = vmin.f32 %v1860_v19, 0.0  ;;  %6564 = vmatprep.subr.mxu1 %v8607_v3  ;;  %10248 = vst [vmem:[#allocation74_spill] sm:$0xff] %v8638_v30  ;;  %v8655_v52 = vld [vmem:[%s10003_s3 + $0x4f0] sm:$0xff]  ;;  %v8660_v19 = vld [vmem:[%s10003_s3 + $0x5f8] sm:$0xff] }
 0x272   : > { %10245 = vst [vmem:[#allocation71_spill] sm:$0xff] %v8620_v58  ;;  %2744 = vmatprep.mubr.f32.mxu0 %v8592_v55  ;;  %6565 = vmatpush3.msra.mxu1 %v8617_v41  ;;  %10249 = vst [vmem:[#allocation75_spill] sm:$0xff] %v8645_v31  ;;  %v8647_v43 = vadd.f32 %v2290_v21, %v2180_v33  ;;  %v8750_v41 = vld [vmem:[%s10003_s3 + $0x5e0] sm:$0xff]  ;;  %v8774_v24 = vld [vmem:[%s10003_s3 + $0x5d8] sm:$0xff] }
 0x273   : > { %2814 = vmatprep.mubr.f32.mxu1 %v8609_v1  ;;  %v2303_v17 = vmul.f32 %v8514_v34, %v2217_v46  ;;  %6566 = vmatprep.subr.mxu1 %v8626_v38  ;;  %10251 = vst [vmem:[#allocation77_spill] sm:$0xff] %v8655_v52  ;;  %10252 = vst [vmem:[#allocation78_spill] sm:$0xff] %v8660_v19  ;;  %v8667_v34 = vld [vmem:[%s10003_s3 + $0x470] sm:$0xff]  ;;  %v8672_v21 = vadd.f32 %v2302_v63, %v2192_v23  ;;  %v8678_v46 = vld [vmem:[%s10003_s3 + $0x4e8] sm:$0xff] }
 0x274   : > { %10250 = vst [vmem:[#allocation76_spill] sm:$0xff] %v8647_v43  ;;  %6574 = vmatprep.subr.mxu0 %v8631_v26  ;;  %6567 = vmatpush3.msra.mxu1 %v8638_v30  ;;  %10253 = vst [vmem:[#allocation79_spill] sm:$0xff] %v8667_v34  ;;  %v8683_v30 = vld [vmem:[%s10003_s3 + $0x578] sm:$0xff]  ;;  %v8697_v23 = vld [vmem:[%s10003_s3 + $0x4e0] sm:$0xff] }
 0x275   : > { %2745 = vmatmul.mubr.f32.gmra.mxu0 %v8620_v58  ;;  %2815 = vmatmul.mubr.f32.vlgmr.msra.gmra.mxu1 %v8647_v43  ;;  %v8670_v33 = vadd.f32 %v2303_v17, %v2193_v10  ;;  %10255 = vst [vmem:[#allocation81_spill] sm:$0xff] %v8672_v21  ;;  %10256 = vst [vmem:[#allocation82_spill] sm:$0xff] %v8678_v46  ;;  %v8689_v10 = vld [vmem:[%s10003_s3 + $0x468] sm:$0xff]  ;;  %v8702_v63 = vld [vmem:[%s10003_s3 + $0x5f0] sm:$0xff] }
 0x276   : > { %6575 = vmatpush3.msra.mxu0 %v8645_v31  ;;  %10257 = vst [vmem:[#allocation83_spill] sm:$0xff] %v8683_v30  ;;  %10258 = vst [vmem:[#allocation84_spill] sm:$0xff] %v8689_v10  ;;  %6612 = vmatprep.subr.mxu1 %v8660_v19  ;;  %v8708_v17 = vld [vmem:[%s10003_s3 + $0x460] sm:$0xff]  ;;  %v8714_v19 = vld [vmem:[%s10003_s3 + $0x570] sm:$0xff] }
 0x277   : > { %10254 = vst [vmem:[#allocation80_spill] sm:$0xff] %v8670_v33  ;;  %6576 = vmatprep.subr.mxu0 %v8655_v52  ;;  %2819 = vmatprep.mubr.f32.mxu1 %v8670_v33  ;;  %10259 = vst [vmem:[#allocation85_spill] sm:$0xff] %v8697_v23  ;;  %v8721_v33 = vld [vmem:[%s10003_s3 + $0x4d8] sm:$0xff]  ;;  %v8726_v38 = vld [vmem:[%s10003_s3 + $0x5e8] sm:$0xff] }
 0x278   : > { %6577 = vmatpush3.msra.mxu0 %v8667_v34  ;;  %10260 = vst [vmem:[#allocation86_spill] sm:$0xff] %v8702_v63  ;;  %10261 = vst [vmem:[#allocation87_spill] sm:$0xff] %v8708_v17  ;;  %6613 = vmatpush3.msra.mxu1 %v8683_v30  ;;  %v8732_v30 = vld [vmem:[%s10003_s3 + $0x458] sm:$0xff]  ;;  %v8744_v43 = vld [vmem:[%s10003_s3 + $0x4d0] sm:$0xff] }
 0x279   : > { %6578 = vmatprep.subr.mxu0 %v8678_v46  ;;  %10262 = vst [vmem:[#allocation88_spill] sm:$0xff] %v8714_v19  ;;  %2820 = vmatmul.mubr.f32.gmra.mxu1 %v8672_v21  ;;  %10263 = vst [vmem:[#allocation89_spill] sm:$0xff] %v8721_v33  ;;  %v8738_v21 = vld [vmem:[%s10003_s3 + $0x568] sm:$0xff]  ;;  %v8762_v3 = vld [vmem:[%s10003_s3 + $0x560] sm:$0xff] }
 0x27a   : > { %6579 = vmatpush3.msra.mxu0 %v8689_v10  ;;  %10264 = vst [vmem:[#allocation90_spill] sm:$0xff] %v8726_v38  ;;  %10265 = vst [vmem:[#allocation91_spill] sm:$0xff] %v8732_v30  ;;  %6614 = vmatprep.subr.mxu1 %v8702_v63  ;;  %v8756_v63 = vld [vmem:[%s10003_s3 + $0x450] sm:$0xff]  ;;  %v8786_v59 = vld [vmem:[%s10003_s3 + $0x558] sm:$0xff] }
 0x27b   : > { %6580 = vmatprep.subr.mxu0 %v8697_v23  ;;  %10266 = vst [vmem:[#allocation92_spill] sm:$0xff] %v8738_v21  ;;  %10267 = vst [vmem:[#allocation93_spill] sm:$0xff] %v8744_v43  ;;  %6615 = vmatpush3.msra.mxu1 %v8714_v19  ;;  %v8768_v19 = vld [vmem:[%s10003_s3 + $0x4c8] sm:$0xff] }
 0x27c   : > { %6581 = vmatpush3.msra.mxu0 %v8708_v17  ;;  %10268 = vst [vmem:[#allocation94_spill] sm:$0xff] %v8750_v41  ;;  %10269 = vst [vmem:[#allocation95_spill] sm:$0xff] %v8756_v63  ;;  %6616 = vmatprep.subr.mxu1 %v8726_v38  ;;  %v8780_v38 = vld [vmem:[%s10003_s3 + $0x448] sm:$0xff] }
 0x27d   : > { %6582 = vmatprep.subr.mxu0 %v8721_v33  ;;  %10270 = vst [vmem:[#allocation96_spill] sm:$0xff] %v8762_v3  ;;  %10271 = vst [vmem:[#allocation97_spill] sm:$0xff] %v8768_v19  ;;  %6617 = vmatpush3.msra.mxu1 %v8738_v21  ;;  %v8792_v21 = vld [vmem:[%s10003_s3 + $0x4c0] sm:$0xff]  ;;  %v8822_v1 = vld [vmem:[%s10003_s3 + $0x5c8] sm:$0xff] }
 0x27e   : > { %6583 = vmatpush3.msra.mxu0 %v8732_v30  ;;  %10272 = vst [vmem:[#allocation98_spill] sm:$0xff] %v8774_v24  ;;  %10273 = vst [vmem:[#allocation99_spill] sm:$0xff] %v8780_v38  ;;  %6618 = vmatprep.subr.mxu1 %v8750_v41  ;;  %v8804_v41 = vld [vmem:[%s10003_s3 + $0x440] sm:$0xff] }
 0x27f   : > { %6584 = vmatprep.subr.mxu0 %v8744_v43  ;;  %10274 = vst [vmem:[#allocation100_spill] sm:$0xff] %v8786_v59  ;;  %10275 = vst [vmem:[#allocation101_spill] sm:$0xff] %v8792_v21  ;;  %6619 = vmatpush3.msra.mxu1 %v8762_v3  ;;  %v8816_v3 = vld [vmem:[%s10003_s3 + $0x4b8] sm:$0xff] }
 0x280   : > { %6585 = vmatpush3.msra.mxu0 %v8756_v63  ;;  %10276 = vst [vmem:[#allocation102_spill] sm:$0xff] %v8798_v8  ;;  %10277 = vst [vmem:[#allocation103_spill] sm:$0xff] %v8804_v41  ;;  %6620 = vmatprep.subr.mxu1 %v8774_v24  ;;  %v8828_v24 = vld [vmem:[%s10003_s3 + $0x438] sm:$0xff] }
 0x281   : > { %6586 = vmatprep.subr.mxu0 %v8768_v19  ;;  %10278 = vst [vmem:[#allocation104_spill] sm:$0xff] %v8810_v22  ;;  %10279 = vst [vmem:[#allocation105_spill] sm:$0xff] %v8816_v3  ;;  %6621 = vmatpush3.msra.mxu1 %v8786_v59  ;;  %v8840_v59 = vld [vmem:[%s10003_s3 + $0x4b0] sm:$0xff] }
 0x282   : > { %6587 = vmatpush3.msra.mxu0 %v8780_v38  ;;  %10280 = vst [vmem:[#allocation106_spill] sm:$0xff] %v8822_v1  ;;  %10281 = vst [vmem:[#allocation107_spill] sm:$0xff] %v8828_v24  ;;  %6622 = vmatprep.subr.mxu1 %v8798_v8  ;;  %v8834_v38 = vld [vmem:[%s10003_s3 + $0x548] sm:$0xff]  ;;  %v8852_v8 = vld [vmem:[%s10003_s3 + $0x430] sm:$0xff] }
 0x283   : > { %6588 = vmatprep.subr.mxu0 %v8792_v21  ;;  %10282 = vst [vmem:[#allocation108_spill] sm:$0xff] %v8834_v38  ;;  %10283 = vst [vmem:[#allocation109_spill] sm:$0xff] %v8840_v59  ;;  %6623 = vmatpush3.msra.mxu1 %v8810_v22  ;;  %v8846_v21 = vld [vmem:[%s10003_s3 + $0x5c0] sm:$0xff]  ;;  %v8864_v22 = vld [vmem:[%s10003_s3 + $0x4a8] sm:$0xff] }
 0x284   : > { %6589 = vmatpush3.msra.mxu0 %v8804_v41  ;;  %10284 = vst [vmem:[#allocation110_spill] sm:$0xff] %v8846_v21  ;;  %10285 = vst [vmem:[#allocation111_spill] sm:$0xff] %v8852_v8  ;;  %6624 = vmatprep.subr.mxu1 %v8822_v1  ;;  %v8858_v41 = vld [vmem:[%s10003_s3 + $0x540] sm:$0xff]  ;;  %v8876_v1 = vld [vmem:[%s10003_s3 + $0x428] sm:$0xff] }
 0x285   : > { %6590 = vmatprep.subr.mxu0 %v8816_v3  ;;  %10286 = vst [vmem:[#allocation112_spill] sm:$0xff] %v8858_v41  ;;  %10287 = vst [vmem:[#allocation113_spill] sm:$0xff] %v8864_v22  ;;  %6625 = vmatpush3.msra.mxu1 %v8834_v38  ;;  %v8870_v3 = vld [vmem:[%s10003_s3 + $0x5b8] sm:$0xff]  ;;  %v8888_v38 = vld [vmem:[%s10003_s3 + $0x4a0] sm:$0xff] }
 0x286   : > { %6591 = vmatpush3.msra.mxu0 %v8828_v24  ;;  %10288 = vst [vmem:[#allocation114_spill] sm:$0xff] %v8870_v3  ;;  %10289 = vst [vmem:[#allocation115_spill] sm:$0xff] %v8876_v1  ;;  %6626 = vmatprep.subr.mxu1 %v8846_v21  ;;  %v8882_v24 = vld [vmem:[%s10003_s3 + $0x538] sm:$0xff]  ;;  %v8900_v21 = vld [vmem:[%s10003_s3 + $0x420] sm:$0xff] }
 0x287   : > { %6592 = vmatprep.subr.mxu0 %v8840_v59  ;;  %10290 = vst [vmem:[#allocation116_spill] sm:$0xff] %v8882_v24  ;;  %10291 = vst [vmem:[#allocation117_spill] sm:$0xff] %v8888_v38  ;;  %6627 = vmatpush3.msra.mxu1 %v8858_v41  ;;  %v8894_v59 = vld [vmem:[%s10003_s3 + $0x5b0] sm:$0xff]  ;;  %v8912_v41 = vld [vmem:[%s10003_s3 + $0x498] sm:$0xff] }
 0x288   : > { %6593 = vmatpush3.msra.mxu0 %v8852_v8  ;;  %10292 = vst [vmem:[#allocation118_spill] sm:$0xff] %v8894_v59  ;;  %10293 = vst [vmem:[#allocation119_spill] sm:$0xff] %v8900_v21  ;;  %6628 = vmatprep.subr.mxu1 %v8870_v3  ;;  %v8906_v8 = vld [vmem:[%s10003_s3 + $0x530] sm:$0xff]  ;;  %v8924_v3 = vld [vmem:[%s10003_s3 + $0x418] sm:$0xff] }
 0x289   : > { %6594 = vmatprep.subr.mxu0 %v8864_v22  ;;  %10294 = vst [vmem:[#allocation120_spill] sm:$0xff] %v8906_v8  ;;  %10295 = vst [vmem:[#allocation121_spill] sm:$0xff] %v8912_v41  ;;  %6629 = vmatpush3.msra.mxu1 %v8882_v24  ;;  %v8918_v22 = vld [vmem:[%s10003_s3 + $0x5a8] sm:$0xff]  ;;  %v8936_v24 = vld [vmem:[%s10003_s3 + $0x490] sm:$0xff] }
 0x28a   : > { %6595 = vmatpush3.msra.mxu0 %v8876_v1  ;;  %10296 = vst [vmem:[#allocation122_spill] sm:$0xff] %v8918_v22  ;;  %10297 = vst [vmem:[#allocation123_spill] sm:$0xff] %v8924_v3  ;;  %6630 = vmatprep.subr.mxu1 %v8894_v59  ;;  %v8930_v1 = vld [vmem:[%s10003_s3 + $0x528] sm:$0xff]  ;;  %v8948_v59 = vld [vmem:[%s10003_s3 + $0x410] sm:$0xff] }
 0x28b   : > { %6596 = vmatprep.subr.mxu0 %v8888_v38  ;;  %10298 = vst [vmem:[#allocation124_spill] sm:$0xff] %v8930_v1  ;;  %10299 = vst [vmem:[#allocation125_spill] sm:$0xff] %v8936_v24  ;;  %6631 = vmatpush3.msra.mxu1 %v8906_v8  ;;  %v8942_v38 = vld [vmem:[%s10003_s3 + $0x5a0] sm:$0xff]  ;;  %v8960_v8 = vld [vmem:[%s10003_s3 + $0x488] sm:$0xff] }
 0x28c   : > { %6597 = vmatpush3.msra.mxu0 %v8900_v21  ;;  %10300 = vst [vmem:[#allocation126_spill] sm:$0xff] %v8942_v38  ;;  %10301 = vst [vmem:[#allocation127_spill] sm:$0xff] %v8948_v59  ;;  %6632 = vmatprep.subr.mxu1 %v8918_v22  ;;  %v8954_v21 = vld [vmem:[%s10003_s3 + $0x520] sm:$0xff]  ;;  %v8972_v22 = vld [vmem:[%s10003_s3 + $0x408] sm:$0xff] }
 0x28d   : > { %6598 = vmatprep.subr.mxu0 %v8912_v41  ;;  %10302 = vst [vmem:[#allocation128_spill] sm:$0xff] %v8954_v21  ;;  %10303 = vst [vmem:[#allocation129_spill] sm:$0xff] %v8960_v8  ;;  %6633 = vmatpush3.msra.mxu1 %v8930_v1  ;;  %v8966_v41 = vld [vmem:[%s10003_s3 + $0x598] sm:$0xff]  ;;  %v8984_v1 = vld [vmem:[%s10003_s3 + $0x480] sm:$0xff] }
 0x28e   : > { %6599 = vmatpush3.msra.mxu0 %v8924_v3  ;;  %10304 = vst [vmem:[#allocation130_spill] sm:$0xff] %v8966_v41  ;;  %10305 = vst [vmem:[#allocation131_spill] sm:$0xff] %v8972_v22  ;;  %6634 = vmatprep.subr.mxu1 %v8942_v38  ;;  %v8978_v3 = vld [vmem:[%s10003_s3 + $0x518] sm:$0xff]  ;;  %v8996_v38 = vld [vmem:[%s10003_s3 + $0x400] sm:$0xff] }
 0x28f   : > { %6600 = vmatprep.subr.mxu0 %v8936_v24  ;;  %10306 = vst [vmem:[#allocation132_spill] sm:$0xff] %v8978_v3  ;;  %10307 = vst [vmem:[#allocation133_spill] sm:$0xff] %v8984_v1  ;;  %6635 = vmatpush3.msra.mxu1 %v8954_v21  ;;  %v8990_v24 = vld [vmem:[%s10003_s3 + $0x590] sm:$0xff]  ;;  %v9009_v21 = vld [vmem:[%s10003_s3 + $0x588] sm:$0xff] }
 0x290   : > { %6601 = vmatpush3.msra.mxu0 %v8948_v59  ;;  %10308 = vst [vmem:[#allocation134_spill] sm:$0xff] %v8990_v24  ;;  %10309 = vst [vmem:[#allocation135_spill] sm:$0xff] %v8996_v38  ;;  %6636 = vmatprep.subr.mxu1 %v8966_v41  ;;  %v9002_v59 = vld [vmem:[%s10003_s3 + $0x510] sm:$0xff]  ;;  %v9016_v41 = vld [vmem:[%s10003_s3 + $0x508] sm:$0xff] }
 0x291   : > { %6602 = vmatprep.subr.mxu0 %v8960_v8  ;;  %10310 = vst [vmem:[#allocation136_spill] sm:$0xff] %v9002_v59  ;;  %6637 = vmatpush3.msra.mxu1 %v8978_v3  ;;  %10311 = vst [vmem:[#allocation137_spill] sm:$0xff] %v9009_v21  ;;  %v9023_v3 = vld [vmem:[%s10003_s3 + $0x580] sm:$0xff] }
 0x292   : > { %6603 = vmatpush3.msra.mxu0 %v8972_v22  ;;  %6638 = vmatprep.subr.mxu1 %v8990_v24  ;;  %10312 = vst [vmem:[#allocation138_spill] sm:$0xff] %v9016_v41  ;;  %10313 = vst [vmem:[#allocation139_spill] sm:$0xff] %v9023_v3  ;;  %v9032_v24 = vld [vmem:[%s10003_s3 + $0x500] sm:$0xff] }
 0x293   : > { %6604 = vmatprep.subr.mxu0 %v8984_v1  ;;  %6639 = vmatpush3.msra.mxu1 %v9002_v59  ;;  %v7136_v1 = vld [vmem:[%s10003_s3 + $0xf8] sm:$0xff]  ;;  %10314 = vst [vmem:[#allocation140_spill] sm:$0xff] %v9032_v24 }
 0x294   : > { %6605 = vmatpush3.msra.mxu0 %v8996_v38  ;;  %6640 = vmatprep.subr.mxu1 %v9009_v21  ;;  %v7137_v59 = vld [vmem:[%s10003_s3 + $0x1f8] sm:$0xff]  ;;  %v9040_v38 = vld [vmem:[#allocation7 + $0x20] ss:$4 sm:$0xf] }
 0x295   : > { %6650 = vmatprep.subr.mxu0 %v7136_v1  ;;  %6641 = vmatpush3.msra.mxu1 %v9016_v41  ;;  %v1221_v1 = vrot.slane %v9040_v38, %v7957_v54  ;;  %v1225_v21 = vrot.slane %v9040_v38, %v7847_v28  ;;  %v9046_v41 = vld [vmem:[#allocation7 + $0x21] ss:$4 sm:$0xf] }
 0x296   : > { %6642 = vmatprep.subr.mxu1 %v9023_v3  ;;  %v2259_v43 = vrot.slane %v9046_v41, %v7957_v54  ;;  %v2263_v17 = vrot.slane %v9046_v41, %v7847_v28 }
 0x297   : > { %6643 = vmatpush3.msra.mxu1 %v9032_v24 }
 0x298   : > { %6688 = vmatprep.subr.mxu1 %v7137_v59 }
 0x2a7   : > { %v1928_v22 = vpop.f32.mrf.mxu0 }
 0x2a8   : > { %v1929_v8 = vadd.f32 %v1928_v22, %v1221_v1 }
 0x2a9   : > { %v2005_v3 = vpop.f32.mrf.mxu1  ;;  %v1930_v19 = vpop.f32.mrf.mxu0 }
 0x2aa   : > { %v2006_v24 = vadd.f32 %v2005_v3, %v1929_v8  ;;  %v1931_v63 = vadd.f32 %v1930_v19, %v1225_v21 }
 0x2ab   : > { %v2007_v59 = vpop.f32.mrf.mxu1 }
 0x2ac   : > { %v2206_v30 = vmin.f32 %v2006_v24, 0.0  ;;  %v2008_v33 = vadd.f32 %v2007_v59, %v1931_v63  ;;  %v2182_v34 = vmax.f32 %v2006_v24, 0.0 }
 0x2ad   : > { %v1934_v23 = vpop.f32.mrf.mxu0 }
 0x2ae   : > { %v2207_v10 = vmin.f32 %v2008_v33, 0.0  ;;  %v1935_v46 = vadd.f32 %v1934_v23, %v1221_v1  ;;  %v2292_v22 = vmul.f32 %v2259_v43, %v2206_v30  ;;  %v2183_v52 = vmax.f32 %v2008_v33, 0.0  ;;  %v7142_v33 = vld [vmem:[%s10003_s3 + $0x68] sm:$0xff]  ;;  %v7147_v1 = vld [vmem:[%s10003_s3 + $0xd0] sm:$0xff] }
 0x2af   : > { %v1936_v58 = vpop.f32.mrf.mxu0 }
 0x2b0   : > { %v2293_v31 = vmul.f32 %v2263_v17, %v2207_v10  ;;  %v1937_v26 = vadd.f32 %v1936_v58, %v1225_v21  ;;  %v2011_v8 = vpop.f32.mrf.mxu1  ;;  %v9054_v54 = vadd.f32 %v2292_v22, %v2182_v34  ;;  %v7138_v58 = vld [vmem:[%s10003_s3 + $0x78] sm:$0xff]  ;;  %v7143_v21 = vld [vmem:[%s10003_s3 + $0xe0] sm:$0xff]  ;;  %v7148_v22 = vld [vmem:[%s10003_s3 + $0x50] sm:$0xff] }
 0x2b1   : > { %v2012_v3 = vadd.f32 %v2011_v8, %v1935_v46  ;;  %v2984_v46 = vmul.f32 %v7929_v2, %v7929_v2  ;;  %v7145_v10 = vld [vmem:[%s10003_s3 + $0xd8] sm:$0xff]  ;;  %v7149_v8 = vld [vmem:[%s10003_s3 + $0xc8] sm:$0xff] }
 0x2b2   : > { %v9052_v19 = vadd.f32 %v2293_v31, %v2183_v52  ;;  %10316 = vst [vmem:[#allocation142_spill] sm:$0xff] %v9054_v54  ;;  %v2013_v55 = vpop.f32.mrf.mxu1  ;;  %v7139_v31 = vld [vmem:[%s10003_s3 + $0xf0] sm:$0xff] }
 0x2b3   : > { %v2218_v63 = vmin.f32 %v2012_v3, 0.0  ;;  %v2014_v59 = vadd.f32 %v2013_v55, %v1937_v26  ;;  %v2194_v28 = vmax.f32 %v2012_v3, 0.0  ;;  %v7140_v55 = vld [vmem:[%s10003_s3 + $0x70] sm:$0xff]  ;;  %v7141_v26 = vld [vmem:[%s10003_s3 + $0xe8] sm:$0xff] }
 0x2b4   : > { %10315 = vst [vmem:[#allocation141_spill] sm:$0xff] %v9052_v19  ;;  %2889 = vmatprep.mubr.f32.mxu0 %v9052_v19  ;;  %v7150_v3 = vld [vmem:[%s10003_s3 + $0x48] sm:$0xff] }
 0x2b5   : > { %2890 = vmatmul.mubr.f32.vlgmr.msra.gmra.mxu0 %v9054_v54  ;;  %v2304_v24 = vmul.f32 %v2259_v43, %v2218_v63  ;;  %v2195_v30 = vmax.f32 %v2014_v59, 0.0  ;;  %v2219_v23 = vmin.f32 %v2014_v59, 0.0  ;;  %v7151_v63 = vld [vmem:[%s10003_s3 + $0xc0] sm:$0xff] }
 0x2b6   : > { %6651 = vmatpush3.msra.mxu0 %v7138_v58  ;;  %v7152_v59 = vld [vmem:[%s10003_s3 + $0x40] sm:$0xff] }
 0x2b7   : > { %6652 = vmatprep.subr.mxu0 %v7139_v31  ;;  %v2305_v52 = vmul.f32 %v2263_v17, %v2219_v23  ;;  %v9070_v43 = vadd.f32 %v2304_v24, %v2194_v28  ;;  %v7144_v28 = vld [vmem:[%s10003_s3 + $0x60] sm:$0xff]  ;;  %v7146_v17 = vld [vmem:[%s10003_s3 + $0x58] sm:$0xff] }
 0x2b8   : > { %6653 = vmatpush3.msra.mxu0 %v7140_v55  ;;  %v7153_v24 = vld [vmem:[%s10003_s3 + $0xb8] sm:$0xff] }
 0x2b9   : > { %6654 = vmatprep.subr.mxu0 %v7141_v26  ;;  %10317 = vst [vmem:[#allocation143_spill] sm:$0xff] %v9070_v43  ;;  %v9072_v34 = vadd.f32 %v2305_v52, %v2195_v30  ;;  %v10335_v23 = vld [vmem:[#allocation59_spill] sm:$0xff] }
 0x2ba   : > { %6655 = vmatpush3.msra.mxu0 %v7142_v33  ;;  %v2987_v33 = vmul.f32 %v8600_v39, %v8600_v39 }
 0x2bb   : > { %10318 = vst [vmem:[#allocation144_spill] sm:$0xff] %v9072_v34  ;;  %6656 = vmatprep.subr.mxu0 %v7143_v21  ;;  %2894 = vmatprep.mubr.f32.mxu0 %v9072_v34 }
 0x2bc   : > { %6657 = vmatpush3.msra.mxu0 %v7144_v28 }
 0x2bd   : > { %2895 = vmatmul.mubr.f32.gmra.mxu0 %v9070_v43  ;;  %6658 = vmatprep.subr.mxu0 %v7145_v10 }
 0x2be   : > { %3071 = vmatprep.mubr.f32.mxu0 %v2984_v46  ;;  %6659 = vmatpush3.msra.mxu0 %v7146_v17  ;;  %v10336_v17 = vld [vmem:[#allocation65_spill] sm:$0xff] }
 0x2bf   : > { %6660 = vmatprep.subr.mxu0 %v7147_v1 }
 0x2c0   : > { %6661 = vmatpush3.msra.mxu0 %v7148_v22 }
 0x2c1   : > { %6662 = vmatprep.subr.mxu0 %v7149_v8 }
 0x2c2   : > { %6663 = vmatpush3.msra.mxu0 %v7150_v3  ;;  %v10337_v3 = vld [vmem:[#allocation73_spill] sm:$0xff] }
 0x2c3   : > { %6664 = vmatprep.subr.mxu0 %v7151_v63 }
 0x2c4   : > { %6665 = vmatpush3.msra.mxu0 %v7152_v59 }
 0x2c5   : > { %6666 = vmatprep.subr.mxu0 %v7153_v24 }
 0x2c6   : > { %6667 = vmatpush3.msra.mxu0 %v8026_v45  ;;  %v2983_v45 = vmul.f32 %v8210_v62, %v8210_v62 }
 0x2c7   : > { %6668 = vmatprep.subr.mxu0 %v8036_v16  ;;  %v2996_v16 = vmul.f32 %v8224_v60, %v8224_v60 }
 0x2c8   : > { %6669 = vmatpush3.msra.mxu0 %v8049_v5  ;;  %v2995_v5 = vmul.f32 %v8262_v12, %v8262_v12 }
 0x2c9   : > { %6670 = vmatprep.subr.mxu0 %v8060_v44  ;;  %v2988_v44 = vmul.f32 %v8271_v15, %v8271_v15 }
 0x2ca   : > { %6671 = vmatpush3.msra.mxu0 %v8075_v47  ;;  %v10319_v47 = vld [vmem:[#allocation35_spill] sm:$0xff] }
 0x2cb   : > { %6672 = vmatprep.subr.mxu0 %v8088_v48  ;;  %v10320_v48 = vld [vmem:[#allocation36_spill] sm:$0xff] }
 0x2cc   : > { %6673 = vmatpush3.msra.mxu0 %v8100_v18  ;;  %v10321_v18 = vld [vmem:[#allocation38_spill] sm:$0xff] }
 0x2cd   : > { %6674 = vmatprep.subr.mxu0 %v8113_v14  ;;  %v10322_v14 = vld [vmem:[#allocation39_spill] sm:$0xff] }
 0x2ce   : > { %6675 = vmatpush3.msra.mxu0 %v8129_v6  ;;  %v10323_v6 = vld [vmem:[#allocation41_spill] sm:$0xff] }
 0x2cf   : > { %6676 = vmatprep.subr.mxu0 %v8142_v9  ;;  %v10324_v9 = vld [vmem:[#allocation42_spill] sm:$0xff] }
 0x2d0   : > { %6677 = vmatpush3.msra.mxu0 %v8154_v29  ;;  %v10325_v29 = vld [vmem:[#allocation43_spill] sm:$0xff] }
 0x2d1   : > { %6678 = vmatprep.subr.mxu0 %v8164_v40  ;;  %v10326_v40 = vld [vmem:[#allocation25_spill] sm:$0xff] }
 0x2d2   : > { %6679 = vmatpush3.msra.mxu0 %v8176_v27  ;;  %v1229_v27 = vrot.slane %v9040_v38, %v10326_v40  ;;  %v2267_v58 = vrot.slane %v9046_v41, %v10326_v40 }
 0x2d3   : > { %6680 = vmatprep.subr.mxu0 %v8188_v36  ;;  %v10327_v36 = vld [vmem:[#allocation45_spill] sm:$0xff] }
 0x2d4   : > { %6681 = vmatpush3.msra.mxu0 %v8204_v49  ;;  %v10328_v49 = vld [vmem:[#allocation47_spill] sm:$0xff] }
 0x2d5   : > { %3072 = vmatmul.mubr.f32.vlgmr.msra.gmra.mxu0 %v2983_v45  ;;  %6726 = vmatprep.subr.mxu0 %v8219_v53  ;;  %v10329_v53 = vld [vmem:[#allocation21_spill] sm:$0xff] }
 0x2d6   : > { %3076 = vmatprep.mubr.f32.mxu0 %v2996_v16  ;;  %6727 = vmatpush3.msra.mxu0 %v8229_v61  ;;  %v1233_v61 = vrot.slane %v9040_v38, %v10329_v53  ;;  %v2271_v52 = vrot.slane %v9046_v41, %v10329_v53  ;;  %v3000_v41 = vmul.f32 %v10336_v17, %v10336_v17 }
 0x2d7   : > { %6728 = vmatprep.subr.mxu0 %v8239_v57  ;;  %v10330_v57 = vld [vmem:[#allocation49_spill] sm:$0xff] }
 0x2d8   : > { %6729 = vmatpush3.msra.mxu0 %v8249_v7 }
 0x2d9   : > { %3077 = vmatmul.mubr.f32.gmra.mxu0 %v2995_v5  ;;  %6730 = vmatprep.subr.mxu0 %v8259_v11  ;;  %v10341_v5 = vld [vmem:[#allocation71_spill] sm:$0xff] }
 0x2da   : > { %6731 = vmatpush3.msra.mxu0 %v8267_v56  ;;  %3221 = vmatprep.mubr.f32.mxu0 %v2988_v44  ;;  %v10331_v56 = vld [vmem:[#allocation51_spill] sm:$0xff]  ;;  %v2999_v44 = vmul.f32 %v10341_v5, %v10341_v5 }
 0x2db   : > { %6732 = vmatprep.subr.mxu0 %v8276_v20 }
 0x2dc   : > { %6733 = vmatpush3.msra.mxu0 %v8286_v42  ;;  %v10332_v42 = vld [vmem:[#allocation53_spill] sm:$0xff] }
 0x2dd   : > { %6734 = vmatprep.subr.mxu0 %v8296_v25 }
 0x2de   : > { %6735 = vmatpush3.msra.mxu0 %v8308_v35  ;;  %v10333_v35 = vld [vmem:[#allocation55_spill] sm:$0xff] }
 0x2df   : > { %6736 = vmatprep.subr.mxu0 %v8317_v37 }
 0x2e0   : > { %6737 = vmatpush3.msra.mxu0 %v8326_v4 }
 0x2e1   : > { %6738 = vmatprep.subr.mxu0 %v8335_v50  ;;  %v10334_v50 = vld [vmem:[#allocation57_spill] sm:$0xff] }
 0x2e2   : > { %6739 = vmatpush3.msra.mxu0 %v10319_v47 }
 0x2e3   : > { %6740 = vmatprep.subr.mxu0 %v10320_v48 }
 0x2e4   : > { %6741 = vmatpush3.msra.mxu0 %v10321_v18 }
 0x2e5   : > { %6742 = vmatprep.subr.mxu0 %v10322_v14 }
 0x2e6   : > { %6743 = vmatpush3.msra.mxu0 %v10323_v6  ;;  %v10343_v6 = vld [vmem:[#allocation79_spill] sm:$0xff] }
 0x2e7   : > { %6744 = vmatprep.subr.mxu0 %v10324_v9 }
 0x2e8   : > { %6745 = vmatpush3.msra.mxu0 %v10325_v29  ;;  %v10344_v29 = vld [vmem:[#allocation82_spill] sm:$0xff] }
 0x2e9   : > { %6746 = vmatprep.subr.mxu0 %v10327_v36  ;;  %v7154_v36 = vld [vmem:[%s10003_s3 + $0x178] sm:$0xff] }
 0x2ea   : > { %6747 = vmatpush3.msra.mxu0 %v10328_v49 }
 0x2eb   : > { %6748 = vmatprep.subr.mxu0 %v10330_v57  ;;  %v2082_v7 = vpop.f32.mrf.mxu0  ;;  %v7155_v57 = vld [vmem:[%s10003_s3 + $0x1f0] sm:$0xff] }
 0x2ec   : > { %v2159_v11 = vpop.f32.mrf.mxu1  ;;  %6749 = vmatpush3.msra.mxu0 %v10331_v56  ;;  %v2083_v20 = vadd.f32 %v2082_v7, %v1229_v27  ;;  %v10348_v56 = vld [vmem:[#allocation85_spill] sm:$0xff] }
 0x2ed   : > { %6750 = vmatprep.subr.mxu0 %v10332_v42  ;;  %v2084_v25 = vpop.f32.mrf.mxu0  ;;  %v10349_v42 = vld [vmem:[#allocation23_spill] sm:$0xff] }
 0x2ee   : > { %6751 = vmatpush3.msra.mxu0 %v10333_v35  ;;  %v2160_v37 = vadd.f32 %v2159_v11, %v2083_v20  ;;  %v2085_v4 = vadd.f32 %v2084_v25, %v1233_v61  ;;  %v2161_v30 = vpop.f32.mrf.mxu1  ;;  %v7156_v11 = vld [vmem:[%s10003_s3 + $0x170] sm:$0xff]  ;;  %v7157_v20 = vld [vmem:[%s10003_s3 + $0x1e8] sm:$0xff]  ;;  %v2986_v25 = vmul.f32 %v10349_v42, %v10349_v42  ;;  %v10350_v35 = vld [vmem:[#allocation87_spill] sm:$0xff] }
 0x2ef   : > { %6752 = vmatprep.subr.mxu0 %v10334_v50  ;;  %v10351_v50 = vld [vmem:[#allocation89_spill] sm:$0xff] }
 0x2f0   : > { %6753 = vmatpush3.msra.mxu0 %v10335_v23  ;;  %v2208_v38 = vmin.f32 %v2160_v37, 0.0  ;;  %v2162_v31 = vadd.f32 %v2161_v30, %v2085_v4  ;;  %v2184_v63 = vmax.f32 %v2160_v37, 0.0  ;;  %v7158_v37 = vld [vmem:[%s10003_s3 + $0x168] sm:$0xff]  ;;  %v7159_v4 = vld [vmem:[%s10003_s3 + $0x1e0] sm:$0xff] }
 0x2f1   : > { %6754 = vmatprep.subr.mxu0 %v8540_v51  ;;  %v2088_v55 = vpop.f32.mrf.mxu0  ;;  %v7160_v30 = vld [vmem:[%s10003_s3 + $0x160] sm:$0xff] }
 0x2f2   : > { %v2165_v26 = vpop.f32.mrf.mxu1  ;;  %6755 = vmatpush3.msra.mxu0 %v8553_v32  ;;  %v2209_v21 = vmin.f32 %v2162_v31, 0.0  ;;  %v2089_v46 = vadd.f32 %v2088_v55, %v1229_v27  ;;  %v2294_v1 = vmul.f32 %v2267_v58, %v2208_v38  ;;  %v2185_v32 = vmax.f32 %v2162_v31, 0.0  ;;  %v10352_v23 = vld [vmem:[#allocation91_spill] sm:$0xff]  ;;  %v7163_v55 = vld [vmem:[%s10003_s3 + $0x1d0] sm:$0xff] }
 0x2f3   : > { %6756 = vmatprep.subr.mxu0 %v8565_v0  ;;  %v2090_v28 = vpop.f32.mrf.mxu0  ;;  %v10338_v0 = vld [vmem:[#allocation75_spill] sm:$0xff]  ;;  %v2992_v27 = vmul.f32 %v9052_v19, %v9052_v19 }
 0x2f4   : > { %v2167_v10 = vpop.f32.mrf.mxu1  ;;  %6757 = vmatpush3.msra.mxu0 %v8583_v13  ;;  %v2295_v51 = vmul.f32 %v2271_v52, %v2209_v21  ;;  %v2091_v22 = vadd.f32 %v2090_v28, %v1233_v61  ;;  %v2166_v8 = vadd.f32 %v2165_v26, %v2089_v46  ;;  %v10340_v13 = vld [vmem:[#allocation77_spill] sm:$0xff]  ;;  %v9188_v47 = vadd.f32 %v2294_v1, %v2184_v63  ;;  %v10346_v61 = vld [vmem:[#allocation84_spill] sm:$0xff]  ;;  %v7161_v38 = vld [vmem:[%s10003_s3 + $0x1d8] sm:$0xff] }
 0x2f5   : > { %3222 = vmatmul.mubr.f32.vlgmr.msra.gmra.mxu0 %v2987_v33  ;;  %6802 = vmatprep.subr.mxu0 %v10337_v3  ;;  %v7162_v31 = vld [vmem:[%s10003_s3 + $0x158] sm:$0xff]  ;;  %v10355_v26 = vld [vmem:[#allocation97_spill] sm:$0xff]  ;;  %v7167_v1 = vld [vmem:[%s10003_s3 + $0x1c0] sm:$0xff] }
 0x2f6   : > { %3226 = vmatprep.mubr.f32.mxu0 %v3000_v41  ;;  %v2220_v59 = vmin.f32 %v2166_v8, 0.0  ;;  %v2168_v24 = vadd.f32 %v2167_v10, %v2091_v22  ;;  %6803 = vmatpush3.msra.mxu0 %v10338_v0  ;;  %v2196_v45 = vmax.f32 %v2166_v8, 0.0  ;;  %v9183_v16 = vadd.f32 %v2295_v51, %v2185_v32  ;;  %10342 = vst [vmem:[#allocation36_spill] sm:$0xff] %v9188_v47  ;;  %v7164_v33 = vld [vmem:[%s10003_s3 + $0x150] sm:$0xff]  ;;  %v10356_v21 = vld [vmem:[#allocation99_spill] sm:$0xff]  ;;  %v7165_v46 = vld [vmem:[%s10003_s3 + $0x1c8] sm:$0xff] }
 0x2f7   : > { %6804 = vmatprep.subr.mxu0 %v10340_v13  ;;  %v10357_v28 = vld [vmem:[#allocation101_spill] sm:$0xff]  ;;  %v10358_v41 = vld [vmem:[#allocation103_spill] sm:$0xff] }
 0x2f8   : > { %10339 = vst [vmem:[#allocation35_spill] sm:$0xff] %v9183_v16  ;;  %v2306_v48 = vmul.f32 %v2267_v58, %v2220_v59  ;;  %v2197_v18 = vmax.f32 %v2168_v24, 0.0  ;;  %v2221_v14 = vmin.f32 %v2168_v24, 0.0  ;;  %6805 = vmatpush3.msra.mxu0 %v10343_v6  ;;  %2964 = vmatprep.mubr.f32.mxu1 %v9183_v16  ;;  %v10353_v58 = vld [vmem:[#allocation93_spill] sm:$0xff]  ;;  %v7168_v22 = vld [vmem:[%s10003_s3 + $0x140] sm:$0xff]  ;;  %v7169_v32 = vld [vmem:[%s10003_s3 + $0x1b8] sm:$0xff] }
 0x2f9   : > { %3227 = vmatmul.mubr.f32.gmra.mxu0 %v2999_v44  ;;  %2965 = vmatmul.mubr.f32.vlgmr.msra.gmra.mxu1 %v9188_v47  ;;  %v7166_v10 = vld [vmem:[%s10003_s3 + $0x148] sm:$0xff]  ;;  %v10360_v8 = vld [vmem:[#allocation107_spill] sm:$0xff]  ;;  %v7171_v24 = vld [vmem:[%s10003_s3 + $0x1b0] sm:$0xff] }
 0x2fa   : > { %v2307_v9 = vmul.f32 %v2271_v52, %v2221_v14  ;;  %6806 = vmatprep.subr.mxu0 %v10344_v29  ;;  %6689 = vmatpush3.msra.mxu1 %v7154_v36  ;;  %v9199_v49 = vadd.f32 %v2306_v48, %v2196_v45  ;;  %v10354_v52 = vld [vmem:[#allocation95_spill] sm:$0xff]  ;;  %v10359_v51 = vld [vmem:[#allocation105_spill] sm:$0xff] }
 0x2fb   : > { %6807 = vmatpush3.msra.mxu0 %v10346_v61  ;;  %6690 = vmatprep.subr.mxu1 %v7155_v57  ;;  %v10361_v3 = vld [vmem:[#allocation109_spill] sm:$0xff]  ;;  %v7170_v63 = vld [vmem:[%s10003_s3 + $0x138] sm:$0xff]  ;;  %v7175_v6 = vld [vmem:[%s10003_s3 + $0x1a0] sm:$0xff] }
 0x2fc   : > { %10345 = vst [vmem:[#allocation38_spill] sm:$0xff] %v9199_v49  ;;  %v9205_v7 = vadd.f32 %v2307_v9, %v2197_v18  ;;  %3371 = vmatprep.mubr.f32.mxu0 %v2992_v27  ;;  %6691 = vmatpush3.msra.mxu1 %v7156_v11  ;;  %v10362_v59 = vld [vmem:[#allocation111_spill] sm:$0xff]  ;;  %v10363_v0 = vld [vmem:[#allocation113_spill] sm:$0xff] }
 0x2fd   : > { %6808 = vmatprep.subr.mxu0 %v10348_v56  ;;  %6692 = vmatprep.subr.mxu1 %v7157_v20  ;;  %v7172_v45 = vld [vmem:[%s10003_s3 + $0x130] sm:$0xff]  ;;  %v10364_v13 = vld [vmem:[#allocation115_spill] sm:$0xff]  ;;  %v7173_v44 = vld [vmem:[%s10003_s3 + $0x1a8] sm:$0xff] }
 0x2fe   : > { %10347 = vst [vmem:[#allocation39_spill] sm:$0xff] %v9205_v7  ;;  %2969 = vmatprep.mubr.f32.mxu1 %v9205_v7  ;;  %6809 = vmatpush3.msra.mxu0 %v10350_v35  ;;  %v10365_v48 = vld [vmem:[#allocation117_spill] sm:$0xff]  ;;  %v10366_v14 = vld [vmem:[#allocation119_spill] sm:$0xff] }
 0x2ff   : > { %2970 = vmatmul.mubr.f32.gmra.mxu1 %v9199_v49  ;;  %6810 = vmatprep.subr.mxu0 %v10351_v50  ;;  %v7174_v18 = vld [vmem:[%s10003_s3 + $0x128] sm:$0xff]  ;;  %v7176_v29 = vld [vmem:[%s10003_s3 + $0x120] sm:$0xff]  ;;  %v7177_v36 = vld [vmem:[%s10003_s3 + $0x198] sm:$0xff] }
 0x300   : > { %6693 = vmatpush3.msra.mxu1 %v7158_v37  ;;  %3146 = vmatprep.mubr.f32.mxu1 %v2986_v25  ;;  %v10367_v9 = vld [vmem:[#allocation121_spill] sm:$0xff]  ;;  %v10368_v27 = vld [vmem:[#allocation123_spill] sm:$0xff]  ;;  %v2991_v37 = vmul.f32 %v9054_v54, %v9054_v54 }
 0x301   : > { %6694 = vmatprep.subr.mxu1 %v7159_v4  ;;  %6811 = vmatpush3.msra.mxu0 %v10352_v23  ;;  %v10369_v61 = vld [vmem:[#allocation125_spill] sm:$0xff]  ;;  %v7178_v57 = vld [vmem:[%s10003_s3 + $0x118] sm:$0xff] }
 0x302   : > { %6695 = vmatpush3.msra.mxu1 %v7160_v30  ;;  %6812 = vmatprep.subr.mxu0 %v10353_v58  ;;  %v10370_v11 = vld [vmem:[#allocation127_spill] sm:$0xff]  ;;  %v7179_v56 = vld [vmem:[%s10003_s3 + $0x190] sm:$0xff]  ;;  %v7181_v4 = vld [vmem:[%s10003_s3 + $0x188] sm:$0xff] }
 0x303   : > { %6696 = vmatprep.subr.mxu1 %v7161_v38  ;;  %6813 = vmatpush3.msra.mxu0 %v10354_v52  ;;  %v10371_v20 = vld [vmem:[#allocation129_spill] sm:$0xff]  ;;  %v10372_v35 = vld [vmem:[#allocation131_spill] sm:$0xff]  ;;  %v3004_v38 = vmul.f32 %v9072_v34, %v9072_v34  ;;  %v10375_v58 = vld [vmem:[#allocation28_spill] sm:$0xff] }
 0x304   : > { %6697 = vmatpush3.msra.mxu1 %v7162_v31  ;;  %6814 = vmatprep.subr.mxu0 %v10355_v26  ;;  %v7180_v25 = vld [vmem:[%s10003_s3 + $0x110] sm:$0xff]  ;;  %v7182_v30 = vld [vmem:[%s10003_s3 + $0x108] sm:$0xff]  ;;  %v10374_v23 = vld [vmem:[#allocation135_spill] sm:$0xff]  ;;  %v2985_v31 = vmul.f32 %v10375_v58, %v10375_v58 }
 0x305   : > { %6698 = vmatprep.subr.mxu1 %v7163_v55  ;;  %6815 = vmatpush3.msra.mxu0 %v10356_v21  ;;  %v10373_v50 = vld [vmem:[#allocation133_spill] sm:$0xff]  ;;  %v7183_v52 = vld [vmem:[%s10003_s3 + $0x180] sm:$0xff]  ;;  %v10376_v26 = vld [vmem:[#allocation30_spill] sm:$0xff] }
 0x306   : > { %6699 = vmatpush3.msra.mxu1 %v7164_v33  ;;  %6816 = vmatprep.subr.mxu0 %v10357_v28  ;;  %v7184_v55 = vld [vmem:[%s10003_s3 + $0x100] sm:$0xff]  ;;  %v2998_v33 = vmul.f32 %v10376_v26, %v10376_v26  ;;  %v7185_v21 = vld [vmem:[%s10003_s3 + $0x3f8] sm:$0xff] }
 0x307   : > { %6700 = vmatprep.subr.mxu1 %v7165_v46  ;;  %6817 = vmatpush3.msra.mxu0 %v10358_v41  ;;  %v3003_v46 = vmul.f32 %v9070_v43, %v9070_v43  ;;  %v7186_v28 = vld [vmem:[%s10003_s3 + $0x378] sm:$0xff] }
 0x308   : > { %6701 = vmatpush3.msra.mxu1 %v7166_v10  ;;  %6818 = vmatprep.subr.mxu0 %v10359_v51  ;;  %v7187_v10 = vld [vmem:[%s10003_s3 + $0x3f0] sm:$0xff]  ;;  %v10377_v41 = vld [vmem:[#allocation31_spill] sm:$0xff] }
 0x309   : > { %6702 = vmatprep.subr.mxu1 %v7167_v1  ;;  %6819 = vmatpush3.msra.mxu0 %v10360_v8  ;;  %v2997_v1 = vmul.f32 %v10377_v41, %v10377_v41  ;;  %v7188_v51 = vld [vmem:[%s10003_s3 + $0x370] sm:$0xff] }
 0x30a   : > { %6703 = vmatpush3.msra.mxu1 %v7168_v22  ;;  %6820 = vmatprep.subr.mxu0 %v10361_v3  ;;  %v10378_v22 = vld [vmem:[#allocation69_spill] sm:$0xff] }
 0x30b   : > { %6704 = vmatprep.subr.mxu1 %v7169_v32  ;;  %6821 = vmatpush3.msra.mxu0 %v10362_v59  ;;  %v2990_v8 = vmul.f32 %v10378_v22, %v10378_v22  ;;  %v7189_v32 = vld [vmem:[%s10003_s3 + $0x3e8] sm:$0xff]  ;;  %v7192_v59 = vld [vmem:[%s10003_s3 + $0x360] sm:$0xff] }
 0x30c   : > { %6705 = vmatpush3.msra.mxu1 %v7170_v63  ;;  %6822 = vmatprep.subr.mxu0 %v10363_v0  ;;  %v7190_v3 = vld [vmem:[%s10003_s3 + $0x368] sm:$0xff]  ;;  %v7191_v63 = vld [vmem:[%s10003_s3 + $0x3e0] sm:$0xff]  ;;  %v7194_v0 = vld [vmem:[%s10003_s3 + $0x358] sm:$0xff] }
 0x30d   : > { %6706 = vmatprep.subr.mxu1 %v7171_v24  ;;  %6823 = vmatpush3.msra.mxu0 %v10364_v13  ;;  %v7193_v24 = vld [vmem:[%s10003_s3 + $0x3d8] sm:$0xff]  ;;  %v7196_v13 = vld [vmem:[%s10003_s3 + $0x350] sm:$0xff] }
 0x30e   : > { %6707 = vmatpush3.msra.mxu1 %v7172_v45  ;;  %6824 = vmatprep.subr.mxu0 %v10365_v48  ;;  %v7195_v45 = vld [vmem:[%s10003_s3 + $0x3d0] sm:$0xff]  ;;  %v7198_v48 = vld [vmem:[%s10003_s3 + $0x348] sm:$0xff] }
 0x30f   : > { %6708 = vmatprep.subr.mxu1 %v7173_v44  ;;  %6825 = vmatpush3.msra.mxu0 %v10366_v14  ;;  %v7197_v44 = vld [vmem:[%s10003_s3 + $0x3c8] sm:$0xff]  ;;  %v10380_v14 = vld [vmem:[#allocation46_spill] sm:$0xff] }
 0x310   : > { %6709 = vmatpush3.msra.mxu1 %v7174_v18  ;;  %6826 = vmatprep.subr.mxu0 %v10367_v9  ;;  %v10379_v18 = vld [vmem:[#allocation44_spill] sm:$0xff]  ;;  %v10382_v9 = vld [vmem:[#allocation50_spill] sm:$0xff] }
 0x311   : > { %6710 = vmatprep.subr.mxu1 %v7175_v6  ;;  %6827 = vmatpush3.msra.mxu0 %v10368_v27  ;;  %v10381_v6 = vld [vmem:[#allocation48_spill] sm:$0xff]  ;;  %v10384_v27 = vld [vmem:[#allocation54_spill] sm:$0xff] }
 0x312   : > { %6711 = vmatpush3.msra.mxu1 %v7176_v29  ;;  %6828 = vmatprep.subr.mxu0 %v10369_v61  ;;  %v10383_v29 = vld [vmem:[#allocation52_spill] sm:$0xff]  ;;  %v10386_v61 = vld [vmem:[#allocation58_spill] sm:$0xff] }
 0x313   : > { %6712 = vmatprep.subr.mxu1 %v7177_v36  ;;  %6829 = vmatpush3.msra.mxu0 %v10370_v11  ;;  %v10385_v36 = vld [vmem:[#allocation56_spill] sm:$0xff]  ;;  %v10388_v11 = vld [vmem:[#allocation61_spill] sm:$0xff] }
 0x314   : > { %6713 = vmatpush3.msra.mxu1 %v7178_v57  ;;  %6830 = vmatprep.subr.mxu0 %v10371_v20  ;;  %v10387_v57 = vld [vmem:[#allocation60_spill] sm:$0xff]  ;;  %v10390_v20 = vld [vmem:[#allocation63_spill] sm:$0xff] }
 0x315   : > { %6714 = vmatprep.subr.mxu1 %v7179_v56  ;;  %6831 = vmatpush3.msra.mxu0 %v10372_v35  ;;  %v10389_v56 = vld [vmem:[#allocation62_spill] sm:$0xff] }
 0x316   : > { %6715 = vmatpush3.msra.mxu1 %v7180_v25  ;;  %6832 = vmatprep.subr.mxu0 %v10373_v50  ;;  %v10391_v25 = vld [vmem:[#allocation64_spill] sm:$0xff]  ;;  %v10392_v35 = vld [vmem:[#allocation66_spill] sm:$0xff] }
 0x317   : > { %6716 = vmatprep.subr.mxu1 %v7181_v4  ;;  %6833 = vmatpush3.msra.mxu0 %v10374_v23  ;;  %v10394_v4 = vld [vmem:[#allocation70_spill] sm:$0xff]  ;;  %v10395_v50 = vld [vmem:[#allocation76_spill] sm:$0xff] }
 0x318   : > { %6717 = vmatpush3.msra.mxu1 %v7182_v30  ;;  %3372 = vmatmul.mubr.f32.vlgmr.msra.gmra.mxu0 %v2991_v37  ;;  %v10393_v37 = vld [vmem:[#allocation68_spill] sm:$0xff]  ;;  %v2989_v30 = vmul.f32 %v10395_v50, %v10395_v50 }
 0x319   : > { %6718 = vmatprep.subr.mxu1 %v7183_v52  ;;  %3376 = vmatprep.mubr.f32.mxu0 %v3004_v38  ;;  %v10396_v23 = vld [vmem:[#allocation72_spill] sm:$0xff]  ;;  %v10397_v38 = vld [vmem:[#allocation74_spill] sm:$0xff] }
 0x31a   : > { %6719 = vmatpush3.msra.mxu1 %v7184_v55  ;;  %v10399_v55 = vld [vmem:[#allocation78_spill] sm:$0xff] }
 0x31b   : > { %3147 = vmatmul.mubr.f32.vlgmr.msra.gmra.mxu1 %v2985_v31  ;;  %6764 = vmatprep.subr.mxu1 %v7185_v21  ;;  %v10398_v31 = vld [vmem:[#allocation80_spill] sm:$0xff]  ;;  %v10401_v21 = vld [vmem:[#allocation86_spill] sm:$0xff] }
 0x31c   : > { %3151 = vmatprep.mubr.f32.mxu1 %v2998_v33  ;;  %6765 = vmatpush3.msra.mxu1 %v7186_v28  ;;  %v3002_v52 = vmul.f32 %v10398_v31, %v10398_v31  ;;  %v10400_v33 = vld [vmem:[#allocation83_spill] sm:$0xff] }
 0x31d   : > { %6766 = vmatprep.subr.mxu1 %v7187_v10  ;;  %3377 = vmatmul.mubr.f32.gmra.mxu0 %v3003_v46  ;;  %v10402_v46 = vld [vmem:[#allocation81_spill] sm:$0xff]  ;;  %v10403_v10 = vld [vmem:[#allocation88_spill] sm:$0xff] }
 0x31e   : > { %6767 = vmatpush3.msra.mxu1 %v7188_v51  ;;  %v3001_v28 = vmul.f32 %v10402_v46, %v10402_v46  ;;  %v10404_v51 = vld [vmem:[#allocation90_spill] sm:$0xff] }
 0x31f   : > { %3152 = vmatmul.mubr.f32.gmra.mxu1 %v2997_v1  ;;  %6768 = vmatprep.subr.mxu1 %v7189_v32  ;;  %v2994_v1 = vmul.f32 %v9183_v16, %v9183_v16  ;;  %v10406_v32 = vld [vmem:[#allocation94_spill] sm:$0xff] }
 0x320   : > { %6769 = vmatpush3.msra.mxu1 %v7190_v3  ;;  %3296 = vmatprep.mubr.f32.mxu1 %v2990_v8  ;;  %v10405_v8 = vld [vmem:[#allocation92_spill] sm:$0xff] }
 0x321   : > { %6770 = vmatprep.subr.mxu1 %v7191_v63  ;;  %v10407_v3 = vld [vmem:[#allocation96_spill] sm:$0xff]  ;;  %v10408_v63 = vld [vmem:[#allocation98_spill] sm:$0xff] }
 0x322   : > { %6771 = vmatpush3.msra.mxu1 %v7192_v59  ;;  %v10409_v59 = vld [vmem:[#allocation100_spill] sm:$0xff] }
 0x323   : > { %6772 = vmatprep.subr.mxu1 %v7193_v24  ;;  %v10410_v24 = vld [vmem:[#allocation102_spill] sm:$0xff] }
 0x324   : > { %6773 = vmatpush3.msra.mxu1 %v7194_v0  ;;  %v10411_v0 = vld [vmem:[#allocation104_spill] sm:$0xff] }
 0x325   : > { %6774 = vmatprep.subr.mxu1 %v7195_v45  ;;  %v10412_v45 = vld [vmem:[#allocation106_spill] sm:$0xff] }
 0x326   : > { %6775 = vmatpush3.msra.mxu1 %v7196_v13  ;;  %v10413_v13 = vld [vmem:[#allocation108_spill] sm:$0xff] }
 0x327   : > { %6776 = vmatprep.subr.mxu1 %v7197_v44  ;;  %v10414_v44 = vld [vmem:[#allocation110_spill] sm:$0xff] }
 0x328   : > { %6777 = vmatpush3.msra.mxu1 %v7198_v48  ;;  %v10415_v48 = vld [vmem:[#allocation112_spill] sm:$0xff] }
 0x329   : > { %6778 = vmatprep.subr.mxu1 %v10379_v18  ;;  %v10416_v18 = vld [vmem:[#allocation114_spill] sm:$0xff] }
 0x32a   : > { %6779 = vmatpush3.msra.mxu1 %v10380_v14  ;;  %v10417_v14 = vld [vmem:[#allocation116_spill] sm:$0xff] }
 0x32b   : > { %6780 = vmatprep.subr.mxu1 %v10381_v6  ;;  %v10418_v6 = vld [vmem:[#allocation118_spill] sm:$0xff] }
 0x32c   : > { %6781 = vmatpush3.msra.mxu1 %v10382_v9  ;;  %v10419_v9 = vld [vmem:[#allocation120_spill] sm:$0xff] }
 0x32d   : > { %6782 = vmatprep.subr.mxu1 %v10383_v29  ;;  %v10420_v29 = vld [vmem:[#allocation122_spill] sm:$0xff] }
 0x32e   : > { %6783 = vmatpush3.msra.mxu1 %v10384_v27  ;;  %v10421_v27 = vld [vmem:[#allocation124_spill] sm:$0xff] }
 0x32f   : > { %6784 = vmatprep.subr.mxu1 %v10385_v36  ;;  %v10422_v36 = vld [vmem:[#allocation126_spill] sm:$0xff] }
 0x330   : > { %6785 = vmatpush3.msra.mxu1 %v10386_v61  ;;  %v10423_v61 = vld [vmem:[#allocation128_spill] sm:$0xff] }
 0x331   : > { %6786 = vmatprep.subr.mxu1 %v10387_v57  ;;  %v10424_v57 = vld [vmem:[#allocation130_spill] sm:$0xff] }
 0x332   : > { %6787 = vmatpush3.msra.mxu1 %v10388_v11  ;;  %v10425_v11 = vld [vmem:[#allocation132_spill] sm:$0xff] }
 0x333   : > { %6788 = vmatprep.subr.mxu1 %v10389_v56  ;;  %v10426_v56 = vld [vmem:[#allocation134_spill] sm:$0xff] }
 0x334   : > { %6789 = vmatpush3.msra.mxu1 %v10390_v20  ;;  %v10427_v20 = vld [vmem:[#allocation136_spill] sm:$0xff] }
 0x335   : > { %6790 = vmatprep.subr.mxu1 %v10391_v25  ;;  %v10428_v25 = vld [vmem:[#allocation137_spill] sm:$0xff] }
 0x336   : > { %6791 = vmatpush3.msra.mxu1 %v10392_v35  ;;  %v10429_v35 = vld [vmem:[#allocation138_spill] sm:$0xff] }
 0x337   : > { %6792 = vmatprep.subr.mxu1 %v10393_v37  ;;  %v2993_v37 = vmul.f32 %v9188_v47, %v9188_v47 }
 0x338   : > { %6793 = vmatpush3.msra.mxu1 %v10394_v4  ;;  %v10430_v4 = vld [vmem:[#allocation139_spill] sm:$0xff] }
 0x339   : > { %6794 = vmatprep.subr.mxu1 %v10396_v23  ;;  %v3006_v23 = vmul.f32 %v9205_v7, %v9205_v7 }
 0x33a   : > { %6795 = vmatpush3.msra.mxu1 %v10397_v38  ;;  %v3005_v38 = vmul.f32 %v9199_v49, %v9199_v49 }
 0x33b   : > { %3297 = vmatmul.mubr.f32.vlgmr.msra.gmra.mxu1 %v2989_v30  ;;  %6840 = vmatprep.subr.mxu1 %v10399_v55  ;;  %v10431_v30 = vld [vmem:[#allocation140_spill] sm:$0xff]  ;;  %v9446_v55 = vld [vmem:[#allocation8 + $0x60] sm:$0xf] }
 0x33c   : > { %3301 = vmatprep.mubr.f32.mxu1 %v3002_v52  ;;  %6841 = vmatpush3.msra.mxu1 %v10400_v33  ;;  %v9444_v52 = vld [vmem:[#allocation8 + $0x68] sm:$0xf] }
 0x33d   : > { %6842 = vmatprep.subr.mxu1 %v10401_v21  ;;  %v9448_v33 = vld [vmem:[#allocation8 + $0x8] sm:$0xff]  ;;  %6359 = vmatprep.subr.msk.mxu0 %vm3498_vm0, %v9444_v52  ;;  %v9452_v21 = vld [vmem:[#allocation8] sm:$0xff] }
 0x33e   : > { %6843 = vmatpush3.msra.mxu1 %v10403_v10  ;;  %v9456_v10 = vld [vmem:[#allocation8 + $0x70] sm:$0xf]  ;;  %6360 = vmatpush1.msk.msra.mxu0 %vm3498_vm0, %v9446_v55 }
 0x33f   : > { %3302 = vmatmul.mubr.f32.gmra.mxu1 %v3001_v28  ;;  %6844 = vmatprep.subr.mxu1 %v10404_v51  ;;  %v9454_v28 = vld [vmem:[#allocation8 + $0x78] sm:$0xf]  ;;  %v9464_v51 = vld [vmem:[#allocation8 + $0x10] sm:$0xff] }
 0x340   : > { %6845 = vmatpush3.msra.mxu1 %v10405_v8  ;;  %3446 = vmatprep.mubr.f32.mxu1 %v2994_v1  ;;  %v9462_v1 = vld [vmem:[#allocation8 + $0x18] sm:$0xff]  ;;  %v9469_v8 = vld [vmem:[#allocation8 + $0x88] sm:$0xf] }
 0x341   : > { %6846 = vmatprep.subr.mxu1 %v10406_v32  ;;  %3565 = vmatprep.subr.mxu0 %v9448_v33  ;;  %10432 = vst [vmem:[#allocation41_spill] sm:$0xff] %v9469_v8  ;;  %v10148_v32 = vmov 0.0  }
 0x342   : > { %6847 = vmatpush3.msra.mxu1 %v10407_v3  ;;  %3566 = vmatpush1.msra.mxu0 %v9452_v21  ;;  %v9478_v3 = vld [vmem:[#allocation8 + $0x98] sm:$0xf] }
 0x343   : > { %6848 = vmatprep.subr.mxu1 %v10408_v63  ;;  %3599 = vmatprep.mubr.f32.mxu0 %v10148_v32  ;;  %10433 = vst [vmem:[#allocation42_spill] sm:$0xff] %v9478_v3  ;;  %v6454_v63 = vpop.f32.mrf.mxu0 }
 0x344   : > { %6849 = vmatpush3.msra.mxu1 %v10409_v59  ;;  %6367 = vmatprep.subr.msk.mxu0 %vm3498_vm0, %v9469_v8 }
 0x345   : > { %6850 = vmatprep.subr.mxu1 %v10410_v24  ;;  %v6455_v59 = vpop.f32.mrf.mxu0  ;;  %v6492_v24 = vpop.f32.mrf.mxu1 }
 0x346   : > { %6851 = vmatpush3.msra.mxu1 %v10411_v0  ;;  %v6456_v19 = vadd.f32 %v6455_v59, %v6454_v63 }
 0x347   : > { %6852 = vmatprep.subr.mxu1 %v10412_v45  ;;  %v6457_v0 = vpop.f32.mrf.mxu0  ;;  %v6493_v45 = vpop.f32.mrf.mxu1 }
 0x348   : > { %6853 = vmatpush3.msra.mxu1 %v10413_v13  ;;  %v6494_v54 = vadd.f32 %v6493_v45, %v6492_v24 }
 0x349   : > { %6854 = vmatprep.subr.mxu1 %v10414_v44  ;;  %v6458_v13 = vpop.f32.mrf.mxu0 }
 0x34a   : > { %6855 = vmatpush3.msra.mxu1 %v10415_v48  ;;  %v6495_v48 = vpop.f32.mrf.mxu1  ;;  %v2667_v46 = vadd.f32 %v6494_v54, %v6456_v19  ;;  %v6459_v5 = vadd.f32 %v6458_v13, %v6457_v0 }
 0x34b   : > { %6856 = vmatprep.subr.mxu1 %v10416_v18  ;;  %v6530_v44 = vpop.f32.mrf.mxu0 }
 0x34c   : > { %6857 = vmatpush3.msra.mxu1 %v10417_v14  ;;  %v6496_v14 = vpop.f32.mrf.mxu1 }
 0x34d   : > { %6858 = vmatprep.subr.mxu1 %v10418_v6  ;;  %v6531_v18 = vpop.f32.mrf.mxu0  ;;  %v6497_v39 = vadd.f32 %v6496_v14, %v6495_v48  ;;  %v6358_v14 = vld [vmem:[#allocation10] ss:$0 sm:$0xff] }
 0x34e   : > { %6859 = vmatpush3.msra.mxu1 %v10419_v9  ;;  %v6568_v9 = vpop.f32.mrf.mxu1  ;;  %v6532_v15 = vadd.f32 %v6531_v18, %v6530_v44 }
 0x34f   : > { %6860 = vmatprep.subr.mxu1 %v10420_v29  ;;  %v6533_v6 = vpop.f32.mrf.mxu0 }
 0x350   : > { %6861 = vmatpush3.msra.mxu1 %v10421_v27  ;;  %v6569_v27 = vpop.f32.mrf.mxu1  ;;  %v2742_v41 = vadd.f32 %v6532_v15, %v2667_v46 }
 0x351   : > { %6862 = vmatprep.subr.mxu1 %v10422_v36  ;;  %v6534_v29 = vpop.f32.mrf.mxu0  ;;  %v6570_v22 = vadd.f32 %v6569_v27, %v6568_v9 }
 0x352   : > { %6863 = vmatpush3.msra.mxu1 %v10423_v61  ;;  %v6571_v61 = vpop.f32.mrf.mxu1  ;;  %v6535_v53 = vadd.f32 %v6534_v29, %v6533_v6 }
 0x353   : > { %6864 = vmatprep.subr.mxu1 %v10424_v57  ;;  %v2817_v8 = vadd.f32 %v6570_v22, %v2742_v41 }
 0x354   : > { %6865 = vmatpush3.msra.mxu1 %v10425_v11  ;;  %v6572_v11 = vpop.f32.mrf.mxu1 }
 0x355   : > { %6866 = vmatprep.subr.mxu1 %v10426_v56  ;;  %v6573_v63 = vadd.f32 %v6572_v11, %v6571_v61 }
 0x356   : > { %6867 = vmatpush3.msra.mxu1 %v10427_v20 }
 0x357   : > { %6868 = vmatprep.subr.mxu1 %v10428_v25 }
 0x358   : > { %6869 = vmatpush3.msra.mxu1 %v10429_v35 }
 0x359   : > { %6870 = vmatprep.subr.mxu1 %v10430_v4 }
 0x35a   : > { %6871 = vmatpush3.msra.mxu1 %v10431_v30 }
 0x35b   : > { %3447 = vmatmul.mubr.f32.vlgmr.msra.gmra.mxu1 %v2993_v37  ;;  %6363 = vmatprep.subr.msk.mxu1 %vm3498_vm0, %v9454_v28 }
 0x35c   : > { %3451 = vmatprep.mubr.f32.mxu1 %v3006_v23  ;;  %6364 = vmatpush1.msk.msra.mxu1 %vm3498_vm0, %v9456_v10 }
 0x35d   : > { %3642 = vmatprep.subr.mxu1 %v9462_v1 }
 0x35e   : > { %3643 = vmatpush1.msra.mxu1 %v9464_v51 }
 0x35f   : > { %3452 = vmatmul.mubr.f32.gmra.mxu1 %v3005_v38  ;;  %6371 = vmatprep.subr.msk.mxu1 %vm3498_vm0, %v9478_v3  ;;  %v2672_v3 = vadd.f32 %v6497_v39, %v6459_v5 }
 0x360   : > { %3676 = vmatprep.mubr.f32.mxu1 %v10148_v32 }
 0x361   : > { %v2747_v54 = vadd.f32 %v6535_v53, %v2672_v3 }
 0x363   : > { %v2822_v15 = vadd.f32 %v6573_v63, %v2747_v54  ;;  %v9514_v63 = vld [vmem:[#allocation8 + $0xa8] sm:$0xf]  ;;  %v3478_v54 = vld [vmem:[#allocation8 + $0x58] sm:$0xff] }
 0x375   : > { %v6606_v36 = vpop.f32.mrf.mxu0 }
 0x377   : > { %v6607_v57 = vpop.f32.mrf.mxu0 }
 0x378   : > { %v6608_v42 = vadd.f32 %v6607_v57, %v6606_v36 }
 0x37a   : > { %v2892_v19 = vadd.f32 %v6608_v42, %v2817_v8 }
 0x37d   : > { %v6609_v56 = vpop.f32.mrf.mxu0 }
 0x37f   : > { %v6610_v25 = vpop.f32.mrf.mxu0 }
 0x380   : > { %v6611_v0 = vadd.f32 %v6610_v25, %v6609_v56  ;;  %v9490_v56 = vld [vmem:[#allocation8 + $0x80] sm:$0xf]  ;;  %v9492_v25 = vld [vmem:[#allocation8 + $0x28] sm:$0xff] }
 0x395   : > { %v6682_v37 = vpop.f32.mrf.mxu0 }
 0x397   : > { %v6683_v30 = vpop.f32.mrf.mxu0 }
 0x398   : > { %v6684_v26 = vadd.f32 %v6683_v30, %v6682_v37  ;;  %v9498_v37 = vld [vmem:[#allocation8 + $0x90] sm:$0xf]  ;;  %v9505_v30 = vld [vmem:[#allocation8 + $0x38] sm:$0xff] }
 0x399   : > { %v6685_v38 = vpop.f32.mrf.mxu0 }
 0x39b   : > { %v6686_v31 = vpop.f32.mrf.mxu0 }
 0x39c   : > { %v6687_v45 = vadd.f32 %v6686_v31, %v6685_v38  ;;  %v9510_v38 = vld [vmem:[#allocation8 + $0x30] sm:$0xff] }
 0x3b5   : > { %v6758_v49 = vpop.f32.mrf.mxu0 }
 0x3b7   : > { %v6759_v34 = vpop.f32.mrf.mxu0 }
 0x3b8   : > { %v6760_v44 = vadd.f32 %v6759_v34, %v6758_v49 }
 0x3b9   : > { %v6644_v20 = vpop.f32.mrf.mxu1  ;;  %v6761_v43 = vpop.f32.mrf.mxu0 }
 0x3bb   : > { %v6645_v35 = vpop.f32.mrf.mxu1  ;;  %v6762_v12 = vpop.f32.mrf.mxu0 }
 0x3bc   : > { %v6646_v59 = vadd.f32 %v6645_v35, %v6644_v20  ;;  %v9496_v35 = vld [vmem:[#allocation8 + $0x20] sm:$0xff] }
 0x3be   : > { %v2967_v46 = vadd.f32 %v6646_v59, %v2892_v19  ;;  %v9516_v59 = vld [vmem:[#allocation8 + $0xb8] sm:$0xf]  ;;  %v3477_v19 = vld [vmem:[#allocation8 + $0x50] sm:$0xff] }
 0x3bf   : > { %v6647_v4 = vpop.f32.mrf.mxu1 }
 0x3c0   : > { %v9482_v34 = vmul.f32 %v6358_v14, %v2967_v46 }
 0x3c1   : > { %v6648_v23 = vpop.f32.mrf.mxu1 }
 0x3d8   : > { %v6834_v50 = vpop.f32.mrf.mxu0 }
 0x3da   : > { %v6835_v24 = vpop.f32.mrf.mxu0 }
 0x3db   : > { %v6720_v32 = vpop.f32.mrf.mxu1  ;;  %v6836_v41 = vadd.f32 %v6835_v24, %v6834_v50  ;;  %v9522_v24 = vld [vmem:[#allocation8 + $0xa0] sm:$0xf] }
 0x3dd   : > { %v6721_v47 = vpop.f32.mrf.mxu1  ;;  %v6837_v18 = vpop.f32.mrf.mxu0 }
 0x3de   : > { %v6722_v17 = vadd.f32 %v6721_v47, %v6720_v32 }
 0x3df   : > { %v6723_v7 = vpop.f32.mrf.mxu1 }
 0x3e0   : > { %v3149_v58 = vadd.f32 %v6722_v17, %v6684_v26  ;;  %v6763_v17 = vadd.f32 %v6762_v12, %v6761_v43  ;;  %v2897_v26 = vadd.f32 %v6611_v0, %v2822_v15  ;;  %v3459_v12 = vmul.f32 %v9482_v34, %v9482_v34 }
 0x3e1   : > { %v6724_v60 = vpop.f32.mrf.mxu1 }
 0x3e2   : > { %v6725_v62 = vadd.f32 %v6724_v60, %v6723_v7  ;;  %v3224_v48 = vadd.f32 %v6760_v44, %v3149_v58  ;;  %v6649_v60 = vadd.f32 %v6648_v23, %v6647_v4  ;;  %v10434_v4 = vmov 0.0   ;;  %v9532_v44 = vld [vmem:[#allocation8 + $0x40] sm:$0xff] }
 0x3e4   : > { %v3154_v13 = vadd.f32 %v6725_v62, %v6687_v45  ;;  %v9526_v45 = vld [vmem:[#allocation8 + $0x48] sm:$0xff] }
 0x3e6   : > { %v3229_v22 = vadd.f32 %v6763_v17, %v3154_v13 }
 0x3fb   : > { %v6796_v16 = vpop.f32.mrf.mxu1 }
 0x3fd   : > { %v6797_v2 = vpop.f32.mrf.mxu1 }
 0x3fe   : > { %v6798_v47 = vadd.f32 %v6797_v2, %v6796_v16  ;;  %v6838_v2 = vpop.f32.mrf.mxu0  ;;  %v2972_v16 = vadd.f32 %v6649_v60, %v2897_v26 }
 0x3ff   : > { %v6799_v40 = vpop.f32.mrf.mxu1  ;;  %v6839_v31 = vadd.f32 %v6838_v2, %v6837_v18 }
 0x400   : > { %v3299_v39 = vadd.f32 %v6798_v47, %v3224_v48  ;;  %v3489_v47 = vld [vmem:[#allocation8 + $0xb0] sm:$0xf] }
 0x401   : > { %v6800_v32 = vpop.f32.mrf.mxu1 }
 0x402   : > { %v6801_v5 = vadd.f32 %v6800_v32, %v6799_v40  ;;  %v3374_v62 = vadd.f32 %v6836_v41, %v3299_v39  ;;  %v9486_v40 = vmul.f32 %v6358_v14, %v2972_v16 }
 0x404   : > { %v3304_v49 = vadd.f32 %v6801_v5, %v3229_v22  ;;  %v3460_v27 = vmul.f32 %v9486_v40, %v9486_v40 }
 0x406   : > { %v3379_v50 = vadd.f32 %v6839_v31, %v3304_v49  ;;  %v4518_v49 = vld [vmem:[#allocation7 + $0x2] ss:$4 sm:$0xff] }
 0x41b   : > { %v6872_v7 = vpop.f32.mrf.mxu1 }
 0x41d   : > { %v6873_v53 = vpop.f32.mrf.mxu1 }
 0x41e   : > { %v6874_v42 = vadd.f32 %v6873_v53, %v6872_v7 }
 0x41f   : > { %v6875_v58 = vpop.f32.mrf.mxu1 }
 0x420   : > { %v3449_v8 = vadd.f32 %v6874_v42, %v3374_v62 }
 0x421   : > { %v6876_v43 = vpop.f32.mrf.mxu1 }
 0x422   : > { %v3457_v3 = vmul.f32 %v6358_v14, %v3449_v8  ;;  %v6877_v6 = vadd.f32 %v6876_v43, %v6875_v58  ;;  %v10437_v58 = vld [vmem:[#allocation27_spill] sm:$0xff]  ;;  %v10438_v8 = vld [vmem:[#allocation28_spill] sm:$0xff] }
 0x423   : > { %v10439_v43 = vld [vmem:[#allocation24_spill] sm:$0xff] }
 0x424   : > { %v3461_v9 = vsub.f32 %v3457_v3, %v3459_v12  ;;  %v3454_v29 = vadd.f32 %v6877_v6, %v3379_v50  ;;  %v10440_v3 = vld [vmem:[#allocation25_spill] sm:$0xff] }
 0x425   : > { %v4534_v50 = vrot.slane %v4518_v49, %v10440_v3  ;;  %v4608_v6 = vld [vmem:[#allocation7 + $0x3] ss:$4 sm:$0xff] }
 0x426   : > { %v3463_v36 = vadd.f32 1e-05, %v3461_v9  ;;  %v3458_v61 = vmul.f32 %v6358_v14, %v3454_v29 }
 0x428   : > { %7080 = vrsqrt.f32 %v3463_v36  ;;  %v3462_v57 = vsub.f32 %v3458_v61, %v3460_v27  ;;  %v10441_v27 = vld [vmem:[#allocation23_spill] sm:$0xff] }
 0x42a   : > { %v3464_v11 = vadd.f32 1e-05, %v3462_v57 }
 0x42c   : > { %7082 = vrsqrt.f32 %v3464_v11  ;;  %v10442_v11 = vld [vmem:[#allocation21_spill] sm:$0xff] }
 0x435   : > { %v7081_v20 = vpop.eup %7080 }
 0x436   : > { %6361 = vmatmul.mubr.msk.f32.vlgmr.msra.gmra.mxu0 %vm3491_vm1, %v7081_v20  ;;  %6365 = vmatmul.mubr.msk.f32.vlgmr.msra.gmra.mxu1 %vm3491_vm1, %v7081_v20 }
 0x437   : > { %6368 = vmatpush1.msk.msra.mxu0 %vm3498_vm0, %v9490_v56  ;;  %3605 = vmatprep.mubr.f32.mxu0 %v10434_v4 }
 0x438   : > { %3682 = vmatprep.mubr.f32.mxu1 %v10434_v4  ;;  %3719 = vmatprep.subr.mxu0 %v9492_v25 }
 0x439   : > { %v7083_v23 = vpop.eup %7082  ;;  %3720 = vmatpush1.msra.mxu0 %v9496_v35  ;;  %6372 = vmatpush1.msk.msra.mxu1 %vm3498_vm0, %v9498_v37 }
 0x43a   : > { %6362 = vmatmul.mubr.msk.f32.gmra.mxu0 %vm3491_vm1, %v7083_v23  ;;  %6366 = vmatmul.mubr.msk.f32.gmra.mxu1 %vm3491_vm1, %v7083_v23 }
 0x43b   : > { %3796 = vmatprep.subr.mxu1 %v9505_v30  ;;  %3753 = vmatprep.mubr.f32.mxu0 %v10434_v4 }
 0x43c   : > { %3797 = vmatpush1.msra.mxu1 %v9510_v38  ;;  %3830 = vmatprep.mubr.f32.mxu1 %v10434_v4 }
 0x43d   : > { %6375 = vmatprep.subr.msk.mxu0 %vm3498_vm0, %v9514_v63  ;;  %6379 = vmatprep.subr.msk.mxu1 %vm3498_vm0, %v9516_v59 }
 0x43e   : > { %6369 = vmatmul.mubr.msk.f32.vlgmr.msra.gmra.mxu0 %vm3491_vm1, %v7081_v20  ;;  %6373 = vmatmul.mubr.msk.f32.vlgmr.msra.gmra.mxu1 %vm3491_vm1, %v7081_v20 }
 0x43f   : > { %6376 = vmatpush1.msk.msra.mxu0 %vm3498_vm0, %v9522_v24  ;;  %3759 = vmatprep.mubr.f32.mxu0 %v10434_v4 }
 0x440   : > { %3836 = vmatprep.mubr.f32.mxu1 %v10434_v4  ;;  %3873 = vmatprep.subr.mxu0 %v9526_v45 }
 0x441   : > { %3874 = vmatpush1.msra.mxu0 %v9532_v44  ;;  %6380 = vmatpush1.msk.msra.mxu1 %vm3498_vm0, %v3489_v47 }
 0x442   : > { %6370 = vmatmul.mubr.msk.f32.gmra.mxu0 %vm3491_vm1, %v7083_v23  ;;  %6374 = vmatmul.mubr.msk.f32.gmra.mxu1 %vm3491_vm1, %v7083_v23 }
 0x443   : > { %3950 = vmatprep.subr.mxu1 %v3478_v54  ;;  %3907 = vmatprep.mubr.f32.mxu0 %v10434_v4 }
 0x444   : > { %3951 = vmatpush1.msra.mxu1 %v3477_v19  ;;  %3984 = vmatprep.mubr.f32.mxu1 %v10434_v4 }
 0x445   : > { %6383 = vmatprep.subr.msk.mxu0 %vm3498_vm0, %v9444_v52  ;;  %6387 = vmatprep.subr.msk.mxu1 %vm3498_vm0, %v9454_v28  ;;  %v3997_v52 = vsub.f32 0.0, %v9482_v34  ;;  %v3998_v28 = vsub.f32 0.0, %v9486_v40  ;;  %v9647_v40 = vrot.slane %v4518_v49, %v10439_v43 }
 0x446   : > { %6377 = vmatmul.mubr.msk.f32.vlgmr.msra.gmra.mxu0 %vm3491_vm1, %v7081_v20  ;;  %6381 = vmatmul.mubr.msk.f32.vlgmr.msra.gmra.mxu1 %vm3491_vm1, %v7081_v20 }
 0x447   : > { %6384 = vmatpush1.msk.msra.mxu0 %vm3498_vm0, %v9446_v55  ;;  %3913 = vmatprep.mubr.f32.mxu0 %v10434_v4  ;;  %v3999_v55 = vmul.f32 %v7081_v20, %v3997_v52 }
 0x448   : > { %3990 = vmatprep.mubr.f32.mxu1 %v10434_v4  ;;  %4037 = vmatprep.subr.mxu0 %v9448_v33  ;;  %v10435_v33 = vld [vmem:[#allocation41_spill] sm:$0xff] }
 0x449   : > { %4038 = vmatpush1.msra.mxu0 %v9452_v21  ;;  %6388 = vmatpush1.msk.msra.mxu1 %vm3498_vm0, %v9456_v10  ;;  %v10436_v21 = vld [vmem:[#allocation42_spill] sm:$0xff]  ;;  %v4000_v10 = vmul.f32 %v7083_v23, %v3998_v28 }
 0x44a   : > { %6378 = vmatmul.mubr.msk.f32.gmra.mxu0 %vm3491_vm1, %v7083_v23  ;;  %6382 = vmatmul.mubr.msk.f32.gmra.mxu1 %vm3491_vm1, %v7083_v23 }
 0x44b   : > { %4114 = vmatprep.subr.mxu1 %v9462_v1  ;;  %4071 = vmatprep.mubr.f32.mxu0 %v10434_v4 }
 0x44c   : > { %4115 = vmatpush1.msra.mxu1 %v9464_v51  ;;  %4148 = vmatprep.mubr.f32.mxu1 %v10434_v4 }
 0x44d   : > { %6391 = vmatprep.subr.msk.mxu0 %vm3498_vm0, %v10435_v33  ;;  %6395 = vmatprep.subr.msk.mxu1 %vm3498_vm0, %v10436_v21 }
 0x44e   : > { %6385 = vmatmul.mubr.msk.f32.vlgmr.msra.gmra.mxu0 %vm3491_vm1, %v3999_v55  ;;  %6389 = vmatmul.mubr.msk.f32.vlgmr.msra.gmra.mxu1 %vm3491_vm1, %v3999_v55 }
 0x44f   : > { %6392 = vmatpush1.msk.msra.mxu0 %vm3498_vm0, %v9490_v56  ;;  %4077 = vmatprep.mubr.f32.mxu0 %v10434_v4  ;;  %v4538_v56 = vrot.slane %v4518_v49, %v10442_v11 }
 0x450   : > { %4154 = vmatprep.mubr.f32.mxu1 %v10434_v4  ;;  %4191 = vmatprep.subr.mxu0 %v9492_v25 }
 0x451   : > { %4192 = vmatpush1.msra.mxu0 %v9496_v35  ;;  %6396 = vmatpush1.msk.msra.mxu1 %vm3498_vm0, %v9498_v37  ;;  %v9655_v35 = vrot.slane %v4608_v6, %v10439_v43  ;;  %v4624_v37 = vrot.slane %v4608_v6, %v10440_v3 }
 0x452   : > { %6386 = vmatmul.mubr.msk.f32.gmra.mxu0 %vm3491_vm1, %v4000_v10  ;;  %6390 = vmatmul.mubr.msk.f32.gmra.mxu1 %vm3491_vm1, %v4000_v10 }
 0x453   : > { %4268 = vmatprep.subr.mxu1 %v9505_v30  ;;  %4225 = vmatprep.mubr.f32.mxu0 %v10434_v4 }
 0x454   : > { %4269 = vmatpush1.msra.mxu1 %v9510_v38  ;;  %4302 = vmatprep.mubr.f32.mxu1 %v10434_v4 }
 0x455   : > { %6399 = vmatprep.subr.msk.mxu0 %vm3498_vm0, %v9514_v63  ;;  %6403 = vmatprep.subr.msk.mxu1 %vm3498_vm0, %v9516_v59  ;;  %v10444_v59 = vld [vmem:[#allocation20_spill] sm:$0xff] }
 0x456   : > { %6393 = vmatmul.mubr.msk.f32.vlgmr.msra.gmra.mxu0 %vm3491_vm1, %v3999_v55  ;;  %6397 = vmatmul.mubr.msk.f32.vlgmr.msra.gmra.mxu1 %vm3491_vm1, %v3999_v55  ;;  %v9668_v33 = vrot.slane %v4608_v6, %v10444_v59 }
 0x457   : > { %4231 = vmatprep.mubr.f32.mxu0 %v10434_v4  ;;  %4308 = vmatprep.mubr.f32.mxu1 %v10434_v4 }
 0x458   : > { %6400 = vmatpush1.msk.msra.mxu0 %vm3498_vm0, %v9522_v24  ;;  %6404 = vmatpush1.msk.msra.mxu1 %vm3498_vm0, %v3489_v47  ;;  %v9661_v24 = vrot.slane %v4518_v49, %v10444_v59  ;;  %v4628_v47 = vrot.slane %v4608_v6, %v10442_v11 }
 0x459   : > { %4345 = vmatprep.subr.mxu0 %v9526_v45  ;;  %4422 = vmatprep.subr.mxu1 %v3478_v54  ;;  %v10445_v54 = vld [vmem:[#allocation30_spill] sm:$0xff] }
 0x45a   : > { %6394 = vmatmul.mubr.msk.f32.gmra.mxu0 %vm3491_vm1, %v4000_v10  ;;  %6398 = vmatmul.mubr.msk.f32.gmra.mxu1 %vm3491_vm1, %v4000_v10 }
 0x45b   : > { %4346 = vmatpush1.msra.mxu0 %v9532_v44  ;;  %4379 = vmatprep.mubr.f32.mxu0 %v10434_v4 }
 0x45c   : > { %4423 = vmatpush1.msra.mxu1 %v3477_v19  ;;  %4456 = vmatprep.mubr.f32.mxu1 %v10434_v4 }
 0x45e   : > { %6401 = vmatmul.mubr.msk.f32.vlgmr.msra.gmra.mxu0 %vm3491_vm1, %v3999_v55  ;;  %6405 = vmatmul.mubr.msk.f32.vlgmr.msra.gmra.mxu1 %vm3491_vm1, %v3999_v55 }
 0x45f   : > { %4385 = vmatprep.mubr.f32.mxu0 %v10434_v4  ;;  %4462 = vmatprep.mubr.f32.mxu1 %v10434_v4  ;;  %v10443_v4 = vld [vmem:[#allocation31_spill] sm:$0xff] }
 0x462   : > { %6402 = vmatmul.mubr.msk.f32.gmra.mxu0 %vm3491_vm1, %v4000_v10  ;;  %6406 = vmatmul.mubr.msk.f32.gmra.mxu1 %vm3491_vm1, %v4000_v10 }
 0x4f6   : > { %v3601_v1 = vpop.f32.mrf.mxu0  ;;  %v3678_v51 = vpop.f32.mrf.mxu1 }
 0x4f7   : > { %v4469_v31 = vmul.f32 %v3601_v1, %v10437_v58  ;;  %v4471_v12 = vmul.f32 %v3678_v51, %v10438_v8  ;;  %v10446_v1 = vld [vmem:[#allocation34_spill] sm:$0xff] }
 0x4f8   : > { %v9610_v32 = vpop.f32.mrf.mxu0  ;;  %v3680_v0 = vpop.f32.mrf.mxu1  ;;  %v4542_v51 = vrot.slane %v4518_v49, %v10446_v1 }
 0x4f9   : > { %v4472_v36 = vmul.f32 %v3680_v0, %v10441_v27  ;;  %v10447_v0 = vld [vmem:[#allocation37_spill] sm:$0xff] }
 0x4fa   : > { %v9612_v13 = vpop.f32.mrf.mxu0  ;;  %v3684_v48 = vpop.f32.mrf.mxu1  ;;  %v9683_v27 = vld [vmem:[#allocation7 + $0x22] ss:$4 sm:$0xf] }
 0x4fb   : > { %v4483_v30 = vmul.f32 %v3684_v48, %v10443_v4  ;;  %v4550_v48 = vrot.slane %v4518_v49, %v10447_v0  ;;  %v9687_v4 = vrot.slane %v4608_v6, %v10446_v1  ;;  %v10455_v1 = vld [vmem:[#allocation81_spill] sm:$0xff] }
 0x4fc   : > { %v9614_v15 = vpop.f32.mrf.mxu0  ;;  %v3686_v46 = vpop.f32.mrf.mxu1 }
 0x4fd   : > { %v4484_v19 = vmul.f32 %v3686_v46, %v10445_v54  ;;  %v10453_v54 = vld [vmem:[#allocation67_spill] sm:$0xff] }
 0x4fe   : > { %v9616_v18 = vpop.f32.mrf.mxu0  ;;  %v3832_v14 = vpop.f32.mrf.mxu1 }
 0x500   : > { %v9618_v17 = vpop.f32.mrf.mxu0  ;;  %v3834_v60 = vpop.f32.mrf.mxu1 }
 0x502   : > { %v9620_v39 = vpop.f32.mrf.mxu0  ;;  %v9622_v5 = vpop.f32.mrf.mxu1 }
 0x504   : > { %v9624_v7 = vpop.f32.mrf.mxu0  ;;  %v9626_v26 = vpop.f32.mrf.mxu1 }
 0x506   : > { %v9628_v41 = vpop.f32.mrf.mxu0  ;;  %v9630_v22 = vpop.f32.mrf.mxu1 }
 0x508   : > { %v9632_v34 = vpop.f32.mrf.mxu0  ;;  %v9634_v2 = vpop.f32.mrf.mxu1 }
 0x50a   : > { %v9636_v53 = vpop.f32.mrf.mxu0  ;;  %v9638_v16 = vpop.f32.mrf.mxu1 }
 0x50c   : > { %v9640_v62 = vpop.f32.mrf.mxu0  ;;  %v9642_v42 = vpop.f32.mrf.mxu1 }
 0x50e   : > { %v4073_v9 = vpop.f32.mrf.mxu0  ;;  %v4150_v29 = vpop.f32.mrf.mxu1 }
 0x50f   : > { %v4493_v61 = vadd.f32 %v4469_v31, %v4073_v9  ;;  %v4495_v57 = vadd.f32 %v4471_v12, %v4150_v29  ;;  %v10448_v12 = vld [vmem:[#allocation26_spill] sm:$0xff]  ;;  %v10449_v9 = vld [vmem:[#allocation40_spill] sm:$0xff] }
 0x510   : > { %v9652_v20 = vpop.f32.mrf.mxu0  ;;  %v4152_v25 = vpop.f32.mrf.mxu1  ;;  %v9678_v46 = vrot.slane %v4518_v49, %v10448_v12  ;;  %v9681_v29 = vrot.slane %v4518_v49, %v10449_v9 }
 0x511   : > { %v4583_v23 = vmul.f32 %v9647_v40, %v4493_v61  ;;  %v4585_v38 = vmul.f32 %v4534_v50, %v4495_v57  ;;  %v4496_v63 = vadd.f32 %v4472_v36, %v4152_v25  ;;  %v10450_v36 = vld [vmem:[#allocation76_spill] sm:$0xff] }
 0x512   : > { %v9663_v45 = vpop.f32.mrf.mxu0  ;;  %v4156_v44 = vpop.f32.mrf.mxu1  ;;  %v4475_v61 = vmul.f32 %v3832_v14, %v10450_v36  ;;  %v4473_v14 = vmul.f32 %v9616_v18, %v10453_v54 }
 0x513   : > { %v4586_v52 = vmul.f32 %v4538_v56, %v4496_v63  ;;  %v4507_v55 = vadd.f32 %v4483_v30, %v4156_v44  ;;  %v4673_v10 = vadd.f32 %v9655_v35, %v4583_v23  ;;  %v9675_v58 = vadd.f32 %v4624_v37, %v4585_v38  ;;  %v10452_v23 = vld [vmem:[#allocation69_spill] sm:$0xff] }
 0x514   : > { %v9670_v21 = vpop.f32.mrf.mxu0  ;;  %v4158_v28 = vpop.f32.mrf.mxu1  ;;  %v4640_v30 = vrot.slane %v4608_v6, %v10447_v0  ;;  %v4476_v38 = vmul.f32 %v3834_v60, %v10452_v23  ;;  %v9696_v44 = vrot.slane %v4608_v6, %v10448_v12  ;;  %v9707_v60 = vrot.slane %v4608_v6, %v10449_v9 }
 0x515   : > { %v4597_v31 = vmul.f32 %v4534_v50, %v4507_v55  ;;  %v4508_v8 = vadd.f32 %v4484_v19, %v4158_v28  ;;  %6914 = vmatprep.mubr.f32.mxu0 %v4673_v10  ;;  %v9690_v50 = vadd.f32 %v4628_v47, %v4586_v52  ;;  %v9702_v10 = vrot.slane %v9683_v27, %v10439_v43  ;;  %v9704_v52 = vld [vmem:[#allocation7 + $0x23] ss:$4 sm:$0xf] }
 0x516   : > { %v4227_v57 = vpop.f32.mrf.mxu0  ;;  %v4304_v25 = vpop.f32.mrf.mxu1  ;;  %v4487_v0 = vmul.f32 %v9622_v5, %v10455_v1  ;;  %v9721_v6 = vrot.slane %v9683_v27, %v10442_v11  ;;  %v9726_v5 = vrot.slane %v9704_v52, %v10439_v43  ;;  %v9734_v54 = vrot.slane %v9704_v52, %v10444_v59 }
 0x517   : > { %10451 = vst [vmem:[#allocation43_spill] sm:$0xff] %v9690_v50  ;;  %v9693_v63 = vadd.f32 %v4624_v37, %v4597_v31  ;;  %v4598_v49 = vmul.f32 %v4538_v56, %v4508_v8  ;;  %v4499_v19 = vadd.f32 %v4475_v61, %v4304_v25  ;;  %v10454_v37 = vld [vmem:[#allocation71_spill] sm:$0xff]  ;;  %v4497_v8 = vadd.f32 %v4473_v14, %v4227_v57  ;;  %v10462_v50 = vld [vmem:[#allocation141_spill] sm:$0xff] }
 0x518   : > { %v4229_v55 = vpop.f32.mrf.mxu0  ;;  %v4306_v28 = vpop.f32.mrf.mxu1  ;;  %v4485_v56 = vmul.f32 %v9620_v39, %v10454_v37  ;;  %v9717_v25 = vrot.slane %v9683_v27, %v10444_v59 }
 0x519   : > { %v9713_v31 = vadd.f32 %v4628_v47, %v4598_v49  ;;  %v4500_v18 = vadd.f32 %v4476_v38, %v4306_v28  ;;  %v4589_v12 = vmul.f32 %v4550_v48, %v4499_v19  ;;  %v10457_v47 = vld [vmem:[#allocation65_spill] sm:$0xff]  ;;  %v9740_v19 = vrot.slane %v9704_v52, %v10442_v11  ;;  %v10458_v28 = vld [vmem:[#allocation22_spill] sm:$0xff] }
 0x51a   : > { %v4233_v36 = vpop.f32.mrf.mxu0  ;;  %v4310_v61 = vpop.f32.mrf.mxu1  ;;  %v4486_v57 = vmul.f32 %v9624_v7, %v10457_v47  ;;  %v4470_v37 = vmul.f32 %v9610_v32, %v10458_v28  ;;  %v10461_v11 = vld [vmem:[#allocation142_spill] sm:$0xff]  ;;  %v4478_v32 = vmul.f32 %v9632_v34, %v10462_v50  ;;  %v10463_v28 = vld [vmem:[#allocation35_spill] sm:$0xff]  ;;  %v10465_v50 = vld [vmem:[#allocation29_spill] sm:$0xff] }
 0x51b   : > { %10456 = vst [vmem:[#allocation45_spill] sm:$0xff] %v9713_v31  ;;  %v4590_v39 = vmul.f32 %v9681_v29, %v4500_v18  ;;  %v4509_v9 = vadd.f32 %v4485_v56, %v4233_v36  ;;  %v4511_v23 = vadd.f32 %v4487_v0, %v4310_v61  ;;  %v9736_v14 = vadd.f32 %v4640_v30, %v4589_v12  ;;  %v10459_v56 = vld [vmem:[#allocation32_spill] sm:$0xff]  ;;  %v10460_v18 = vld [vmem:[#allocation33_spill] sm:$0xff] }
 0x51c   : > { %v4235_v38 = vpop.f32.mrf.mxu0  ;;  %v9730_v49 = vpop.f32.mrf.mxu1  ;;  %v4481_v1 = vmul.f32 %v9612_v13, %v10459_v56  ;;  %v4474_v36 = vmul.f32 %v9618_v17, %v10460_v18  ;;  %v4587_v61 = vmul.f32 %v4542_v51, %v4497_v8  ;;  %v4477_v31 = vmul.f32 %v9628_v41, %v10461_v11  ;;  %v10466_v56 = vld [vmem:[#allocation144_spill] sm:$0xff] }
 0x51d   : > { %v4599_v7 = vmul.f32 %v4542_v51, %v4509_v9  ;;  %v4601_v0 = vmul.f32 %v4550_v48, %v4511_v23  ;;  %v4510_v47 = vadd.f32 %v4486_v57, %v4235_v38  ;;  %v9749_v59 = vadd.f32 %v9707_v60, %v4590_v39  ;;  %v10464_v57 = vld [vmem:[#allocation143_spill] sm:$0xff] }
 0x51e   : > { %v4381_v43 = vpop.f32.mrf.mxu0  ;;  %v4458_v12 = vpop.f32.mrf.mxu1  ;;  %v4480_v13 = vmul.f32 %v9634_v2, %v10463_v28  ;;  %v4494_v48 = vadd.f32 %v4470_v37, %v9652_v20  ;;  %v4505_v17 = vadd.f32 %v4481_v1, %v9663_v45  ;;  %v4498_v51 = vadd.f32 %v4474_v36, %v4229_v55  ;;  %v10467_v1 = vld [vmem:[#allocation39_spill] sm:$0xff] }
 0x51f   : > { %v4689_v23 = vadd.f32 %v9687_v4, %v4599_v7  ;;  %v9760_v39 = vadd.f32 %v4640_v30, %v4601_v0  ;;  %v4489_v41 = vmul.f32 %v9636_v53, %v10464_v57  ;;  %v4501_v11 = vadd.f32 %v4477_v31, %v4381_v43 }
 0x520   : > { %v4383_v8 = vpop.f32.mrf.mxu0  ;;  %v4460_v9 = vpop.f32.mrf.mxu1  ;;  %v4482_v2 = vmul.f32 %v9614_v15, %v10465_v50  ;;  %v4490_v20 = vmul.f32 %v9640_v62, %v10466_v56  ;;  %v4600_v45 = vmul.f32 %v9678_v46, %v4510_v47  ;;  %v4677_v30 = vadd.f32 %v9687_v4, %v4587_v61  ;;  %v10468_v15 = vld [vmem:[#allocation38_spill] sm:$0xff] }
 0x521   : > { %v4502_v38 = vadd.f32 %v4478_v32, %v4383_v8  ;;  %v4504_v34 = vadd.f32 %v4480_v13, %v4460_v9  ;;  %6910 = vmatprep.subr.mxu0 %v4689_v23  ;;  %v4492_v7 = vmul.f32 %v9642_v42, %v10467_v1  ;;  %v4491_v0 = vmul.f32 %v9638_v16, %v10468_v15 }
 0x522   : > { %v4387_v55 = vpop.f32.mrf.mxu0  ;;  %v4464_v37 = vpop.f32.mrf.mxu1  ;;  %6911 = vmatpush3.xpose.msra.mxu0 %v4689_v23  ;;  %v4584_v62 = vmul.f32 %v9661_v24, %v4494_v48  ;;  %v4595_v18 = vmul.f32 %v9647_v40, %v4505_v17  ;;  %v4588_v36 = vmul.f32 %v9678_v46, %v4498_v51  ;;  %v4591_v42 = vmul.f32 %v9702_v10, %v4501_v11 }
 0x523   : > { %v4592_v53 = vmul.f32 %v9717_v25, %v4502_v38  ;;  %v4594_v43 = vmul.f32 %v9721_v6, %v4504_v34  ;;  %v4513_v31 = vadd.f32 %v4489_v41, %v4387_v55  ;;  %6912 = vmatprep.subr.mxu0 %v4677_v30  ;;  %v4515_v13 = vadd.f32 %v4491_v0, %v4464_v37  ;;  %v10470_v41 = vld [vmem:[#allocation80_spill] sm:$0xff] }
 0x524   : > { %v4389_v4 = vpop.f32.mrf.mxu0  ;;  %v4466_v61 = vpop.f32.mrf.mxu1  ;;  %v4690_v8 = vadd.f32 %v9696_v44, %v4600_v45  ;;  %v4566_v40 = vrot.slane %v9683_v27, %v10440_v3  ;;  %v4685_v9 = vadd.f32 %v9655_v35, %v4595_v18  ;;  %v4506_v23 = vadd.f32 %v4482_v2, %v9670_v21 }
 0x525   : > { %v4603_v47 = vmul.f32 %v9702_v10, %v4513_v31  ;;  %v4514_v32 = vadd.f32 %v4490_v20, %v4389_v4  ;;  %v4516_v28 = vadd.f32 %v4492_v7, %v4466_v61  ;;  %v9783_v16 = vadd.f32 %v9734_v54, %v4592_v53  ;;  %v10469_v10 = vld [vmem:[#allocation36_spill] sm:$0xff] }
 0x526   : > { %v9786_v48 = vadd.f32 %v9740_v19, %v4594_v43  ;;  %6913 = vmatpush3.xpose.msra.mxu0 %v4677_v30  ;;  %v4479_v51 = vmul.f32 %v9630_v22, %v10469_v10  ;;  %v4488_v11 = vmul.f32 %v9626_v26, %v10470_v41  ;;  %v4674_v27 = vadd.f32 %v9668_v33, %v4584_v62 }
 0x527   : > { %v4606_v46 = vmul.f32 %v9721_v6, %v4516_v28  ;;  %v4693_v17 = vadd.f32 %v9726_v5, %v4603_v47  ;;  %v4604_v57 = vmul.f32 %v9717_v25, %v4514_v32  ;;  %6924 = vmatprep.subr.mxu0 %v4690_v8  ;;  %v4678_v6 = vadd.f32 %v9696_v44, %v4588_v36 }
 0x528   : > { %v4503_v34 = vadd.f32 %v4479_v51, %v4458_v12  ;;  %v4605_v22 = vmul.f32 %v4566_v40, %v4515_v13  ;;  %v4681_v35 = vadd.f32 %v9726_v5, %v4591_v42  ;;  %v4656_v21 = vrot.slane %v9704_v52, %v10440_v3 }
 0x529   : > { %6917 = vmatprep.subr.mxu1 %v4693_v17  ;;  %v9802_v38 = vadd.f32 %v9740_v19, %v4606_v46  ;;  %6915 = vmatmul.mubr.f32.vlgmr.msra.gmra.mxu0 %v4685_v9  ;;  %v4596_v26 = vmul.f32 %v9661_v24, %v4506_v23  ;;  %v4512_v25 = vadd.f32 %v4488_v11, %v9730_v49 }
 0x52a   : > { %6918 = vmatpush3.msra.mxu1 %v4693_v17  ;;  %6925 = vmatpush3.xpose.msra.mxu0 %v4690_v8  ;;  %v9810_v44 = vadd.f32 %v9734_v54, %v4604_v57  ;;  %v4593_v19 = vmul.f32 %v4566_v40, %v4503_v34  ;;  %v4695_v12 = vadd.f32 %v4656_v21, %v4605_v22 }
 0x52b   : > { %6928 = vmatprep.mubr.f32.mxu0 %v4674_v27  ;;  %6919 = vmatprep.subr.mxu1 %v4681_v35  ;;  %v4686_v5 = vadd.f32 %v9668_v33, %v4596_v26  ;;  %v4602_v50 = vmul.f32 %v9681_v29, %v4512_v25 }
 0x52c   : > { %6926 = vmatprep.subr.mxu0 %v4678_v6  ;;  %6920 = vmatpush3.msra.mxu1 %v4681_v35  ;;  %v4683_v24 = vadd.f32 %v4656_v21, %v4593_v19 }
 0x52d   : > { %6931 = vmatprep.subr.mxu1 %v9810_v44  ;;  %v9816_v52 = vadd.f32 %v9707_v60, %v4602_v50 }
 0x52e   : > { %6927 = vmatpush3.xpose.msra.mxu0 %v4678_v6 }
 0x52f   : > { %6945 = vmatprep.subr.mxu0 %v4695_v12 }
 0x531   : > { %6929 = vmatmul.mubr.f32.vlgmr.msra.gmra.mxu0 %v4686_v5 }
 0x532   : > { %6946 = vmatpush3.msra.mxu0 %v4695_v12 }
 0x533   : > { %6947 = vmatprep.subr.mxu0 %v4683_v24 }
 0x534   : > { %6948 = vmatpush3.msra.mxu0 %v4683_v24 }
 0x535   : > { %6952 = vmatprep.subr.mxu0 %v9816_v52 }
 0x5e9   : > { %v6916_v49 = vpop.f32.mrf.mxu0 }
 0x5ea   : > { %v4773_v56 = vmul.f32 0.088388346, %v6916_v49 }
 0x5eb   : > { %v4763_v54 = vpop.f32.mrf.mxu0 }
 0x5ec   : > { %v4772_v2 = vmul.f32 0.088388346, %v4763_v54  ;;  %v4778_v20 = vsel %vm4774_vm2, %v4773_v56, -inf }
 0x5ee   : > { %v4775_v33 = vsel %vm4774_vm2, %v4772_v2, -inf }
 0x5ef   : > { %4776 = vmax.xlane.f32.xlu0 %v4775_v33 }
 0x5f1   : > { %v6930_v29 = vpop.f32.mrf.mxu0 }
 0x5f2   : > { %v4954_v37 = vmul.f32 0.088388346, %v6930_v29 }
 0x5f3   : > { %v4944_v45 = vpop.f32.mrf.mxu0  ;;  %4779 = vmax.xlane.f32.xlu0 %v4778_v20 }
 0x5f4   : > { %v4953_v55 = vmul.f32 0.088388346, %v4944_v45  ;;  %v4958_v30 = vsel %vm4774_vm2, %v4954_v37, -inf }
 0x5f6   : > { %v4955_v60 = vsel %vm4774_vm2, %v4953_v55, -inf }
 0x5f7   : > { %4956 = vmax.xlane.f32.xlu1 %v4955_v60  ;;  %v10472_v60 = vld [vmem:[#allocation45_spill] sm:$0xff] }
 0x5fb   : > { %4959 = vmax.xlane.f32.xlu1 %v4958_v30 }
 0x678   : > { %v4777_v1 = vpop.xlane.xlu0 %4776 }
 0x679   : > { %v4781_v7 = vsub.f32 %v4772_v2, %v4777_v1 }
 0x67b   : > { %v4783_v53 = vmul.f32 1.442695, %v4781_v7 }
 0x67c   : > { %v4780_v43 = vpop.xlane.xlu0 %4779 }
 0x67d   : > { %7084 = vpow2.f32 %v4783_v53  ;;  %v4782_v31 = vsub.f32 %v4773_v56, %v4780_v43 }
 0x67f   : > { %v4785_v15 = vmul.f32 1.442695, %v4782_v31 }
 0x680   : > { %v4957_v0 = vpop.xlane.xlu1 %4956 }
 0x681   : > { %7086 = vpow2.f32 %v4785_v15  ;;  %v4961_v62 = vsub.f32 %v4953_v55, %v4957_v0 }
 0x683   : > { %v4963_v18 = vmul.f32 1.442695, %v4961_v62 }
 0x684   : > { %v4960_v36 = vpop.xlane.xlu1 %4959 }
 0x685   : > { %7088 = vpow2.f32 %v4963_v18  ;;  %v4962_v4 = vsub.f32 %v4954_v37, %v4960_v36  ;;  %v10471_v37 = vld [vmem:[#allocation43_spill] sm:$0xff] }
 0x687   : > { %v4965_v61 = vmul.f32 1.442695, %v4962_v4 }
 0x689   : > { %7090 = vpow2.f32 %v4965_v61 }
 0x68a   : > { %v7085_v42 = vpop.eup %7084 }
 0x68b   : > { %v4787_v47 = vsel %vm4774_vm2, %v7085_v42, 0.0 }
 0x68c   : > { %4788 = vadd.xlane.f32.xlu0 %v4787_v47 }
 0x68e   : > { %v7087_v32 = vpop.eup %7086 }
 0x68f   : > { %v4790_v28 = vsel %vm4774_vm2, %v7087_v32, 0.0 }
 0x690   : > { %4791 = vadd.xlane.f32.xlu1 %v4790_v28  ;;  %v5479_v28 = vld [vmem:[#allocation11 + $0x1e8] sm:$0xff] }
 0x692   : > { %v7089_v13 = vpop.eup %7088 }
 0x693   : > { %v4967_v8 = vsel %vm4774_vm2, %v7089_v13, 0.0 }
 0x694   : > { %4968 = vadd.xlane.f32.xlu0 %v4967_v8 }
 0x696   : > { %v7091_v40 = vpop.eup %7090 }
 0x697   : > { %v4970_v46 = vsel %vm4774_vm2, %v7091_v40, 0.0 }
 0x698   : > { %4971 = vadd.xlane.f32.xlu1 %v4970_v46 }
 0x715   : > { %v4789_v17 = vpop.xlane.xlu0 %4788 }
 0x716   : > { %7092 = vrcp.f32 %v4789_v17 }
 0x719   : > { %v4792_v10 = vpop.xlane.xlu1 %4791 }
 0x71a   : > { %7094 = vrcp.f32 %v4792_v10 }
 0x71d   : > { %v4969_v51 = vpop.xlane.xlu0 %4968 }
 0x71e   : > { %7096 = vrcp.f32 %v4969_v51  ;;  %v5478_v51 = vld [vmem:[#allocation11 + $0x1e0] sm:$0xff] }
 0x721   : > { %v4972_v9 = vpop.xlane.xlu1 %4971 }
 0x722   : > { %7098 = vrcp.f32 %v4972_v9  ;;  %v5475_v9 = vld [vmem:[#allocation11 + $0x1c8] sm:$0xff] }
 0x723   : > { %v7093_v23 = vpop.eup %7092 }
 0x724   : > { %v4794_v57 = vmul.f32 %v7093_v23, %v7085_v42  ;;  %v5474_v23 = vld [vmem:[#allocation11 + $0x1c0] sm:$0xff] }
 0x726   : > { %6921 = vmatprep.mubr.msk.f32.mxu1 %vm4774_vm2, %v4794_v57  ;;  %v5471_v57 = vld [vmem:[#allocation11 + $0x1a8] sm:$0xff] }
 0x727   : > { %v7095_v41 = vpop.eup %7094 }
 0x728   : > { %v4796_v11 = vmul.f32 %v7095_v41, %v7087_v32  ;;  %v5607_v41 = vld [vmem:[#allocation11 + $0x5e8] sm:$0xff] }
 0x72a   : > { %6922 = vmatmul.mubr.msk.f32.vlgmr.msra.gmra.mxu1 %vm4774_vm2, %v4796_v11  ;;  %v5470_v11 = vld [vmem:[#allocation11 + $0x1a0] sm:$0xff] }
 0x72b   : > { %v7097_v27 = vpop.eup %7096  ;;  %6932 = vmatpush3.msra.mxu1 %v9810_v44 }
 0x72c   : > { %6933 = vmatprep.subr.mxu1 %v9783_v16  ;;  %v4974_v6 = vmul.f32 %v7097_v27, %v7089_v13  ;;  %v5467_v27 = vld [vmem:[#allocation11 + $0x188] sm:$0xff] }
 0x72d   : > { %6934 = vmatpush3.msra.mxu1 %v9783_v16 }
 0x72e   : > { %6938 = vmatprep.subr.mxu1 %v9760_v39  ;;  %6935 = vmatprep.mubr.msk.f32.mxu1 %vm4774_vm2, %v4974_v6  ;;  %v5466_v6 = vld [vmem:[#allocation11 + $0x180] sm:$0xff] }
 0x72f   : > { %v7099_v34 = vpop.eup %7098 }
 0x730   : > { %v4976_v22 = vmul.f32 %v7099_v34, %v7091_v40  ;;  %v5606_v34 = vld [vmem:[#allocation11 + $0x5e0] sm:$0xff] }
 0x732   : > { %6936 = vmatmul.mubr.msk.f32.vlgmr.msra.gmra.mxu1 %vm4774_vm2, %v4976_v22  ;;  %v5603_v22 = vld [vmem:[#allocation11 + $0x5c8] sm:$0xff] }
 0x733   : > { %6939 = vmatpush3.xpose.msra.mxu1 %v9760_v39  ;;  %6942 = vmatprep.mubr.f32.mxu1 %v9675_v58 }
 0x734   : > { %6940 = vmatprep.subr.mxu1 %v9736_v14 }
 0x737   : > { %6941 = vmatpush3.xpose.msra.mxu1 %v9736_v14 }
 0x738   : > { %6959 = vmatprep.subr.mxu1 %v9802_v38 }
 0x73a   : > { %6943 = vmatmul.mubr.f32.vlgmr.msra.gmra.mxu1 %v9693_v63 }
 0x73b   : > { %6960 = vmatpush3.msra.mxu1 %v9802_v38 }
 0x73c   : > { %6961 = vmatprep.subr.mxu1 %v9786_v48 }
 0x73d   : > { %6962 = vmatpush3.msra.mxu1 %v9786_v48 }
 0x73e   : > { %5696 = vmatprep.subr.mxu1 %v5479_v28  ;;  %v5562_v28 = vld [vmem:[#allocation11 + $0x480] sm:$0xff] }
 0x7ea   : > { %v9844_v16 = vpop.f32.mrf.mxu1 }
 0x7ec   : > { %v9846_v35 = vpop.f32.mrf.mxu1 }
 0x7f2   : > { %v9848_v39 = vpop.f32.mrf.mxu1 }
 0x7f4   : > { %v9850_v58 = vpop.f32.mrf.mxu1 }
 0x7fa   : > { %v6944_v21 = vpop.f32.mrf.mxu1 }
 0x7fb   : > { %v5134_v14 = vmul.f32 0.088388346, %v6944_v21  ;;  %v5602_v21 = vld [vmem:[#allocation11 + $0x5c0] sm:$0xff] }
 0x7fc   : > { %v5124_v26 = vpop.f32.mrf.mxu1 }
 0x7fd   : > { %v5133_v25 = vmul.f32 0.088388346, %v5124_v26  ;;  %v5138_v63 = vsel %vm4774_vm2, %v5134_v14, -inf  ;;  %v5599_v26 = vld [vmem:[#allocation11 + $0x5a8] sm:$0xff] }
 0x7fe   : > { %5139 = vmax.xlane.f32.xlu1 %v5138_v63  ;;  %v5598_v63 = vld [vmem:[#allocation11 + $0x5a0] sm:$0xff] }
 0x7ff   : > { %v5135_v38 = vsel %vm4774_vm2, %v5133_v25, -inf }
 0x800   : > { %5136 = vmax.xlane.f32.xlu0 %v5135_v38  ;;  %v5459_v38 = vld [vmem:[#allocation11 + $0x148] sm:$0xff] }
 0x887   : > { %v5140_v44 = vpop.xlane.xlu1 %5139 }
 0x888   : > { %v5142_v48 = vsub.f32 %v5134_v14, %v5140_v44  ;;  %v5463_v14 = vld [vmem:[#allocation11 + $0x168] sm:$0xff] }
 0x889   : > { %v5137_v19 = vpop.xlane.xlu0 %5136  ;;  %v5595_v44 = vld [vmem:[#allocation11 + $0x588] sm:$0xff] }
 0x88a   : > { %v5145_v12 = vmul.f32 1.442695, %v5142_v48  ;;  %v5141_v5 = vsub.f32 %v5133_v25, %v5137_v19  ;;  %v5462_v25 = vld [vmem:[#allocation11 + $0x160] sm:$0xff] }
 0x88b   : > { %v5458_v48 = vld [vmem:[#allocation11 + $0x140] sm:$0xff] }
 0x88c   : > { %7100 = vpow2.f32 %v5145_v12  ;;  %v5143_v50 = vmul.f32 1.442695, %v5141_v5  ;;  %v5594_v19 = vld [vmem:[#allocation11 + $0x580] sm:$0xff]  ;;  %v5455_v12 = vld [vmem:[#allocation11 + $0x128] sm:$0xff] }
 0x88d   : > { %v5591_v5 = vld [vmem:[#allocation11 + $0x568] sm:$0xff] }
 0x88e   : > { %7102 = vpow2.f32 %v5143_v50  ;;  %v5454_v50 = vld [vmem:[#allocation11 + $0x120] sm:$0xff] }
 0x899   : > { %v7101_v24 = vpop.eup %7100 }
 0x89a   : > { %v5150_v49 = vsel %vm4774_vm2, %v7101_v24, 0.0 }
 0x89b   : > { %v7103_v54 = vpop.eup %7102  ;;  %5151 = vadd.xlane.f32.xlu1 %v5150_v49  ;;  %v5451_v49 = vld [vmem:[#allocation11 + $0x108] sm:$0xff] }
 0x89c   : > { %v5147_v2 = vsel %vm4774_vm2, %v7103_v54, 0.0 }
 0x89d   : > { %5148 = vadd.xlane.f32.xlu0 %v5147_v2  ;;  %v5450_v2 = vld [vmem:[#allocation11 + $0x100] sm:$0xff] }
 0x924   : > { %v5152_v56 = vpop.xlane.xlu1 %5151 }
 0x925   : > { %7104 = vrcp.f32 %v5152_v56  ;;  %v5586_v56 = vld [vmem:[#allocation11 + $0x540] sm:$0xff] }
 0x926   : > { %v5149_v33 = vpop.xlane.xlu0 %5148 }
 0x927   : > { %7106 = vrcp.f32 %v5149_v33  ;;  %v5447_v33 = vld [vmem:[#allocation11 + $0xe8] sm:$0xff] }
 0x932   : > { %v7105_v29 = vpop.eup %7104 }
 0x933   : > { %v5156_v55 = vmul.f32 %v7105_v29, %v7101_v24  ;;  %v5590_v24 = vld [vmem:[#allocation11 + $0x560] sm:$0xff]  ;;  %v5583_v29 = vld [vmem:[#allocation11 + $0x528] sm:$0xff] }
 0x934   : > { %v7107_v20 = vpop.eup %7106 }
 0x935   : > { %v5154_v45 = vmul.f32 %v7107_v20, %v7103_v54  ;;  %v5587_v54 = vld [vmem:[#allocation11 + $0x548] sm:$0xff]  ;;  %v5446_v20 = vld [vmem:[#allocation11 + $0xe0] sm:$0xff] }
 0x937   : > { %6949 = vmatprep.mubr.msk.f32.mxu0 %vm4774_vm2, %v5154_v45  ;;  %v5582_v45 = vld [vmem:[#allocation11 + $0x520] sm:$0xff] }
 0x938   : > { %6950 = vmatmul.mubr.msk.f32.vlgmr.msra.gmra.mxu0 %vm4774_vm2, %v5156_v55  ;;  %v5443_v55 = vld [vmem:[#allocation11 + $0xc8] sm:$0xff] }
 0x939   : > { %6953 = vmatpush3.xpose.msra.mxu0 %v9816_v52  ;;  %6956 = vmatprep.mubr.f32.mxu0 %v10471_v37  ;;  %v5579_v37 = vld [vmem:[#allocation11 + $0x508] sm:$0xff] }
 0x93a   : > { %6954 = vmatprep.subr.mxu0 %v9749_v59 }
 0x93d   : > { %6955 = vmatpush3.xpose.msra.mxu0 %v9749_v59 }
 0x93e   : > { %5773 = vmatprep.subr.mxu0 %v5607_v41  ;;  %v5542_v41 = vld [vmem:[#allocation11 + $0x3e0] sm:$0xff] }
 0x940   : > { %6957 = vmatmul.mubr.f32.vlgmr.msra.gmra.mxu0 %v10472_v60  ;;  %v5442_v60 = vld [vmem:[#allocation11 + $0xc0] sm:$0xff] }
 0x941   : > { %5774 = vmatpush1.msra.mxu0 %v5606_v34  ;;  %v5538_v34 = vld [vmem:[#allocation11 + $0x3c0] sm:$0xff] }
 0x942   : > { %5775 = vmatprep.subr.mxu0 %v5603_v22  ;;  %v5546_v22 = vld [vmem:[#allocation11 + $0x400] sm:$0xff] }
 0x943   : > { %5776 = vmatpush1.msra.mxu0 %v5602_v21  ;;  %v5535_v21 = vld [vmem:[#allocation11 + $0x3a8] sm:$0xff] }
 0x944   : > { %5777 = vmatprep.subr.mxu0 %v5599_v26  ;;  %v5534_v26 = vld [vmem:[#allocation11 + $0x3a0] sm:$0xff] }
 0x945   : > { %5778 = vmatpush1.msra.mxu0 %v5598_v63  ;;  %v5531_v63 = vld [vmem:[#allocation11 + $0x388] sm:$0xff] }
 0x946   : > { %5779 = vmatprep.subr.mxu0 %v5595_v44  ;;  %v5530_v44 = vld [vmem:[#allocation11 + $0x380] sm:$0xff] }
 0x947   : > { %5780 = vmatpush1.msra.mxu0 %v5594_v19  ;;  %v5527_v19 = vld [vmem:[#allocation11 + $0x368] sm:$0xff] }
 0x948   : > { %5781 = vmatprep.subr.mxu0 %v5591_v5  ;;  %v5526_v5 = vld [vmem:[#allocation11 + $0x360] sm:$0xff] }
 0x949   : > { %5782 = vmatpush1.msra.mxu0 %v5590_v24  ;;  %v5523_v24 = vld [vmem:[#allocation11 + $0x348] sm:$0xff] }
 0x94a   : > { %5783 = vmatprep.subr.mxu0 %v5587_v54  ;;  %v5522_v54 = vld [vmem:[#allocation11 + $0x340] sm:$0xff] }
 0x94b   : > { %5784 = vmatpush1.msra.mxu0 %v5586_v56  ;;  %v5519_v56 = vld [vmem:[#allocation11 + $0x328] sm:$0xff] }
 0x94c   : > { %5785 = vmatprep.subr.mxu0 %v5583_v29  ;;  %v5518_v29 = vld [vmem:[#allocation11 + $0x320] sm:$0xff] }
 0x94d   : > { %5786 = vmatpush1.msra.mxu0 %v5582_v45  ;;  %v5515_v45 = vld [vmem:[#allocation11 + $0x308] sm:$0xff] }
 0x94e   : > { %5787 = vmatprep.subr.mxu0 %v5579_v37  ;;  %v5514_v37 = vld [vmem:[#allocation11 + $0x300] sm:$0xff] }
 0x9f8   : > { %v9863_v30 = vpop.f32.mrf.mxu0 }
 0x9fa   : > { %v9865_v1 = vpop.f32.mrf.mxu0 }
 0xa00   : > { %v6958_v7 = vpop.f32.mrf.mxu0 }
 0xa01   : > { %v5314_v53 = vmul.f32 0.088388346, %v6958_v7  ;;  %v5578_v7 = vld [vmem:[#allocation11 + $0x500] sm:$0xff] }
 0xa02   : > { %v5304_v43 = vpop.f32.mrf.mxu0  ;;  %5788 = vmatpush1.msra.mxu0 %v5578_v7  ;;  %v5511_v7 = vld [vmem:[#allocation11 + $0x2e8] sm:$0xff] }
 0xa03   : > { %v5313_v31 = vmul.f32 0.088388346, %v5304_v43  ;;  %v5318_v15 = vsel %vm4774_vm2, %v5314_v53, -inf  ;;  %v5575_v43 = vld [vmem:[#allocation11 + $0x4e8] sm:$0xff] }
 0xa04   : > { %5319 = vmax.xlane.f32.xlu1 %v5318_v15  ;;  %v5574_v15 = vld [vmem:[#allocation11 + $0x4e0] sm:$0xff]  ;;  %5789 = vmatprep.subr.mxu0 %v5575_v43 }
 0xa05   : > { %v5315_v52 = vsel %vm4774_vm2, %v5313_v31, -inf  ;;  %5790 = vmatpush1.msra.mxu0 %v5574_v15  ;;  %v5510_v43 = vld [vmem:[#allocation11 + $0x2e0] sm:$0xff]  ;;  %v5507_v15 = vld [vmem:[#allocation11 + $0x2c8] sm:$0xff] }
 0xa06   : > { %5316 = vmax.xlane.f32.xlu0 %v5315_v52  ;;  %v5435_v52 = vld [vmem:[#allocation11 + $0x88] sm:$0xff] }
 0xa8d   : > { %v5320_v0 = vpop.xlane.xlu1 %5319 }
 0xa8e   : > { %v5322_v62 = vsub.f32 %v5314_v53, %v5320_v0  ;;  %v5439_v53 = vld [vmem:[#allocation11 + $0xa8] sm:$0xff] }
 0xa8f   : > { %v5317_v18 = vpop.xlane.xlu0 %5316  ;;  %v5571_v0 = vld [vmem:[#allocation11 + $0x4c8] sm:$0xff] }
 0xa90   : > { %v5325_v59 = vmul.f32 1.442695, %v5322_v62  ;;  %v5321_v36 = vsub.f32 %v5313_v31, %v5317_v18  ;;  %v5438_v31 = vld [vmem:[#allocation11 + $0xa0] sm:$0xff]  ;;  %5791 = vmatprep.subr.mxu0 %v5571_v0 }
 0xa91   : > { %v5434_v62 = vld [vmem:[#allocation11 + $0x80] sm:$0xff] }
 0xa92   : > { %7108 = vpow2.f32 %v5325_v59  ;;  %v5323_v4 = vmul.f32 1.442695, %v5321_v36  ;;  %v5570_v18 = vld [vmem:[#allocation11 + $0x4c0] sm:$0xff]  ;;  %v5431_v59 = vld [vmem:[#allocation11 + $0x68] sm:$0xff] }
 0xa93   : > { %v5567_v36 = vld [vmem:[#allocation11 + $0x4a8] sm:$0xff]  ;;  %5792 = vmatpush1.msra.mxu0 %v5570_v18  ;;  %v5506_v0 = vld [vmem:[#allocation11 + $0x2c0] sm:$0xff] }
 0xa94   : > { %7110 = vpow2.f32 %v5323_v4  ;;  %v5430_v4 = vld [vmem:[#allocation11 + $0x60] sm:$0xff]  ;;  %5793 = vmatprep.subr.mxu0 %v5567_v36  ;;  %v5503_v18 = vld [vmem:[#allocation11 + $0x2a8] sm:$0xff] }
 0xa95   : > { %v5502_v36 = vld [vmem:[#allocation11 + $0x2a0] sm:$0xff] }
 0xa9f   : > { %v7109_v61 = vpop.eup %7108 }
 0xaa0   : > { %v5330_v42 = vsel %vm4774_vm2, %v7109_v61, 0.0 }
 0xaa1   : > { %v7111_v47 = vpop.eup %7110  ;;  %5331 = vadd.xlane.f32.xlu1 %v5330_v42  ;;  %v5427_v42 = vld [vmem:[#allocation11 + $0x48] sm:$0xff] }
 0xaa2   : > { %v5327_v32 = vsel %vm4774_vm2, %v7111_v47, 0.0 }
 0xaa3   : > { %5328 = vadd.xlane.f32.xlu0 %v5327_v32  ;;  %v5426_v32 = vld [vmem:[#allocation11 + $0x40] sm:$0xff] }
 0xb2a   : > { %v5332_v13 = vpop.xlane.xlu1 %5331 }
 0xb2b   : > { %7112 = vrcp.f32 %v5332_v13  ;;  %v5423_v13 = vld [vmem:[#allocation11 + $0x28] sm:$0xff] }
 0xb2c   : > { %v5329_v8 = vpop.xlane.xlu0 %5328 }
 0xb2d   : > { %7114 = vrcp.f32 %v5329_v8  ;;  %v5559_v8 = vld [vmem:[#allocation11 + $0x468] sm:$0xff] }
 0xb38   : > { %v7113_v40 = vpop.eup %7112 }
 0xb39   : > { %v5336_v10 = vmul.f32 %v7113_v40, %v7109_v61  ;;  %v5566_v61 = vld [vmem:[#allocation11 + $0x4a0] sm:$0xff] }
 0xb3a   : > { %v7115_v46 = vpop.eup %7114  ;;  %5794 = vmatpush1.msra.mxu0 %v5566_v61  ;;  %v5422_v40 = vld [vmem:[#allocation11 + $0x20] sm:$0xff]  ;;  %v5499_v61 = vld [vmem:[#allocation11 + $0x288] sm:$0xff] }
 0xb3b   : > { %v5334_v17 = vmul.f32 %v7115_v46, %v7111_v47  ;;  %v5563_v47 = vld [vmem:[#allocation11 + $0x488] sm:$0xff]  ;;  %v5558_v46 = vld [vmem:[#allocation11 + $0x460] sm:$0xff] }
 0xb3c   : > { %5795 = vmatprep.subr.mxu0 %v5563_v47  ;;  %v5498_v47 = vld [vmem:[#allocation11 + $0x280] sm:$0xff] }
 0xb3d   : > { %6963 = vmatprep.mubr.msk.f32.mxu1 %vm4774_vm2, %v5334_v17  ;;  %v5419_v17 = vld [vmem:[#allocation11 + $0x8] sm:$0xff]  ;;  %5796 = vmatpush1.msra.mxu0 %v5562_v28 }
 0xb3e   : > { %6964 = vmatmul.mubr.msk.f32.vlgmr.msra.gmra.mxu1 %vm4774_vm2, %v5336_v10  ;;  %v5555_v10 = vld [vmem:[#allocation11 + $0x448] sm:$0xff]  ;;  %5797 = vmatprep.subr.mxu0 %v5559_v8  ;;  %v5494_v8 = vld [vmem:[#allocation11 + $0x260] sm:$0xff] }
 0xb3f   : > { %5697 = vmatpush1.msra.mxu1 %v5478_v51  ;;  %5760 = vmatprep.mubr.f32.mxu1 %v9850_v58  ;;  %v5418_v51 = vld [vmem:[#allocation11] sm:$0xff]  ;;  %v5495_v28 = vld [vmem:[#allocation11 + $0x268] sm:$0xff] }
 0xb40   : > { %5698 = vmatprep.subr.mxu1 %v5475_v9  ;;  %v5554_v9 = vld [vmem:[#allocation11 + $0x440] sm:$0xff]  ;;  %5798 = vmatpush1.msra.mxu0 %v5558_v46  ;;  %v5491_v46 = vld [vmem:[#allocation11 + $0x248] sm:$0xff] }
 0xb41   : > { %5699 = vmatpush1.msra.mxu1 %v5474_v23  ;;  %v5543_v23 = vld [vmem:[#allocation11 + $0x3e8] sm:$0xff]  ;;  %5799 = vmatprep.subr.mxu0 %v5555_v10  ;;  %v5490_v10 = vld [vmem:[#allocation11 + $0x240] sm:$0xff] }
 0xb42   : > { %5700 = vmatprep.subr.mxu1 %v5471_v57  ;;  %v5551_v57 = vld [vmem:[#allocation11 + $0x428] sm:$0xff]  ;;  %5800 = vmatpush1.msra.mxu0 %v5554_v9 }
 0xb43   : > { %5701 = vmatpush1.msra.mxu1 %v5470_v11  ;;  %v5550_v11 = vld [vmem:[#allocation11 + $0x420] sm:$0xff]  ;;  %5801 = vmatprep.subr.mxu0 %v5551_v57  ;;  %v5487_v9 = vld [vmem:[#allocation11 + $0x228] sm:$0xff] }
 0xb44   : > { %5702 = vmatprep.subr.mxu1 %v5467_v27  ;;  %v5539_v27 = vld [vmem:[#allocation11 + $0x3c8] sm:$0xff]  ;;  %5802 = vmatpush1.msra.mxu0 %v5550_v11  ;;  %v5486_v57 = vld [vmem:[#allocation11 + $0x220] sm:$0xff] }
 0xb45   : > { %5703 = vmatpush1.msra.mxu1 %v5466_v6  ;;  %v5547_v6 = vld [vmem:[#allocation11 + $0x408] sm:$0xff] }
 0xb46   : > { %5704 = vmatprep.subr.mxu1 %v5463_v14  ;;  %v5671_v14 = vld [vmem:[#allocation11 + $0x7e8] sm:$0xff]  ;;  %5803 = vmatprep.subr.mxu0 %v5547_v6  ;;  %v5482_v6 = vld [vmem:[#allocation11 + $0x200] sm:$0xff] }
 0xb47   : > { %5705 = vmatpush1.msra.mxu1 %v5462_v25  ;;  %v5670_v25 = vld [vmem:[#allocation11 + $0x7e0] sm:$0xff]  ;;  %5804 = vmatpush1.msra.mxu0 %v5546_v22  ;;  %v5483_v11 = vld [vmem:[#allocation11 + $0x208] sm:$0xff]  ;;  %v5481_v22 = vld [vmem:[#allocation11 + $0x1f8] sm:$0xff] }
 0xb48   : > { %5706 = vmatprep.subr.mxu1 %v5459_v38  ;;  %v5667_v38 = vld [vmem:[#allocation11 + $0x7c8] sm:$0xff]  ;;  %5805 = vmatprep.subr.mxu0 %v5671_v14  ;;  %v5477_v14 = vld [vmem:[#allocation11 + $0x1d8] sm:$0xff] }
 0xb49   : > { %5707 = vmatpush1.msra.mxu1 %v5458_v48  ;;  %v5666_v48 = vld [vmem:[#allocation11 + $0x7c0] sm:$0xff]  ;;  %5806 = vmatpush2.msra.mxu0 %v5670_v25  ;;  %v5476_v25 = vld [vmem:[#allocation11 + $0x1d0] sm:$0xff] }
 0xb4a   : > { %5708 = vmatprep.subr.mxu1 %v5455_v12  ;;  %v5663_v12 = vld [vmem:[#allocation11 + $0x7a8] sm:$0xff]  ;;  %5807 = vmatprep.subr.mxu0 %v5667_v38  ;;  %v5473_v38 = vld [vmem:[#allocation11 + $0x1b8] sm:$0xff] }
 0xb4b   : > { %5709 = vmatpush1.msra.mxu1 %v5454_v50  ;;  %v5662_v50 = vld [vmem:[#allocation11 + $0x7a0] sm:$0xff]  ;;  %5808 = vmatpush2.msra.mxu0 %v5666_v48  ;;  %v5469_v48 = vld [vmem:[#allocation11 + $0x198] sm:$0xff] }
 0xb4c   : > { %5710 = vmatprep.subr.mxu1 %v5451_v49  ;;  %v5659_v49 = vld [vmem:[#allocation11 + $0x788] sm:$0xff]  ;;  %5809 = vmatprep.subr.mxu0 %v5663_v12  ;;  %v5468_v12 = vld [vmem:[#allocation11 + $0x190] sm:$0xff] }
 0xb4d   : > { %5711 = vmatpush1.msra.mxu1 %v5450_v2  ;;  %v5658_v2 = vld [vmem:[#allocation11 + $0x780] sm:$0xff]  ;;  %5810 = vmatpush2.msra.mxu0 %v5662_v50  ;;  %v5465_v50 = vld [vmem:[#allocation11 + $0x178] sm:$0xff] }
 0xb4e   : > { %5712 = vmatprep.subr.mxu1 %v5447_v33  ;;  %v5655_v33 = vld [vmem:[#allocation11 + $0x768] sm:$0xff]  ;;  %5811 = vmatprep.subr.mxu0 %v5659_v49  ;;  %v5464_v49 = vld [vmem:[#allocation11 + $0x170] sm:$0xff] }
 0xb4f   : > { %5713 = vmatpush1.msra.mxu1 %v5446_v20  ;;  %v5654_v20 = vld [vmem:[#allocation11 + $0x760] sm:$0xff]  ;;  %5812 = vmatpush2.msra.mxu0 %v5658_v2  ;;  %v5460_v2 = vld [vmem:[#allocation11 + $0x150] sm:$0xff] }
 0xb50   : > { %5714 = vmatprep.subr.mxu1 %v5443_v55  ;;  %v5651_v55 = vld [vmem:[#allocation11 + $0x748] sm:$0xff]  ;;  %5813 = vmatprep.subr.mxu0 %v5655_v33  ;;  %v5456_v33 = vld [vmem:[#allocation11 + $0x130] sm:$0xff] }
 0xb51   : > { %5715 = vmatpush1.msra.mxu1 %v5442_v60  ;;  %v5650_v60 = vld [vmem:[#allocation11 + $0x740] sm:$0xff]  ;;  %5814 = vmatpush2.msra.mxu0 %v5654_v20  ;;  %v5452_v20 = vld [vmem:[#allocation11 + $0x110] sm:$0xff] }
 0xb52   : > { %5716 = vmatprep.subr.mxu1 %v5439_v53  ;;  %v5647_v53 = vld [vmem:[#allocation11 + $0x728] sm:$0xff]  ;;  %5815 = vmatprep.subr.mxu0 %v5651_v55  ;;  %v5445_v55 = vld [vmem:[#allocation11 + $0xd8] sm:$0xff] }
 0xb53   : > { %5717 = vmatpush1.msra.mxu1 %v5438_v31  ;;  %v5646_v31 = vld [vmem:[#allocation11 + $0x720] sm:$0xff]  ;;  %5816 = vmatpush2.msra.mxu0 %v5650_v60  ;;  %v5441_v60 = vld [vmem:[#allocation11 + $0xb8] sm:$0xff] }
 0xb54   : > { %5718 = vmatprep.subr.mxu1 %v5435_v52  ;;  %v5643_v52 = vld [vmem:[#allocation11 + $0x708] sm:$0xff]  ;;  %5817 = vmatprep.subr.mxu0 %v5647_v53  ;;  %v5437_v53 = vld [vmem:[#allocation11 + $0x98] sm:$0xff] }
 0xb55   : > { %5719 = vmatpush1.msra.mxu1 %v5434_v62  ;;  %v5642_v62 = vld [vmem:[#allocation11 + $0x700] sm:$0xff]  ;;  %5818 = vmatpush2.msra.mxu0 %v5646_v31  ;;  %v5433_v31 = vld [vmem:[#allocation11 + $0x78] sm:$0xff] }
 0xb56   : > { %5720 = vmatprep.subr.mxu1 %v5431_v59  ;;  %v5639_v59 = vld [vmem:[#allocation11 + $0x6e8] sm:$0xff]  ;;  %5819 = vmatprep.subr.mxu0 %v5643_v52  ;;  %v5429_v52 = vld [vmem:[#allocation11 + $0x58] sm:$0xff] }
 0xb57   : > { %5721 = vmatpush1.msra.mxu1 %v5430_v4  ;;  %v5638_v4 = vld [vmem:[#allocation11 + $0x6e0] sm:$0xff]  ;;  %5820 = vmatpush2.msra.mxu0 %v5642_v62  ;;  %v5425_v62 = vld [vmem:[#allocation11 + $0x38] sm:$0xff] }
 0xb58   : > { %5722 = vmatprep.subr.mxu1 %v5427_v42  ;;  %v5635_v42 = vld [vmem:[#allocation11 + $0x6c8] sm:$0xff]  ;;  %5821 = vmatprep.subr.mxu0 %v5639_v59  ;;  %v5421_v59 = vld [vmem:[#allocation11 + $0x18] sm:$0xff] }
 0xb59   : > { %5723 = vmatpush1.msra.mxu1 %v5426_v32  ;;  %v5634_v32 = vld [vmem:[#allocation11 + $0x6c0] sm:$0xff]  ;;  %5822 = vmatpush2.msra.mxu0 %v5638_v4  ;;  %v5545_v4 = vld [vmem:[#allocation11 + $0x3f8] sm:$0xff] }
 0xb5a   : > { %5724 = vmatprep.subr.mxu1 %v5423_v13  ;;  %v5631_v13 = vld [vmem:[#allocation11 + $0x6a8] sm:$0xff]  ;;  %5823 = vmatprep.subr.mxu0 %v5635_v42  ;;  %v5541_v42 = vld [vmem:[#allocation11 + $0x3d8] sm:$0xff] }
 0xb5b   : > { %5725 = vmatpush1.msra.mxu1 %v5422_v40  ;;  %v5630_v40 = vld [vmem:[#allocation11 + $0x6a0] sm:$0xff]  ;;  %5824 = vmatpush2.msra.mxu0 %v5634_v32  ;;  %v5537_v32 = vld [vmem:[#allocation11 + $0x3b8] sm:$0xff] }
 0xb5c   : > { %5726 = vmatprep.subr.mxu1 %v5419_v17  ;;  %v5627_v17 = vld [vmem:[#allocation11 + $0x688] sm:$0xff]  ;;  %5825 = vmatprep.subr.mxu0 %v5631_v13  ;;  %v5533_v13 = vld [vmem:[#allocation11 + $0x398] sm:$0xff] }
 0xb5d   : > { %5727 = vmatpush1.msra.mxu1 %v5418_v51  ;;  %v5626_v51 = vld [vmem:[#allocation11 + $0x680] sm:$0xff]  ;;  %5826 = vmatpush2.msra.mxu0 %v5630_v40  ;;  %v5529_v40 = vld [vmem:[#allocation11 + $0x378] sm:$0xff] }
 0xb5e   : > { %5728 = vmatprep.subr.mxu1 %v5543_v23  ;;  %v5623_v23 = vld [vmem:[#allocation11 + $0x668] sm:$0xff]  ;;  %5827 = vmatprep.subr.mxu0 %v5627_v17  ;;  %v5525_v17 = vld [vmem:[#allocation11 + $0x358] sm:$0xff] }
 0xb5f   : > { %5729 = vmatpush2.msra.mxu1 %v5542_v41  ;;  %v5622_v41 = vld [vmem:[#allocation11 + $0x660] sm:$0xff]  ;;  %5828 = vmatpush2.msra.mxu0 %v5626_v51  ;;  %v5521_v51 = vld [vmem:[#allocation11 + $0x338] sm:$0xff] }
 0xb60   : > { %5730 = vmatprep.subr.mxu1 %v5539_v27  ;;  %v5619_v27 = vld [vmem:[#allocation11 + $0x648] sm:$0xff]  ;;  %5829 = vmatprep.subr.mxu0 %v5623_v23  ;;  %v5517_v23 = vld [vmem:[#allocation11 + $0x318] sm:$0xff] }
 0xb61   : > { %5731 = vmatpush2.msra.mxu1 %v5538_v34  ;;  %v5618_v34 = vld [vmem:[#allocation11 + $0x640] sm:$0xff]  ;;  %5830 = vmatpush2.msra.mxu0 %v5622_v41  ;;  %v5513_v41 = vld [vmem:[#allocation11 + $0x2f8] sm:$0xff] }
 0xb62   : > { %5732 = vmatprep.subr.mxu1 %v5535_v21  ;;  %v5480_v21 = vld [vmem:[#allocation11 + $0x1f0] sm:$0xff]  ;;  %5831 = vmatprep.subr.mxu0 %v5619_v27  ;;  %v5509_v27 = vld [vmem:[#allocation11 + $0x2d8] sm:$0xff] }
 0xb63   : > { %5733 = vmatpush2.msra.mxu1 %v5534_v26  ;;  %5832 = vmatpush2.msra.mxu0 %v5618_v34  ;;  %v5615_v26 = vld [vmem:[#allocation11 + $0x628] sm:$0xff]  ;;  %v5505_v34 = vld [vmem:[#allocation11 + $0x2b8] sm:$0xff] }
 0xb64   : > { %5734 = vmatprep.subr.mxu1 %v5531_v63  ;;  %v5614_v63 = vld [vmem:[#allocation11 + $0x620] sm:$0xff]  ;;  %5833 = vmatprep.subr.mxu0 %v5615_v26  ;;  %v5497_v26 = vld [vmem:[#allocation11 + $0x278] sm:$0xff] }
 0xb65   : > { %5735 = vmatpush2.msra.mxu1 %v5530_v44  ;;  %v5472_v44 = vld [vmem:[#allocation11 + $0x1b0] sm:$0xff]  ;;  %5834 = vmatpush2.msra.mxu0 %v5614_v63  ;;  %v5493_v63 = vld [vmem:[#allocation11 + $0x258] sm:$0xff] }
 0xb66   : > { %5736 = vmatprep.subr.mxu1 %v5527_v19  ;;  %v5611_v19 = vld [vmem:[#allocation11 + $0x608] sm:$0xff] }
 0xb67   : > { %5737 = vmatpush2.msra.mxu1 %v5526_v5  ;;  %v5610_v5 = vld [vmem:[#allocation11 + $0x600] sm:$0xff]  ;;  %5835 = vmatprep.subr.mxu0 %v5611_v19  ;;  %v5485_v19 = vld [vmem:[#allocation11 + $0x218] sm:$0xff] }
 0xb68   : > { %5738 = vmatprep.subr.mxu1 %v5523_v24  ;;  %v5609_v24 = vld [vmem:[#allocation11 + $0x5f8] sm:$0xff]  ;;  %5836 = vmatpush2.msra.mxu0 %v5610_v5 }
 0xb69   : > { %5739 = vmatpush2.msra.mxu1 %v5522_v54  ;;  %v5461_v54 = vld [vmem:[#allocation11 + $0x158] sm:$0xff]  ;;  %5927 = vmatprep.subr.mxu0 %v5609_v24  ;;  %v5608_v24 = vld [vmem:[#allocation11 + $0x5f0] sm:$0xff] }
 0xb6a   : > { %5740 = vmatprep.subr.mxu1 %v5519_v56  ;;  %v5457_v56 = vld [vmem:[#allocation11 + $0x138] sm:$0xff] }
 0xb6b   : > { %5741 = vmatpush2.msra.mxu1 %v5518_v29  ;;  %v5453_v29 = vld [vmem:[#allocation11 + $0x118] sm:$0xff] }
 0xb6c   : > { %5742 = vmatprep.subr.mxu1 %v5515_v45  ;;  %v5448_v45 = vld [vmem:[#allocation11 + $0xf0] sm:$0xff] }
 0xb6d   : > { %5743 = vmatpush2.msra.mxu1 %v5514_v37  ;;  %v5444_v37 = vld [vmem:[#allocation11 + $0xd0] sm:$0xff] }
 0xb6e   : > { %5744 = vmatprep.subr.mxu1 %v5511_v7  ;;  %v5440_v7 = vld [vmem:[#allocation11 + $0xb0] sm:$0xff] }
 0xb6f   : > { %5745 = vmatpush2.msra.mxu1 %v5510_v43  ;;  %v5436_v43 = vld [vmem:[#allocation11 + $0x90] sm:$0xff] }
 0xb70   : > { %5746 = vmatprep.subr.mxu1 %v5507_v15  ;;  %v5432_v15 = vld [vmem:[#allocation11 + $0x70] sm:$0xff] }
 0xb71   : > { %5747 = vmatpush2.msra.mxu1 %v5506_v0  ;;  %v5428_v0 = vld [vmem:[#allocation11 + $0x50] sm:$0xff] }
 0xb72   : > { %5748 = vmatprep.subr.mxu1 %v5503_v18  ;;  %v5424_v18 = vld [vmem:[#allocation11 + $0x30] sm:$0xff] }
 0xb73   : > { %5749 = vmatpush2.msra.mxu1 %v5502_v36  ;;  %v5420_v36 = vld [vmem:[#allocation11 + $0x10] sm:$0xff] }
 0xb74   : > { %5750 = vmatprep.subr.mxu1 %v5499_v61  ;;  %v5544_v61 = vld [vmem:[#allocation11 + $0x3f0] sm:$0xff] }
 0xb75   : > { %5751 = vmatpush2.msra.mxu1 %v5498_v47  ;;  %v5540_v47 = vld [vmem:[#allocation11 + $0x3d0] sm:$0xff] }
 0xb76   : > { %5752 = vmatprep.subr.mxu1 %v5495_v28  ;;  %v5536_v28 = vld [vmem:[#allocation11 + $0x3b0] sm:$0xff] }
 0xb77   : > { %5753 = vmatpush2.msra.mxu1 %v5494_v8  ;;  %v5532_v8 = vld [vmem:[#allocation11 + $0x390] sm:$0xff] }
 0xb78   : > { %5754 = vmatprep.subr.mxu1 %v5491_v46  ;;  %v5528_v46 = vld [vmem:[#allocation11 + $0x370] sm:$0xff] }
 0xb79   : > { %5755 = vmatpush2.msra.mxu1 %v5490_v10  ;;  %v5524_v10 = vld [vmem:[#allocation11 + $0x350] sm:$0xff] }
 0xb7a   : > { %5756 = vmatprep.subr.mxu1 %v5487_v9  ;;  %v5520_v9 = vld [vmem:[#allocation11 + $0x330] sm:$0xff] }
 0xb7b   : > { %5757 = vmatpush2.msra.mxu1 %v5486_v57  ;;  %v5516_v57 = vld [vmem:[#allocation11 + $0x310] sm:$0xff] }
 0xb7c   : > { %5758 = vmatprep.subr.mxu1 %v5483_v11  ;;  %v5512_v11 = vld [vmem:[#allocation11 + $0x2f0] sm:$0xff] }
 0xb7d   : > { %5759 = vmatpush2.msra.mxu1 %v5482_v6  ;;  %v5508_v6 = vld [vmem:[#allocation11 + $0x2d0] sm:$0xff] }
 0xb7e   : > { %5761 = vmatmul.mubr.f32.vlgmr.msra.gmra.mxu1 %v9846_v35  ;;  %5850 = vmatprep.subr.mxu1 %v5481_v22  ;;  %v5504_v22 = vld [vmem:[#allocation11 + $0x2b0] sm:$0xff] }
 0xb7f   : > { %5766 = vmatprep.mubr.f32.mxu1 %v9848_v39  ;;  %5851 = vmatpush1.msra.mxu1 %v5480_v21  ;;  %v5501_v21 = vld [vmem:[#allocation11 + $0x298] sm:$0xff] }
 0xb80   : > { %5852 = vmatprep.subr.mxu1 %v5477_v14  ;;  %v5500_v14 = vld [vmem:[#allocation11 + $0x290] sm:$0xff] }
 0xb81   : > { %5853 = vmatpush1.msra.mxu1 %v5476_v25  ;;  %v5496_v25 = vld [vmem:[#allocation11 + $0x270] sm:$0xff] }
 0xb82   : > { %5767 = vmatmul.mubr.f32.gmra.mxu1 %v9844_v16  ;;  %5854 = vmatprep.subr.mxu1 %v5473_v38  ;;  %v5492_v38 = vld [vmem:[#allocation11 + $0x250] sm:$0xff] }
 0xb83   : > { %5855 = vmatpush1.msra.mxu1 %v5472_v44  ;;  %5914 = vmatprep.mubr.f32.mxu1 %v9850_v58  ;;  %v5449_v58 = vld [vmem:[#allocation11 + $0xf8] sm:$0xff] }
 0xb84   : > { %5856 = vmatprep.subr.mxu1 %v5469_v48  ;;  %v5489_v44 = vld [vmem:[#allocation11 + $0x238] sm:$0xff]  ;;  %v5488_v48 = vld [vmem:[#allocation11 + $0x230] sm:$0xff] }
 0xb85   : > { %5857 = vmatpush1.msra.mxu1 %v5468_v12  ;;  %v5484_v12 = vld [vmem:[#allocation11 + $0x210] sm:$0xff] }
 0xb86   : > { %5858 = vmatprep.subr.mxu1 %v5465_v50 }
 0xb87   : > { %5859 = vmatpush1.msra.mxu1 %v5464_v49  ;;  %v5605_v49 = vld [vmem:[#allocation11 + $0x5d8] sm:$0xff] }
 0xb88   : > { %5860 = vmatprep.subr.mxu1 %v5461_v54  ;;  %v5604_v54 = vld [vmem:[#allocation11 + $0x5d0] sm:$0xff] }
 0xb89   : > { %5861 = vmatpush1.msra.mxu1 %v5460_v2  ;;  %v5601_v2 = vld [vmem:[#allocation11 + $0x5b8] sm:$0xff] }
 0xb8a   : > { %5862 = vmatprep.subr.mxu1 %v5457_v56  ;;  %v5600_v56 = vld [vmem:[#allocation11 + $0x5b0] sm:$0xff] }
 0xb8b   : > { %5863 = vmatpush1.msra.mxu1 %v5456_v33  ;;  %v5592_v33 = vld [vmem:[#allocation11 + $0x570] sm:$0xff] }
 0xb8c   : > { %5864 = vmatprep.subr.mxu1 %v5453_v29  ;;  %v5589_v29 = vld [vmem:[#allocation11 + $0x558] sm:$0xff] }
 0xb8d   : > { %5865 = vmatpush1.msra.mxu1 %v5452_v20  ;;  %v5588_v20 = vld [vmem:[#allocation11 + $0x550] sm:$0xff] }
 0xb8e   : > { %5866 = vmatprep.subr.mxu1 %v5449_v58  ;;  %v5585_v58 = vld [vmem:[#allocation11 + $0x538] sm:$0xff] }
 0xb8f   : > { %5867 = vmatpush1.msra.mxu1 %v5448_v45  ;;  %v5584_v45 = vld [vmem:[#allocation11 + $0x530] sm:$0xff] }
 0xb90   : > { %5868 = vmatprep.subr.mxu1 %v5445_v55  ;;  %v5581_v55 = vld [vmem:[#allocation11 + $0x518] sm:$0xff] }
 0xb91   : > { %5869 = vmatpush1.msra.mxu1 %v5444_v37  ;;  %v5580_v37 = vld [vmem:[#allocation11 + $0x510] sm:$0xff] }
 0xb92   : > { %5870 = vmatprep.subr.mxu1 %v5441_v60  ;;  %v5577_v60 = vld [vmem:[#allocation11 + $0x4f8] sm:$0xff] }
 0xb93   : > { %5871 = vmatpush1.msra.mxu1 %v5440_v7  ;;  %v5576_v7 = vld [vmem:[#allocation11 + $0x4f0] sm:$0xff] }
 0xb94   : > { %5872 = vmatprep.subr.mxu1 %v5437_v53  ;;  %v5573_v53 = vld [vmem:[#allocation11 + $0x4d8] sm:$0xff] }
 0xb95   : > { %5873 = vmatpush1.msra.mxu1 %v5436_v43  ;;  %v5572_v43 = vld [vmem:[#allocation11 + $0x4d0] sm:$0xff] }
 0xb96   : > { %5874 = vmatprep.subr.mxu1 %v5433_v31  ;;  %v5569_v31 = vld [vmem:[#allocation11 + $0x4b8] sm:$0xff] }
 0xb97   : > { %5875 = vmatpush1.msra.mxu1 %v5432_v15  ;;  %v5568_v15 = vld [vmem:[#allocation11 + $0x4b0] sm:$0xff] }
 0xb98   : > { %5876 = vmatprep.subr.mxu1 %v5429_v52  ;;  %v5565_v52 = vld [vmem:[#allocation11 + $0x498] sm:$0xff] }
 0xb99   : > { %5877 = vmatpush1.msra.mxu1 %v5428_v0  ;;  %v5564_v0 = vld [vmem:[#allocation11 + $0x490] sm:$0xff] }
 0xb9a   : > { %5878 = vmatprep.subr.mxu1 %v5425_v62  ;;  %v5561_v62 = vld [vmem:[#allocation11 + $0x478] sm:$0xff] }
 0xb9b   : > { %5879 = vmatpush1.msra.mxu1 %v5424_v18  ;;  %v5560_v18 = vld [vmem:[#allocation11 + $0x470] sm:$0xff] }
 0xb9c   : > { %5880 = vmatprep.subr.mxu1 %v5421_v59  ;;  %v5557_v59 = vld [vmem:[#allocation11 + $0x458] sm:$0xff] }
 0xb9d   : > { %5881 = vmatpush1.msra.mxu1 %v5420_v36  ;;  %v5556_v36 = vld [vmem:[#allocation11 + $0x450] sm:$0xff] }
 0xb9e   : > { %5882 = vmatprep.subr.mxu1 %v5545_v4  ;;  %v5553_v4 = vld [vmem:[#allocation11 + $0x438] sm:$0xff] }
 0xb9f   : > { %5883 = vmatpush2.msra.mxu1 %v5544_v61  ;;  %v5552_v61 = vld [vmem:[#allocation11 + $0x430] sm:$0xff] }
 0xba0   : > { %5884 = vmatprep.subr.mxu1 %v5541_v42  ;;  %v5549_v42 = vld [vmem:[#allocation11 + $0x418] sm:$0xff] }
 0xba1   : > { %5885 = vmatpush2.msra.mxu1 %v5540_v47  ;;  %v5548_v47 = vld [vmem:[#allocation11 + $0x410] sm:$0xff] }
 0xba2   : > { %5886 = vmatprep.subr.mxu1 %v5537_v32  ;;  %v5673_v32 = vld [vmem:[#allocation11 + $0x7f8] sm:$0xff] }
 0xba3   : > { %5887 = vmatpush2.msra.mxu1 %v5536_v28  ;;  %v5672_v28 = vld [vmem:[#allocation11 + $0x7f0] sm:$0xff] }
 0xba4   : > { %5888 = vmatprep.subr.mxu1 %v5533_v13  ;;  %v5669_v13 = vld [vmem:[#allocation11 + $0x7d8] sm:$0xff] }
 0xba5   : > { %5889 = vmatpush2.msra.mxu1 %v5532_v8  ;;  %v5668_v8 = vld [vmem:[#allocation11 + $0x7d0] sm:$0xff] }
 0xba6   : > { %5890 = vmatprep.subr.mxu1 %v5529_v40  ;;  %v5665_v40 = vld [vmem:[#allocation11 + $0x7b8] sm:$0xff] }
 0xba7   : > { %5891 = vmatpush2.msra.mxu1 %v5528_v46  ;;  %v5664_v46 = vld [vmem:[#allocation11 + $0x7b0] sm:$0xff] }
 0xba8   : > { %5892 = vmatprep.subr.mxu1 %v5525_v17  ;;  %v5661_v17 = vld [vmem:[#allocation11 + $0x798] sm:$0xff] }
 0xba9   : > { %5893 = vmatpush2.msra.mxu1 %v5524_v10  ;;  %v5660_v10 = vld [vmem:[#allocation11 + $0x790] sm:$0xff] }
 0xbaa   : > { %5894 = vmatprep.subr.mxu1 %v5521_v51  ;;  %v5657_v51 = vld [vmem:[#allocation11 + $0x778] sm:$0xff] }
 0xbab   : > { %5895 = vmatpush2.msra.mxu1 %v5520_v9  ;;  %v5656_v9 = vld [vmem:[#allocation11 + $0x770] sm:$0xff] }
 0xbac   : > { %5896 = vmatprep.subr.mxu1 %v5517_v23  ;;  %v5653_v23 = vld [vmem:[#allocation11 + $0x758] sm:$0xff] }
 0xbad   : > { %5897 = vmatpush2.msra.mxu1 %v5516_v57  ;;  %v5652_v57 = vld [vmem:[#allocation11 + $0x750] sm:$0xff] }
 0xbae   : > { %5898 = vmatprep.subr.mxu1 %v5513_v41  ;;  %v5649_v41 = vld [vmem:[#allocation11 + $0x738] sm:$0xff] }
 0xbaf   : > { %5899 = vmatpush2.msra.mxu1 %v5512_v11  ;;  %v5648_v11 = vld [vmem:[#allocation11 + $0x730] sm:$0xff] }
 0xbb0   : > { %5900 = vmatprep.subr.mxu1 %v5509_v27  ;;  %v5645_v27 = vld [vmem:[#allocation11 + $0x718] sm:$0xff] }
 0xbb1   : > { %5901 = vmatpush2.msra.mxu1 %v5508_v6  ;;  %v5644_v6 = vld [vmem:[#allocation11 + $0x710] sm:$0xff] }
 0xbb2   : > { %5902 = vmatprep.subr.mxu1 %v5505_v34  ;;  %v5641_v34 = vld [vmem:[#allocation11 + $0x6f8] sm:$0xff] }
 0xbb3   : > { %5903 = vmatpush2.msra.mxu1 %v5504_v22  ;;  %v5640_v22 = vld [vmem:[#allocation11 + $0x6f0] sm:$0xff] }
 0xbb4   : > { %5904 = vmatprep.subr.mxu1 %v5501_v21  ;;  %v5637_v21 = vld [vmem:[#allocation11 + $0x6d8] sm:$0xff] }
 0xbb5   : > { %5905 = vmatpush2.msra.mxu1 %v5500_v14  ;;  %v5636_v14 = vld [vmem:[#allocation11 + $0x6d0] sm:$0xff] }
 0xbb6   : > { %5906 = vmatprep.subr.mxu1 %v5497_v26  ;;  %v5633_v26 = vld [vmem:[#allocation11 + $0x6b8] sm:$0xff] }
 0xbb7   : > { %5907 = vmatpush2.msra.mxu1 %v5496_v25  ;;  %v5632_v25 = vld [vmem:[#allocation11 + $0x6b0] sm:$0xff] }
 0xbb8   : > { %5908 = vmatprep.subr.mxu1 %v5493_v63  ;;  %v5629_v63 = vld [vmem:[#allocation11 + $0x698] sm:$0xff] }
 0xbb9   : > { %5909 = vmatpush2.msra.mxu1 %v5492_v38  ;;  %v5628_v38 = vld [vmem:[#allocation11 + $0x690] sm:$0xff] }
 0xbba   : > { %5910 = vmatprep.subr.mxu1 %v5489_v44  ;;  %v5625_v44 = vld [vmem:[#allocation11 + $0x678] sm:$0xff] }
 0xbbb   : > { %5911 = vmatpush2.msra.mxu1 %v5488_v48  ;;  %v5624_v48 = vld [vmem:[#allocation11 + $0x670] sm:$0xff] }
 0xbbc   : > { %5912 = vmatprep.subr.mxu1 %v5485_v19  ;;  %v5621_v19 = vld [vmem:[#allocation11 + $0x658] sm:$0xff] }
 0xbbd   : > { %5913 = vmatpush2.msra.mxu1 %v5484_v12  ;;  %v5620_v12 = vld [vmem:[#allocation11 + $0x650] sm:$0xff] }
 0xbbe   : > { %5915 = vmatmul.mubr.f32.vlgmr.msra.gmra.mxu1 %v9846_v35  ;;  %v5597_v35 = vld [vmem:[#allocation11 + $0x598] sm:$0xff] }
 0xbbf   : > { %5920 = vmatprep.mubr.f32.mxu1 %v9848_v39  ;;  %v5593_v39 = vld [vmem:[#allocation11 + $0x578] sm:$0xff] }
 0xbc2   : > { %5921 = vmatmul.mubr.f32.gmra.mxu1 %v9844_v16  ;;  %v5596_v16 = vld [vmem:[#allocation11 + $0x590] sm:$0xff] }
 0xbfe   : > { %v9881_v5 = vpop.f32.mrf.mxu1 }
 0xc00   : > { %v5409_v50 = vpop.f32.mrf.mxu1 }
 0xc01   : > { %5837 = vmatprep.mubr.f32.mxu0 %v5409_v50 }
 0xc02   : > { %5838 = vmatmul.mubr.f32.vlgmr.msra.gmra.mxu0 %v9865_v1 }
 0xc03   : > { %5928 = vmatpush1.msra.mxu0 %v5608_v24  ;;  %5843 = vmatprep.mubr.f32.mxu0 %v9881_v5  ;;  %v5616_v24 = vld [vmem:[#allocation11 + $0x630] sm:$0xff] }
 0xc04   : > { %5929 = vmatprep.subr.mxu0 %v5605_v49  ;;  %v5613_v49 = vld [vmem:[#allocation11 + $0x618] sm:$0xff] }
 0xc05   : > { %5930 = vmatpush1.msra.mxu0 %v5604_v54  ;;  %v5612_v54 = vld [vmem:[#allocation11 + $0x610] sm:$0xff] }
 0xc06   : > { %5931 = vmatprep.subr.mxu0 %v5601_v2  ;;  %5844 = vmatmul.mubr.f32.gmra.mxu0 %v9863_v30 }
 0xc07   : > { %5932 = vmatpush1.msra.mxu0 %v5600_v56  ;;  %5991 = vmatprep.mubr.f32.mxu0 %v5409_v50  ;;  %v5617_v50 = vld [vmem:[#allocation11 + $0x638] sm:$0xff] }
 0xc08   : > { %5933 = vmatprep.subr.mxu0 %v5597_v35 }
 0xc09   : > { %5934 = vmatpush1.msra.mxu0 %v5596_v16  ;;  %v5674_v16 = vld [vmem:[#allocation13] ss:$4 sm:$0xf] }
 0xc0a   : > { %5935 = vmatprep.subr.mxu0 %v5593_v39  ;;  %v10473_v39 = vld [vmem:[#allocation20_spill] sm:$0xff] }
 0xc0b   : > { %5936 = vmatpush1.msra.mxu0 %v5592_v33  ;;  %v5683_v33 = vrot.slane %v5674_v16, %v10473_v39 }
 0xc0c   : > { %5937 = vmatprep.subr.mxu0 %v5589_v29 }
 0xc0d   : > { %5938 = vmatpush1.msra.mxu0 %v5588_v20 }
 0xc0e   : > { %5939 = vmatprep.subr.mxu0 %v5585_v58  ;;  %v10474_v58 = vld [vmem:[#allocation24_spill] sm:$0xff] }
 0xc0f   : > { %5940 = vmatpush1.msra.mxu0 %v5584_v45  ;;  %v5679_v45 = vrot.slane %v5674_v16, %v10474_v58 }
 0xc10   : > { %5941 = vmatprep.subr.mxu0 %v5581_v55 }
 0xc11   : > { %5942 = vmatpush1.msra.mxu0 %v5580_v37 }
 0xc12   : > { %5943 = vmatprep.subr.mxu0 %v5577_v60 }
 0xc13   : > { %5944 = vmatpush1.msra.mxu0 %v5576_v7 }
 0xc14   : > { %5945 = vmatprep.subr.mxu0 %v5573_v53 }
 0xc15   : > { %5946 = vmatpush1.msra.mxu0 %v5572_v43 }
 0xc16   : > { %5947 = vmatprep.subr.mxu0 %v5569_v31 }
 0xc17   : > { %5948 = vmatpush1.msra.mxu0 %v5568_v15 }
 0xc18   : > { %5949 = vmatprep.subr.mxu0 %v5565_v52 }
 0xc19   : > { %5950 = vmatpush1.msra.mxu0 %v5564_v0 }
 0xc1a   : > { %5951 = vmatprep.subr.mxu0 %v5561_v62 }
 0xc1b   : > { %5952 = vmatpush1.msra.mxu0 %v5560_v18 }
 0xc1c   : > { %5953 = vmatprep.subr.mxu0 %v5557_v59 }
 0xc1d   : > { %5954 = vmatpush1.msra.mxu0 %v5556_v36 }
 0xc1e   : > { %5955 = vmatprep.subr.mxu0 %v5553_v4  ;;  %v5687_v4 = vrot.slane %v5674_v16, %v10440_v3 }
 0xc1f   : > { %5956 = vmatpush1.msra.mxu0 %v5552_v61 }
 0xc20   : > { %5957 = vmatprep.subr.mxu0 %v5549_v42 }
 0xc21   : > { %5958 = vmatpush1.msra.mxu0 %v5548_v47  ;;  %v10475_v47 = vld [vmem:[#allocation21_spill] sm:$0xff] }
 0xc22   : > { %5959 = vmatprep.subr.mxu0 %v5673_v32  ;;  %v5691_v32 = vrot.slane %v5674_v16, %v10475_v47 }
 0xc23   : > { %5960 = vmatpush2.msra.mxu0 %v5672_v28 }
 0xc24   : > { %5961 = vmatprep.subr.mxu0 %v5669_v13 }
 0xc25   : > { %5962 = vmatpush2.msra.mxu0 %v5668_v8 }
 0xc26   : > { %5963 = vmatprep.subr.mxu0 %v5665_v40 }
 0xc27   : > { %5964 = vmatpush2.msra.mxu0 %v5664_v46 }
 0xc28   : > { %5965 = vmatprep.subr.mxu0 %v5661_v17 }
 0xc29   : > { %5966 = vmatpush2.msra.mxu0 %v5660_v10 }
 0xc2a   : > { %5967 = vmatprep.subr.mxu0 %v5657_v51 }
 0xc2b   : > { %5968 = vmatpush2.msra.mxu0 %v5656_v9 }
 0xc2c   : > { %5969 = vmatprep.subr.mxu0 %v5653_v23 }
 0xc2d   : > { %5970 = vmatpush2.msra.mxu0 %v5652_v57 }
 0xc2e   : > { %5971 = vmatprep.subr.mxu0 %v5649_v41 }
 0xc2f   : > { %5972 = vmatpush2.msra.mxu0 %v5648_v11 }
 0xc30   : > { %5973 = vmatprep.subr.mxu0 %v5645_v27 }
 0xc31   : > { %5974 = vmatpush2.msra.mxu0 %v5644_v6 }
 0xc32   : > { %5975 = vmatprep.subr.mxu0 %v5641_v34 }
 0xc33   : > { %5976 = vmatpush2.msra.mxu0 %v5640_v22 }
 0xc34   : > { %5977 = vmatprep.subr.mxu0 %v5637_v21 }
 0xc35   : > { %5978 = vmatpush2.msra.mxu0 %v5636_v14 }
 0xc36   : > { %5979 = vmatprep.subr.mxu0 %v5633_v26 }
 0xc37   : > { %5980 = vmatpush2.msra.mxu0 %v5632_v25 }
 0xc38   : > { %5981 = vmatprep.subr.mxu0 %v5629_v63 }
 0xc39   : > { %5982 = vmatpush2.msra.mxu0 %v5628_v38 }
 0xc3a   : > { %5983 = vmatprep.subr.mxu0 %v5625_v44 }
 0xc3b   : > { %5984 = vmatpush2.msra.mxu0 %v5624_v48 }
 0xc3c   : > { %5985 = vmatprep.subr.mxu0 %v5621_v19 }
 0xc3d   : > { %5986 = vmatpush2.msra.mxu0 %v5620_v12 }
 0xc3e   : > { %5987 = vmatprep.subr.mxu0 %v5617_v50  ;;  %v5762_v2 = vpop.f32.mrf.mxu1 }
 0xc3f   : > { %5988 = vmatpush2.msra.mxu0 %v5616_v24  ;;  %v5763_v7 = vadd.f32 %v5762_v2, %v5679_v45 }
 0xc40   : > { %5989 = vmatprep.subr.mxu0 %v5613_v49  ;;  %v5764_v56 = vpop.f32.mrf.mxu1 }
 0xc41   : > { %5990 = vmatpush2.msra.mxu0 %v5612_v54  ;;  %v5765_v55 = vadd.f32 %v5764_v56, %v5683_v33 }
 0xc42   : > { %5992 = vmatmul.mubr.f32.vlgmr.msra.gmra.mxu0 %v9865_v1  ;;  %v5768_v29 = vpop.f32.mrf.mxu1 }
 0xc43   : > { %5997 = vmatprep.mubr.f32.mxu0 %v9881_v5  ;;  %v6005_v5 = vld [vmem:[#allocation13 + $0x1] ss:$4 sm:$0xf]  ;;  %v5769_v62 = vadd.f32 %v5768_v29, %v5679_v45 }
 0xc44   : > { %v5770_v37 = vpop.f32.mrf.mxu1  ;;  %v6030_v52 = vrot.slane %v6005_v5, %v10473_v39  ;;  %v6026_v59 = vrot.slane %v6005_v5, %v10474_v58  ;;  %v6034_v11 = vrot.slane %v6005_v5, %v10440_v3  ;;  %v6038_v26 = vrot.slane %v6005_v5, %v10475_v47 }
 0xc46   : > { %5998 = vmatmul.mubr.f32.gmra.mxu0 %v9863_v30  ;;  %v5771_v30 = vadd.f32 %v5770_v37, %v5683_v33 }
 0xc7e   : > { %v5916_v1 = vpop.f32.mrf.mxu1 }
 0xc7f   : > { %v5917_v46 = vadd.f32 %v5916_v1, %v5687_v4 }
 0xc80   : > { %v5918_v0 = vpop.f32.mrf.mxu1 }
 0xc81   : > { %v5919_v23 = vadd.f32 %v5918_v0, %v5691_v32 }
 0xc82   : > { %v5922_v28 = vpop.f32.mrf.mxu1 }
 0xc83   : > { %v5923_v22 = vadd.f32 %v5922_v28, %v5687_v4 }
 0xc84   : > { %v5924_v57 = vpop.f32.mrf.mxu1 }
 0xc85   : > { %v5925_v25 = vadd.f32 %v5924_v57, %v5691_v32 }
 0xcc2   : > { %v5839_v35 = vpop.f32.mrf.mxu0 }
 0xcc3   : > { %v5840_v43 = vadd.f32 %v5839_v35, %v5763_v7 }
 0xcc4   : > { %v5841_v20 = vpop.f32.mrf.mxu0 }
 0xcc5   : > { %v5842_v53 = vadd.f32 %v5841_v20, %v5765_v55  ;;  %v6014_v18 = vmin.f32 %v5840_v43, 0.0  ;;  %v6006_v17 = vmax.f32 %v5840_v43, 0.0 }
 0xcc6   : > { %v5845_v60 = vpop.f32.mrf.mxu0 }
 0xcc7   : > { %v6015_v15 = vmin.f32 %v5842_v53, 0.0  ;;  %v5846_v42 = vadd.f32 %v5845_v60, %v5769_v62  ;;  %v6043_v13 = vmul.f32 %v6026_v59, %v6014_v18  ;;  %v6007_v8 = vmax.f32 %v5842_v53, 0.0 }
 0xcc8   : > { %v5847_v31 = vpop.f32.mrf.mxu0 }
 0xcc9   : > { %v5848_v36 = vadd.f32 %v5847_v31, %v5771_v30  ;;  %v6044_v61 = vmul.f32 %v6030_v52, %v6015_v15  ;;  %v6018_v51 = vmin.f32 %v5846_v42, 0.0  ;;  %v9898_v27 = vadd.f32 %v6043_v13, %v6006_v17 }
 0xcca   : > { %v6010_v49 = vmax.f32 %v5846_v42, 0.0 }
 0xccb   : > { %v6019_v40 = vmin.f32 %v5848_v36, 0.0  ;;  %v9895_v10 = vadd.f32 %v6044_v61, %v6007_v8  ;;  %v6047_v63 = vmul.f32 %v6026_v59, %v6018_v51  ;;  %v6011_v38 = vmax.f32 %v5848_v36, 0.0 }
 0xccc   : > { %v6071_v35 = vmul.f32 %v9898_v27, %v9898_v27 }
 0xccd   : > { %v6048_v6 = vmul.f32 %v6030_v52, %v6019_v40  ;;  %v6072_v48 = vmul.f32 %v9895_v10, %v9895_v10  ;;  %v6059_v56 = vadd.f32 %v9895_v10, %v9898_v27  ;;  %v9911_v45 = vadd.f32 %v6047_v63, %v6010_v49  ;;  %v6116_v63 = vld [vmem:[#allocation13 + $0x2] ss:$4 sm:$0xf] }
 0xccf   : > { %v9903_v54 = vadd.f32 %v6048_v6, %v6011_v38  ;;  %v6079_v60 = vadd.f32 %v6072_v48, %v6071_v35  ;;  %v6075_v36 = vmul.f32 %v9911_v45, %v9911_v45  ;;  %v6147_v38 = vld [vmem:[#allocation13 + $0x3] ss:$4 sm:$0xf]  ;;  %v6125_v48 = vrot.slane %v6116_v63, %v10473_v39 }
 0xcd0   : > { %v6152_v35 = vrot.slane %v6147_v38, %v10474_v58 }
 0xcd1   : > { %v6064_v31 = vadd.f32 %v9903_v54, %v9911_v45  ;;  %v6076_v30 = vmul.f32 %v9903_v54, %v9903_v54 }
 0xcd3   : > { %v6084_v32 = vadd.f32 %v6076_v30, %v6075_v36  ;;  %v7200_v36 = vld [vmem:[%s7716_s10 + $0x8] sm:$0xff] }
 0xd02   : > { %v5993_v9 = vpop.f32.mrf.mxu0 }
 0xd03   : > { %v5994_v41 = vadd.f32 %v5993_v9, %v5917_v46 }
 0xd04   : > { %v5995_v34 = vpop.f32.mrf.mxu0 }
 0xd05   : > { %v6016_v21 = vmin.f32 %v5994_v41, 0.0  ;;  %v5996_v14 = vadd.f32 %v5995_v34, %v5919_v23  ;;  %v6008_v19 = vmax.f32 %v5994_v41, 0.0 }
 0xd06   : > { %v5999_v44 = vpop.f32.mrf.mxu0 }
 0xd07   : > { %v6045_v12 = vmul.f32 %v6034_v11, %v6016_v21  ;;  %v6017_v50 = vmin.f32 %v5996_v14, 0.0  ;;  %v6000_v24 = vadd.f32 %v5999_v44, %v5923_v22  ;;  %v6009_v33 = vmax.f32 %v5996_v14, 0.0 }
 0xd08   : > { %v6001_v2 = vpop.f32.mrf.mxu0  ;;  %v6121_v44 = vrot.slane %v6116_v63, %v10474_v58 }
 0xd09   : > { %v9909_v16 = vadd.f32 %v6045_v12, %v6008_v19  ;;  %v6046_v29 = vmul.f32 %v6038_v26, %v6017_v50  ;;  %v6020_v20 = vmin.f32 %v6000_v24, 0.0  ;;  %v6012_v55 = vmax.f32 %v6000_v24, 0.0 }
 0xd0a   : > { %v6002_v37 = vadd.f32 %v6001_v2, %v5925_v25  ;;  %v6129_v19 = vrot.slane %v6116_v63, %v10440_v3  ;;  %v6133_v12 = vrot.slane %v6116_v63, %v10475_v47 }
 0xd0b   : > { %v6054_v7 = vadd.f32 %v6046_v29, %v6009_v33  ;;  %v6049_v53 = vmul.f32 %v6034_v11, %v6020_v20  ;;  %v6060_v1 = vadd.f32 %v6059_v56, %v9909_v16  ;;  %v6073_v43 = vmul.f32 %v9909_v16, %v9909_v16 }
 0xd0c   : > { %v6021_v5 = vmin.f32 %v6002_v37, 0.0  ;;  %v6013_v18 = vmax.f32 %v6002_v37, 0.0  ;;  %v6156_v33 = vrot.slane %v6147_v38, %v10473_v39  ;;  %v6160_v29 = vrot.slane %v6147_v38, %v10440_v3 }
 0xd0d   : > { %v9920_v15 = vadd.f32 %v6049_v53, %v6012_v55  ;;  %v6061_v52 = vadd.f32 %v6060_v1, %v6054_v7  ;;  %v6074_v0 = vmul.f32 %v6054_v7, %v6054_v7  ;;  %v6080_v62 = vadd.f32 %v6079_v60, %v6073_v43 }
 0xd0e   : > { %v6050_v59 = vmul.f32 %v6038_v26, %v6021_v5  ;;  %v6164_v20 = vrot.slane %v6147_v38, %v10475_v47 }
 0xd0f   : > { %6062 = vadd.xlane.f32.xlu0 %v6061_v52  ;;  %v6065_v4 = vadd.f32 %v6064_v31, %v9920_v15  ;;  %v6077_v61 = vmul.f32 %v9920_v15, %v9920_v15  ;;  %v6081_v28 = vadd.f32 %v6080_v62, %v6074_v0 }
 0xd10   : > { %v6058_v42 = vadd.f32 %v6050_v59, %v6013_v18  ;;  %v7199_v59 = vld [vmem:[%s7716_s10] sm:$0xff] }
 0xd11   : > { %v6085_v40 = vadd.f32 %v6084_v32, %v6077_v61 }
 0xd12   : > { %v6066_v13 = vadd.f32 %v6065_v4, %v6058_v42  ;;  %v6078_v8 = vmul.f32 %v6058_v42, %v6058_v42  ;;  %v7201_v4 = vld [vmem:[%s7716_s10 + $0x10] sm:$0xff] }
 0xd13   : > { %6082 = vadd.xlane.f32.xlu0 %v6081_v28 }
 0xd14   : > { %6067 = vadd.xlane.f32.xlu1 %v6066_v13  ;;  %v6086_v46 = vadd.f32 %v6085_v40, %v6078_v8 }
 0xd18   : > { %6087 = vadd.xlane.f32.xlu1 %v6086_v46 }
 0xd98   : > { %v6063_v17 = vpop.xlane.xlu0 %6062 }
 0xd99   : > { %v6069_v51 = vmul.f32 0.001953125, %v6063_v17 }
 0xd9b   : > { %v6099_v57 = vmul.f32 %v6069_v51, %v6069_v51  ;;  %v6091_v50 = vsub.f32 %v9898_v27, %v6069_v51  ;;  %v6092_v24 = vsub.f32 %v9895_v10, %v6069_v51  ;;  %v6093_v49 = vsub.f32 %v9909_v16, %v6069_v51 }
 0xd9c   : > { %v6083_v9 = vpop.xlane.xlu0 %6082  ;;  %v6094_v2 = vsub.f32 %v6054_v7, %v6069_v51 }
 0xd9d   : > { %v6068_v23 = vpop.xlane.xlu1 %6067  ;;  %v6089_v41 = vmul.f32 0.001953125, %v6083_v9  ;;  %v7203_v9 = vld [vmem:[%s7716_s10 + $0x20] sm:$0xff] }
 0xd9e   : > { %v6070_v11 = vmul.f32 0.001953125, %v6068_v23 }
 0xd9f   : > { %v6101_v6 = vsub.f32 %v6089_v41, %v6099_v57  ;;  %v7204_v57 = vld [vmem:[%s7716_s10 + $0x28] sm:$0xff] }
 0xda0   : > { %v6100_v21 = vmul.f32 %v6070_v11, %v6070_v11  ;;  %v6095_v16 = vsub.f32 %v9911_v45, %v6070_v11  ;;  %v6096_v58 = vsub.f32 %v9903_v54, %v6070_v11  ;;  %v6097_v39 = vsub.f32 %v9920_v15, %v6070_v11  ;;  %v7202_v15 = vld [vmem:[%s7716_s10 + $0x18] sm:$0xff] }
 0xda1   : > { %v6103_v34 = vadd.f32 1e-05, %v6101_v6  ;;  %v6088_v22 = vpop.xlane.xlu1 %6087  ;;  %v6098_v3 = vsub.f32 %v6058_v42, %v6070_v11  ;;  %v7205_v11 = vld [vmem:[%s7716_s10 + $0x30] sm:$0xff] }
 0xda2   : > { %v6090_v14 = vmul.f32 0.001953125, %v6088_v22 }
 0xda3   : > { %7116 = vrsqrt.f32 %v6103_v34  ;;  %v7206_v34 = vld [vmem:[%s7716_s10 + $0x38] sm:$0xff] }
 0xda4   : > { %v6102_v26 = vsub.f32 %v6090_v14, %v6100_v21 }
 0xda6   : > { %v6104_v25 = vadd.f32 1e-05, %v6102_v26 }
 0xda8   : > { %7118 = vrsqrt.f32 %v6104_v25 }
 0xdb0   : > { %v7117_v56 = vpop.eup %7116 }
 0xdb1   : > { %v6107_v55 = vmul.f32 %v7117_v56, %v6091_v50  ;;  %v6108_v37 = vmul.f32 %v7117_v56, %v6092_v24  ;;  %v6109_v60 = vmul.f32 %v7117_v56, %v6093_v49  ;;  %v6110_v53 = vmul.f32 %v7117_v56, %v6094_v2 }
 0xdb3   : > { %v6138_v1 = vmul.f32 %v6121_v44, %v6107_v55  ;;  %v6139_v27 = vmul.f32 %v6125_v48, %v6108_v37  ;;  %v6140_v10 = vmul.f32 %v6129_v19, %v6109_v60  ;;  %v6141_v43 = vmul.f32 %v6133_v12, %v6110_v53 }
 0xdb5   : > { %v7119_v47 = vpop.eup %7118  ;;  %v6169_v7 = vadd.f32 %v6152_v35, %v6138_v1  ;;  %v6170_v5 = vadd.f32 %v6156_v33, %v6139_v27  ;;  %v6171_v31 = vadd.f32 %v6160_v29, %v6140_v10  ;;  %v6172_v30 = vadd.f32 %v6164_v20, %v6141_v43 }
 0xdb6   : > { %v6111_v52 = vmul.f32 %v7119_v47, %v6095_v16  ;;  %v6112_v0 = vmul.f32 %v7119_v47, %v6096_v58  ;;  %v6113_v62 = vmul.f32 %v7119_v47, %v6097_v39  ;;  %v6114_v18 = vmul.f32 %v7119_v47, %v6098_v3 }
 0xdb7   : > { %v6177_v45 = vadd.f32 %v7199_v59, %v6169_v7  ;;  %v6178_v54 = vadd.f32 %v7200_v36, %v6170_v5  ;;  %v6179_v61 = vadd.f32 %v7201_v4, %v6171_v31  ;;  %v6180_v42 = vadd.f32 %v7202_v15, %v6172_v30 }
 0xdb8   : > { %v6142_v32 = vmul.f32 %v6121_v44, %v6111_v52  ;;  %v6143_v28 = vmul.f32 %v6125_v48, %v6112_v0  ;;  %v6144_v13 = vmul.f32 %v6129_v19, %v6113_v62  ;;  %v6145_v8 = vmul.f32 %v6133_v12, %v6114_v18 }
 0xdb9   : > { %6185 = vst [vmem:[%s404_s9] sm:$0xff] %v6177_v45  ;;  %6186 = vst [vmem:[%s404_s9 + $0x8] sm:$0xff] %v6178_v54 }
 0xdba   : > { %6187 = vst [vmem:[%s404_s9 + $0x10] sm:$0xff] %v6179_v61  ;;  %6188 = vst [vmem:[%s404_s9 + $0x18] sm:$0xff] %v6180_v42  ;;  %v6173_v40 = vadd.f32 %v6152_v35, %v6142_v32  ;;  %v6174_v46 = vadd.f32 %v6156_v33, %v6143_v28  ;;  %v6175_v17 = vadd.f32 %v6160_v29, %v6144_v13 }
 0xdbb   : > { %v6176_v51 = vadd.f32 %v6164_v20, %v6145_v8 }
 0xdbc   : > { %v6181_v23 = vadd.f32 %v7203_v9, %v6173_v40  ;;  %v6182_v41 = vadd.f32 %v7204_v57, %v6174_v46  ;;  %v6183_v6 = vadd.f32 %v7205_v11, %v6175_v17 }
 0xdbd   : > { %v6184_v22 = vadd.f32 %v7206_v34, %v6176_v51 }
 0xdbe   : > { %6189 = vst [vmem:[%s404_s9 + $0x20] sm:$0xff] %v6181_v23  ;;  %6190 = vst [vmem:[%s404_s9 + $0x28] sm:$0xff] %v6182_v41 }
 0xdbf   : > { %6191 = vst [vmem:[%s404_s9 + $0x30] sm:$0xff] %v6183_v6  ;;  %6192 = vst [vmem:[%s404_s9 + $0x38] sm:$0xff] %v6184_v22 }
 0xdc0   : > { %7404 = shalt.err (!%p7401_p3)
}
 0xdc1   : > { %s7405_s10 = scalar_lea.hbm %s9951_s23, 1024  ;;  %s7409_s18 = scalar_lea.hbm %s10008_s8, 2048 }
 0xdc2   : > { %p7406_p6 = scmp.ne.s32.totalorder %s9951_s23, %s7405_s10  ;;  %p7410_p7 = scmp.lt.s32.totalorder %s9951_s23, %s10008_s8 }
 0xdc3   : > { %p7411_p12 = scmp.lt.s32.totalorder %s7409_s18, %s7405_s10 }
 0xdc4   : > { %p7407_p9 = pnand %p7406_p6, %p10476_p2 }
 0xdc5   : > { %p7412_p0 = por %p7411_p12, %p7410_p7 }
 0xdc6   : > { %p7408_p1 = pneg %p7407_p9 }
 0xdc8   : > { %p7413_p13 = pnand %p7412_p0, %p7408_p1 }
 0xdca   : > { %7416 = shalt.err (!%p7413_p13)
}
 0xdcb   : > { %s7482_s1 = smov 512   ;;  %s7483_s21 = smov 32  }
 0xdcc   : > { %6992 = dma.vmem_to_hbm [thread:$0]  (%p10476_p2), %s9953_s20, 1024, %s9951_s23, %s6194_s11, %s7482_s1, %s7482_s1, %s7483_s21  }
 0xdcd PF: > { %s6222_s2 = sand.u32 1, %s7455_s27   ;;  %p10477_p5 = scmp.ne.s32.totalorder %s10182_s16, 0 }
 0xdce   : > { %p10478_p8 = scmp.ge.s32.totalorder %s7467_s30, 2  ;;  %s6223_s12 = scalar_lea.sflag [#allocation4], %s6222_s2 }
 0xdd0   : > { %p7018_p4 = pnand %p10478_p8, %p10477_p5 }
 0xdd2   : > { %p7019_p11 = pneg %p7018_p4 }
 0xdd4   : > { %7450 = dma.done.wait (%p7019_p11), %s6223_s12, 1024  }
 0xdd5   : > { %7452 = vsyncadd (%p7019_p11), %s6223_s12, 4294966272  ;;  %p24_p10 = scmp.ge.s32.totalorder %s7635_s15, 4   ;;  %s10479_s27 = smov %s7459_s28 }
 0xdd6   : > { %s10480_s28 = smov %s7463_s29  ;;  %s10481_s29 = smov %s7646_s25 }
 0xdd7   : > { %s10482_s30 = smov %s7635_s15  ;;  %26 = sbr.rel (!%p24_p10) target bundleno = 11 (0xb), region = 131 }
 0xddc   :  { %6228 = vsyncpa [#allocation3], 1 }
 0xddd   :  { %6230 = vsyncpa [#allocation3 + $0x1], 1 }
 0xdde   :  { %6231 = vsyncpa [#allocation6], 1 }
 0xddf   :  { %6232 = vsyncpa [#allocation9], 1 }
 0xde0   :  { %6233 = vsyncpa [#allocation12], 1 }
 0xde1   :  { %6234 = vsyncpa [#allocation4], 1 }
 0xde2   :  { %6236 = vsyncpa [#allocation4 + $0x1], 1 }

</bundles_post_ra>
